<compile_context>
chip_gen: v7x
topology: tpu7x:2x2x1
jax: 0.10.0
libtpu: 0.0.40
codegen_flags: <defaults>
</compile_context>

<pallas_src>
import functools

import jax
import jax.numpy as jnp
from jax.experimental import pallas as pl
from jax.experimental.pallas import tpu as pltpu

BN_EPS = 1e-5
NUM_CLASSES = 3
FEAT_DIM = 1280
HEAD1 = 512
HEAD2 = 128
OUT_PAD = 128                      # lane-dense padded output width (>= num_classes)

MAX_TILE_B = 256                   # MXU-aligned M; ~9.5 MiB VMEM total at this tile
MIN_SPLIT_B = 256                  # >=2x128 padded rows -> use >=2 grid steps (v7x dual-TC)


def _silu(v):
    return v * jax.nn.sigmoid(v)


def _round_up(n, m):
    return ((n + m - 1) // m) * m


def _choose_tiling(B, max_tile=MAX_TILE_B):
    """Pick (tile_b, padded_B).

    Pads B to a multiple of 16 (bf16 packs 16 sublanes per vreg), splits the
    padded batch evenly across tiles (avoids near-2x padding waste just above
    a tile boundary), and forces >=2 grid steps once there is enough work so
    dimension_semantics=("parallel",) can shard the batch over v7x's two TCs.
    """
    bp16 = _round_up(B, 16)
    if bp16 < MIN_SPLIT_B:
        n_tiles = 1
    else:
        n_tiles = max(2, -(-bp16 // max_tile))
    tile_b = _round_up(-(-bp16 // n_tiles), 16)
    return tile_b, tile_b * n_tiles


# -----------------------------------------------------------------------------
# Pallas kernel: fused per-view heads + combined classifier
# (BatchNorms folded into the Linears, concat eliminated, bf16 weights)
# -----------------------------------------------------------------------------
def combined_head_kernel(
    fa_ref, fs_ref, fc_ref,                # (TB, 1280) bf16 features per view
    wa_ref, ba_ref,                        # axial    Linear(1280, 512)
    ws_ref, bs_ref,                        # sagittal Linear(1280, 512)
    wc_ref, bc_ref,                        # coronal  Linear(1280, 512)
    w1a_ref, w1s_ref, w1c_ref, b1_ref,     # BN(1536)+Linear(1536,512) folded, split into 3 row blocks
    w2_ref, b2_ref,                        # BN(512)+Linear(512,128) folded
    w3_ref, b3_ref,                        # BN(128)+Linear(128,OUT_PAD) folded (zero-padded lanes)
    out_ref,                               # (TB, OUT_PAD) f32
):
    bf = jnp.bfloat16

    # Per-view replaced classifiers: Dropout(eval)=identity -> Linear(1280, 512),
    # then the head's leading SiLU (elementwise, commutes with the concat).
    ya = _silu(jnp.dot(fa_ref[...], wa_ref[...], preferred_element_type=jnp.float32) + ba_ref[...])
    ys = _silu(jnp.dot(fs_ref[...], ws_ref[...], preferred_element_type=jnp.float32) + bs_ref[...])
    yc = _silu(jnp.dot(fc_ref[...], wc_ref[...], preferred_element_type=jnp.float32) + bc_ref[...])

    # cat((ya, ys, yc), -1) @ W1'  ==  ya @ W1'[0:512] + ys @ W1'[512:1024] + yc @ W1'[1024:1536]
    # (BatchNorm1d(1536) eval scale/shift already folded into W1'/b1').
    y = (jnp.dot(ya.astype(bf), w1a_ref[...], preferred_element_type=jnp.float32)
         + jnp.dot(ys.astype(bf), w1s_ref[...], preferred_element_type=jnp.float32)
         + jnp.dot(yc.astype(bf), w1c_ref[...], preferred_element_type=jnp.float32)
         + b1_ref[...])
    y = _silu(y)
    # BatchNorm1d(512) folded into W2'/b2'.
    y = jnp.dot(y.astype(bf), w2_ref[...], preferred_element_type=jnp.float32) + b2_ref[...]
    y = _silu(y)
    # BatchNorm1d(128) folded into W3'/b3'; Dropout(eval)=identity.
    out_ref[...] = (
        jnp.dot(y.astype(bf), w3_ref[...], preferred_element_type=jnp.float32) + b3_ref[...]
    ).astype(out_ref.dtype)


def combined_head(fa, fs, fc, kp, num_classes, max_tile_b=MAX_TILE_B):
    """Fused Pallas head. Inputs: three (B, 1280) feature matrices (any float dtype)."""
    B = fa.shape[0]
    tile_b, Bp = _choose_tiling(B, max_tile_b)
    pad = Bp - B

    def prep(f):
        f = f.astype(jnp.bfloat16)
        if pad:
            f = jnp.pad(f, ((0, pad), (0, 0)))
        return f

    fa, fs, fc = prep(fa), prep(fs), prep(fc)

    feat_spec = pl.BlockSpec((tile_b, FEAT_DIM), lambda i: (i, 0))

    def resident(arr):
        # Constant block index -> DMA'd once and kept resident; single-buffer it
        # so the ~5.4 MiB bf16 weight set is not allocated twice by the default
        # 2-deep pipeline (frees VMEM for bigger batch tiles).
        return pl.BlockSpec(arr.shape, lambda i: (0, 0),
                            pipeline_mode=pl.Buffered(1))

    args = [
        fa, fs, fc,
        kp["wa"], kp["ba"], kp["ws"], kp["bs"], kp["wc"], kp["bc"],
        kp["w1a"], kp["w1s"], kp["w1c"], kp["b1"],
        kp["w2"], kp["b2"],
        kp["w3"], kp["b3"],
    ]
    in_specs = [feat_spec, feat_spec, feat_spec] + [resident(a) for a in args[3:]]

    out = pl.pallas_call(
        combined_head_kernel,
        out_shape=jax.ShapeDtypeStruct((Bp, OUT_PAD), jnp.float32),
        grid=(Bp // tile_b,),
        in_specs=in_specs,
        out_specs=pl.BlockSpec((tile_b, OUT_PAD), lambda i: (i, 0)),
        compiler_params=pltpu.CompilerParams(dimension_semantics=("parallel",)),
    )(*args)
    return out[:B, :num_classes]


# -----------------------------------------------------------------------------
# Synthetic backbone (the real axial/sagittal/coronal models are external)
# -----------------------------------------------------------------------------
def backbone_features(x_nhwc, w, b):
    # Global average pool over the spatial dims is layout-independent, so we
    # pool directly on NHWC (no NCHW transpose needed).
    pooled = jnp.mean(x_nhwc, axis=(1, 2))          # (B, C)
    return _silu(pooled @ w + b)                    # (B, 1280)


# -----------------------------------------------------------------------------
# Parameter initialization (deterministic, synthetic), with BN folding
# -----------------------------------------------------------------------------
def init_params(key, in_channels, num_classes):
    keys = jax.random.split(key, 16)
    k = iter(keys)

    def lin(kw, d_in, d_out, scale=0.02):
        w = scale * jax.random.normal(kw, (d_in, d_out), jnp.float32)
        b = jnp.zeros((d_out,), jnp.float32)
        return w, b

    params = {}
    # synthetic backbones: C -> 1280
    for name in ("axial", "sagittal", "coronal"):
        w, b = lin(next(k), in_channels, FEAT_DIM)
        params[f"bk_{name}_w"] = w
        params[f"bk_{name}_b"] = b

    # head params (reference f32)
    wa, ba = lin(next(k), FEAT_DIM, HEAD1)
    ws_, bs_ = lin(next(k), FEAT_DIM, HEAD1)
    wc, bc = lin(next(k), FEAT_DIM, HEAD1)
    w1, b1 = lin(next(k), 3 * HEAD1, HEAD1)
    w2, b2 = lin(next(k), HEAD1, HEAD2)
    w3, b3 = lin(next(k), HEAD2, num_classes)

    def bn(kw, dim):
        kg, kb = jax.random.split(kw)
        gamma = 1.0 + 0.01 * jax.random.normal(kg, (dim,), jnp.float32)
        beta = 0.01 * jax.random.normal(kb, (dim,), jnp.float32)
        mean = jnp.zeros((dim,), jnp.float32)       # eval-mode running stats
        var = jnp.ones((dim,), jnp.float32)
        return gamma, beta, mean, var

    bn1, bn2, bn3 = bn(next(k), 3 * HEAD1), bn(next(k), HEAD1), bn(next(k), HEAD2)

    def fold(bn_params, w, b):
        # (y*s + t) @ W + b  ==  y @ (s[:,None]*W) + (t @ W + b)
        gamma, beta, mean, var = bn_params
        s = gamma / jnp.sqrt(var + BN_EPS)
        t = beta - mean * s
        return s[:, None] * w, b + t @ w

    w1f, b1f = fold(bn1, w1, b1)
    w2f, b2f = fold(bn2, w2, b2)
    w3f, b3f = fold(bn3, w3, b3)

    # Pad the final projection to a lane-dense 128-wide output block.
    w3p = jnp.zeros((HEAD2, OUT_PAD), jnp.float32).at[:, :num_classes].set(w3f)
    b3p = jnp.zeros((OUT_PAD,), jnp.float32).at[:num_classes].set(b3f)

    bf16 = lambda a: a.astype(jnp.bfloat16)
    row = lambda v: v[None, :].astype(jnp.float32)  # (1, D) for lane broadcast

    params["head"] = dict(
        wa=bf16(wa), ba=row(ba),
        ws=bf16(ws_), bs=row(bs_),
        wc=bf16(wc), bc=row(bc),
        w1a=bf16(w1f[0:HEAD1]),
        w1s=bf16(w1f[HEAD1:2 * HEAD1]),
        w1c=bf16(w1f[2 * HEAD1:3 * HEAD1]),
        b1=row(b1f),
        w2=bf16(w2f), b2=row(b2f),
        w3=bf16(w3p), b3=row(b3p),
    )
    return params


# -----------------------------------------------------------------------------
# Full forward pass, matching CombinedClassifierL.forward semantics
# -----------------------------------------------------------------------------
@functools.partial(jax.jit, static_argnames=("num_classes",))
def combined_classifier_forward(x, params, num_classes=NUM_CLASSES):
    # PyTorch: permute NHWC -> NCHW, then split [100,100,100] along H (NCHW dim 2).
    # We split along H directly in NHWC (dim 1); the backbone pooling is
    # layout-independent so the transpose is unnecessary.
    x1 = x[:, 0:100]
    x2 = x[:, 100:200]
    x3 = x[:, 200:300]

    fa = backbone_features(x1, params["bk_axial_w"], params["bk_axial_b"])
    fs = backbone_features(x2, params["bk_sagittal_w"], params["bk_sagittal_b"])
    fc = backbone_features(x3, params["bk_coronal_w"], params["bk_coronal_b"])

    return combined_head(fa, fs, fc, params["head"], num_classes)


if __name__ == "__main__":
    key = jax.random.PRNGKey(0)
    k_x, k_p = jax.random.split(key)

    B, H, W, C = 2, 300, 16, 3                      # split [100,100,100] requires H=300
    x = jax.random.normal(k_x, (B, H, W, C), jnp.float32)

    params = init_params(k_p, in_channels=C, num_classes=NUM_CLASSES)

    out = combined_classifier_forward(x, params)
    out = jax.block_until_ready(out)
    assert out.shape == (B, NUM_CLASSES), out.shape
    assert bool(jnp.all(jnp.isfinite(out)))
    print("KERNEL_OK")
</pallas_src>

<mosaic_0001>
module attributes {stable_mosaic.version = 11 : i64} {
  func.func @combined_head_kernel(%arg0: i32, %arg1: memref<16x1280xbf16, #tpu.memory_space<vmem>>, %arg2: memref<16x1280xbf16, #tpu.memory_space<vmem>>, %arg3: memref<16x1280xbf16, #tpu.memory_space<vmem>>, %arg4: memref<1280x512xbf16, #tpu.memory_space<vmem>>, %arg5: memref<1x512xf32, #tpu.memory_space<vmem>>, %arg6: memref<1280x512xbf16, #tpu.memory_space<vmem>>, %arg7: memref<1x512xf32, #tpu.memory_space<vmem>>, %arg8: memref<1280x512xbf16, #tpu.memory_space<vmem>>, %arg9: memref<1x512xf32, #tpu.memory_space<vmem>>, %arg10: memref<512x512xbf16, #tpu.memory_space<vmem>>, %arg11: memref<512x512xbf16, #tpu.memory_space<vmem>>, %arg12: memref<512x512xbf16, #tpu.memory_space<vmem>>, %arg13: memref<1x512xf32, #tpu.memory_space<vmem>>, %arg14: memref<512x128xbf16, #tpu.memory_space<vmem>>, %arg15: memref<1x128xf32, #tpu.memory_space<vmem>>, %arg16: memref<128x128xbf16, #tpu.memory_space<vmem>>, %arg17: memref<1x128xf32, #tpu.memory_space<vmem>>, %arg18: memref<16x128xf32, #tpu.memory_space<vmem>>) attributes {dimension_semantics = [#tpu.dimension_semantics<parallel>], iteration_bounds = array<i64: 1>, scalar_prefetch = 0 : i64, scratch_operands = 0 : i64, tpu.core_type = #tpu.core_type<tc>, window_params = [{transform_indices = @transform_0, window_bounds = array<i64: 16, 1280>}, {transform_indices = @transform_1, window_bounds = array<i64: 16, 1280>}, {transform_indices = @transform_2, window_bounds = array<i64: 16, 1280>}, {pipeline_mode = #tpu.pipeline_mode<synchronous>, transform_indices = @transform_3, window_bounds = array<i64: 1280, 512>}, {pipeline_mode = #tpu.pipeline_mode<synchronous>, transform_indices = @transform_4, window_bounds = array<i64: 1, 512>}, {pipeline_mode = #tpu.pipeline_mode<synchronous>, transform_indices = @transform_5, window_bounds = array<i64: 1280, 512>}, {pipeline_mode = #tpu.pipeline_mode<synchronous>, transform_indices = @transform_6, window_bounds = array<i64: 1, 512>}, {pipeline_mode = #tpu.pipeline_mode<synchronous>, transform_indices = @transform_7, window_bounds = array<i64: 1280, 512>}, {pipeline_mode = #tpu.pipeline_mode<synchronous>, transform_indices = @transform_8, window_bounds = array<i64: 1, 512>}, {pipeline_mode = #tpu.pipeline_mode<synchronous>, transform_indices = @transform_9, window_bounds = array<i64: 512, 512>}, {pipeline_mode = #tpu.pipeline_mode<synchronous>, transform_indices = @transform_10, window_bounds = array<i64: 512, 512>}, {pipeline_mode = #tpu.pipeline_mode<synchronous>, transform_indices = @transform_11, window_bounds = array<i64: 512, 512>}, {pipeline_mode = #tpu.pipeline_mode<synchronous>, transform_indices = @transform_12, window_bounds = array<i64: 1, 512>}, {pipeline_mode = #tpu.pipeline_mode<synchronous>, transform_indices = @transform_13, window_bounds = array<i64: 512, 128>}, {pipeline_mode = #tpu.pipeline_mode<synchronous>, transform_indices = @transform_14, window_bounds = array<i64: 1, 128>}, {pipeline_mode = #tpu.pipeline_mode<synchronous>, transform_indices = @transform_15, window_bounds = array<i64: 128, 128>}, {pipeline_mode = #tpu.pipeline_mode<synchronous>, transform_indices = @transform_16, window_bounds = array<i64: 1, 128>}, {transform_indices = @transform_17, window_bounds = array<i64: 16, 128>}]} {
    %c0 = arith.constant 0 : index
    %c0_0 = arith.constant 0 : index
    %0 = vector.load %arg1[%c0, %c0_0] : memref<16x1280xbf16, #tpu.memory_space<vmem>>, vector<16x1280xbf16>
    %c0_1 = arith.constant 0 : index
    %c0_2 = arith.constant 0 : index
    %1 = vector.load %arg4[%c0_1, %c0_2] : memref<1280x512xbf16, #tpu.memory_space<vmem>>, vector<1280x512xbf16>
    %cst = arith.constant dense<0.000000e+00> : vector<16x512xf32>
    %2 = tpu.matmul %0, %1, %cst {dimension_numbers = #tpu.dot_dimension_numbers<[1], [0], [0], [1], [0, 0, 1, 1], [], []>} : vector<16x1280xbf16>, vector<1280x512xbf16>, vector<16x512xf32> -> vector<16x512xf32>
    %c0_3 = arith.constant 0 : index
    %c0_4 = arith.constant 0 : index
    %3 = vector.load %arg5[%c0_3, %c0_4] : memref<1x512xf32, #tpu.memory_space<vmem>>, vector<1x512xf32>
    %4 = vector.broadcast %3 : vector<1x512xf32> to vector<16x512xf32>
    %5 = arith.addf %2, %4 : vector<16x512xf32>
    %6 = arith.negf %5 : vector<16x512xf32>
    %7 = math.exp %6 : vector<16x512xf32>
    %cst_5 = arith.constant 1.000000e+00 : f32
    %8 = vector.broadcast %cst_5 : f32 to vector<16x512xf32>
    %9 = arith.addf %8, %7 : vector<16x512xf32>
    %10 = arith.divf %8, %9 : vector<16x512xf32>
    %11 = arith.mulf %5, %10 : vector<16x512xf32>
    %c0_6 = arith.constant 0 : index
    %c0_7 = arith.constant 0 : index
    %12 = vector.load %arg2[%c0_6, %c0_7] : memref<16x1280xbf16, #tpu.memory_space<vmem>>, vector<16x1280xbf16>
    %c0_8 = arith.constant 0 : index
    %c0_9 = arith.constant 0 : index
    %13 = vector.load %arg6[%c0_8, %c0_9] : memref<1280x512xbf16, #tpu.memory_space<vmem>>, vector<1280x512xbf16>
    %cst_10 = arith.constant dense<0.000000e+00> : vector<16x512xf32>
    %14 = tpu.matmul %12, %13, %cst_10 {dimension_numbers = #tpu.dot_dimension_numbers<[1], [0], [0], [1], [0, 0, 1, 1], [], []>} : vector<16x1280xbf16>, vector<1280x512xbf16>, vector<16x512xf32> -> vector<16x512xf32>
    %c0_11 = arith.constant 0 : index
    %c0_12 = arith.constant 0 : index
    %15 = vector.load %arg7[%c0_11, %c0_12] : memref<1x512xf32, #tpu.memory_space<vmem>>, vector<1x512xf32>
    %16 = vector.broadcast %15 : vector<1x512xf32> to vector<16x512xf32>
    %17 = arith.addf %14, %16 : vector<16x512xf32>
    %18 = arith.negf %17 : vector<16x512xf32>
    %19 = math.exp %18 : vector<16x512xf32>
    %cst_13 = arith.constant 1.000000e+00 : f32
    %20 = vector.broadcast %cst_13 : f32 to vector<16x512xf32>
    %21 = arith.addf %20, %19 : vector<16x512xf32>
    %22 = arith.divf %20, %21 : vector<16x512xf32>
    %23 = arith.mulf %17, %22 : vector<16x512xf32>
    %c0_14 = arith.constant 0 : index
    %c0_15 = arith.constant 0 : index
    %24 = vector.load %arg3[%c0_14, %c0_15] : memref<16x1280xbf16, #tpu.memory_space<vmem>>, vector<16x1280xbf16>
    %c0_16 = arith.constant 0 : index
    %c0_17 = arith.constant 0 : index
    %25 = vector.load %arg8[%c0_16, %c0_17] : memref<1280x512xbf16, #tpu.memory_space<vmem>>, vector<1280x512xbf16>
    %cst_18 = arith.constant dense<0.000000e+00> : vector<16x512xf32>
    %26 = tpu.matmul %24, %25, %cst_18 {dimension_numbers = #tpu.dot_dimension_numbers<[1], [0], [0], [1], [0, 0, 1, 1], [], []>} : vector<16x1280xbf16>, vector<1280x512xbf16>, vector<16x512xf32> -> vector<16x512xf32>
    %c0_19 = arith.constant 0 : index
    %c0_20 = arith.constant 0 : index
    %27 = vector.load %arg9[%c0_19, %c0_20] : memref<1x512xf32, #tpu.memory_space<vmem>>, vector<1x512xf32>
    %28 = vector.broadcast %27 : vector<1x512xf32> to vector<16x512xf32>
    %29 = arith.addf %26, %28 : vector<16x512xf32>
    %30 = arith.negf %29 : vector<16x512xf32>
    %31 = math.exp %30 : vector<16x512xf32>
    %cst_21 = arith.constant 1.000000e+00 : f32
    %32 = vector.broadcast %cst_21 : f32 to vector<16x512xf32>
    %33 = arith.addf %32, %31 : vector<16x512xf32>
    %34 = arith.divf %32, %33 : vector<16x512xf32>
    %35 = arith.mulf %29, %34 : vector<16x512xf32>
    %36 = arith.truncf %11 : vector<16x512xf32> to vector<16x512xbf16>
    %c0_22 = arith.constant 0 : index
    %c0_23 = arith.constant 0 : index
    %37 = vector.load %arg10[%c0_22, %c0_23] : memref<512x512xbf16, #tpu.memory_space<vmem>>, vector<512x512xbf16>
    %cst_24 = arith.constant dense<0.000000e+00> : vector<16x512xf32>
    %38 = tpu.matmul %36, %37, %cst_24 {dimension_numbers = #tpu.dot_dimension_numbers<[1], [0], [0], [1], [0, 0, 1, 1], [], []>} : vector<16x512xbf16>, vector<512x512xbf16>, vector<16x512xf32> -> vector<16x512xf32>
    %39 = arith.truncf %23 : vector<16x512xf32> to vector<16x512xbf16>
    %c0_25 = arith.constant 0 : index
    %c0_26 = arith.constant 0 : index
    %40 = vector.load %arg11[%c0_25, %c0_26] : memref<512x512xbf16, #tpu.memory_space<vmem>>, vector<512x512xbf16>
    %cst_27 = arith.constant dense<0.000000e+00> : vector<16x512xf32>
    %41 = tpu.matmul %39, %40, %cst_27 {dimension_numbers = #tpu.dot_dimension_numbers<[1], [0], [0], [1], [0, 0, 1, 1], [], []>} : vector<16x512xbf16>, vector<512x512xbf16>, vector<16x512xf32> -> vector<16x512xf32>
    %42 = arith.addf %38, %41 : vector<16x512xf32>
    %43 = arith.truncf %35 : vector<16x512xf32> to vector<16x512xbf16>
    %c0_28 = arith.constant 0 : index
    %c0_29 = arith.constant 0 : index
    %44 = vector.load %arg12[%c0_28, %c0_29] : memref<512x512xbf16, #tpu.memory_space<vmem>>, vector<512x512xbf16>
    %cst_30 = arith.constant dense<0.000000e+00> : vector<16x512xf32>
    %45 = tpu.matmul %43, %44, %cst_30 {dimension_numbers = #tpu.dot_dimension_numbers<[1], [0], [0], [1], [0, 0, 1, 1], [], []>} : vector<16x512xbf16>, vector<512x512xbf16>, vector<16x512xf32> -> vector<16x512xf32>
    %46 = arith.addf %42, %45 : vector<16x512xf32>
    %c0_31 = arith.constant 0 : index
    %c0_32 = arith.constant 0 : index
    %47 = vector.load %arg13[%c0_31, %c0_32] : memref<1x512xf32, #tpu.memory_space<vmem>>, vector<1x512xf32>
    %48 = vector.broadcast %47 : vector<1x512xf32> to vector<16x512xf32>
    %49 = arith.addf %46, %48 : vector<16x512xf32>
    %50 = arith.negf %49 : vector<16x512xf32>
    %51 = math.exp %50 : vector<16x512xf32>
    %cst_33 = arith.constant 1.000000e+00 : f32
    %52 = vector.broadcast %cst_33 : f32 to vector<16x512xf32>
    %53 = arith.addf %52, %51 : vector<16x512xf32>
    %54 = arith.divf %52, %53 : vector<16x512xf32>
    %55 = arith.mulf %49, %54 : vector<16x512xf32>
    %56 = arith.truncf %55 : vector<16x512xf32> to vector<16x512xbf16>
    %c0_34 = arith.constant 0 : index
    %c0_35 = arith.constant 0 : index
    %57 = vector.load %arg14[%c0_34, %c0_35] : memref<512x128xbf16, #tpu.memory_space<vmem>>, vector<512x128xbf16>
    %cst_36 = arith.constant dense<0.000000e+00> : vector<16x128xf32>
    %58 = tpu.matmul %56, %57, %cst_36 {dimension_numbers = #tpu.dot_dimension_numbers<[1], [0], [0], [1], [0, 0, 1, 1], [], []>} : vector<16x512xbf16>, vector<512x128xbf16>, vector<16x128xf32> -> vector<16x128xf32>
    %c0_37 = arith.constant 0 : index
    %c0_38 = arith.constant 0 : index
    %59 = vector.load %arg15[%c0_37, %c0_38] : memref<1x128xf32, #tpu.memory_space<vmem>>, vector<1x128xf32>
    %60 = vector.broadcast %59 : vector<1x128xf32> to vector<16x128xf32>
    %61 = arith.addf %58, %60 : vector<16x128xf32>
    %62 = arith.negf %61 : vector<16x128xf32>
    %63 = math.exp %62 : vector<16x128xf32>
    %cst_39 = arith.constant 1.000000e+00 : f32
    %64 = vector.broadcast %cst_39 : f32 to vector<16x128xf32>
    %65 = arith.addf %64, %63 : vector<16x128xf32>
    %66 = arith.divf %64, %65 : vector<16x128xf32>
    %67 = arith.mulf %61, %66 : vector<16x128xf32>
    %68 = arith.truncf %67 : vector<16x128xf32> to vector<16x128xbf16>
    %c0_40 = arith.constant 0 : index
    %c0_41 = arith.constant 0 : index
    %69 = vector.load %arg16[%c0_40, %c0_41] : memref<128x128xbf16, #tpu.memory_space<vmem>>, vector<128x128xbf16>
    %cst_42 = arith.constant dense<0.000000e+00> : vector<16x128xf32>
    %70 = tpu.matmul %68, %69, %cst_42 {dimension_numbers = #tpu.dot_dimension_numbers<[1], [0], [0], [1], [0, 0, 1, 1], [], []>} : vector<16x128xbf16>, vector<128x128xbf16>, vector<16x128xf32> -> vector<16x128xf32>
    %c0_43 = arith.constant 0 : index
    %c0_44 = arith.constant 0 : index
    %71 = vector.load %arg17[%c0_43, %c0_44] : memref<1x128xf32, #tpu.memory_space<vmem>>, vector<1x128xf32>
    %72 = vector.broadcast %71 : vector<1x128xf32> to vector<16x128xf32>
    %73 = arith.addf %70, %72 : vector<16x128xf32>
    %c0_45 = arith.constant 0 : index
    %c0_46 = arith.constant 0 : index
    %74 = vector.load %arg18[%c0_45, %c0_46] : memref<16x128xf32, #tpu.memory_space<vmem>>, vector<16x128xf32>
    tpu.vector_store %arg18[%c0_45, %c0_46], %73 {strides = array<i32>} : memref<16x128xf32, #tpu.memory_space<vmem>>, vector<16x128xf32>,
    return
  }
  func.func @transform_0(%arg0: i32) -> (i32, i32) {
    %c0_i32 = arith.constant 0 : i32
    %c0_i32_0 = arith.constant 0 : i32
    return %arg0, %c0_i32 : i32, i32
  }
  func.func @transform_1(%arg0: i32) -> (i32, i32) {
    %c0_i32 = arith.constant 0 : i32
    %c0_i32_0 = arith.constant 0 : i32
    return %arg0, %c0_i32 : i32, i32
  }
  func.func @transform_2(%arg0: i32) -> (i32, i32) {
    %c0_i32 = arith.constant 0 : i32
    %c0_i32_0 = arith.constant 0 : i32
    return %arg0, %c0_i32 : i32, i32
  }
  func.func @transform_3(%arg0: i32) -> (i32, i32) {
    %c0_i32 = arith.constant 0 : i32
    %c0_i32_0 = arith.constant 0 : i32
    %c0_i32_1 = arith.constant 0 : i32
    return %c0_i32, %c0_i32_0 : i32, i32
  }
  func.func @transform_4(%arg0: i32) -> (i32, i32) {
    %c0_i32 = arith.constant 0 : i32
    %c0_i32_0 = arith.constant 0 : i32
    %c0_i32_1 = arith.constant 0 : i32
    return %c0_i32, %c0_i32_0 : i32, i32
  }
  func.func @transform_5(%arg0: i32) -> (i32, i32) {
    %c0_i32 = arith.constant 0 : i32
    %c0_i32_0 = arith.constant 0 : i32
    %c0_i32_1 = arith.constant 0 : i32
    return %c0_i32, %c0_i32_0 : i32, i32
  }
  func.func @transform_6(%arg0: i32) -> (i32, i32) {
    %c0_i32 = arith.constant 0 : i32
    %c0_i32_0 = arith.constant 0 : i32
    %c0_i32_1 = arith.constant 0 : i32
    return %c0_i32, %c0_i32_0 : i32, i32
  }
  func.func @transform_7(%arg0: i32) -> (i32, i32) {
    %c0_i32 = arith.constant 0 : i32
    %c0_i32_0 = arith.constant 0 : i32
    %c0_i32_1 = arith.constant 0 : i32
    return %c0_i32, %c0_i32_0 : i32, i32
  }
  func.func @transform_8(%arg0: i32) -> (i32, i32) {
    %c0_i32 = arith.constant 0 : i32
    %c0_i32_0 = arith.constant 0 : i32
    %c0_i32_1 = arith.constant 0 : i32
    return %c0_i32, %c0_i32_0 : i32, i32
  }
  func.func @transform_9(%arg0: i32) -> (i32, i32) {
    %c0_i32 = arith.constant 0 : i32
    %c0_i32_0 = arith.constant 0 : i32
    %c0_i32_1 = arith.constant 0 : i32
    return %c0_i32, %c0_i32_0 : i32, i32
  }
  func.func @transform_10(%arg0: i32) -> (i32, i32) {
    %c0_i32 = arith.constant 0 : i32
    %c0_i32_0 = arith.constant 0 : i32
    %c0_i32_1 = arith.constant 0 : i32
    return %c0_i32, %c0_i32_0 : i32, i32
  }
  func.func @transform_11(%arg0: i32) -> (i32, i32) {
    %c0_i32 = arith.constant 0 : i32
    %c0_i32_0 = arith.constant 0 : i32
    %c0_i32_1 = arith.constant 0 : i32
    return %c0_i32, %c0_i32_0 : i32, i32
  }
  func.func @transform_12(%arg0: i32) -> (i32, i32) {
    %c0_i32 = arith.constant 0 : i32
    %c0_i32_0 = arith.constant 0 : i32
    %c0_i32_1 = arith.constant 0 : i32
    return %c0_i32, %c0_i32_0 : i32, i32
  }
  func.func @transform_13(%arg0: i32) -> (i32, i32) {
    %c0_i32 = arith.constant 0 : i32
    %c0_i32_0 = arith.constant 0 : i32
    %c0_i32_1 = arith.constant 0 : i32
    return %c0_i32, %c0_i32_0 : i32, i32
  }
  func.func @transform_14(%arg0: i32) -> (i32, i32) {
    %c0_i32 = arith.constant 0 : i32
    %c0_i32_0 = arith.constant 0 : i32
    %c0_i32_1 = arith.constant 0 : i32
    return %c0_i32, %c0_i32_0 : i32, i32
  }
  func.func @transform_15(%arg0: i32) -> (i32, i32) {
    %c0_i32 = arith.constant 0 : i32
    %c0_i32_0 = arith.constant 0 : i32
    %c0_i32_1 = arith.constant 0 : i32
    return %c0_i32, %c0_i32_0 : i32, i32
  }
  func.func @transform_16(%arg0: i32) -> (i32, i32) {
    %c0_i32 = arith.constant 0 : i32
    %c0_i32_0 = arith.constant 0 : i32
    %c0_i32_1 = arith.constant 0 : i32
    return %c0_i32, %c0_i32_0 : i32, i32
  }
  func.func @transform_17(%arg0: i32) -> (i32, i32) {
    %c0_i32 = arith.constant 0 : i32
    %c0_i32_0 = arith.constant 0 : i32
    return %arg0, %c0_i32 : i32, i32
  }
}

</mosaic_0001>

<bundles_post_ra>
// kernel: combined_classifier_forward.1
= control target key start
LH: loop header
LB: loop body
LE: loop exit
PB: predicated region body
PF: predicated region fallthrough
CT: control target
= control target key end

     0   :  { %s15939_s0 = inlined_call_operand.vmem [shape: bf16[16,1280], index: 0, kind: input, shape index: {}]   ;;  %s15940_s1 = inlined_call_operand.vmem [shape: bf16[16,1280], index: 1, kind: input, shape index: {}]   ;;  %s15941_s2 = inlined_call_operand.vmem [shape: bf16[16,1280], index: 2, kind: input, shape index: {}]   ;;  %s15942_s3 = inlined_call_operand.hbm [shape: bf16[1280,512], index: 3, kind: input, shape index: {}]   ;;  %s15943_s4 = inlined_call_operand.hbm [shape: f32[1,512], index: 4, kind: input, shape index: {}]   ;;  %s15944_s5 = inlined_call_operand.hbm [shape: bf16[1280,512], index: 5, kind: input, shape index: {}]   ;;  %s15945_s6 = inlined_call_operand.hbm [shape: f32[1,512], index: 6, kind: input, shape index: {}]   ;;  %s15946_s7 = inlined_call_operand.hbm [shape: bf16[1280,512], index: 7, kind: input, shape index: {}]   ;;  %s15947_s8 = inlined_call_operand.hbm [shape: f32[1,512], index: 8, kind: input, shape index: {}]   ;;  %s15948_s9 = inlined_call_operand.hbm [shape: bf16[512,512], index: 9, kind: input, shape index: {}]   ;;  %s15949_s10 = inlined_call_operand.hbm [shape: bf16[512,512], index: 10, kind: input, shape index: {}]   ;;  %s15950_s11 = inlined_call_operand.hbm [shape: bf16[512,512], index: 11, kind: input, shape index: {}]   ;;  %s15951_s12 = inlined_call_operand.hbm [shape: f32[1,512], index: 12, kind: input, shape index: {}]   ;;  %s15952_s13 = inlined_call_operand.hbm [shape: bf16[512,128], index: 13, kind: input, shape index: {}]   ;;  %s15953_s14 = inlined_call_operand.hbm [shape: f32[1,128], index: 14, kind: input, shape index: {}]   ;;  %s15954_s15 = inlined_call_operand.hbm [shape: bf16[128,128], index: 15, kind: input, shape index: {}]   ;;  %s15955_s16 = inlined_call_operand.hbm [shape: f32[1,128], index: 16, kind: input, shape index: {}]   ;;  %s15956_s17 = inlined_call_operand.vmem [shape: f32[16,128], index: 17, kind: output, shape index: {}]  }
   0x1   :  { %15959 = sst [smem:[#allocation32_spill]] %s15939_s0 }
   0x2   :  { %15960 = sst [smem:[#allocation33_spill]] %s15940_s1 }
   0x3   :  { %22 = vsyncpa [#allocation3], 0 }
   0x4   :  { %23 = vsyncpa [#allocation5], 0 }
   0x5   :  { %24 = vsyncpa [#allocation8], 0 }
   0x6   :  { %25 = vsyncpa [#allocation11], 0 }
   0x7   :  { %26 = vsyncpa [#allocation14], 0 }
   0x8   :  { %27 = vsyncpa [#allocation17], 0 }
   0x9   :  { %28 = vsyncpa [#allocation20], 0 }
   0xa   :  { %29 = vsyncpa [#allocation23], 0  ;;  %s15379_s24 = smov [#allocation4]   ;;  %s15380_s26 = smov [#allocation7]  }
   0xb   :  { %s54_s25 = sshll.u32 %s15379_s24, 4  ;;  %s76_s27 = sshll.u32 %s15380_s26, 4  ;;  %s55_s25 = int_to_ptr.vmem [resolvable:$true] %s54_s25  ;;  %s77_s27 = int_to_ptr.vmem [resolvable:$true] %s76_s27 }
   0xc   :  { %s15055_s0 = scalar_lea.hbm %s15943_s4, 64 }
   0xd   :  { %p15056_p0 = scmp.ne.s32.totalorder %s15943_s4, %s15055_s0  ;;  %p15059_p1 = scmp.lt.u32.totalorder %s15055_s0, %s15943_s4 }
   0xf   :  { %p15061_p2 = pnand %p15059_p1, %p15056_p0 }
  0x11   :  { %15064 = shalt.err (!%p15061_p2)
}
  0x12   :  { %s15065_s20 = scalar_lea.vmem %s55_s25, 64  ;;  %p15070_p4 = scmp.lt.s32.totalorder %s55_s25, %s55_s25 }
  0x13   :  { %p15066_p3 = scmp.ne.s32.totalorder %s55_s25, %s15065_s20  ;;  %p15071_p5 = scmp.lt.s32.totalorder %s15065_s20, %s15065_s20 }
  0x15   :  { %p15072_p6 = por %p15071_p5, %p15070_p4 }
  0x17   :  { %p15073_p7 = pnand %p15072_p6, %p15066_p3 }
  0x19   :  { %15076 = shalt.err (!%p15073_p7)
}
  0x1a   :  { %57 = dma.hbm_to_vmem [thread:$0]  %s15943_s4, 64, %s55_s25, [#allocation5]  }
  0x1b   :  { %s15077_s26 = scalar_lea.hbm %s15945_s6, 64 }
  0x1c   :  { %p15078_p8 = scmp.ne.s32.totalorder %s15945_s6, %s15077_s26  ;;  %p15081_p9 = scmp.lt.u32.totalorder %s15077_s26, %s15945_s6 }
  0x1e   :  { %p15083_p10 = pnand %p15081_p9, %p15078_p8 }
  0x20   :  { %15086 = shalt.err (!%p15083_p10)
}
  0x21   :  { %s15087_s18 = scalar_lea.vmem %s77_s27, 64  ;;  %p15092_p12 = scmp.lt.s32.totalorder %s77_s27, %s77_s27 }
  0x22   :  { %p15088_p11 = scmp.ne.s32.totalorder %s77_s27, %s15087_s18  ;;  %p15093_p13 = scmp.lt.s32.totalorder %s15087_s18, %s15087_s18 }
  0x24   :  { %p15094_p0 = por %p15093_p13, %p15092_p12 }
  0x26   :  { %p15095_p1 = pnand %p15094_p0, %p15088_p11 }
  0x28   :  { %15098 = shalt.err (!%p15095_p1)
}
  0x29   :  { %79 = dma.hbm_to_vmem [thread:$0]  %s15945_s6, 64, %s77_s27, [#allocation8]  }
  0x2a   :  { %s15381_s19 = smov [#allocation10]   ;;  %s15099_s22 = scalar_lea.hbm %s15947_s8, 64 }
  0x2b   :  { %s98_s1 = sshll.u32 %s15381_s19, 4  ;;  %p15100_p2 = scmp.ne.s32.totalorder %s15947_s8, %s15099_s22  ;;  %s99_s1 = int_to_ptr.vmem [resolvable:$true] %s98_s1 }
  0x2c   :  { %p15103_p3 = scmp.lt.u32.totalorder %s15099_s22, %s15947_s8 }
  0x2e   :  { %p15105_p4 = pnand %p15103_p3, %p15100_p2 }
  0x30   :  { %15108 = shalt.err (!%p15105_p4)
}
  0x31   :  { %s15109_s29 = scalar_lea.vmem %s99_s1, 64  ;;  %p15114_p6 = scmp.lt.s32.totalorder %s99_s1, %s99_s1 }
  0x32   :  { %p15110_p5 = scmp.ne.s32.totalorder %s99_s1, %s15109_s29  ;;  %p15115_p7 = scmp.lt.s32.totalorder %s15109_s29, %s15109_s29 }
  0x34   :  { %p15116_p8 = por %p15115_p7, %p15114_p6 }
  0x36   :  { %p15117_p9 = pnand %p15116_p8, %p15110_p5 }
  0x38   :  { %15120 = shalt.err (!%p15117_p9)
}
  0x39   :  { %101 = dma.hbm_to_vmem [thread:$0]  %s15947_s8, 64, %s99_s1, [#allocation11]  }
  0x3a   :  { %s15382_s0 = smov [#allocation13]   ;;  %s15383_s18 = smov [#allocation16]  }
  0x3b   :  { %s119_s30 = sshll.u32 %s15382_s0, 4  ;;  %s144_s4 = sshll.u32 %s15383_s18, 4  ;;  %s120_s30 = int_to_ptr.vmem [resolvable:$true] %s119_s30  ;;  %s145_s4 = int_to_ptr.vmem [resolvable:$true] %s144_s4 }
  0x3c   :  { %s15121_s20 = scalar_lea.hbm %s15949_s10, 16384 }
  0x3d   :  { %p15122_p10 = scmp.ne.s32.totalorder %s15949_s10, %s15121_s20  ;;  %p15125_p11 = scmp.lt.u32.totalorder %s15121_s20, %s15949_s10 }
  0x3f   :  { %p15127_p12 = pnand %p15125_p11, %p15122_p10 }
  0x41   :  { %15130 = shalt.err (!%p15127_p12)
}
  0x42   :  { %s15131_s8 = scalar_lea.vmem %s120_s30, 16384  ;;  %p15136_p0 = scmp.lt.s32.totalorder %s120_s30, %s120_s30 }
  0x43   :  { %p15132_p13 = scmp.ne.s32.totalorder %s120_s30, %s15131_s8  ;;  %p15137_p1 = scmp.lt.s32.totalorder %s15131_s8, %s15131_s8 }
  0x45   :  { %p15138_p2 = por %p15137_p1, %p15136_p0 }
  0x47   :  { %p15139_p3 = pnand %p15138_p2, %p15132_p13 }
  0x49   :  { %15142 = shalt.err (!%p15139_p3)
}
  0x4a   :  { %s15384_s1 = smov 256   ;;  %s15385_s26 = smov 16  }
  0x4b   :  { %125 = dma.hbm_to_vmem [thread:$0]  %s15949_s10, 16384, %s120_s30, [#allocation14], %s15384_s1, %s15384_s1, %s15385_s26  }
  0x4c   :  { %s15143_s0 = scalar_lea.hbm %s15951_s12, 64 }
  0x4d   :  { %p15144_p4 = scmp.ne.s32.totalorder %s15951_s12, %s15143_s0  ;;  %p15147_p5 = scmp.lt.u32.totalorder %s15143_s0, %s15951_s12 }
  0x4f   :  { %p15149_p6 = pnand %p15147_p5, %p15144_p4 }
  0x51   :  { %15152 = shalt.err (!%p15149_p6)
}
  0x52   :  { %s15153_s21 = scalar_lea.vmem %s145_s4, 64  ;;  %p15158_p8 = scmp.lt.s32.totalorder %s145_s4, %s145_s4 }
  0x53   :  { %p15154_p7 = scmp.ne.s32.totalorder %s145_s4, %s15153_s21  ;;  %p15159_p9 = scmp.lt.s32.totalorder %s15153_s21, %s15153_s21 }
  0x55   :  { %p15160_p10 = por %p15159_p9, %p15158_p8 }
  0x57   :  { %p15161_p11 = pnand %p15160_p10, %p15154_p7 }
  0x59   :  { %15164 = shalt.err (!%p15161_p11)
}
  0x5a   :  { %147 = dma.hbm_to_vmem [thread:$0]  %s15951_s12, 64, %s145_s4, [#allocation17]  }
  0x5b   :  { %s15386_s22 = smov [#allocation19]   ;;  %s15387_s24 = smov [#allocation2]  }
  0x5c   :  { %s166_s23 = sshll.u32 %s15386_s22, 4  ;;  %s41_s8 = sshll.u32 %s15387_s24, 4  ;;  %s167_s23 = int_to_ptr.vmem [resolvable:$true] %s166_s23  ;;  %s42_s8 = int_to_ptr.vmem [resolvable:$true] %s41_s8 }
  0x5d   :  { %s15165_s6 = scalar_lea.hbm %s15953_s14, 16 }
  0x5e   :  { %p15166_p12 = scmp.ne.s32.totalorder %s15953_s14, %s15165_s6  ;;  %p15169_p13 = scmp.lt.u32.totalorder %s15165_s6, %s15953_s14 }
  0x60   :  { %p15171_p0 = pnand %p15169_p13, %p15166_p12 }
  0x62   :  { %15174 = shalt.err (!%p15171_p0)
}
  0x63   :  { %s15175_s12 = scalar_lea.vmem %s167_s23, 16  ;;  %s15179_s4 = scalar_lea.vmem %s167_s23, 32 }
  0x64   :  { %p15176_p1 = scmp.ne.s32.totalorder %s167_s23, %s15175_s12  ;;  %p15180_p2 = scmp.lt.s32.totalorder %s167_s23, %s167_s23 }
  0x65   :  { %p15181_p3 = scmp.lt.s32.totalorder %s15179_s4, %s15175_s12 }
  0x67   :  { %p15182_p4 = por %p15181_p3, %p15180_p2 }
  0x69   :  { %p15183_p5 = pnand %p15182_p4, %p15176_p1 }
  0x6b   :  { %15186 = shalt.err (!%p15183_p5)
}
  0x6c   :  { %169 = dma.hbm_to_vmem [thread:$0]  %s15953_s14, 16, %s167_s23, [#allocation20]  }
  0x6d   :  { %s15187_s30 = scalar_lea.hbm %s15942_s3, 40960 }
  0x6e   :  { %p15188_p6 = scmp.ne.s32.totalorder %s15942_s3, %s15187_s30  ;;  %p15191_p7 = scmp.lt.u32.totalorder %s15187_s30, %s15942_s3 }
  0x70   :  { %p15193_p8 = pnand %p15191_p7, %p15188_p6 }
  0x72   :  { %15196 = shalt.err (!%p15193_p8)
}
  0x73   :  { %s15197_s6 = scalar_lea.vmem %s42_s8, 40960  ;;  %p15202_p10 = scmp.lt.s32.totalorder %s42_s8, %s42_s8 }
  0x74   :  { %p15198_p9 = scmp.ne.s32.totalorder %s42_s8, %s15197_s6  ;;  %p15203_p11 = scmp.lt.s32.totalorder %s15197_s6, %s15197_s6 }
  0x76   :  { %p15204_p12 = por %p15203_p11, %p15202_p10 }
  0x78   :  { %p15205_p13 = pnand %p15204_p12, %p15198_p9 }
  0x7a   :  { %15208 = shalt.err (!%p15205_p13)
}
  0x7b   :  { %47 = dma.hbm_to_vmem [thread:$0]  %s15942_s3, 40960, %s42_s8, [#allocation3], %s15384_s1, %s15384_s1, %s15385_s26  }
  0x7c   :  { %s15388_s27 = smov [#allocation6]   ;;  %s15389_s18 = smov [#allocation9]  }
  0x7d   :  { %s63_s0 = sshll.u32 %s15388_s27, 4  ;;  %s85_s25 = sshll.u32 %s15389_s18, 4  ;;  %s64_s0 = int_to_ptr.vmem [resolvable:$true] %s63_s0  ;;  %s86_s25 = int_to_ptr.vmem [resolvable:$true] %s85_s25 }
  0x7e   :  { %s15209_s19 = scalar_lea.hbm %s15944_s5, 40960 }
  0x7f   :  { %p15210_p0 = scmp.ne.s32.totalorder %s15944_s5, %s15209_s19  ;;  %p15213_p1 = scmp.lt.u32.totalorder %s15209_s19, %s15944_s5 }
  0x81   :  { %p15215_p2 = pnand %p15213_p1, %p15210_p0 }
  0x83   :  { %15218 = shalt.err (!%p15215_p2)
}
  0x84   :  { %s15219_s3 = scalar_lea.vmem %s64_s0, 40960  ;;  %p15224_p4 = scmp.lt.s32.totalorder %s64_s0, %s64_s0 }
  0x85   :  { %p15220_p3 = scmp.ne.s32.totalorder %s64_s0, %s15219_s3  ;;  %p15225_p5 = scmp.lt.s32.totalorder %s15219_s3, %s15219_s3 }
  0x87   :  { %p15226_p6 = por %p15225_p5, %p15224_p4 }
  0x89   :  { %p15227_p7 = pnand %p15226_p6, %p15220_p3 }
  0x8b   :  { %15230 = shalt.err (!%p15227_p7)
}
  0x8c   :  { %69 = dma.hbm_to_vmem [thread:$0]  %s15944_s5, 40960, %s64_s0, [#allocation5], %s15384_s1, %s15384_s1, %s15385_s26  }
  0x8d   :  { %s15231_s29 = scalar_lea.hbm %s15946_s7, 40960 }
  0x8e   :  { %p15232_p8 = scmp.ne.s32.totalorder %s15946_s7, %s15231_s29  ;;  %p15235_p9 = scmp.lt.u32.totalorder %s15231_s29, %s15946_s7 }
  0x90   :  { %p15237_p10 = pnand %p15235_p9, %p15232_p8 }
  0x92   :  { %15240 = shalt.err (!%p15237_p10)
}
  0x93   :  { %s15241_s18 = scalar_lea.vmem %s86_s25, 40960  ;;  %p15246_p12 = scmp.lt.s32.totalorder %s86_s25, %s86_s25 }
  0x94   :  { %p15242_p11 = scmp.ne.s32.totalorder %s86_s25, %s15241_s18  ;;  %p15247_p13 = scmp.lt.s32.totalorder %s15241_s18, %s15241_s18 }
  0x96   :  { %p15248_p0 = por %p15247_p13, %p15246_p12 }
  0x98   :  { %p15249_p1 = pnand %p15248_p0, %p15242_p11 }
  0x9a   :  { %15252 = shalt.err (!%p15249_p1)
}
  0x9b   :  { %91 = dma.hbm_to_vmem [thread:$0]  %s15946_s7, 40960, %s86_s25, [#allocation8], %s15384_s1, %s15384_s1, %s15385_s26  }
  0x9c   :  { %s15390_s12 = smov [#allocation12]   ;;  %s15391_s19 = smov [#allocation15]  }
  0x9d   :  { %s107_s4 = sshll.u32 %s15390_s12, 4  ;;  %s131_s20 = sshll.u32 %s15391_s19, 4  ;;  %s108_s4 = int_to_ptr.vmem [resolvable:$true] %s107_s4  ;;  %s132_s20 = int_to_ptr.vmem [resolvable:$true] %s131_s20 }
  0x9e   :  { %s15253_s30 = scalar_lea.hbm %s15948_s9, 16384 }
  0x9f   :  { %p15254_p2 = scmp.ne.s32.totalorder %s15948_s9, %s15253_s30  ;;  %p15257_p3 = scmp.lt.u32.totalorder %s15253_s30, %s15948_s9 }
  0xa1   :  { %p15259_p4 = pnand %p15257_p3, %p15254_p2 }
  0xa3   :  { %15262 = shalt.err (!%p15259_p4)
}
  0xa4   :  { %s15263_s7 = scalar_lea.vmem %s108_s4, 16384  ;;  %p15268_p6 = scmp.lt.s32.totalorder %s108_s4, %s108_s4 }
  0xa5   :  { %p15264_p5 = scmp.ne.s32.totalorder %s108_s4, %s15263_s7  ;;  %p15269_p7 = scmp.lt.s32.totalorder %s15263_s7, %s15263_s7 }
  0xa7   :  { %p15270_p8 = por %p15269_p7, %p15268_p6 }
  0xa9   :  { %p15271_p9 = pnand %p15270_p8, %p15264_p5 }
  0xab   :  { %15274 = shalt.err (!%p15271_p9)
}
  0xac   :  { %113 = dma.hbm_to_vmem [thread:$0]  %s15948_s9, 16384, %s108_s4, [#allocation11], %s15384_s1, %s15384_s1, %s15385_s26  }
  0xad   :  { %s15275_s14 = scalar_lea.hbm %s15950_s11, 16384 }
  0xae   :  { %p15276_p10 = scmp.ne.s32.totalorder %s15950_s11, %s15275_s14  ;;  %p15279_p11 = scmp.lt.u32.totalorder %s15275_s14, %s15950_s11 }
  0xb0   :  { %p15281_p12 = pnand %p15279_p11, %p15276_p10 }
  0xb2   :  { %15284 = shalt.err (!%p15281_p12)
}
  0xb3   :  { %s15285_s0 = scalar_lea.vmem %s132_s20, 16384  ;;  %p15290_p0 = scmp.lt.s32.totalorder %s132_s20, %s132_s20 }
  0xb4   :  { %p15286_p13 = scmp.ne.s32.totalorder %s132_s20, %s15285_s0  ;;  %p15291_p1 = scmp.lt.s32.totalorder %s15285_s0, %s15285_s0 }
  0xb6   :  { %p15292_p2 = por %p15291_p1, %p15290_p0 }
  0xb8   :  { %p15293_p3 = pnand %p15292_p2, %p15286_p13 }
  0xba   :  { %15296 = shalt.err (!%p15293_p3)
}
  0xbb   :  { %137 = dma.hbm_to_vmem [thread:$0]  %s15950_s11, 16384, %s132_s20, [#allocation14], %s15384_s1, %s15384_s1, %s15385_s26  }
  0xbc   :  { %s15392_s4 = smov [#allocation18]   ;;  %s15297_s30 = scalar_lea.hbm %s15952_s13, 4096 }
  0xbd   :  { %s153_s19 = sshll.u32 %s15392_s4, 4  ;;  %p15298_p4 = scmp.ne.s32.totalorder %s15952_s13, %s15297_s30  ;;  %s154_s19 = int_to_ptr.vmem [resolvable:$true] %s153_s19 }
  0xbe   :  { %p15301_p5 = scmp.lt.u32.totalorder %s15297_s30, %s15952_s13 }
  0xc0   :  { %p15303_p6 = pnand %p15301_p5, %p15298_p4 }
  0xc2   :  { %15306 = shalt.err (!%p15303_p6)
}
  0xc3   :  { %s15307_s7 = scalar_lea.vmem %s154_s19, 4096  ;;  %p15312_p8 = scmp.lt.s32.totalorder %s154_s19, %s154_s19 }
  0xc4   :  { %p15308_p7 = scmp.ne.s32.totalorder %s154_s19, %s15307_s7  ;;  %p15313_p9 = scmp.lt.s32.totalorder %s15307_s7, %s15307_s7 }
  0xc6   :  { %p15314_p10 = por %p15313_p9, %p15312_p8 }
  0xc8   :  { %p15315_p11 = pnand %p15314_p10, %p15308_p7 }
  0xca   :  { %15318 = shalt.err (!%p15315_p11)
}
  0xcb   :  { %s15393_s11 = smov 64   ;;  %s15394_s1 = smov 4  }
  0xcc   :  { %159 = dma.hbm_to_vmem [thread:$0]  %s15952_s13, 4096, %s154_s19, [#allocation17], %s15393_s11, %s15393_s11, %s15394_s1  }
  0xcd   :  { %s15395_s25 = smov [#allocation21]   ;;  %s15396_s29 = smov [#allocation22]  }
  0xce   :  { %s175_s28 = sshll.u32 %s15395_s25, 4  ;;  %s188_s6 = sshll.u32 %s15396_s29, 4  ;;  %s176_s28 = int_to_ptr.vmem [resolvable:$true] %s175_s28  ;;  %s189_s6 = int_to_ptr.vmem [resolvable:$true] %s188_s6 }
  0xcf   :  { %s15319_s27 = scalar_lea.hbm %s15954_s15, 1024 }
  0xd0   :  { %p15320_p12 = scmp.ne.s32.totalorder %s15954_s15, %s15319_s27  ;;  %p15323_p13 = scmp.lt.u32.totalorder %s15319_s27, %s15954_s15 }
  0xd2   :  { %p15325_p0 = pnand %p15323_p13, %p15320_p12 }
  0xd4   :  { %15328 = shalt.err (!%p15325_p0)
}
  0xd5   :  { %s15329_s13 = scalar_lea.vmem %s176_s28, 1024  ;;  %p15334_p2 = scmp.lt.s32.totalorder %s176_s28, %s176_s28 }
  0xd6   :  { %p15330_p1 = scmp.ne.s32.totalorder %s176_s28, %s15329_s13  ;;  %p15335_p3 = scmp.lt.s32.totalorder %s15329_s13, %s15329_s13 }
  0xd8   :  { %p15336_p4 = por %p15335_p3, %p15334_p2 }
  0xda   :  { %p15337_p5 = pnand %p15336_p4, %p15330_p1 }
  0xdc   :  { %15340 = shalt.err (!%p15337_p5)
}
  0xdd   :  { %181 = dma.hbm_to_vmem [thread:$0]  %s15954_s15, 1024, %s176_s28, [#allocation20], %s15393_s11, %s15393_s11, %s15394_s1  }
  0xde   :  { %s15341_s10 = scalar_lea.hbm %s15955_s16, 16 }
  0xdf   :  { %p15342_p6 = scmp.ne.s32.totalorder %s15955_s16, %s15341_s10  ;;  %p15345_p7 = scmp.lt.u32.totalorder %s15341_s10, %s15955_s16 }
  0xe1   :  { %p15347_p8 = pnand %p15345_p7, %p15342_p6 }
  0xe3   :  { %15350 = shalt.err (!%p15347_p8)
}
  0xe4   :  { %s15351_s24 = scalar_lea.vmem %s189_s6, 16  ;;  %s15355_s7 = scalar_lea.vmem %s189_s6, 32 }
  0xe5   :  { %p15352_p9 = scmp.ne.s32.totalorder %s189_s6, %s15351_s24  ;;  %p15356_p10 = scmp.lt.s32.totalorder %s189_s6, %s189_s6 }
  0xe6   :  { %p15357_p11 = scmp.lt.s32.totalorder %s15355_s7, %s15351_s24 }
  0xe8   :  { %p15358_p12 = por %p15357_p11, %p15356_p10 }
  0xea   :  { %p15359_p13 = pnand %p15358_p12, %p15352_p9 }
  0xec   :  { %15362 = shalt.err (!%p15359_p13)
}
  0xed   :  { %191 = dma.hbm_to_vmem [thread:$0]  %s15955_s16, 16, %s189_s6, [#allocation23]  }
  0xee   :  { %15363 = dma.done.wait [#allocation3], 40960  }
  0xef   :  { %15364 = vsyncadd [#allocation3], 4294926336 }
  0xf0   :  { %15365 = dma.done.wait [#allocation5], 41024  }
  0xf1   :  { %15366 = vsyncadd [#allocation5], 4294926272 }
  0xf2   :  { %15367 = dma.done.wait [#allocation8], 41024  }
  0xf3   :  { %15368 = vsyncadd [#allocation8], 4294926272 }
  0xf4   :  { %15369 = dma.done.wait [#allocation11], 16448  }
  0xf5   :  { %15370 = vsyncadd [#allocation11], 4294950848 }
  0xf6   :  { %15371 = dma.done.wait [#allocation14], 32768  }
  0xf7   :  { %15372 = vsyncadd [#allocation14], 4294934528 }
  0xf8   :  { %15373 = dma.done.wait [#allocation17], 4160  }
  0xf9   :  { %15374 = vsyncadd [#allocation17], 4294963136 }
  0xfa   :  { %15375 = dma.done.wait [#allocation20], 1040  }
  0xfb   :  { %15376 = vsyncadd [#allocation20], 4294966256 }
  0xfc   :  { %15377 = dma.done.wait [#allocation23], 16  }
  0xfd   :  { %15378 = vsyncadd [#allocation23], 4294967280  ;;  %v12818_v0 = vld [vmem:[#allocation2 + $0x4] ss:$16 sps:$4 sm:$0xff]   ;;  %v12820_v1 = vld [vmem:[#allocation2 + $0xc] ss:$16 sps:$4 sm:$0xff]  }
  0xfe   :  { %2237 = vmatprep.subr.bf16.mxu0 %v12818_v0  ;;  %v12822_v2 = vld [vmem:[#allocation2] ss:$16 sps:$4 sm:$0xff]   ;;  %v12823_v3 = vld [vmem:[#allocation2 + $0x8] ss:$16 sps:$4 sm:$0xff]   ;;  %2452 = vmatprep.subr.bf16.mxu1 %v12820_v1  ;;  %v12824_v4 = vld [vmem:[#allocation2 + $0x24] ss:$16 sps:$4 sm:$0xff]  }
  0xff   :  { %2238 = vmatpush1.bf16.msra.mxu0 %v12822_v2  ;;  %2453 = vmatpush1.bf16.msra.mxu1 %v12823_v3  ;;  %v12826_v5 = vld [vmem:[#allocation2 + $0x2c] ss:$16 sps:$4 sm:$0xff]   ;;  %v12828_v6 = vld [vmem:[#allocation2 + $0x20] ss:$16 sps:$4 sm:$0xff]   ;;  %v12829_v7 = vld [vmem:[#allocation2 + $0x28] ss:$16 sps:$4 sm:$0xff]  }
 0x100   :  { %2239 = vmatprep.subr.bf16.mxu0 %v12824_v4  ;;  %2454 = vmatprep.subr.bf16.mxu1 %v12826_v5  ;;  %v12830_v8 = vld [vmem:[#allocation2 + $0x44] ss:$16 sps:$4 sm:$0xff]   ;;  %v12832_v9 = vld [vmem:[#allocation2 + $0x4c] ss:$16 sps:$4 sm:$0xff]   ;;  %v12834_v10 = vld [vmem:[#allocation2 + $0x40] ss:$16 sps:$4 sm:$0xff]  }
 0x101   :  { %v12835_v11 = vld [vmem:[#allocation2 + $0x48] ss:$16 sps:$4 sm:$0xff]   ;;  %v12836_v12 = vld [vmem:[#allocation2 + $0x64] ss:$16 sps:$4 sm:$0xff]   ;;  %v12838_v13 = vld [vmem:[#allocation2 + $0x6c] ss:$16 sps:$4 sm:$0xff]  }
 0x102   :  { %v12840_v14 = vld [vmem:[#allocation2 + $0x60] ss:$16 sps:$4 sm:$0xff]   ;;  %v12841_v15 = vld [vmem:[#allocation2 + $0x68] ss:$16 sps:$4 sm:$0xff]   ;;  %v12842_v16 = vld [vmem:[#allocation2 + $0x84] ss:$16 sps:$4 sm:$0xff]  }
 0x103   :  { %2240 = vmatpush1.bf16.msra.mxu0 %v12828_v6  ;;  %2455 = vmatpush1.bf16.msra.mxu1 %v12829_v7  ;;  %v12844_v17 = vld [vmem:[#allocation2 + $0x8c] ss:$16 sps:$4 sm:$0xff]   ;;  %v12846_v18 = vld [vmem:[#allocation2 + $0x80] ss:$16 sps:$4 sm:$0xff]   ;;  %v12847_v19 = vld [vmem:[#allocation2 + $0x88] ss:$16 sps:$4 sm:$0xff]  }
 0x104   :  { %2241 = vmatprep.subr.bf16.mxu0 %v12830_v8  ;;  %2456 = vmatprep.subr.bf16.mxu1 %v12832_v9  ;;  %v12848_v20 = vld [vmem:[#allocation2 + $0xa4] ss:$16 sps:$4 sm:$0xff]   ;;  %v12850_v21 = vld [vmem:[#allocation2 + $0xac] ss:$16 sps:$4 sm:$0xff]   ;;  %v12852_v22 = vld [vmem:[#allocation2 + $0xa0] ss:$16 sps:$4 sm:$0xff]  }
 0x105   :  { %v12853_v23 = vld [vmem:[#allocation2 + $0xa8] ss:$16 sps:$4 sm:$0xff]   ;;  %v12854_v24 = vld [vmem:[#allocation2 + $0xc4] ss:$16 sps:$4 sm:$0xff]   ;;  %v12856_v25 = vld [vmem:[#allocation2 + $0xcc] ss:$16 sps:$4 sm:$0xff]  }
 0x106   :  { %v12858_v26 = vld [vmem:[#allocation2 + $0xc0] ss:$16 sps:$4 sm:$0xff]   ;;  %v12859_v27 = vld [vmem:[#allocation2 + $0xc8] ss:$16 sps:$4 sm:$0xff]   ;;  %v12860_v28 = vld [vmem:[#allocation2 + $0xe4] ss:$16 sps:$4 sm:$0xff]  }
 0x107   :  { %2242 = vmatpush1.bf16.msra.mxu0 %v12834_v10  ;;  %2457 = vmatpush1.bf16.msra.mxu1 %v12835_v11  ;;  %v12862_v29 = vld [vmem:[#allocation2 + $0xec] ss:$16 sps:$4 sm:$0xff]   ;;  %v12864_v30 = vld [vmem:[#allocation2 + $0xe0] ss:$16 sps:$4 sm:$0xff]   ;;  %v12865_v31 = vld [vmem:[#allocation2 + $0xe8] ss:$16 sps:$4 sm:$0xff]  }
 0x108   :  { %2243 = vmatprep.subr.bf16.mxu0 %v12836_v12  ;;  %2458 = vmatprep.subr.bf16.mxu1 %v12838_v13  ;;  %v12866_v32 = vld [vmem:[#allocation2 + $0x104] ss:$16 sps:$4 sm:$0xff]   ;;  %v12868_v33 = vld [vmem:[#allocation2 + $0x10c] ss:$16 sps:$4 sm:$0xff]   ;;  %v12870_v34 = vld [vmem:[#allocation2 + $0x100] ss:$16 sps:$4 sm:$0xff]  }
 0x109   :  { %v12871_v35 = vld [vmem:[#allocation2 + $0x108] ss:$16 sps:$4 sm:$0xff]   ;;  %v12872_v36 = vld [vmem:[#allocation2 + $0x124] ss:$16 sps:$4 sm:$0xff]   ;;  %v12874_v37 = vld [vmem:[#allocation2 + $0x12c] ss:$16 sps:$4 sm:$0xff]  }
 0x10a   :  { %v12876_v38 = vld [vmem:[#allocation2 + $0x120] ss:$16 sps:$4 sm:$0xff]   ;;  %v12877_v39 = vld [vmem:[#allocation2 + $0x128] ss:$16 sps:$4 sm:$0xff]   ;;  %v12878_v40 = vld [vmem:[#allocation2 + $0x144] ss:$16 sps:$4 sm:$0xff]  }
 0x10b   :  { %2244 = vmatpush1.bf16.msra.mxu0 %v12840_v14  ;;  %2459 = vmatpush1.bf16.msra.mxu1 %v12841_v15  ;;  %v12880_v41 = vld [vmem:[#allocation2 + $0x14c] ss:$16 sps:$4 sm:$0xff]   ;;  %v12882_v42 = vld [vmem:[#allocation2 + $0x140] ss:$16 sps:$4 sm:$0xff]   ;;  %v12883_v43 = vld [vmem:[#allocation2 + $0x148] ss:$16 sps:$4 sm:$0xff]  }
 0x10c   :  { %2245 = vmatprep.subr.bf16.mxu0 %v12842_v16  ;;  %2460 = vmatprep.subr.bf16.mxu1 %v12844_v17  ;;  %v12884_v44 = vld [vmem:[#allocation2 + $0x164] ss:$16 sps:$4 sm:$0xff]   ;;  %v12886_v45 = vld [vmem:[#allocation2 + $0x16c] ss:$16 sps:$4 sm:$0xff]   ;;  %v12888_v46 = vld [vmem:[#allocation2 + $0x160] ss:$16 sps:$4 sm:$0xff]  }
 0x10d   :  { %v12889_v47 = vld [vmem:[#allocation2 + $0x168] ss:$16 sps:$4 sm:$0xff]   ;;  %s15961_s26 = sld [smem:[#allocation32_spill]]  ;;  %v12890_v49 = vld [vmem:[#allocation2 + $0x184] ss:$16 sps:$4 sm:$0xff]   ;;  %s15962_s8 = sld [smem:[#allocation33_spill]] }
 0x10e   :  { %v12892_v50 = vld [vmem:[#allocation2 + $0x18c] ss:$16 sps:$4 sm:$0xff]   ;;  %v12894_v51 = vld [vmem:[#allocation2 + $0x180] ss:$16 sps:$4 sm:$0xff]   ;;  %v12895_v52 = vld [vmem:[#allocation2 + $0x188] ss:$16 sps:$4 sm:$0xff]  }
 0x10f   :  { %2246 = vmatpush1.bf16.msra.mxu0 %v12846_v18  ;;  %2461 = vmatpush1.bf16.msra.mxu1 %v12847_v19  ;;  %v12896_v53 = vld [vmem:[#allocation2 + $0x1a4] ss:$16 sps:$4 sm:$0xff]   ;;  %v12898_v54 = vld [vmem:[#allocation2 + $0x1ac] ss:$16 sps:$4 sm:$0xff]   ;;  %v12900_v55 = vld [vmem:[#allocation2 + $0x1a0] ss:$16 sps:$4 sm:$0xff]  }
 0x110   :  { %2247 = vmatprep.subr.bf16.mxu0 %v12848_v20  ;;  %2462 = vmatprep.subr.bf16.mxu1 %v12850_v21  ;;  %v12901_v56 = vld [vmem:[#allocation2 + $0x1a8] ss:$16 sps:$4 sm:$0xff]   ;;  %v12902_v57 = vld [vmem:[#allocation2 + $0x1c4] ss:$16 sps:$4 sm:$0xff]   ;;  %v12904_v58 = vld [vmem:[#allocation2 + $0x1cc] ss:$16 sps:$4 sm:$0xff]  }
 0x111   :  { %v12906_v59 = vld [vmem:[#allocation2 + $0x1c0] ss:$16 sps:$4 sm:$0xff]   ;;  %v12907_v60 = vld [vmem:[#allocation2 + $0x1c8] ss:$16 sps:$4 sm:$0xff]   ;;  %v12908_v61 = vld [vmem:[#allocation2 + $0x1e4] ss:$16 sps:$4 sm:$0xff]  }
 0x112   :  { %v12910_v62 = vld [vmem:[#allocation2 + $0x1ec] ss:$16 sps:$4 sm:$0xff]   ;;  %v12912_v63 = vld [vmem:[#allocation2 + $0x1e0] ss:$16 sps:$4 sm:$0xff]   ;;  %v12913_v0 = vld [vmem:[#allocation2 + $0x1e8] ss:$16 sps:$4 sm:$0xff]  }
 0x113   :  { %2248 = vmatpush1.bf16.msra.mxu0 %v12852_v22  ;;  %2463 = vmatpush1.bf16.msra.mxu1 %v12853_v23  ;;  %v12916_v48 = vld [vmem:[%s15961_s26 + $0x4] ss:$40 sps:$4 sm:$0xff]   ;;  %v12914_v3 = vld [vmem:[%s15961_s26] ss:$40 sps:$4 sm:$0xff]   ;;  %vm15398_vm0 = vmmov 0  }
 0x114   :  { %2249 = vmatprep.subr.bf16.mxu0 %v12854_v24  ;;  %2464 = vmatprep.subr.bf16.mxu1 %v12856_v25  ;;  %v12919_v1 = vld [vmem:[#allocation2 + $0x204] ss:$16 sps:$4 sm:$0xff]   ;;  %v12922_v2 = vld [vmem:[#allocation2 + $0x20c] ss:$16 sps:$4 sm:$0xff]   ;;  %v12917_v4 = vld [vmem:[#allocation2 + $0x200] ss:$16 sps:$4 sm:$0xff]  }
 0x115   :  { %2269 = vmatprep.mubr.bf16.mxu0 %v12916_v48  ;;  %2484 = vmatprep.mubr.bf16.mxu1 %v12916_v48  ;;  %v12920_v5 = vld [vmem:[#allocation2 + $0x208] ss:$16 sps:$4 sm:$0xff]   ;;  %v12925_v6 = vld [vmem:[#allocation2 + $0x224] ss:$16 sps:$4 sm:$0xff]   ;;  %v12928_v7 = vld [vmem:[#allocation2 + $0x22c] ss:$16 sps:$4 sm:$0xff]  }
 0x116   :  { %v12923_v8 = vld [vmem:[#allocation2 + $0x220] ss:$16 sps:$4 sm:$0xff]   ;;  %v12926_v9 = vld [vmem:[#allocation2 + $0x228] ss:$16 sps:$4 sm:$0xff]   ;;  %v12931_v10 = vld [vmem:[#allocation2 + $0x244] ss:$16 sps:$4 sm:$0xff]  }
 0x117   :  { %2250 = vmatpush1.bf16.msra.mxu0 %v12858_v26  ;;  %2465 = vmatpush1.bf16.msra.mxu1 %v12859_v27  ;;  %v12934_v11 = vld [vmem:[#allocation2 + $0x24c] ss:$16 sps:$4 sm:$0xff]   ;;  %v12929_v12 = vld [vmem:[#allocation2 + $0x240] ss:$16 sps:$4 sm:$0xff]   ;;  %v12932_v13 = vld [vmem:[#allocation2 + $0x248] ss:$16 sps:$4 sm:$0xff]  }
 0x118   :  { %2251 = vmatprep.subr.bf16.mxu0 %v12860_v28  ;;  %2466 = vmatprep.subr.bf16.mxu1 %v12862_v29  ;;  %v12937_v14 = vld [vmem:[#allocation2 + $0x264] ss:$16 sps:$4 sm:$0xff]   ;;  %v12940_v15 = vld [vmem:[#allocation2 + $0x26c] ss:$16 sps:$4 sm:$0xff]   ;;  %v12935_v16 = vld [vmem:[#allocation2 + $0x260] ss:$16 sps:$4 sm:$0xff]  }
 0x119   :  { %v12938_v17 = vld [vmem:[#allocation2 + $0x268] ss:$16 sps:$4 sm:$0xff]   ;;  %v12943_v18 = vld [vmem:[#allocation2 + $0x284] ss:$16 sps:$4 sm:$0xff]   ;;  %v12946_v19 = vld [vmem:[#allocation2 + $0x28c] ss:$16 sps:$4 sm:$0xff]  }
 0x11a   :  { %v12941_v20 = vld [vmem:[#allocation2 + $0x280] ss:$16 sps:$4 sm:$0xff]   ;;  %v12944_v21 = vld [vmem:[#allocation2 + $0x288] ss:$16 sps:$4 sm:$0xff]   ;;  %v12949_v22 = vld [vmem:[#allocation2 + $0x2a4] ss:$16 sps:$4 sm:$0xff]  }
 0x11b   :  { %2252 = vmatpush1.bf16.msra.mxu0 %v12864_v30  ;;  %2467 = vmatpush1.bf16.msra.mxu1 %v12865_v31  ;;  %v12952_v23 = vld [vmem:[#allocation2 + $0x2ac] ss:$16 sps:$4 sm:$0xff]   ;;  %v12947_v24 = vld [vmem:[#allocation2 + $0x2a0] ss:$16 sps:$4 sm:$0xff]   ;;  %v12950_v25 = vld [vmem:[#allocation2 + $0x2a8] ss:$16 sps:$4 sm:$0xff]  }
 0x11c   :  { %2253 = vmatprep.subr.bf16.mxu0 %v12866_v32  ;;  %2468 = vmatprep.subr.bf16.mxu1 %v12868_v33  ;;  %v12955_v26 = vld [vmem:[#allocation2 + $0x2c4] ss:$16 sps:$4 sm:$0xff]   ;;  %v12958_v27 = vld [vmem:[#allocation2 + $0x2cc] ss:$16 sps:$4 sm:$0xff]   ;;  %v12953_v28 = vld [vmem:[#allocation2 + $0x2c0] ss:$16 sps:$4 sm:$0xff]  }
 0x11d   :  { %v12956_v29 = vld [vmem:[#allocation2 + $0x2c8] ss:$16 sps:$4 sm:$0xff]   ;;  %v13015_v30 = vld [vmem:[%s15961_s26 + $0xc] ss:$40 sps:$4 sm:$0xff]   ;;  %v12959_v33 = vld [vmem:[#allocation2 + $0x2e0] ss:$16 sps:$4 sm:$0xff]  }
 0x11e   :  { %v12961_v31 = vld [vmem:[#allocation2 + $0x2e4] ss:$16 sps:$4 sm:$0xff]   ;;  %v12964_v32 = vld [vmem:[#allocation2 + $0x2ec] ss:$16 sps:$4 sm:$0xff]  }
 0x11f   :  { %2254 = vmatpush1.bf16.msra.mxu0 %v12870_v34  ;;  %2469 = vmatpush1.bf16.msra.mxu1 %v12871_v35  ;;  %v12962_v34 = vld [vmem:[#allocation2 + $0x2e8] ss:$16 sps:$4 sm:$0xff]   ;;  %v12967_v35 = vld [vmem:[#allocation2 + $0x304] ss:$16 sps:$4 sm:$0xff]   ;;  %v12988_v48 = vld [vmem:[#allocation2 + $0x36c] ss:$16 sps:$4 sm:$0xff]  }
 0x120   :  { %2255 = vmatprep.subr.bf16.mxu0 %v12872_v36  ;;  %2470 = vmatprep.subr.bf16.mxu1 %v12874_v37  ;;  %v12970_v36 = vld [vmem:[#allocation2 + $0x30c] ss:$16 sps:$4 sm:$0xff]   ;;  %v12965_v37 = vld [vmem:[#allocation2 + $0x300] ss:$16 sps:$4 sm:$0xff]  }
 0x123   :  { %2256 = vmatpush1.bf16.msra.mxu0 %v12876_v38  ;;  %2471 = vmatpush1.bf16.msra.mxu1 %v12877_v39  ;;  %v12968_v38 = vld [vmem:[#allocation2 + $0x308] ss:$16 sps:$4 sm:$0xff]   ;;  %v12973_v39 = vld [vmem:[#allocation2 + $0x324] ss:$16 sps:$4 sm:$0xff]  }
 0x124   :  { %2257 = vmatprep.subr.bf16.mxu0 %v12878_v40  ;;  %2472 = vmatprep.subr.bf16.mxu1 %v12880_v41  ;;  %v12976_v40 = vld [vmem:[#allocation2 + $0x32c] ss:$16 sps:$4 sm:$0xff]   ;;  %v12971_v41 = vld [vmem:[#allocation2 + $0x320] ss:$16 sps:$4 sm:$0xff]  }
 0x127   :  { %2258 = vmatpush1.bf16.msra.mxu0 %v12882_v42  ;;  %2473 = vmatpush1.bf16.msra.mxu1 %v12883_v43  ;;  %v12974_v42 = vld [vmem:[#allocation2 + $0x328] ss:$16 sps:$4 sm:$0xff]   ;;  %v12979_v43 = vld [vmem:[#allocation2 + $0x344] ss:$16 sps:$4 sm:$0xff]  }
 0x128   :  { %2259 = vmatprep.subr.bf16.mxu0 %v12884_v44  ;;  %2474 = vmatprep.subr.bf16.mxu1 %v12886_v45  ;;  %v12982_v44 = vld [vmem:[#allocation2 + $0x34c] ss:$16 sps:$4 sm:$0xff]   ;;  %v12977_v45 = vld [vmem:[#allocation2 + $0x340] ss:$16 sps:$4 sm:$0xff]  }
 0x12b   :  { %2260 = vmatpush1.bf16.msra.mxu0 %v12888_v46  ;;  %2475 = vmatpush1.bf16.msra.mxu1 %v12889_v47  ;;  %v12980_v46 = vld [vmem:[#allocation2 + $0x348] ss:$16 sps:$4 sm:$0xff]   ;;  %v12985_v47 = vld [vmem:[#allocation2 + $0x364] ss:$16 sps:$4 sm:$0xff]  }
 0x12c   :  { %2261 = vmatprep.subr.bf16.mxu0 %v12890_v49  ;;  %2476 = vmatprep.subr.bf16.mxu1 %v12892_v50  ;;  %v12983_v49 = vld [vmem:[#allocation2 + $0x360] ss:$16 sps:$4 sm:$0xff]   ;;  %v12986_v50 = vld [vmem:[#allocation2 + $0x368] ss:$16 sps:$4 sm:$0xff]  }
 0x12f   :  { %2262 = vmatpush1.bf16.msra.mxu0 %v12894_v51  ;;  %2477 = vmatpush1.bf16.msra.mxu1 %v12895_v52  ;;  %v12991_v51 = vld [vmem:[#allocation2 + $0x384] ss:$16 sps:$4 sm:$0xff]   ;;  %v12994_v52 = vld [vmem:[#allocation2 + $0x38c] ss:$16 sps:$4 sm:$0xff]  }
 0x130   :  { %2263 = vmatprep.subr.bf16.mxu0 %v12896_v53  ;;  %2478 = vmatprep.subr.bf16.mxu1 %v12898_v54  ;;  %v12989_v53 = vld [vmem:[#allocation2 + $0x380] ss:$16 sps:$4 sm:$0xff]   ;;  %v12992_v54 = vld [vmem:[#allocation2 + $0x388] ss:$16 sps:$4 sm:$0xff]  }
 0x133   :  { %2264 = vmatpush1.bf16.msra.mxu0 %v12900_v55  ;;  %2479 = vmatpush1.bf16.msra.mxu1 %v12901_v56  ;;  %v12997_v55 = vld [vmem:[#allocation2 + $0x3a4] ss:$16 sps:$4 sm:$0xff]   ;;  %v13000_v56 = vld [vmem:[#allocation2 + $0x3ac] ss:$16 sps:$4 sm:$0xff]  }
 0x134   :  { %2265 = vmatprep.subr.bf16.mxu0 %v12902_v57  ;;  %2480 = vmatprep.subr.bf16.mxu1 %v12904_v58  ;;  %v12995_v57 = vld [vmem:[#allocation2 + $0x3a0] ss:$16 sps:$4 sm:$0xff]   ;;  %v12998_v58 = vld [vmem:[#allocation2 + $0x3a8] ss:$16 sps:$4 sm:$0xff]  }
 0x137   :  { %2266 = vmatpush1.bf16.msra.mxu0 %v12906_v59  ;;  %2481 = vmatpush1.bf16.msra.mxu1 %v12907_v60  ;;  %v13003_v59 = vld [vmem:[#allocation2 + $0x3c4] ss:$16 sps:$4 sm:$0xff]   ;;  %v13006_v60 = vld [vmem:[#allocation2 + $0x3cc] ss:$16 sps:$4 sm:$0xff]  }
 0x138   :  { %2267 = vmatprep.subr.bf16.mxu0 %v12908_v61  ;;  %2482 = vmatprep.subr.bf16.mxu1 %v12910_v62  ;;  %v13001_v61 = vld [vmem:[#allocation2 + $0x3c0] ss:$16 sps:$4 sm:$0xff]   ;;  %v13004_v62 = vld [vmem:[#allocation2 + $0x3c8] ss:$16 sps:$4 sm:$0xff]  }
 0x13b   :  { %2268 = vmatpush1.bf16.msra.mxu0 %v12912_v63  ;;  %2483 = vmatpush1.bf16.msra.mxu1 %v12913_v0  ;;  %v13009_v63 = vld [vmem:[#allocation2 + $0x3e4] ss:$16 sps:$4 sm:$0xff]   ;;  %v13012_v0 = vld [vmem:[#allocation2 + $0x3ec] ss:$16 sps:$4 sm:$0xff]  }
 0x13c   :  { %2280 = vmatprep.subr.bf16.mxu0 %v12919_v1  ;;  %2495 = vmatprep.subr.bf16.mxu1 %v12922_v2  ;;  %v13007_v1 = vld [vmem:[#allocation2 + $0x3e0] ss:$16 sps:$4 sm:$0xff]   ;;  %v13010_v2 = vld [vmem:[#allocation2 + $0x3e8] ss:$16 sps:$4 sm:$0xff]  }
 0x13e   :  { %2270 = vmatmul.mubr.bf16.vlgmr.msra.gmra.mrb[0].mxu0 %v12914_v3  ;;  %2485 = vmatmul.mubr.bf16.vlgmr.msra.gmra.mrb[0].mxu1 %v12914_v3  ;;  %v13018_v3 = vld [vmem:[#allocation2 + $0x404] ss:$16 sps:$4 sm:$0xff]  }
 0x13f   :  { %2281 = vmatpush1.bf16.msra.mxu0 %v12917_v4  ;;  %2496 = vmatpush1.bf16.msra.mxu1 %v12920_v5  ;;  %v13021_v4 = vld [vmem:[#allocation2 + $0x40c] ss:$16 sps:$4 sm:$0xff]   ;;  %v13013_v5 = vld [vmem:[%s15961_s26 + $0x8] ss:$40 sps:$4 sm:$0xff]  }
 0x140   :  { %2282 = vmatprep.subr.bf16.mxu0 %v12925_v6  ;;  %2497 = vmatprep.subr.bf16.mxu1 %v12928_v7  ;;  %v13016_v6 = vld [vmem:[#allocation2 + $0x400] ss:$16 sps:$4 sm:$0xff]   ;;  %v13019_v7 = vld [vmem:[#allocation2 + $0x408] ss:$16 sps:$4 sm:$0xff]  }
 0x141   :  { %2312 = vmatprep.mubr.bf16.mxu0 %v13015_v30  ;;  %2527 = vmatprep.mubr.bf16.mxu1 %v13015_v30  ;;  %v13057_v30 = vld [vmem:[#allocation2 + $0x4cc] ss:$16 sps:$4 sm:$0xff]  }
 0x143   :  { %2283 = vmatpush1.bf16.msra.mxu0 %v12923_v8  ;;  %2498 = vmatpush1.bf16.msra.mxu1 %v12926_v9  ;;  %v13024_v8 = vld [vmem:[#allocation2 + $0x424] ss:$16 sps:$4 sm:$0xff]   ;;  %v13027_v9 = vld [vmem:[#allocation2 + $0x42c] ss:$16 sps:$4 sm:$0xff]  }
 0x144   :  { %2284 = vmatprep.subr.bf16.mxu0 %v12931_v10  ;;  %2499 = vmatprep.subr.bf16.mxu1 %v12934_v11  ;;  %v13022_v10 = vld [vmem:[#allocation2 + $0x420] ss:$16 sps:$4 sm:$0xff]   ;;  %v13025_v11 = vld [vmem:[#allocation2 + $0x428] ss:$16 sps:$4 sm:$0xff]  }
 0x147   :  { %2285 = vmatpush1.bf16.msra.mxu0 %v12929_v12  ;;  %2500 = vmatpush1.bf16.msra.mxu1 %v12932_v13  ;;  %v13114_v12 = vld [vmem:[%s15961_s26 + $0x14] ss:$40 sps:$4 sm:$0xff]  }
 0x148   :  { %2286 = vmatprep.subr.bf16.mxu0 %v12937_v14  ;;  %2501 = vmatprep.subr.bf16.mxu1 %v12940_v15  ;;  %v13030_v13 = vld [vmem:[#allocation2 + $0x444] ss:$16 sps:$4 sm:$0xff]   ;;  %v13033_v14 = vld [vmem:[#allocation2 + $0x44c] ss:$16 sps:$4 sm:$0xff]   ;;  %v13028_v15 = vld [vmem:[#allocation2 + $0x440] ss:$16 sps:$4 sm:$0xff]  }
 0x14b   :  { %2287 = vmatpush1.bf16.msra.mxu0 %v12935_v16  ;;  %2502 = vmatpush1.bf16.msra.mxu1 %v12938_v17  ;;  %v13031_v16 = vld [vmem:[#allocation2 + $0x448] ss:$16 sps:$4 sm:$0xff]   ;;  %v13036_v17 = vld [vmem:[#allocation2 + $0x464] ss:$16 sps:$4 sm:$0xff]  }
 0x14c   :  { %2288 = vmatprep.subr.bf16.mxu0 %v12943_v18  ;;  %2503 = vmatprep.subr.bf16.mxu1 %v12946_v19  ;;  %v13039_v18 = vld [vmem:[#allocation2 + $0x46c] ss:$16 sps:$4 sm:$0xff]   ;;  %v13034_v19 = vld [vmem:[#allocation2 + $0x460] ss:$16 sps:$4 sm:$0xff]  }
 0x14f   :  { %2289 = vmatpush1.bf16.msra.mxu0 %v12941_v20  ;;  %2504 = vmatpush1.bf16.msra.mxu1 %v12944_v21  ;;  %v13037_v20 = vld [vmem:[#allocation2 + $0x468] ss:$16 sps:$4 sm:$0xff]   ;;  %v13042_v21 = vld [vmem:[#allocation2 + $0x484] ss:$16 sps:$4 sm:$0xff]  }
 0x150   :  { %2290 = vmatprep.subr.bf16.mxu0 %v12949_v22  ;;  %2505 = vmatprep.subr.bf16.mxu1 %v12952_v23  ;;  %v13045_v22 = vld [vmem:[#allocation2 + $0x48c] ss:$16 sps:$4 sm:$0xff]   ;;  %v13040_v23 = vld [vmem:[#allocation2 + $0x480] ss:$16 sps:$4 sm:$0xff]  }
 0x153   :  { %2291 = vmatpush1.bf16.msra.mxu0 %v12947_v24  ;;  %2506 = vmatpush1.bf16.msra.mxu1 %v12950_v25  ;;  %v13043_v24 = vld [vmem:[#allocation2 + $0x488] ss:$16 sps:$4 sm:$0xff]   ;;  %v13048_v25 = vld [vmem:[#allocation2 + $0x4a4] ss:$16 sps:$4 sm:$0xff]  }
 0x154   :  { %2292 = vmatprep.subr.bf16.mxu0 %v12955_v26  ;;  %2507 = vmatprep.subr.bf16.mxu1 %v12958_v27  ;;  %v13051_v26 = vld [vmem:[#allocation2 + $0x4ac] ss:$16 sps:$4 sm:$0xff]   ;;  %v13046_v27 = vld [vmem:[#allocation2 + $0x4a0] ss:$16 sps:$4 sm:$0xff]  }
 0x157   :  { %2293 = vmatpush1.bf16.msra.mxu0 %v12953_v28  ;;  %2508 = vmatpush1.bf16.msra.mxu1 %v12956_v29  ;;  %v13049_v28 = vld [vmem:[#allocation2 + $0x4a8] ss:$16 sps:$4 sm:$0xff]   ;;  %v13054_v29 = vld [vmem:[#allocation2 + $0x4c4] ss:$16 sps:$4 sm:$0xff]  }
 0x158   :  { %2294 = vmatprep.subr.bf16.mxu0 %v12961_v31  ;;  %2509 = vmatprep.subr.bf16.mxu1 %v12964_v32  ;;  %v13052_v31 = vld [vmem:[#allocation2 + $0x4c0] ss:$16 sps:$4 sm:$0xff]   ;;  %v13055_v32 = vld [vmem:[#allocation2 + $0x4c8] ss:$16 sps:$4 sm:$0xff]  }
 0x15b   :  { %2295 = vmatpush1.bf16.msra.mxu0 %v12959_v33  ;;  %2510 = vmatpush1.bf16.msra.mxu1 %v12962_v34  ;;  %v13060_v33 = vld [vmem:[#allocation2 + $0x4e4] ss:$16 sps:$4 sm:$0xff]   ;;  %v13063_v34 = vld [vmem:[#allocation2 + $0x4ec] ss:$16 sps:$4 sm:$0xff]  }
 0x15c   :  { %2296 = vmatprep.subr.bf16.mxu0 %v12967_v35  ;;  %2511 = vmatprep.subr.bf16.mxu1 %v12970_v36  ;;  %v13058_v35 = vld [vmem:[#allocation2 + $0x4e0] ss:$16 sps:$4 sm:$0xff]   ;;  %v13061_v36 = vld [vmem:[#allocation2 + $0x4e8] ss:$16 sps:$4 sm:$0xff]  }
 0x15f   :  { %2297 = vmatpush1.bf16.msra.mxu0 %v12965_v37  ;;  %2512 = vmatpush1.bf16.msra.mxu1 %v12968_v38  ;;  %v13066_v37 = vld [vmem:[#allocation2 + $0x504] ss:$16 sps:$4 sm:$0xff]   ;;  %v13069_v38 = vld [vmem:[#allocation2 + $0x50c] ss:$16 sps:$4 sm:$0xff]  }
 0x160   :  { %2298 = vmatprep.subr.bf16.mxu0 %v12973_v39  ;;  %2513 = vmatprep.subr.bf16.mxu1 %v12976_v40  ;;  %v13064_v39 = vld [vmem:[#allocation2 + $0x500] ss:$16 sps:$4 sm:$0xff]   ;;  %v13067_v40 = vld [vmem:[#allocation2 + $0x508] ss:$16 sps:$4 sm:$0xff]  }
 0x163   :  { %2299 = vmatpush1.bf16.msra.mxu0 %v12971_v41  ;;  %2514 = vmatpush1.bf16.msra.mxu1 %v12974_v42  ;;  %v13072_v41 = vld [vmem:[#allocation2 + $0x524] ss:$16 sps:$4 sm:$0xff]   ;;  %v13075_v42 = vld [vmem:[#allocation2 + $0x52c] ss:$16 sps:$4 sm:$0xff]  }
 0x164   :  { %2300 = vmatprep.subr.bf16.mxu0 %v12979_v43  ;;  %2515 = vmatprep.subr.bf16.mxu1 %v12982_v44  ;;  %v13070_v43 = vld [vmem:[#allocation2 + $0x520] ss:$16 sps:$4 sm:$0xff]   ;;  %v13073_v44 = vld [vmem:[#allocation2 + $0x528] ss:$16 sps:$4 sm:$0xff]  }
 0x167   :  { %2301 = vmatpush1.bf16.msra.mxu0 %v12977_v45  ;;  %2516 = vmatpush1.bf16.msra.mxu1 %v12980_v46  ;;  %v13078_v45 = vld [vmem:[#allocation2 + $0x544] ss:$16 sps:$4 sm:$0xff]   ;;  %v13081_v46 = vld [vmem:[#allocation2 + $0x54c] ss:$16 sps:$4 sm:$0xff]  }
 0x168   :  { %2302 = vmatprep.subr.bf16.mxu0 %v12985_v47  ;;  %2517 = vmatprep.subr.bf16.mxu1 %v12988_v48  ;;  %v13076_v47 = vld [vmem:[#allocation2 + $0x540] ss:$16 sps:$4 sm:$0xff]   ;;  %v13079_v48 = vld [vmem:[#allocation2 + $0x548] ss:$16 sps:$4 sm:$0xff]  }
 0x16b   :  { %2303 = vmatpush1.bf16.msra.mxu0 %v12983_v49  ;;  %2518 = vmatpush1.bf16.msra.mxu1 %v12986_v50  ;;  %v13084_v49 = vld [vmem:[#allocation2 + $0x564] ss:$16 sps:$4 sm:$0xff]   ;;  %v13087_v50 = vld [vmem:[#allocation2 + $0x56c] ss:$16 sps:$4 sm:$0xff]  }
 0x16c   :  { %2304 = vmatprep.subr.bf16.mxu0 %v12991_v51  ;;  %2519 = vmatprep.subr.bf16.mxu1 %v12994_v52  ;;  %v13082_v51 = vld [vmem:[#allocation2 + $0x560] ss:$16 sps:$4 sm:$0xff]   ;;  %v13085_v52 = vld [vmem:[#allocation2 + $0x568] ss:$16 sps:$4 sm:$0xff]  }
 0x16f   :  { %2305 = vmatpush1.bf16.msra.mxu0 %v12989_v53  ;;  %2520 = vmatpush1.bf16.msra.mxu1 %v12992_v54  ;;  %v13090_v53 = vld [vmem:[#allocation2 + $0x584] ss:$16 sps:$4 sm:$0xff]   ;;  %v13093_v54 = vld [vmem:[#allocation2 + $0x58c] ss:$16 sps:$4 sm:$0xff]  }
 0x170   :  { %2306 = vmatprep.subr.bf16.mxu0 %v12997_v55  ;;  %2521 = vmatprep.subr.bf16.mxu1 %v13000_v56  ;;  %v13088_v55 = vld [vmem:[#allocation2 + $0x580] ss:$16 sps:$4 sm:$0xff]   ;;  %v13091_v56 = vld [vmem:[#allocation2 + $0x588] ss:$16 sps:$4 sm:$0xff]  }
 0x173   :  { %2307 = vmatpush1.bf16.msra.mxu0 %v12995_v57  ;;  %2522 = vmatpush1.bf16.msra.mxu1 %v12998_v58  ;;  %v13096_v57 = vld [vmem:[#allocation2 + $0x5a4] ss:$16 sps:$4 sm:$0xff]   ;;  %v13099_v58 = vld [vmem:[#allocation2 + $0x5ac] ss:$16 sps:$4 sm:$0xff]  }
 0x174   :  { %2308 = vmatprep.subr.bf16.mxu0 %v13003_v59  ;;  %2523 = vmatprep.subr.bf16.mxu1 %v13006_v60  ;;  %v13094_v59 = vld [vmem:[#allocation2 + $0x5a0] ss:$16 sps:$4 sm:$0xff]   ;;  %v13097_v60 = vld [vmem:[#allocation2 + $0x5a8] ss:$16 sps:$4 sm:$0xff]  }
 0x177   :  { %2309 = vmatpush1.bf16.msra.mxu0 %v13001_v61  ;;  %2524 = vmatpush1.bf16.msra.mxu1 %v13004_v62  ;;  %v13102_v61 = vld [vmem:[#allocation2 + $0x5c4] ss:$16 sps:$4 sm:$0xff]   ;;  %v13105_v62 = vld [vmem:[#allocation2 + $0x5cc] ss:$16 sps:$4 sm:$0xff]  }
 0x178   :  { %2310 = vmatprep.subr.bf16.mxu0 %v13009_v63  ;;  %2525 = vmatprep.subr.bf16.mxu1 %v13012_v0  ;;  %v13100_v63 = vld [vmem:[#allocation2 + $0x5c0] ss:$16 sps:$4 sm:$0xff]   ;;  %v13103_v0 = vld [vmem:[#allocation2 + $0x5c8] ss:$16 sps:$4 sm:$0xff]  }
 0x17b   :  { %2311 = vmatpush1.bf16.msra.mxu0 %v13007_v1  ;;  %2526 = vmatpush1.bf16.msra.mxu1 %v13010_v2  ;;  %v13108_v1 = vld [vmem:[#allocation2 + $0x5e4] ss:$16 sps:$4 sm:$0xff]   ;;  %v13111_v2 = vld [vmem:[#allocation2 + $0x5ec] ss:$16 sps:$4 sm:$0xff]  }
 0x17c   :  { %2323 = vmatprep.subr.bf16.mxu0 %v13018_v3  ;;  %2538 = vmatprep.subr.bf16.mxu1 %v13021_v4  ;;  %v13106_v3 = vld [vmem:[#allocation2 + $0x5e0] ss:$16 sps:$4 sm:$0xff]   ;;  %v13109_v4 = vld [vmem:[#allocation2 + $0x5e8] ss:$16 sps:$4 sm:$0xff]  }
 0x17e   :  { %2313 = vmatmul.mubr.bf16.vlgmr.msra.gmra.mrb[0].mxu0 %v13013_v5  ;;  %2528 = vmatmul.mubr.bf16.vlgmr.msra.gmra.mrb[0].mxu1 %v13013_v5  ;;  %v13117_v5 = vld [vmem:[#allocation2 + $0x604] ss:$16 sps:$4 sm:$0xff]  }
 0x17f   :  { %2324 = vmatpush1.bf16.msra.mxu0 %v13016_v6  ;;  %2539 = vmatpush1.bf16.msra.mxu1 %v13019_v7  ;;  %v13120_v6 = vld [vmem:[#allocation2 + $0x60c] ss:$16 sps:$4 sm:$0xff]   ;;  %v13112_v7 = vld [vmem:[%s15961_s26 + $0x10] ss:$40 sps:$4 sm:$0xff]  }
 0x180   :  { %2325 = vmatprep.subr.bf16.mxu0 %v13024_v8  ;;  %2540 = vmatprep.subr.bf16.mxu1 %v13027_v9  ;;  %v13115_v8 = vld [vmem:[#allocation2 + $0x600] ss:$16 sps:$4 sm:$0xff]   ;;  %v13118_v9 = vld [vmem:[#allocation2 + $0x608] ss:$16 sps:$4 sm:$0xff]  }
 0x181   :  { %2355 = vmatprep.mubr.bf16.mxu0 %v13114_v12  ;;  %2570 = vmatprep.mubr.bf16.mxu1 %v13114_v12  ;;  %v13213_v12 = vld [vmem:[%s15961_s26 + $0x1c] ss:$40 sps:$4 sm:$0xff]  }
 0x183   :  { %2326 = vmatpush1.bf16.msra.mxu0 %v13022_v10  ;;  %2541 = vmatpush1.bf16.msra.mxu1 %v13025_v11  ;;  %v13123_v10 = vld [vmem:[#allocation2 + $0x624] ss:$16 sps:$4 sm:$0xff]   ;;  %v13126_v11 = vld [vmem:[#allocation2 + $0x62c] ss:$16 sps:$4 sm:$0xff]  }
 0x184   :  { %2327 = vmatprep.subr.bf16.mxu0 %v13030_v13  ;;  %2542 = vmatprep.subr.bf16.mxu1 %v13033_v14  ;;  %v13121_v13 = vld [vmem:[#allocation2 + $0x620] ss:$16 sps:$4 sm:$0xff]   ;;  %v13124_v14 = vld [vmem:[#allocation2 + $0x628] ss:$16 sps:$4 sm:$0xff]  }
 0x187   :  { %2328 = vmatpush1.bf16.msra.mxu0 %v13028_v15  ;;  %2543 = vmatpush1.bf16.msra.mxu1 %v13031_v16  ;;  %v13129_v15 = vld [vmem:[#allocation2 + $0x644] ss:$16 sps:$4 sm:$0xff]   ;;  %v13132_v16 = vld [vmem:[#allocation2 + $0x64c] ss:$16 sps:$4 sm:$0xff]  }
 0x188   :  { %2329 = vmatprep.subr.bf16.mxu0 %v13036_v17  ;;  %2544 = vmatprep.subr.bf16.mxu1 %v13039_v18  ;;  %v13127_v17 = vld [vmem:[#allocation2 + $0x640] ss:$16 sps:$4 sm:$0xff]   ;;  %v13130_v18 = vld [vmem:[#allocation2 + $0x648] ss:$16 sps:$4 sm:$0xff]  }
 0x18b   :  { %2330 = vmatpush1.bf16.msra.mxu0 %v13034_v19  ;;  %2545 = vmatpush1.bf16.msra.mxu1 %v13037_v20  ;;  %v13135_v19 = vld [vmem:[#allocation2 + $0x664] ss:$16 sps:$4 sm:$0xff]   ;;  %v13138_v20 = vld [vmem:[#allocation2 + $0x66c] ss:$16 sps:$4 sm:$0xff]  }
 0x18c   :  { %2331 = vmatprep.subr.bf16.mxu0 %v13042_v21  ;;  %2546 = vmatprep.subr.bf16.mxu1 %v13045_v22  ;;  %v13133_v21 = vld [vmem:[#allocation2 + $0x660] ss:$16 sps:$4 sm:$0xff]   ;;  %v13136_v22 = vld [vmem:[#allocation2 + $0x668] ss:$16 sps:$4 sm:$0xff]  }
 0x18f   :  { %2332 = vmatpush1.bf16.msra.mxu0 %v13040_v23  ;;  %2547 = vmatpush1.bf16.msra.mxu1 %v13043_v24  ;;  %v13141_v23 = vld [vmem:[#allocation2 + $0x684] ss:$16 sps:$4 sm:$0xff]   ;;  %v13144_v24 = vld [vmem:[#allocation2 + $0x68c] ss:$16 sps:$4 sm:$0xff]  }
 0x190   :  { %2333 = vmatprep.subr.bf16.mxu0 %v13048_v25  ;;  %2548 = vmatprep.subr.bf16.mxu1 %v13051_v26  ;;  %v13139_v25 = vld [vmem:[#allocation2 + $0x680] ss:$16 sps:$4 sm:$0xff]   ;;  %v13142_v26 = vld [vmem:[#allocation2 + $0x688] ss:$16 sps:$4 sm:$0xff]  }
 0x193   :  { %2334 = vmatpush1.bf16.msra.mxu0 %v13046_v27  ;;  %2549 = vmatpush1.bf16.msra.mxu1 %v13049_v28  ;;  %v13147_v27 = vld [vmem:[#allocation2 + $0x6a4] ss:$16 sps:$4 sm:$0xff]   ;;  %v13150_v28 = vld [vmem:[#allocation2 + $0x6ac] ss:$16 sps:$4 sm:$0xff]  }
 0x194   :  { %2335 = vmatprep.subr.bf16.mxu0 %v13054_v29  ;;  %2550 = vmatprep.subr.bf16.mxu1 %v13057_v30  ;;  %v13145_v29 = vld [vmem:[#allocation2 + $0x6a0] ss:$16 sps:$4 sm:$0xff]   ;;  %v13148_v30 = vld [vmem:[#allocation2 + $0x6a8] ss:$16 sps:$4 sm:$0xff]  }
 0x197   :  { %2336 = vmatpush1.bf16.msra.mxu0 %v13052_v31  ;;  %2551 = vmatpush1.bf16.msra.mxu1 %v13055_v32  ;;  %v13153_v31 = vld [vmem:[#allocation2 + $0x6c4] ss:$16 sps:$4 sm:$0xff]   ;;  %v13156_v32 = vld [vmem:[#allocation2 + $0x6cc] ss:$16 sps:$4 sm:$0xff]  }
 0x198   :  { %2337 = vmatprep.subr.bf16.mxu0 %v13060_v33  ;;  %2552 = vmatprep.subr.bf16.mxu1 %v13063_v34  ;;  %v13151_v33 = vld [vmem:[#allocation2 + $0x6c0] ss:$16 sps:$4 sm:$0xff]   ;;  %v13154_v34 = vld [vmem:[#allocation2 + $0x6c8] ss:$16 sps:$4 sm:$0xff]  }
 0x19b   :  { %2338 = vmatpush1.bf16.msra.mxu0 %v13058_v35  ;;  %2553 = vmatpush1.bf16.msra.mxu1 %v13061_v36  ;;  %v13159_v35 = vld [vmem:[#allocation2 + $0x6e4] ss:$16 sps:$4 sm:$0xff]   ;;  %v13162_v36 = vld [vmem:[#allocation2 + $0x6ec] ss:$16 sps:$4 sm:$0xff]  }
 0x19c   :  { %2339 = vmatprep.subr.bf16.mxu0 %v13066_v37  ;;  %2554 = vmatprep.subr.bf16.mxu1 %v13069_v38  ;;  %v13157_v37 = vld [vmem:[#allocation2 + $0x6e0] ss:$16 sps:$4 sm:$0xff]   ;;  %v13160_v38 = vld [vmem:[#allocation2 + $0x6e8] ss:$16 sps:$4 sm:$0xff]  }
 0x19f   :  { %2340 = vmatpush1.bf16.msra.mxu0 %v13064_v39  ;;  %2555 = vmatpush1.bf16.msra.mxu1 %v13067_v40  ;;  %v13165_v39 = vld [vmem:[#allocation2 + $0x704] ss:$16 sps:$4 sm:$0xff]   ;;  %v13168_v40 = vld [vmem:[#allocation2 + $0x70c] ss:$16 sps:$4 sm:$0xff]  }
 0x1a0   :  { %2341 = vmatprep.subr.bf16.mxu0 %v13072_v41  ;;  %2556 = vmatprep.subr.bf16.mxu1 %v13075_v42  ;;  %v13163_v41 = vld [vmem:[#allocation2 + $0x700] ss:$16 sps:$4 sm:$0xff]   ;;  %v13166_v42 = vld [vmem:[#allocation2 + $0x708] ss:$16 sps:$4 sm:$0xff]  }
 0x1a3   :  { %2342 = vmatpush1.bf16.msra.mxu0 %v13070_v43  ;;  %2557 = vmatpush1.bf16.msra.mxu1 %v13073_v44  ;;  %v13171_v43 = vld [vmem:[#allocation2 + $0x724] ss:$16 sps:$4 sm:$0xff]   ;;  %v13174_v44 = vld [vmem:[#allocation2 + $0x72c] ss:$16 sps:$4 sm:$0xff]  }
 0x1a4   :  { %2343 = vmatprep.subr.bf16.mxu0 %v13078_v45  ;;  %2558 = vmatprep.subr.bf16.mxu1 %v13081_v46  ;;  %v13169_v45 = vld [vmem:[#allocation2 + $0x720] ss:$16 sps:$4 sm:$0xff]   ;;  %v13172_v46 = vld [vmem:[#allocation2 + $0x728] ss:$16 sps:$4 sm:$0xff]  }
 0x1a7   :  { %2344 = vmatpush1.bf16.msra.mxu0 %v13076_v47  ;;  %2559 = vmatpush1.bf16.msra.mxu1 %v13079_v48  ;;  %v13177_v47 = vld [vmem:[#allocation2 + $0x744] ss:$16 sps:$4 sm:$0xff]   ;;  %v13180_v48 = vld [vmem:[#allocation2 + $0x74c] ss:$16 sps:$4 sm:$0xff]  }
 0x1a8   :  { %2345 = vmatprep.subr.bf16.mxu0 %v13084_v49  ;;  %2560 = vmatprep.subr.bf16.mxu1 %v13087_v50  ;;  %v13175_v49 = vld [vmem:[#allocation2 + $0x740] ss:$16 sps:$4 sm:$0xff]   ;;  %v13178_v50 = vld [vmem:[#allocation2 + $0x748] ss:$16 sps:$4 sm:$0xff]  }
 0x1ab   :  { %2346 = vmatpush1.bf16.msra.mxu0 %v13082_v51  ;;  %2561 = vmatpush1.bf16.msra.mxu1 %v13085_v52  ;;  %v13183_v51 = vld [vmem:[#allocation2 + $0x764] ss:$16 sps:$4 sm:$0xff]   ;;  %v13186_v52 = vld [vmem:[#allocation2 + $0x76c] ss:$16 sps:$4 sm:$0xff]  }
 0x1ac   :  { %2347 = vmatprep.subr.bf16.mxu0 %v13090_v53  ;;  %2562 = vmatprep.subr.bf16.mxu1 %v13093_v54  ;;  %v13181_v53 = vld [vmem:[#allocation2 + $0x760] ss:$16 sps:$4 sm:$0xff]   ;;  %v13184_v54 = vld [vmem:[#allocation2 + $0x768] ss:$16 sps:$4 sm:$0xff]  }
 0x1af   :  { %2348 = vmatpush1.bf16.msra.mxu0 %v13088_v55  ;;  %2563 = vmatpush1.bf16.msra.mxu1 %v13091_v56  ;;  %v13189_v55 = vld [vmem:[#allocation2 + $0x784] ss:$16 sps:$4 sm:$0xff]   ;;  %v13192_v56 = vld [vmem:[#allocation2 + $0x78c] ss:$16 sps:$4 sm:$0xff]  }
 0x1b0   :  { %2349 = vmatprep.subr.bf16.mxu0 %v13096_v57  ;;  %2564 = vmatprep.subr.bf16.mxu1 %v13099_v58  ;;  %v13187_v57 = vld [vmem:[#allocation2 + $0x780] ss:$16 sps:$4 sm:$0xff]   ;;  %v13190_v58 = vld [vmem:[#allocation2 + $0x788] ss:$16 sps:$4 sm:$0xff]  }
 0x1b3   :  { %2350 = vmatpush1.bf16.msra.mxu0 %v13094_v59  ;;  %2565 = vmatpush1.bf16.msra.mxu1 %v13097_v60  ;;  %v13195_v59 = vld [vmem:[#allocation2 + $0x7a4] ss:$16 sps:$4 sm:$0xff]   ;;  %v13198_v60 = vld [vmem:[#allocation2 + $0x7ac] ss:$16 sps:$4 sm:$0xff]  }
 0x1b4   :  { %2351 = vmatprep.subr.bf16.mxu0 %v13102_v61  ;;  %2566 = vmatprep.subr.bf16.mxu1 %v13105_v62  ;;  %v13193_v61 = vld [vmem:[#allocation2 + $0x7a0] ss:$16 sps:$4 sm:$0xff]   ;;  %v13196_v62 = vld [vmem:[#allocation2 + $0x7a8] ss:$16 sps:$4 sm:$0xff]  }
 0x1b7   :  { %2352 = vmatpush1.bf16.msra.mxu0 %v13100_v63  ;;  %2567 = vmatpush1.bf16.msra.mxu1 %v13103_v0  ;;  %v13201_v63 = vld [vmem:[#allocation2 + $0x7c4] ss:$16 sps:$4 sm:$0xff]   ;;  %v13204_v0 = vld [vmem:[#allocation2 + $0x7cc] ss:$16 sps:$4 sm:$0xff]  }
 0x1b8   :  { %2353 = vmatprep.subr.bf16.mxu0 %v13108_v1  ;;  %2568 = vmatprep.subr.bf16.mxu1 %v13111_v2  ;;  %v13199_v1 = vld [vmem:[#allocation2 + $0x7c0] ss:$16 sps:$4 sm:$0xff]   ;;  %v13202_v2 = vld [vmem:[#allocation2 + $0x7c8] ss:$16 sps:$4 sm:$0xff]  }
 0x1bb   :  { %2354 = vmatpush1.bf16.msra.mxu0 %v13106_v3  ;;  %2569 = vmatpush1.bf16.msra.mxu1 %v13109_v4  ;;  %v13207_v3 = vld [vmem:[#allocation2 + $0x7e4] ss:$16 sps:$4 sm:$0xff]   ;;  %v13210_v4 = vld [vmem:[#allocation2 + $0x7ec] ss:$16 sps:$4 sm:$0xff]  }
 0x1bc   :  { %2366 = vmatprep.subr.bf16.mxu0 %v13117_v5  ;;  %2581 = vmatprep.subr.bf16.mxu1 %v13120_v6  ;;  %v13205_v5 = vld [vmem:[#allocation2 + $0x7e0] ss:$16 sps:$4 sm:$0xff]   ;;  %v13208_v6 = vld [vmem:[#allocation2 + $0x7e8] ss:$16 sps:$4 sm:$0xff]  }
 0x1be   :  { %2356 = vmatmul.mubr.bf16.vlgmr.msra.gmra.mrb[0].mxu0 %v13112_v7  ;;  %2571 = vmatmul.mubr.bf16.vlgmr.msra.gmra.mrb[0].mxu1 %v13112_v7  ;;  %v13216_v7 = vld [vmem:[#allocation2 + $0x804] ss:$16 sps:$4 sm:$0xff]  }
 0x1bf   :  { %2367 = vmatpush1.bf16.msra.mxu0 %v13115_v8  ;;  %2582 = vmatpush1.bf16.msra.mxu1 %v13118_v9  ;;  %v13219_v8 = vld [vmem:[#allocation2 + $0x80c] ss:$16 sps:$4 sm:$0xff]   ;;  %v13211_v9 = vld [vmem:[%s15961_s26 + $0x18] ss:$40 sps:$4 sm:$0xff]  }
 0x1c0   :  { %2368 = vmatprep.subr.bf16.mxu0 %v13123_v10  ;;  %2583 = vmatprep.subr.bf16.mxu1 %v13126_v11  ;;  %v13214_v10 = vld [vmem:[#allocation2 + $0x800] ss:$16 sps:$4 sm:$0xff]   ;;  %v13217_v11 = vld [vmem:[#allocation2 + $0x808] ss:$16 sps:$4 sm:$0xff]  }
 0x1c1   :  { %2398 = vmatprep.mubr.bf16.mxu0 %v13213_v12  ;;  %2613 = vmatprep.mubr.bf16.mxu1 %v13213_v12  ;;  %v13222_v12 = vld [vmem:[#allocation2 + $0x824] ss:$16 sps:$4 sm:$0xff]  }
 0x1c3   :  { %2369 = vmatpush1.bf16.msra.mxu0 %v13121_v13  ;;  %2584 = vmatpush1.bf16.msra.mxu1 %v13124_v14  ;;  %v13225_v13 = vld [vmem:[#allocation2 + $0x82c] ss:$16 sps:$4 sm:$0xff]  }
 0x1c4   :  { %2370 = vmatprep.subr.bf16.mxu0 %v13129_v15  ;;  %2585 = vmatprep.subr.bf16.mxu1 %v13132_v16  ;;  %v13312_v14 = vld [vmem:[%s15961_s26 + $0x24] ss:$40 sps:$4 sm:$0xff]   ;;  %v13220_v15 = vld [vmem:[#allocation2 + $0x820] ss:$16 sps:$4 sm:$0xff]   ;;  %v13223_v16 = vld [vmem:[#allocation2 + $0x828] ss:$16 sps:$4 sm:$0xff]  }
 0x1c7   :  { %2371 = vmatpush1.bf16.msra.mxu0 %v13127_v17  ;;  %2586 = vmatpush1.bf16.msra.mxu1 %v13130_v18  ;;  %v13228_v17 = vld [vmem:[#allocation2 + $0x844] ss:$16 sps:$4 sm:$0xff]   ;;  %v13231_v18 = vld [vmem:[#allocation2 + $0x84c] ss:$16 sps:$4 sm:$0xff]  }
 0x1c8   :  { %2372 = vmatprep.subr.bf16.mxu0 %v13135_v19  ;;  %2587 = vmatprep.subr.bf16.mxu1 %v13138_v20  ;;  %v13226_v19 = vld [vmem:[#allocation2 + $0x840] ss:$16 sps:$4 sm:$0xff]   ;;  %v13229_v20 = vld [vmem:[#allocation2 + $0x848] ss:$16 sps:$4 sm:$0xff]  }
 0x1cb   :  { %2373 = vmatpush1.bf16.msra.mxu0 %v13133_v21  ;;  %2588 = vmatpush1.bf16.msra.mxu1 %v13136_v22  ;;  %v13234_v21 = vld [vmem:[#allocation2 + $0x864] ss:$16 sps:$4 sm:$0xff]   ;;  %v13237_v22 = vld [vmem:[#allocation2 + $0x86c] ss:$16 sps:$4 sm:$0xff]  }
 0x1cc   :  { %2374 = vmatprep.subr.bf16.mxu0 %v13141_v23  ;;  %2589 = vmatprep.subr.bf16.mxu1 %v13144_v24  ;;  %v13232_v23 = vld [vmem:[#allocation2 + $0x860] ss:$16 sps:$4 sm:$0xff]   ;;  %v13235_v24 = vld [vmem:[#allocation2 + $0x868] ss:$16 sps:$4 sm:$0xff]  }
 0x1cf   :  { %2375 = vmatpush1.bf16.msra.mxu0 %v13139_v25  ;;  %2590 = vmatpush1.bf16.msra.mxu1 %v13142_v26  ;;  %v13240_v25 = vld [vmem:[#allocation2 + $0x884] ss:$16 sps:$4 sm:$0xff]   ;;  %v13243_v26 = vld [vmem:[#allocation2 + $0x88c] ss:$16 sps:$4 sm:$0xff]  }
 0x1d0   :  { %2376 = vmatprep.subr.bf16.mxu0 %v13147_v27  ;;  %2591 = vmatprep.subr.bf16.mxu1 %v13150_v28  ;;  %v13238_v27 = vld [vmem:[#allocation2 + $0x880] ss:$16 sps:$4 sm:$0xff]   ;;  %v13241_v28 = vld [vmem:[#allocation2 + $0x888] ss:$16 sps:$4 sm:$0xff]  }
 0x1d3   :  { %2377 = vmatpush1.bf16.msra.mxu0 %v13145_v29  ;;  %2592 = vmatpush1.bf16.msra.mxu1 %v13148_v30  ;;  %v13246_v29 = vld [vmem:[#allocation2 + $0x8a4] ss:$16 sps:$4 sm:$0xff]   ;;  %v13249_v30 = vld [vmem:[#allocation2 + $0x8ac] ss:$16 sps:$4 sm:$0xff]  }
 0x1d4   :  { %2378 = vmatprep.subr.bf16.mxu0 %v13153_v31  ;;  %2593 = vmatprep.subr.bf16.mxu1 %v13156_v32  ;;  %v13244_v31 = vld [vmem:[#allocation2 + $0x8a0] ss:$16 sps:$4 sm:$0xff]   ;;  %v13247_v32 = vld [vmem:[#allocation2 + $0x8a8] ss:$16 sps:$4 sm:$0xff]  }
 0x1d7   :  { %2379 = vmatpush1.bf16.msra.mxu0 %v13151_v33  ;;  %2594 = vmatpush1.bf16.msra.mxu1 %v13154_v34  ;;  %v13252_v33 = vld [vmem:[#allocation2 + $0x8c4] ss:$16 sps:$4 sm:$0xff]   ;;  %v13255_v34 = vld [vmem:[#allocation2 + $0x8cc] ss:$16 sps:$4 sm:$0xff]  }
 0x1d8   :  { %2380 = vmatprep.subr.bf16.mxu0 %v13159_v35  ;;  %2595 = vmatprep.subr.bf16.mxu1 %v13162_v36  ;;  %v13250_v35 = vld [vmem:[#allocation2 + $0x8c0] ss:$16 sps:$4 sm:$0xff]   ;;  %v13253_v36 = vld [vmem:[#allocation2 + $0x8c8] ss:$16 sps:$4 sm:$0xff]  }
 0x1db   :  { %2381 = vmatpush1.bf16.msra.mxu0 %v13157_v37  ;;  %2596 = vmatpush1.bf16.msra.mxu1 %v13160_v38  ;;  %v13258_v37 = vld [vmem:[#allocation2 + $0x8e4] ss:$16 sps:$4 sm:$0xff]   ;;  %v13261_v38 = vld [vmem:[#allocation2 + $0x8ec] ss:$16 sps:$4 sm:$0xff]  }
 0x1dc   :  { %2382 = vmatprep.subr.bf16.mxu0 %v13165_v39  ;;  %2597 = vmatprep.subr.bf16.mxu1 %v13168_v40  ;;  %v13256_v39 = vld [vmem:[#allocation2 + $0x8e0] ss:$16 sps:$4 sm:$0xff]   ;;  %v13259_v40 = vld [vmem:[#allocation2 + $0x8e8] ss:$16 sps:$4 sm:$0xff]  }
 0x1df   :  { %2383 = vmatpush1.bf16.msra.mxu0 %v13163_v41  ;;  %2598 = vmatpush1.bf16.msra.mxu1 %v13166_v42  ;;  %v13264_v41 = vld [vmem:[#allocation2 + $0x904] ss:$16 sps:$4 sm:$0xff]   ;;  %v13267_v42 = vld [vmem:[#allocation2 + $0x90c] ss:$16 sps:$4 sm:$0xff]  }
 0x1e0   :  { %2384 = vmatprep.subr.bf16.mxu0 %v13171_v43  ;;  %2599 = vmatprep.subr.bf16.mxu1 %v13174_v44  ;;  %v13262_v43 = vld [vmem:[#allocation2 + $0x900] ss:$16 sps:$4 sm:$0xff]   ;;  %v13265_v44 = vld [vmem:[#allocation2 + $0x908] ss:$16 sps:$4 sm:$0xff]  }
 0x1e3   :  { %2385 = vmatpush1.bf16.msra.mxu0 %v13169_v45  ;;  %2600 = vmatpush1.bf16.msra.mxu1 %v13172_v46  ;;  %v13270_v45 = vld [vmem:[#allocation2 + $0x924] ss:$16 sps:$4 sm:$0xff]   ;;  %v13273_v46 = vld [vmem:[#allocation2 + $0x92c] ss:$16 sps:$4 sm:$0xff]  }
 0x1e4   :  { %2386 = vmatprep.subr.bf16.mxu0 %v13177_v47  ;;  %2601 = vmatprep.subr.bf16.mxu1 %v13180_v48  ;;  %v13268_v47 = vld [vmem:[#allocation2 + $0x920] ss:$16 sps:$4 sm:$0xff]   ;;  %v13271_v48 = vld [vmem:[#allocation2 + $0x928] ss:$16 sps:$4 sm:$0xff]  }
 0x1e7   :  { %2387 = vmatpush1.bf16.msra.mxu0 %v13175_v49  ;;  %2602 = vmatpush1.bf16.msra.mxu1 %v13178_v50  ;;  %v13276_v49 = vld [vmem:[#allocation2 + $0x944] ss:$16 sps:$4 sm:$0xff]   ;;  %v13279_v50 = vld [vmem:[#allocation2 + $0x94c] ss:$16 sps:$4 sm:$0xff]  }
 0x1e8   :  { %2388 = vmatprep.subr.bf16.mxu0 %v13183_v51  ;;  %2603 = vmatprep.subr.bf16.mxu1 %v13186_v52  ;;  %v13274_v51 = vld [vmem:[#allocation2 + $0x940] ss:$16 sps:$4 sm:$0xff]   ;;  %v13277_v52 = vld [vmem:[#allocation2 + $0x948] ss:$16 sps:$4 sm:$0xff]  }
 0x1eb   :  { %2389 = vmatpush1.bf16.msra.mxu0 %v13181_v53  ;;  %2604 = vmatpush1.bf16.msra.mxu1 %v13184_v54  ;;  %v13282_v53 = vld [vmem:[#allocation2 + $0x964] ss:$16 sps:$4 sm:$0xff]   ;;  %v13285_v54 = vld [vmem:[#allocation2 + $0x96c] ss:$16 sps:$4 sm:$0xff]  }
 0x1ec   :  { %2390 = vmatprep.subr.bf16.mxu0 %v13189_v55  ;;  %2605 = vmatprep.subr.bf16.mxu1 %v13192_v56  ;;  %v13280_v55 = vld [vmem:[#allocation2 + $0x960] ss:$16 sps:$4 sm:$0xff]   ;;  %v13283_v56 = vld [vmem:[#allocation2 + $0x968] ss:$16 sps:$4 sm:$0xff]  }
 0x1ef   :  { %2391 = vmatpush1.bf16.msra.mxu0 %v13187_v57  ;;  %2606 = vmatpush1.bf16.msra.mxu1 %v13190_v58  ;;  %v13288_v57 = vld [vmem:[#allocation2 + $0x984] ss:$16 sps:$4 sm:$0xff]   ;;  %v13291_v58 = vld [vmem:[#allocation2 + $0x98c] ss:$16 sps:$4 sm:$0xff]  }
 0x1f0   :  { %2392 = vmatprep.subr.bf16.mxu0 %v13195_v59  ;;  %2607 = vmatprep.subr.bf16.mxu1 %v13198_v60  ;;  %v13286_v59 = vld [vmem:[#allocation2 + $0x980] ss:$16 sps:$4 sm:$0xff]   ;;  %v13289_v60 = vld [vmem:[#allocation2 + $0x988] ss:$16 sps:$4 sm:$0xff]  }
 0x1f3   :  { %2393 = vmatpush1.bf16.msra.mxu0 %v13193_v61  ;;  %2608 = vmatpush1.bf16.msra.mxu1 %v13196_v62  ;;  %v13294_v61 = vld [vmem:[#allocation2 + $0x9a4] ss:$16 sps:$4 sm:$0xff]   ;;  %v13297_v62 = vld [vmem:[#allocation2 + $0x9ac] ss:$16 sps:$4 sm:$0xff]  }
 0x1f4   :  { %2394 = vmatprep.subr.bf16.mxu0 %v13201_v63  ;;  %2609 = vmatprep.subr.bf16.mxu1 %v13204_v0  ;;  %v13292_v63 = vld [vmem:[#allocation2 + $0x9a0] ss:$16 sps:$4 sm:$0xff]   ;;  %v13295_v0 = vld [vmem:[#allocation2 + $0x9a8] ss:$16 sps:$4 sm:$0xff]  }
 0x1f7   :  { %2395 = vmatpush1.bf16.msra.mxu0 %v13199_v1  ;;  %2610 = vmatpush1.bf16.msra.mxu1 %v13202_v2  ;;  %v13300_v1 = vld [vmem:[#allocation2 + $0x9c4] ss:$16 sps:$4 sm:$0xff]   ;;  %v13303_v2 = vld [vmem:[#allocation2 + $0x9cc] ss:$16 sps:$4 sm:$0xff]  }
 0x1f8   :  { %2396 = vmatprep.subr.bf16.mxu0 %v13207_v3  ;;  %2611 = vmatprep.subr.bf16.mxu1 %v13210_v4  ;;  %v13298_v3 = vld [vmem:[#allocation2 + $0x9c0] ss:$16 sps:$4 sm:$0xff]   ;;  %v13301_v4 = vld [vmem:[#allocation2 + $0x9c8] ss:$16 sps:$4 sm:$0xff]  }
 0x1fb   :  { %2397 = vmatpush1.bf16.msra.mxu0 %v13205_v5  ;;  %2612 = vmatpush1.bf16.msra.mxu1 %v13208_v6  ;;  %v13306_v5 = vld [vmem:[#allocation2 + $0x9e4] ss:$16 sps:$4 sm:$0xff]   ;;  %v13309_v6 = vld [vmem:[#allocation2 + $0x9ec] ss:$16 sps:$4 sm:$0xff]  }
 0x1fc   :  { %2409 = vmatprep.subr.bf16.mxu0 %v13216_v7  ;;  %2624 = vmatprep.subr.bf16.mxu1 %v13219_v8  ;;  %v13304_v7 = vld [vmem:[#allocation2 + $0x9e0] ss:$16 sps:$4 sm:$0xff]   ;;  %v13307_v8 = vld [vmem:[#allocation2 + $0x9e8] ss:$16 sps:$4 sm:$0xff]  }
 0x1fe   :  { %2399 = vmatmul.mubr.bf16.vlgmr.msra.gmra.mrb[0].mxu0 %v13211_v9  ;;  %2614 = vmatmul.mubr.bf16.vlgmr.msra.gmra.mrb[0].mxu1 %v13211_v9  ;;  %v13310_v9 = vld [vmem:[%s15961_s26 + $0x20] ss:$40 sps:$4 sm:$0xff]  }
 0x1ff   :  { %2410 = vmatpush1.bf16.msra.mxu0 %v13214_v10  ;;  %2625 = vmatpush1.bf16.msra.mxu1 %v13217_v11  ;;  %v13315_v10 = vld [vmem:[#allocation6 + $0x4] ss:$16 sps:$4 sm:$0xff]   ;;  %v13318_v11 = vld [vmem:[#allocation6 + $0xc] ss:$16 sps:$4 sm:$0xff]  }
 0x200   :  { %2411 = vmatprep.subr.bf16.mxu0 %v13222_v12  ;;  %2626 = vmatprep.subr.bf16.mxu1 %v13225_v13  ;;  %v13313_v12 = vld [vmem:[#allocation6] ss:$16 sps:$4 sm:$0xff]   ;;  %v13316_v13 = vld [vmem:[#allocation6 + $0x8] ss:$16 sps:$4 sm:$0xff]  }
 0x201   :  { %2441 = vmatprep.mubr.bf16.mxu0 %v13312_v14  ;;  %2656 = vmatprep.mubr.bf16.mxu1 %v13312_v14  ;;  %v13321_v14 = vld [vmem:[#allocation6 + $0x24] ss:$16 sps:$4 sm:$0xff]  }
 0x203   :  { %2412 = vmatpush1.bf16.msra.mxu0 %v13220_v15  ;;  %2627 = vmatpush1.bf16.msra.mxu1 %v13223_v16  ;;  %v13324_v15 = vld [vmem:[#allocation6 + $0x2c] ss:$16 sps:$4 sm:$0xff]   ;;  %v13411_v16 = vld [vmem:[%s15962_s8 + $0x4] ss:$40 sps:$4 sm:$0xff]  }
 0x204   :  { %2413 = vmatprep.subr.bf16.mxu0 %v13228_v17  ;;  %2628 = vmatprep.subr.bf16.mxu1 %v13231_v18  ;;  %v13319_v17 = vld [vmem:[#allocation6 + $0x20] ss:$16 sps:$4 sm:$0xff]   ;;  %v13322_v18 = vld [vmem:[#allocation6 + $0x28] ss:$16 sps:$4 sm:$0xff]  }
 0x207   :  { %2414 = vmatpush1.bf16.msra.mxu0 %v13226_v19  ;;  %2629 = vmatpush1.bf16.msra.mxu1 %v13229_v20  ;;  %v13327_v19 = vld [vmem:[#allocation6 + $0x44] ss:$16 sps:$4 sm:$0xff]   ;;  %v13330_v20 = vld [vmem:[#allocation6 + $0x4c] ss:$16 sps:$4 sm:$0xff]  }
 0x208   :  { %2415 = vmatprep.subr.bf16.mxu0 %v13234_v21  ;;  %2630 = vmatprep.subr.bf16.mxu1 %v13237_v22  ;;  %v13325_v21 = vld [vmem:[#allocation6 + $0x40] ss:$16 sps:$4 sm:$0xff]   ;;  %v13328_v22 = vld [vmem:[#allocation6 + $0x48] ss:$16 sps:$4 sm:$0xff]  }
 0x20b   :  { %2416 = vmatpush1.bf16.msra.mxu0 %v13232_v23  ;;  %2631 = vmatpush1.bf16.msra.mxu1 %v13235_v24  ;;  %v13333_v23 = vld [vmem:[#allocation6 + $0x64] ss:$16 sps:$4 sm:$0xff]   ;;  %v13336_v24 = vld [vmem:[#allocation6 + $0x6c] ss:$16 sps:$4 sm:$0xff]  }
 0x20c   :  { %2417 = vmatprep.subr.bf16.mxu0 %v13240_v25  ;;  %2632 = vmatprep.subr.bf16.mxu1 %v13243_v26  ;;  %v13331_v25 = vld [vmem:[#allocation6 + $0x60] ss:$16 sps:$4 sm:$0xff]   ;;  %v13334_v26 = vld [vmem:[#allocation6 + $0x68] ss:$16 sps:$4 sm:$0xff]  }
 0x20f   :  { %2418 = vmatpush1.bf16.msra.mxu0 %v13238_v27  ;;  %2633 = vmatpush1.bf16.msra.mxu1 %v13241_v28  ;;  %v13339_v27 = vld [vmem:[#allocation6 + $0x84] ss:$16 sps:$4 sm:$0xff]   ;;  %v13342_v28 = vld [vmem:[#allocation6 + $0x8c] ss:$16 sps:$4 sm:$0xff]  }
 0x210   :  { %2419 = vmatprep.subr.bf16.mxu0 %v13246_v29  ;;  %2634 = vmatprep.subr.bf16.mxu1 %v13249_v30  ;;  %v13337_v29 = vld [vmem:[#allocation6 + $0x80] ss:$16 sps:$4 sm:$0xff]   ;;  %v13340_v30 = vld [vmem:[#allocation6 + $0x88] ss:$16 sps:$4 sm:$0xff]  }
 0x213   :  { %2420 = vmatpush1.bf16.msra.mxu0 %v13244_v31  ;;  %2635 = vmatpush1.bf16.msra.mxu1 %v13247_v32  ;;  %v13345_v31 = vld [vmem:[#allocation6 + $0xa4] ss:$16 sps:$4 sm:$0xff]   ;;  %v13348_v32 = vld [vmem:[#allocation6 + $0xac] ss:$16 sps:$4 sm:$0xff]  }
 0x214   :  { %2421 = vmatprep.subr.bf16.mxu0 %v13252_v33  ;;  %2636 = vmatprep.subr.bf16.mxu1 %v13255_v34  ;;  %v13343_v33 = vld [vmem:[#allocation6 + $0xa0] ss:$16 sps:$4 sm:$0xff]   ;;  %v13346_v34 = vld [vmem:[#allocation6 + $0xa8] ss:$16 sps:$4 sm:$0xff]  }
 0x217   :  { %2422 = vmatpush1.bf16.msra.mxu0 %v13250_v35  ;;  %2637 = vmatpush1.bf16.msra.mxu1 %v13253_v36  ;;  %v13351_v35 = vld [vmem:[#allocation6 + $0xc4] ss:$16 sps:$4 sm:$0xff]   ;;  %v13354_v36 = vld [vmem:[#allocation6 + $0xcc] ss:$16 sps:$4 sm:$0xff]  }
 0x218   :  { %2423 = vmatprep.subr.bf16.mxu0 %v13258_v37  ;;  %2638 = vmatprep.subr.bf16.mxu1 %v13261_v38  ;;  %v13349_v37 = vld [vmem:[#allocation6 + $0xc0] ss:$16 sps:$4 sm:$0xff]   ;;  %v13352_v38 = vld [vmem:[#allocation6 + $0xc8] ss:$16 sps:$4 sm:$0xff]  }
 0x21b   :  { %2424 = vmatpush1.bf16.msra.mxu0 %v13256_v39  ;;  %2639 = vmatpush1.bf16.msra.mxu1 %v13259_v40  ;;  %v13357_v39 = vld [vmem:[#allocation6 + $0xe4] ss:$16 sps:$4 sm:$0xff]   ;;  %v13360_v40 = vld [vmem:[#allocation6 + $0xec] ss:$16 sps:$4 sm:$0xff]  }
 0x21c   :  { %2425 = vmatprep.subr.bf16.mxu0 %v13264_v41  ;;  %2640 = vmatprep.subr.bf16.mxu1 %v13267_v42  ;;  %v13355_v41 = vld [vmem:[#allocation6 + $0xe0] ss:$16 sps:$4 sm:$0xff]   ;;  %v13358_v42 = vld [vmem:[#allocation6 + $0xe8] ss:$16 sps:$4 sm:$0xff]  }
 0x21f   :  { %2426 = vmatpush1.bf16.msra.mxu0 %v13262_v43  ;;  %2641 = vmatpush1.bf16.msra.mxu1 %v13265_v44  ;;  %v13363_v43 = vld [vmem:[#allocation6 + $0x104] ss:$16 sps:$4 sm:$0xff]   ;;  %v13366_v44 = vld [vmem:[#allocation6 + $0x10c] ss:$16 sps:$4 sm:$0xff]  }
 0x220   :  { %2427 = vmatprep.subr.bf16.mxu0 %v13270_v45  ;;  %2642 = vmatprep.subr.bf16.mxu1 %v13273_v46  ;;  %v13361_v45 = vld [vmem:[#allocation6 + $0x100] ss:$16 sps:$4 sm:$0xff]   ;;  %v13364_v46 = vld [vmem:[#allocation6 + $0x108] ss:$16 sps:$4 sm:$0xff]  }
 0x223   :  { %2428 = vmatpush1.bf16.msra.mxu0 %v13268_v47  ;;  %2643 = vmatpush1.bf16.msra.mxu1 %v13271_v48  ;;  %v13369_v47 = vld [vmem:[#allocation6 + $0x124] ss:$16 sps:$4 sm:$0xff]   ;;  %v13372_v48 = vld [vmem:[#allocation6 + $0x12c] ss:$16 sps:$4 sm:$0xff]  }
 0x224   :  { %2429 = vmatprep.subr.bf16.mxu0 %v13276_v49  ;;  %2644 = vmatprep.subr.bf16.mxu1 %v13279_v50  ;;  %v13367_v49 = vld [vmem:[#allocation6 + $0x120] ss:$16 sps:$4 sm:$0xff]   ;;  %v13370_v50 = vld [vmem:[#allocation6 + $0x128] ss:$16 sps:$4 sm:$0xff]  }
 0x227   :  { %2430 = vmatpush1.bf16.msra.mxu0 %v13274_v51  ;;  %2645 = vmatpush1.bf16.msra.mxu1 %v13277_v52  ;;  %v13375_v51 = vld [vmem:[#allocation6 + $0x144] ss:$16 sps:$4 sm:$0xff]   ;;  %v13378_v52 = vld [vmem:[#allocation6 + $0x14c] ss:$16 sps:$4 sm:$0xff]  }
 0x228   :  { %2431 = vmatprep.subr.bf16.mxu0 %v13282_v53  ;;  %2646 = vmatprep.subr.bf16.mxu1 %v13285_v54  ;;  %v13373_v53 = vld [vmem:[#allocation6 + $0x140] ss:$16 sps:$4 sm:$0xff]   ;;  %v13376_v54 = vld [vmem:[#allocation6 + $0x148] ss:$16 sps:$4 sm:$0xff]  }
 0x22b   :  { %2432 = vmatpush1.bf16.msra.mxu0 %v13280_v55  ;;  %2647 = vmatpush1.bf16.msra.mxu1 %v13283_v56  ;;  %v13381_v55 = vld [vmem:[#allocation6 + $0x164] ss:$16 sps:$4 sm:$0xff]   ;;  %v13384_v56 = vld [vmem:[#allocation6 + $0x16c] ss:$16 sps:$4 sm:$0xff]  }
 0x22c   :  { %2433 = vmatprep.subr.bf16.mxu0 %v13288_v57  ;;  %2648 = vmatprep.subr.bf16.mxu1 %v13291_v58  ;;  %v13379_v57 = vld [vmem:[#allocation6 + $0x160] ss:$16 sps:$4 sm:$0xff]   ;;  %v13382_v58 = vld [vmem:[#allocation6 + $0x168] ss:$16 sps:$4 sm:$0xff]  }
 0x22f   :  { %2434 = vmatpush1.bf16.msra.mxu0 %v13286_v59  ;;  %2649 = vmatpush1.bf16.msra.mxu1 %v13289_v60  ;;  %v13387_v59 = vld [vmem:[#allocation6 + $0x184] ss:$16 sps:$4 sm:$0xff]   ;;  %v13390_v60 = vld [vmem:[#allocation6 + $0x18c] ss:$16 sps:$4 sm:$0xff]  }
 0x230   :  { %2435 = vmatprep.subr.bf16.mxu0 %v13294_v61  ;;  %2650 = vmatprep.subr.bf16.mxu1 %v13297_v62  ;;  %v13385_v61 = vld [vmem:[#allocation6 + $0x180] ss:$16 sps:$4 sm:$0xff]   ;;  %v13388_v62 = vld [vmem:[#allocation6 + $0x188] ss:$16 sps:$4 sm:$0xff]  }
 0x233   :  { %2436 = vmatpush1.bf16.msra.mxu0 %v13292_v63  ;;  %2651 = vmatpush1.bf16.msra.mxu1 %v13295_v0  ;;  %v13393_v63 = vld [vmem:[#allocation6 + $0x1a4] ss:$16 sps:$4 sm:$0xff]   ;;  %v13396_v0 = vld [vmem:[#allocation6 + $0x1ac] ss:$16 sps:$4 sm:$0xff]  }
 0x234   :  { %2437 = vmatprep.subr.bf16.mxu0 %v13300_v1  ;;  %2652 = vmatprep.subr.bf16.mxu1 %v13303_v2  ;;  %v13391_v1 = vld [vmem:[#allocation6 + $0x1a0] ss:$16 sps:$4 sm:$0xff]   ;;  %v13394_v2 = vld [vmem:[#allocation6 + $0x1a8] ss:$16 sps:$4 sm:$0xff]  }
 0x237   :  { %2438 = vmatpush1.bf16.msra.mxu0 %v13298_v3  ;;  %2653 = vmatpush1.bf16.msra.mxu1 %v13301_v4  ;;  %v13399_v3 = vld [vmem:[#allocation6 + $0x1c4] ss:$16 sps:$4 sm:$0xff]   ;;  %v13402_v4 = vld [vmem:[#allocation6 + $0x1cc] ss:$16 sps:$4 sm:$0xff]  }
 0x238   :  { %2439 = vmatprep.subr.bf16.mxu0 %v13306_v5  ;;  %2654 = vmatprep.subr.bf16.mxu1 %v13309_v6  ;;  %v13397_v5 = vld [vmem:[#allocation6 + $0x1c0] ss:$16 sps:$4 sm:$0xff]   ;;  %v13400_v6 = vld [vmem:[#allocation6 + $0x1c8] ss:$16 sps:$4 sm:$0xff]  }
 0x23b   :  { %2440 = vmatpush1.bf16.msra.mxu0 %v13304_v7  ;;  %2655 = vmatpush1.bf16.msra.mxu1 %v13307_v8  ;;  %v13405_v7 = vld [vmem:[#allocation6 + $0x1e4] ss:$16 sps:$4 sm:$0xff]   ;;  %v13408_v8 = vld [vmem:[#allocation6 + $0x1ec] ss:$16 sps:$4 sm:$0xff]  }
 0x23c   :  { %4725 = vmatprep.subr.bf16.mxu0 %v13315_v10  ;;  %4940 = vmatprep.subr.bf16.mxu1 %v13318_v11  ;;  %v13406_v10 = vld [vmem:[#allocation6 + $0x1e8] ss:$16 sps:$4 sm:$0xff]   ;;  %v13409_v11 = vld [vmem:[%s15962_s8] ss:$40 sps:$4 sm:$0xff]  }
 0x23e   :  { %2442 = vmatmul.mubr.bf16.vlgmr.msra.gmra.mrb[0].mxu0 %v13310_v9  ;;  %2657 = vmatmul.mubr.bf16.vlgmr.msra.gmra.mrb[0].mxu1 %v13310_v9  ;;  %v13403_v9 = vld [vmem:[#allocation6 + $0x1e0] ss:$16 sps:$4 sm:$0xff]  }
 0x23f   :  { %4726 = vmatpush1.bf16.msra.mxu0 %v13313_v12  ;;  %4941 = vmatpush1.bf16.msra.mxu1 %v13316_v13  ;;  %v13414_v12 = vld [vmem:[#allocation6 + $0x204] ss:$16 sps:$4 sm:$0xff]   ;;  %v13417_v13 = vld [vmem:[#allocation6 + $0x20c] ss:$16 sps:$4 sm:$0xff]  }
 0x240   :  { %4727 = vmatprep.subr.bf16.mxu0 %v13321_v14  ;;  %4942 = vmatprep.subr.bf16.mxu1 %v13324_v15  ;;  %v13412_v14 = vld [vmem:[#allocation6 + $0x200] ss:$16 sps:$4 sm:$0xff]   ;;  %v13415_v15 = vld [vmem:[#allocation6 + $0x208] ss:$16 sps:$4 sm:$0xff]  }
 0x241   :  { %4757 = vmatprep.mubr.bf16.mxu0 %v13411_v16  ;;  %4972 = vmatprep.mubr.bf16.mxu1 %v13411_v16  ;;  %v13420_v16 = vld [vmem:[#allocation6 + $0x224] ss:$16 sps:$4 sm:$0xff]  }
 0x243   :  { %4728 = vmatpush1.bf16.msra.mxu0 %v13319_v17  ;;  %4943 = vmatpush1.bf16.msra.mxu1 %v13322_v18  ;;  %v13423_v17 = vld [vmem:[#allocation6 + $0x22c] ss:$16 sps:$4 sm:$0xff]   ;;  %v13510_v18 = vld [vmem:[%s15962_s8 + $0xc] ss:$40 sps:$4 sm:$0xff]  }
 0x244   :  { %4729 = vmatprep.subr.bf16.mxu0 %v13327_v19  ;;  %4944 = vmatprep.subr.bf16.mxu1 %v13330_v20  ;;  %v13418_v19 = vld [vmem:[#allocation6 + $0x220] ss:$16 sps:$4 sm:$0xff]   ;;  %v13421_v20 = vld [vmem:[#allocation6 + $0x228] ss:$16 sps:$4 sm:$0xff]  }
 0x247   :  { %4730 = vmatpush1.bf16.msra.mxu0 %v13325_v21  ;;  %4945 = vmatpush1.bf16.msra.mxu1 %v13328_v22  ;;  %v13426_v21 = vld [vmem:[#allocation6 + $0x244] ss:$16 sps:$4 sm:$0xff]   ;;  %v13429_v22 = vld [vmem:[#allocation6 + $0x24c] ss:$16 sps:$4 sm:$0xff]  }
 0x248   :  { %4731 = vmatprep.subr.bf16.mxu0 %v13333_v23  ;;  %4946 = vmatprep.subr.bf16.mxu1 %v13336_v24  ;;  %v13424_v23 = vld [vmem:[#allocation6 + $0x240] ss:$16 sps:$4 sm:$0xff]   ;;  %v13427_v24 = vld [vmem:[#allocation6 + $0x248] ss:$16 sps:$4 sm:$0xff]  }
 0x24b   :  { %4732 = vmatpush1.bf16.msra.mxu0 %v13331_v25  ;;  %4947 = vmatpush1.bf16.msra.mxu1 %v13334_v26  ;;  %v13432_v25 = vld [vmem:[#allocation6 + $0x264] ss:$16 sps:$4 sm:$0xff]   ;;  %v13435_v26 = vld [vmem:[#allocation6 + $0x26c] ss:$16 sps:$4 sm:$0xff]  }
 0x24c   :  { %4733 = vmatprep.subr.bf16.mxu0 %v13339_v27  ;;  %4948 = vmatprep.subr.bf16.mxu1 %v13342_v28  ;;  %v13430_v27 = vld [vmem:[#allocation6 + $0x260] ss:$16 sps:$4 sm:$0xff]   ;;  %v13433_v28 = vld [vmem:[#allocation6 + $0x268] ss:$16 sps:$4 sm:$0xff]  }
 0x24f   :  { %4734 = vmatpush1.bf16.msra.mxu0 %v13337_v29  ;;  %4949 = vmatpush1.bf16.msra.mxu1 %v13340_v30  ;;  %v13438_v29 = vld [vmem:[#allocation6 + $0x284] ss:$16 sps:$4 sm:$0xff]   ;;  %v13441_v30 = vld [vmem:[#allocation6 + $0x28c] ss:$16 sps:$4 sm:$0xff]  }
 0x250   :  { %4735 = vmatprep.subr.bf16.mxu0 %v13345_v31  ;;  %4950 = vmatprep.subr.bf16.mxu1 %v13348_v32  ;;  %v13436_v31 = vld [vmem:[#allocation6 + $0x280] ss:$16 sps:$4 sm:$0xff]   ;;  %v13439_v32 = vld [vmem:[#allocation6 + $0x288] ss:$16 sps:$4 sm:$0xff]  }
 0x253   :  { %4736 = vmatpush1.bf16.msra.mxu0 %v13343_v33  ;;  %4951 = vmatpush1.bf16.msra.mxu1 %v13346_v34  ;;  %v13444_v33 = vld [vmem:[#allocation6 + $0x2a4] ss:$16 sps:$4 sm:$0xff]   ;;  %v13447_v34 = vld [vmem:[#allocation6 + $0x2ac] ss:$16 sps:$4 sm:$0xff]  }
 0x254   :  { %4737 = vmatprep.subr.bf16.mxu0 %v13351_v35  ;;  %4952 = vmatprep.subr.bf16.mxu1 %v13354_v36  ;;  %v13442_v35 = vld [vmem:[#allocation6 + $0x2a0] ss:$16 sps:$4 sm:$0xff]   ;;  %v13445_v36 = vld [vmem:[#allocation6 + $0x2a8] ss:$16 sps:$4 sm:$0xff]  }
 0x257   :  { %4738 = vmatpush1.bf16.msra.mxu0 %v13349_v37  ;;  %4953 = vmatpush1.bf16.msra.mxu1 %v13352_v38  ;;  %v13450_v37 = vld [vmem:[#allocation6 + $0x2c4] ss:$16 sps:$4 sm:$0xff]   ;;  %v13453_v38 = vld [vmem:[#allocation6 + $0x2cc] ss:$16 sps:$4 sm:$0xff]  }
 0x258   :  { %4739 = vmatprep.subr.bf16.mxu0 %v13357_v39  ;;  %4954 = vmatprep.subr.bf16.mxu1 %v13360_v40  ;;  %v13448_v39 = vld [vmem:[#allocation6 + $0x2c0] ss:$16 sps:$4 sm:$0xff]   ;;  %v13451_v40 = vld [vmem:[#allocation6 + $0x2c8] ss:$16 sps:$4 sm:$0xff]  }
 0x25b   :  { %4740 = vmatpush1.bf16.msra.mxu0 %v13355_v41  ;;  %4955 = vmatpush1.bf16.msra.mxu1 %v13358_v42  ;;  %v13456_v41 = vld [vmem:[#allocation6 + $0x2e4] ss:$16 sps:$4 sm:$0xff]   ;;  %v13459_v42 = vld [vmem:[#allocation6 + $0x2ec] ss:$16 sps:$4 sm:$0xff]  }
 0x25c   :  { %4741 = vmatprep.subr.bf16.mxu0 %v13363_v43  ;;  %4956 = vmatprep.subr.bf16.mxu1 %v13366_v44  ;;  %v13454_v43 = vld [vmem:[#allocation6 + $0x2e0] ss:$16 sps:$4 sm:$0xff]   ;;  %v13457_v44 = vld [vmem:[#allocation6 + $0x2e8] ss:$16 sps:$4 sm:$0xff]  }
 0x25f   :  { %4742 = vmatpush1.bf16.msra.mxu0 %v13361_v45  ;;  %4957 = vmatpush1.bf16.msra.mxu1 %v13364_v46  ;;  %v13462_v45 = vld [vmem:[#allocation6 + $0x304] ss:$16 sps:$4 sm:$0xff]   ;;  %v13465_v46 = vld [vmem:[#allocation6 + $0x30c] ss:$16 sps:$4 sm:$0xff]  }
 0x260   :  { %4743 = vmatprep.subr.bf16.mxu0 %v13369_v47  ;;  %4958 = vmatprep.subr.bf16.mxu1 %v13372_v48  ;;  %v13460_v47 = vld [vmem:[#allocation6 + $0x300] ss:$16 sps:$4 sm:$0xff]   ;;  %v13463_v48 = vld [vmem:[#allocation6 + $0x308] ss:$16 sps:$4 sm:$0xff]  }
 0x263   :  { %4744 = vmatpush1.bf16.msra.mxu0 %v13367_v49  ;;  %4959 = vmatpush1.bf16.msra.mxu1 %v13370_v50  ;;  %v13468_v49 = vld [vmem:[#allocation6 + $0x324] ss:$16 sps:$4 sm:$0xff]   ;;  %v13471_v50 = vld [vmem:[#allocation6 + $0x32c] ss:$16 sps:$4 sm:$0xff]  }
 0x264   :  { %4745 = vmatprep.subr.bf16.mxu0 %v13375_v51  ;;  %4960 = vmatprep.subr.bf16.mxu1 %v13378_v52  ;;  %v13466_v51 = vld [vmem:[#allocation6 + $0x320] ss:$16 sps:$4 sm:$0xff]   ;;  %v13469_v52 = vld [vmem:[#allocation6 + $0x328] ss:$16 sps:$4 sm:$0xff]  }
 0x267   :  { %4746 = vmatpush1.bf16.msra.mxu0 %v13373_v53  ;;  %4961 = vmatpush1.bf16.msra.mxu1 %v13376_v54  ;;  %v13474_v53 = vld [vmem:[#allocation6 + $0x344] ss:$16 sps:$4 sm:$0xff]   ;;  %v13477_v54 = vld [vmem:[#allocation6 + $0x34c] ss:$16 sps:$4 sm:$0xff]  }
 0x268   :  { %4747 = vmatprep.subr.bf16.mxu0 %v13381_v55  ;;  %4962 = vmatprep.subr.bf16.mxu1 %v13384_v56  ;;  %v13472_v55 = vld [vmem:[#allocation6 + $0x340] ss:$16 sps:$4 sm:$0xff]   ;;  %v13475_v56 = vld [vmem:[#allocation6 + $0x348] ss:$16 sps:$4 sm:$0xff]  }
 0x26b   :  { %4748 = vmatpush1.bf16.msra.mxu0 %v13379_v57  ;;  %4963 = vmatpush1.bf16.msra.mxu1 %v13382_v58  ;;  %v13480_v57 = vld [vmem:[#allocation6 + $0x364] ss:$16 sps:$4 sm:$0xff]   ;;  %v13483_v58 = vld [vmem:[#allocation6 + $0x36c] ss:$16 sps:$4 sm:$0xff]  }
 0x26c   :  { %4749 = vmatprep.subr.bf16.mxu0 %v13387_v59  ;;  %4964 = vmatprep.subr.bf16.mxu1 %v13390_v60  ;;  %v13478_v59 = vld [vmem:[#allocation6 + $0x360] ss:$16 sps:$4 sm:$0xff]   ;;  %v13481_v60 = vld [vmem:[#allocation6 + $0x368] ss:$16 sps:$4 sm:$0xff]  }
 0x26f   :  { %4750 = vmatpush1.bf16.msra.mxu0 %v13385_v61  ;;  %4965 = vmatpush1.bf16.msra.mxu1 %v13388_v62  ;;  %v13486_v61 = vld [vmem:[#allocation6 + $0x384] ss:$16 sps:$4 sm:$0xff]   ;;  %v13489_v62 = vld [vmem:[#allocation6 + $0x38c] ss:$16 sps:$4 sm:$0xff]  }
 0x270   :  { %4751 = vmatprep.subr.bf16.mxu0 %v13393_v63  ;;  %4966 = vmatprep.subr.bf16.mxu1 %v13396_v0  ;;  %v13484_v63 = vld [vmem:[#allocation6 + $0x380] ss:$16 sps:$4 sm:$0xff]   ;;  %v13487_v0 = vld [vmem:[#allocation6 + $0x388] ss:$16 sps:$4 sm:$0xff]  }
 0x273   :  { %4752 = vmatpush1.bf16.msra.mxu0 %v13391_v1  ;;  %4967 = vmatpush1.bf16.msra.mxu1 %v13394_v2  ;;  %v13492_v1 = vld [vmem:[#allocation6 + $0x3a4] ss:$16 sps:$4 sm:$0xff]   ;;  %v13495_v2 = vld [vmem:[#allocation6 + $0x3ac] ss:$16 sps:$4 sm:$0xff]  }
 0x274   :  { %4753 = vmatprep.subr.bf16.mxu0 %v13399_v3  ;;  %4968 = vmatprep.subr.bf16.mxu1 %v13402_v4  ;;  %v13490_v3 = vld [vmem:[#allocation6 + $0x3a0] ss:$16 sps:$4 sm:$0xff]   ;;  %v13493_v4 = vld [vmem:[#allocation6 + $0x3a8] ss:$16 sps:$4 sm:$0xff]  }
 0x277   :  { %4754 = vmatpush1.bf16.msra.mxu0 %v13397_v5  ;;  %4969 = vmatpush1.bf16.msra.mxu1 %v13400_v6  ;;  %v13498_v5 = vld [vmem:[#allocation6 + $0x3c4] ss:$16 sps:$4 sm:$0xff]   ;;  %v13501_v6 = vld [vmem:[#allocation6 + $0x3cc] ss:$16 sps:$4 sm:$0xff]  }
 0x278   :  { %4755 = vmatprep.subr.bf16.mxu0 %v13405_v7  ;;  %4970 = vmatprep.subr.bf16.mxu1 %v13408_v8  ;;  %v13496_v7 = vld [vmem:[#allocation6 + $0x3c0] ss:$16 sps:$4 sm:$0xff]   ;;  %v13499_v8 = vld [vmem:[#allocation6 + $0x3c8] ss:$16 sps:$4 sm:$0xff]  }
 0x27b   :  { %4756 = vmatpush1.bf16.msra.mxu0 %v13403_v9  ;;  %4971 = vmatpush1.bf16.msra.mxu1 %v13406_v10  ;;  %v13504_v9 = vld [vmem:[#allocation6 + $0x3e4] ss:$16 sps:$4 sm:$0xff]   ;;  %v13507_v10 = vld [vmem:[#allocation6 + $0x3ec] ss:$16 sps:$4 sm:$0xff]  }
 0x27c   :  { %4768 = vmatprep.subr.bf16.mxu0 %v13414_v12  ;;  %4983 = vmatprep.subr.bf16.mxu1 %v13417_v13  ;;  %v13505_v12 = vld [vmem:[#allocation6 + $0x3e8] ss:$16 sps:$4 sm:$0xff]   ;;  %v13508_v13 = vld [vmem:[%s15962_s8 + $0x8] ss:$40 sps:$4 sm:$0xff]  }
 0x27e   :  { %4758 = vmatmul.mubr.bf16.vlgmr.msra.gmra.mrb[4].mxu0 %v13409_v11  ;;  %4973 = vmatmul.mubr.bf16.vlgmr.msra.gmra.mrb[4].mxu1 %v13409_v11  ;;  %v13502_v11 = vld [vmem:[#allocation6 + $0x3e0] ss:$16 sps:$4 sm:$0xff]  }
 0x27f   :  { %4769 = vmatpush1.bf16.msra.mxu0 %v13412_v14  ;;  %4984 = vmatpush1.bf16.msra.mxu1 %v13415_v15  ;;  %v13513_v14 = vld [vmem:[#allocation6 + $0x404] ss:$16 sps:$4 sm:$0xff]   ;;  %v13516_v15 = vld [vmem:[#allocation6 + $0x40c] ss:$16 sps:$4 sm:$0xff]  }
 0x280   :  { %4770 = vmatprep.subr.bf16.mxu0 %v13420_v16  ;;  %4985 = vmatprep.subr.bf16.mxu1 %v13423_v17  ;;  %v13511_v16 = vld [vmem:[#allocation6 + $0x400] ss:$16 sps:$4 sm:$0xff]   ;;  %v13514_v17 = vld [vmem:[#allocation6 + $0x408] ss:$16 sps:$4 sm:$0xff]  }
 0x281   :  { %4800 = vmatprep.mubr.bf16.mxu0 %v13510_v18  ;;  %5015 = vmatprep.mubr.bf16.mxu1 %v13510_v18  ;;  %v13519_v18 = vld [vmem:[#allocation6 + $0x424] ss:$16 sps:$4 sm:$0xff]  }
 0x283   :  { %4771 = vmatpush1.bf16.msra.mxu0 %v13418_v19  ;;  %4986 = vmatpush1.bf16.msra.mxu1 %v13421_v20  ;;  %v13522_v19 = vld [vmem:[#allocation6 + $0x42c] ss:$16 sps:$4 sm:$0xff]   ;;  %v13609_v20 = vld [vmem:[%s15962_s8 + $0x14] ss:$40 sps:$4 sm:$0xff]  }
 0x284   :  { %4772 = vmatprep.subr.bf16.mxu0 %v13426_v21  ;;  %4987 = vmatprep.subr.bf16.mxu1 %v13429_v22  ;;  %v13517_v21 = vld [vmem:[#allocation6 + $0x420] ss:$16 sps:$4 sm:$0xff]   ;;  %v13520_v22 = vld [vmem:[#allocation6 + $0x428] ss:$16 sps:$4 sm:$0xff]  }
 0x287   :  { %4773 = vmatpush1.bf16.msra.mxu0 %v13424_v23  ;;  %4988 = vmatpush1.bf16.msra.mxu1 %v13427_v24  ;;  %v13525_v23 = vld [vmem:[#allocation6 + $0x444] ss:$16 sps:$4 sm:$0xff]   ;;  %v13528_v24 = vld [vmem:[#allocation6 + $0x44c] ss:$16 sps:$4 sm:$0xff]  }
 0x288   :  { %4774 = vmatprep.subr.bf16.mxu0 %v13432_v25  ;;  %4989 = vmatprep.subr.bf16.mxu1 %v13435_v26  ;;  %v13523_v25 = vld [vmem:[#allocation6 + $0x440] ss:$16 sps:$4 sm:$0xff]   ;;  %v13526_v26 = vld [vmem:[#allocation6 + $0x448] ss:$16 sps:$4 sm:$0xff]  }
 0x28b   :  { %4775 = vmatpush1.bf16.msra.mxu0 %v13430_v27  ;;  %4990 = vmatpush1.bf16.msra.mxu1 %v13433_v28  ;;  %v13531_v27 = vld [vmem:[#allocation6 + $0x464] ss:$16 sps:$4 sm:$0xff]   ;;  %v13534_v28 = vld [vmem:[#allocation6 + $0x46c] ss:$16 sps:$4 sm:$0xff]  }
 0x28c   :  { %4776 = vmatprep.subr.bf16.mxu0 %v13438_v29  ;;  %4991 = vmatprep.subr.bf16.mxu1 %v13441_v30  ;;  %v13529_v29 = vld [vmem:[#allocation6 + $0x460] ss:$16 sps:$4 sm:$0xff]   ;;  %v13532_v30 = vld [vmem:[#allocation6 + $0x468] ss:$16 sps:$4 sm:$0xff]  }
 0x28f   :  { %4777 = vmatpush1.bf16.msra.mxu0 %v13436_v31  ;;  %4992 = vmatpush1.bf16.msra.mxu1 %v13439_v32  ;;  %v13537_v31 = vld [vmem:[#allocation6 + $0x484] ss:$16 sps:$4 sm:$0xff]   ;;  %v13540_v32 = vld [vmem:[#allocation6 + $0x48c] ss:$16 sps:$4 sm:$0xff]  }
 0x290   :  { %4778 = vmatprep.subr.bf16.mxu0 %v13444_v33  ;;  %4993 = vmatprep.subr.bf16.mxu1 %v13447_v34  ;;  %v13535_v33 = vld [vmem:[#allocation6 + $0x480] ss:$16 sps:$4 sm:$0xff]   ;;  %v13538_v34 = vld [vmem:[#allocation6 + $0x488] ss:$16 sps:$4 sm:$0xff]  }
 0x293   :  { %4779 = vmatpush1.bf16.msra.mxu0 %v13442_v35  ;;  %4994 = vmatpush1.bf16.msra.mxu1 %v13445_v36  ;;  %v13543_v35 = vld [vmem:[#allocation6 + $0x4a4] ss:$16 sps:$4 sm:$0xff]   ;;  %v13546_v36 = vld [vmem:[#allocation6 + $0x4ac] ss:$16 sps:$4 sm:$0xff]  }
 0x294   :  { %4780 = vmatprep.subr.bf16.mxu0 %v13450_v37  ;;  %4995 = vmatprep.subr.bf16.mxu1 %v13453_v38  ;;  %v13541_v37 = vld [vmem:[#allocation6 + $0x4a0] ss:$16 sps:$4 sm:$0xff]   ;;  %v13544_v38 = vld [vmem:[#allocation6 + $0x4a8] ss:$16 sps:$4 sm:$0xff]  }
 0x297   :  { %4781 = vmatpush1.bf16.msra.mxu0 %v13448_v39  ;;  %4996 = vmatpush1.bf16.msra.mxu1 %v13451_v40  ;;  %v13549_v39 = vld [vmem:[#allocation6 + $0x4c4] ss:$16 sps:$4 sm:$0xff]   ;;  %v13552_v40 = vld [vmem:[#allocation6 + $0x4cc] ss:$16 sps:$4 sm:$0xff]  }
 0x298   :  { %4782 = vmatprep.subr.bf16.mxu0 %v13456_v41  ;;  %4997 = vmatprep.subr.bf16.mxu1 %v13459_v42  ;;  %v13547_v41 = vld [vmem:[#allocation6 + $0x4c0] ss:$16 sps:$4 sm:$0xff]   ;;  %v13550_v42 = vld [vmem:[#allocation6 + $0x4c8] ss:$16 sps:$4 sm:$0xff]  }
 0x29b   :  { %4783 = vmatpush1.bf16.msra.mxu0 %v13454_v43  ;;  %4998 = vmatpush1.bf16.msra.mxu1 %v13457_v44  ;;  %v13555_v43 = vld [vmem:[#allocation6 + $0x4e4] ss:$16 sps:$4 sm:$0xff]   ;;  %v13558_v44 = vld [vmem:[#allocation6 + $0x4ec] ss:$16 sps:$4 sm:$0xff]  }
 0x29c   :  { %4784 = vmatprep.subr.bf16.mxu0 %v13462_v45  ;;  %4999 = vmatprep.subr.bf16.mxu1 %v13465_v46  ;;  %v13553_v45 = vld [vmem:[#allocation6 + $0x4e0] ss:$16 sps:$4 sm:$0xff]   ;;  %v13556_v46 = vld [vmem:[#allocation6 + $0x4e8] ss:$16 sps:$4 sm:$0xff]  }
 0x29f   :  { %4785 = vmatpush1.bf16.msra.mxu0 %v13460_v47  ;;  %5000 = vmatpush1.bf16.msra.mxu1 %v13463_v48  ;;  %v13561_v47 = vld [vmem:[#allocation6 + $0x504] ss:$16 sps:$4 sm:$0xff]   ;;  %v13564_v48 = vld [vmem:[#allocation6 + $0x50c] ss:$16 sps:$4 sm:$0xff]  }
 0x2a0   :  { %4786 = vmatprep.subr.bf16.mxu0 %v13468_v49  ;;  %5001 = vmatprep.subr.bf16.mxu1 %v13471_v50  ;;  %v13559_v49 = vld [vmem:[#allocation6 + $0x500] ss:$16 sps:$4 sm:$0xff]   ;;  %v13562_v50 = vld [vmem:[#allocation6 + $0x508] ss:$16 sps:$4 sm:$0xff]  }
 0x2a3   :  { %4787 = vmatpush1.bf16.msra.mxu0 %v13466_v51  ;;  %5002 = vmatpush1.bf16.msra.mxu1 %v13469_v52  ;;  %v13567_v51 = vld [vmem:[#allocation6 + $0x524] ss:$16 sps:$4 sm:$0xff]   ;;  %v13570_v52 = vld [vmem:[#allocation6 + $0x52c] ss:$16 sps:$4 sm:$0xff]  }
 0x2a4   :  { %4788 = vmatprep.subr.bf16.mxu0 %v13474_v53  ;;  %5003 = vmatprep.subr.bf16.mxu1 %v13477_v54  ;;  %v13565_v53 = vld [vmem:[#allocation6 + $0x520] ss:$16 sps:$4 sm:$0xff]   ;;  %v13568_v54 = vld [vmem:[#allocation6 + $0x528] ss:$16 sps:$4 sm:$0xff]  }
 0x2a7   :  { %4789 = vmatpush1.bf16.msra.mxu0 %v13472_v55  ;;  %5004 = vmatpush1.bf16.msra.mxu1 %v13475_v56  ;;  %v13573_v55 = vld [vmem:[#allocation6 + $0x544] ss:$16 sps:$4 sm:$0xff]   ;;  %v13576_v56 = vld [vmem:[#allocation6 + $0x54c] ss:$16 sps:$4 sm:$0xff]  }
 0x2a8   :  { %4790 = vmatprep.subr.bf16.mxu0 %v13480_v57  ;;  %5005 = vmatprep.subr.bf16.mxu1 %v13483_v58  ;;  %v13571_v57 = vld [vmem:[#allocation6 + $0x540] ss:$16 sps:$4 sm:$0xff]   ;;  %v13574_v58 = vld [vmem:[#allocation6 + $0x548] ss:$16 sps:$4 sm:$0xff]  }
 0x2ab   :  { %4791 = vmatpush1.bf16.msra.mxu0 %v13478_v59  ;;  %5006 = vmatpush1.bf16.msra.mxu1 %v13481_v60  ;;  %v13579_v59 = vld [vmem:[#allocation6 + $0x564] ss:$16 sps:$4 sm:$0xff]   ;;  %v13582_v60 = vld [vmem:[#allocation6 + $0x56c] ss:$16 sps:$4 sm:$0xff]  }
 0x2ac   :  { %4792 = vmatprep.subr.bf16.mxu0 %v13486_v61  ;;  %5007 = vmatprep.subr.bf16.mxu1 %v13489_v62  ;;  %v13577_v61 = vld [vmem:[#allocation6 + $0x560] ss:$16 sps:$4 sm:$0xff]   ;;  %v13580_v62 = vld [vmem:[#allocation6 + $0x568] ss:$16 sps:$4 sm:$0xff]  }
 0x2af   :  { %4793 = vmatpush1.bf16.msra.mxu0 %v13484_v63  ;;  %5008 = vmatpush1.bf16.msra.mxu1 %v13487_v0  ;;  %v13585_v63 = vld [vmem:[#allocation6 + $0x584] ss:$16 sps:$4 sm:$0xff]   ;;  %v13588_v0 = vld [vmem:[#allocation6 + $0x58c] ss:$16 sps:$4 sm:$0xff]  }
 0x2b0   :  { %4794 = vmatprep.subr.bf16.mxu0 %v13492_v1  ;;  %5009 = vmatprep.subr.bf16.mxu1 %v13495_v2  ;;  %v13583_v1 = vld [vmem:[#allocation6 + $0x580] ss:$16 sps:$4 sm:$0xff]   ;;  %v13586_v2 = vld [vmem:[#allocation6 + $0x588] ss:$16 sps:$4 sm:$0xff]  }
 0x2b3   :  { %4795 = vmatpush1.bf16.msra.mxu0 %v13490_v3  ;;  %5010 = vmatpush1.bf16.msra.mxu1 %v13493_v4  ;;  %v13591_v3 = vld [vmem:[#allocation6 + $0x5a4] ss:$16 sps:$4 sm:$0xff]   ;;  %v13594_v4 = vld [vmem:[#allocation6 + $0x5ac] ss:$16 sps:$4 sm:$0xff]  }
 0x2b4   :  { %4796 = vmatprep.subr.bf16.mxu0 %v13498_v5  ;;  %5011 = vmatprep.subr.bf16.mxu1 %v13501_v6  ;;  %v13589_v5 = vld [vmem:[#allocation6 + $0x5a0] ss:$16 sps:$4 sm:$0xff]   ;;  %v13592_v6 = vld [vmem:[#allocation6 + $0x5a8] ss:$16 sps:$4 sm:$0xff]  }
 0x2b7   :  { %4797 = vmatpush1.bf16.msra.mxu0 %v13496_v7  ;;  %5012 = vmatpush1.bf16.msra.mxu1 %v13499_v8  ;;  %v13597_v7 = vld [vmem:[#allocation6 + $0x5c4] ss:$16 sps:$4 sm:$0xff]   ;;  %v13600_v8 = vld [vmem:[#allocation6 + $0x5cc] ss:$16 sps:$4 sm:$0xff]  }
 0x2b8   :  { %4798 = vmatprep.subr.bf16.mxu0 %v13504_v9  ;;  %5013 = vmatprep.subr.bf16.mxu1 %v13507_v10  ;;  %v13595_v9 = vld [vmem:[#allocation6 + $0x5c0] ss:$16 sps:$4 sm:$0xff]   ;;  %v13598_v10 = vld [vmem:[#allocation6 + $0x5c8] ss:$16 sps:$4 sm:$0xff]  }
 0x2bb   :  { %4799 = vmatpush1.bf16.msra.mxu0 %v13502_v11  ;;  %5014 = vmatpush1.bf16.msra.mxu1 %v13505_v12  ;;  %v13603_v11 = vld [vmem:[#allocation6 + $0x5e4] ss:$16 sps:$4 sm:$0xff]   ;;  %v13606_v12 = vld [vmem:[#allocation6 + $0x5ec] ss:$16 sps:$4 sm:$0xff]  }
 0x2bc   :  { %4811 = vmatprep.subr.bf16.mxu0 %v13513_v14  ;;  %5026 = vmatprep.subr.bf16.mxu1 %v13516_v15  ;;  %v13604_v14 = vld [vmem:[#allocation6 + $0x5e8] ss:$16 sps:$4 sm:$0xff]   ;;  %v13607_v15 = vld [vmem:[%s15962_s8 + $0x10] ss:$40 sps:$4 sm:$0xff]  }
 0x2be   :  { %4801 = vmatmul.mubr.bf16.vlgmr.msra.gmra.mrb[4].mxu0 %v13508_v13  ;;  %5016 = vmatmul.mubr.bf16.vlgmr.msra.gmra.mrb[4].mxu1 %v13508_v13  ;;  %v13601_v13 = vld [vmem:[#allocation6 + $0x5e0] ss:$16 sps:$4 sm:$0xff]  }
 0x2bf   :  { %4812 = vmatpush1.bf16.msra.mxu0 %v13511_v16  ;;  %5027 = vmatpush1.bf16.msra.mxu1 %v13514_v17  ;;  %v13612_v16 = vld [vmem:[#allocation6 + $0x604] ss:$16 sps:$4 sm:$0xff]   ;;  %v13615_v17 = vld [vmem:[#allocation6 + $0x60c] ss:$16 sps:$4 sm:$0xff]  }
 0x2c0   :  { %4813 = vmatprep.subr.bf16.mxu0 %v13519_v18  ;;  %5028 = vmatprep.subr.bf16.mxu1 %v13522_v19  ;;  %v13610_v18 = vld [vmem:[#allocation6 + $0x600] ss:$16 sps:$4 sm:$0xff]   ;;  %v13613_v19 = vld [vmem:[#allocation6 + $0x608] ss:$16 sps:$4 sm:$0xff]  }
 0x2c1   :  { %4843 = vmatprep.mubr.bf16.mxu0 %v13609_v20  ;;  %5058 = vmatprep.mubr.bf16.mxu1 %v13609_v20  ;;  %v13618_v20 = vld [vmem:[#allocation6 + $0x624] ss:$16 sps:$4 sm:$0xff]  }
 0x2c3   :  { %4814 = vmatpush1.bf16.msra.mxu0 %v13517_v21  ;;  %5029 = vmatpush1.bf16.msra.mxu1 %v13520_v22  ;;  %v13621_v21 = vld [vmem:[#allocation6 + $0x62c] ss:$16 sps:$4 sm:$0xff]   ;;  %v13708_v22 = vld [vmem:[%s15962_s8 + $0x1c] ss:$40 sps:$4 sm:$0xff]  }
 0x2c4   :  { %4815 = vmatprep.subr.bf16.mxu0 %v13525_v23  ;;  %5030 = vmatprep.subr.bf16.mxu1 %v13528_v24  ;;  %v13616_v23 = vld [vmem:[#allocation6 + $0x620] ss:$16 sps:$4 sm:$0xff]   ;;  %v13619_v24 = vld [vmem:[#allocation6 + $0x628] ss:$16 sps:$4 sm:$0xff]  }
 0x2c7   :  { %4816 = vmatpush1.bf16.msra.mxu0 %v13523_v25  ;;  %5031 = vmatpush1.bf16.msra.mxu1 %v13526_v26  ;;  %v13624_v25 = vld [vmem:[#allocation6 + $0x644] ss:$16 sps:$4 sm:$0xff]   ;;  %v13627_v26 = vld [vmem:[#allocation6 + $0x64c] ss:$16 sps:$4 sm:$0xff]  }
 0x2c8   :  { %4817 = vmatprep.subr.bf16.mxu0 %v13531_v27  ;;  %5032 = vmatprep.subr.bf16.mxu1 %v13534_v28  ;;  %v567_v27 = vlaneseq  ;;  %v13622_v28 = vld [vmem:[#allocation6 + $0x640] ss:$16 sps:$4 sm:$0xff]  }
 0x2cb   :  { %4818 = vmatpush1.bf16.msra.mxu0 %v13529_v29  ;;  %5033 = vmatpush1.bf16.msra.mxu1 %v13532_v30  ;;  %v13625_v29 = vld [vmem:[#allocation6 + $0x648] ss:$16 sps:$4 sm:$0xff]   ;;  %v13630_v30 = vld [vmem:[#allocation6 + $0x664] ss:$16 sps:$4 sm:$0xff]  }
 0x2cc   :  { %4819 = vmatprep.subr.bf16.mxu0 %v13537_v31  ;;  %5034 = vmatprep.subr.bf16.mxu1 %v13540_v32  ;;  %v13633_v31 = vld [vmem:[#allocation6 + $0x66c] ss:$16 sps:$4 sm:$0xff]   ;;  %v568_v32 = vshrl.u32 %v567_v27, 7  ;;  %v13667_v27 = vld [vmem:[#allocation6 + $0x728] ss:$16 sps:$4 sm:$0xff]  }
 0x2cf   :  { %4820 = vmatpush1.bf16.msra.mxu0 %v13535_v33  ;;  %5035 = vmatpush1.bf16.msra.mxu1 %v13538_v34  ;;  %v13628_v33 = vld [vmem:[#allocation6 + $0x660] ss:$16 sps:$4 sm:$0xff]   ;;  %v13631_v34 = vld [vmem:[#allocation6 + $0x668] ss:$16 sps:$4 sm:$0xff]  }
 0x2d0   :  { %4821 = vmatprep.subr.bf16.mxu0 %v13543_v35  ;;  %5036 = vmatprep.subr.bf16.mxu1 %v13546_v36  ;;  %v13636_v35 = vld [vmem:[#allocation6 + $0x684] ss:$16 sps:$4 sm:$0xff]   ;;  %v13639_v36 = vld [vmem:[#allocation6 + $0x68c] ss:$16 sps:$4 sm:$0xff]  }
 0x2d3   :  { %4822 = vmatpush1.bf16.msra.mxu0 %v13541_v37  ;;  %5037 = vmatpush1.bf16.msra.mxu1 %v13544_v38  ;;  %v13634_v37 = vld [vmem:[#allocation6 + $0x680] ss:$16 sps:$4 sm:$0xff]   ;;  %v13637_v38 = vld [vmem:[#allocation6 + $0x688] ss:$16 sps:$4 sm:$0xff]  }
 0x2d4   :  { %4823 = vmatprep.subr.bf16.mxu0 %v13549_v39  ;;  %5038 = vmatprep.subr.bf16.mxu1 %v13552_v40  ;;  %v15726_v39 = vsub.s32 0, %v568_v32  ;;  %v15728_v40 = vsub.s32 2, %v568_v32 }
 0x2d7   :  { %4824 = vmatpush1.bf16.msra.mxu0 %v13547_v41  ;;  %5039 = vmatpush1.bf16.msra.mxu1 %v13550_v42  ;;  %v565_v41 = vld [vmem:[#allocation4] sm:$0xf]  ;;  %v15730_v42 = vsub.s32 1, %v568_v32 }
 0x2d8   :  { %4825 = vmatprep.subr.bf16.mxu0 %v13555_v43  ;;  %5040 = vmatprep.subr.bf16.mxu1 %v13558_v44  ;;  %v15732_v43 = vsub.s32 3, %v568_v32  ;;  %v13642_v44 = vld [vmem:[#allocation6 + $0x6a4] ss:$16 sps:$4 sm:$0xff]  }
 0x2db   :  { %4826 = vmatpush1.bf16.msra.mxu0 %v13553_v45  ;;  %5041 = vmatpush1.bf16.msra.mxu1 %v13556_v46  ;;  %v13645_v45 = vld [vmem:[#allocation6 + $0x6ac] ss:$16 sps:$4 sm:$0xff]   ;;  %v570_v46 = vrot.slane %v565_v41, %v15726_v39 }
 0x2dc   :  { %4827 = vmatprep.subr.bf16.mxu0 %v13561_v47  ;;  %5042 = vmatprep.subr.bf16.mxu1 %v13564_v48  ;;  %v578_v47 = vrot.slane %v565_v41, %v15728_v40  ;;  %v574_v48 = vrot.slane %v565_v41, %v15730_v42 }
 0x2df   :  { %4828 = vmatpush1.bf16.msra.mxu0 %v13559_v49  ;;  %5043 = vmatpush1.bf16.msra.mxu1 %v13562_v50  ;;  %v582_v49 = vrot.slane %v565_v41, %v15732_v43  ;;  %v13640_v50 = vld [vmem:[#allocation6 + $0x6a0] ss:$16 sps:$4 sm:$0xff]  }
 0x2e0   :  { %4829 = vmatprep.subr.bf16.mxu0 %v13567_v51  ;;  %5044 = vmatprep.subr.bf16.mxu1 %v13570_v52  ;;  %v13643_v51 = vld [vmem:[#allocation6 + $0x6a8] ss:$16 sps:$4 sm:$0xff]   ;;  %v13648_v52 = vld [vmem:[#allocation6 + $0x6c4] ss:$16 sps:$4 sm:$0xff]  }
 0x2e3   :  { %4830 = vmatpush1.bf16.msra.mxu0 %v13565_v53  ;;  %5045 = vmatpush1.bf16.msra.mxu1 %v13568_v54  ;;  %v13651_v53 = vld [vmem:[#allocation6 + $0x6cc] ss:$16 sps:$4 sm:$0xff]  }
 0x2e4   :  { %4831 = vmatprep.subr.bf16.mxu0 %v13573_v55  ;;  %5046 = vmatprep.subr.bf16.mxu1 %v13576_v56  ;;  %v13646_v56 = vld [vmem:[#allocation6 + $0x6c0] ss:$16 sps:$4 sm:$0xff]  }
 0x2e7   :  { %4832 = vmatpush1.bf16.msra.mxu0 %v13571_v57  ;;  %5047 = vmatpush1.bf16.msra.mxu1 %v13574_v58  ;;  %v13649_v57 = vld [vmem:[#allocation6 + $0x6c8] ss:$16 sps:$4 sm:$0xff]  }
 0x2e8   :  { %4833 = vmatprep.subr.bf16.mxu0 %v13579_v59  ;;  %5048 = vmatprep.subr.bf16.mxu1 %v13582_v60 }
 0x2eb   :  { %4834 = vmatpush1.bf16.msra.mxu0 %v13577_v61  ;;  %5049 = vmatpush1.bf16.msra.mxu1 %v13580_v62 }
 0x2ec   :  { %4835 = vmatprep.subr.bf16.mxu0 %v13585_v63  ;;  %5050 = vmatprep.subr.bf16.mxu1 %v13588_v0 }
 0x2ef   :  { %4836 = vmatpush1.bf16.msra.mxu0 %v13583_v1  ;;  %5051 = vmatpush1.bf16.msra.mxu1 %v13586_v2  ;;  %v13654_v2 = vld [vmem:[#allocation6 + $0x6e4] ss:$16 sps:$4 sm:$0xff]  }
 0x2f0   :  { %4837 = vmatprep.subr.bf16.mxu0 %v13591_v3  ;;  %5052 = vmatprep.subr.bf16.mxu1 %v13594_v4  ;;  %v13657_v3 = vld [vmem:[#allocation6 + $0x6ec] ss:$16 sps:$4 sm:$0xff]  }
 0x2f3   :  { %4838 = vmatpush1.bf16.msra.mxu0 %v13589_v5  ;;  %5053 = vmatpush1.bf16.msra.mxu1 %v13592_v6 }
 0x2f4   :  { %4839 = vmatprep.subr.bf16.mxu0 %v13597_v7  ;;  %5054 = vmatprep.subr.bf16.mxu1 %v13600_v8 }
 0x2f7   :  { %4840 = vmatpush1.bf16.msra.mxu0 %v13595_v9  ;;  %5055 = vmatpush1.bf16.msra.mxu1 %v13598_v10 }
 0x2f8   :  { %4841 = vmatprep.subr.bf16.mxu0 %v13603_v11  ;;  %5056 = vmatprep.subr.bf16.mxu1 %v13606_v12 }
 0x2fb   :  { %4842 = vmatpush1.bf16.msra.mxu0 %v13601_v13  ;;  %5057 = vmatpush1.bf16.msra.mxu1 %v13604_v14 }
 0x2fc   :  { %4854 = vmatprep.subr.bf16.mxu0 %v13612_v16  ;;  %5069 = vmatprep.subr.bf16.mxu1 %v13615_v17  ;;  %v13652_v16 = vld [vmem:[#allocation6 + $0x6e0] ss:$16 sps:$4 sm:$0xff]   ;;  %v13655_v17 = vld [vmem:[#allocation6 + $0x6e8] ss:$16 sps:$4 sm:$0xff]  }
 0x2fe   :  { %4844 = vmatmul.mubr.bf16.vlgmr.msra.gmra.mrb[4].mxu0 %v13607_v15  ;;  %5059 = vmatmul.mubr.bf16.vlgmr.msra.gmra.mrb[4].mxu1 %v13607_v15 }
 0x2ff   :  { %4855 = vmatpush1.bf16.msra.mxu0 %v13610_v18  ;;  %5070 = vmatpush1.bf16.msra.mxu1 %v13613_v19  ;;  %v13660_v19 = vld [vmem:[#allocation6 + $0x704] ss:$16 sps:$4 sm:$0xff]  }
 0x300   :  { %4856 = vmatprep.subr.bf16.mxu0 %v13618_v20  ;;  %5071 = vmatprep.subr.bf16.mxu1 %v13621_v21  ;;  %v13663_v20 = vld [vmem:[#allocation6 + $0x70c] ss:$16 sps:$4 sm:$0xff]  }
 0x301   :  { %4886 = vmatprep.mubr.bf16.mxu0 %v13708_v22  ;;  %5101 = vmatprep.mubr.bf16.mxu1 %v13708_v22  ;;  %v13658_v22 = vld [vmem:[#allocation6 + $0x700] ss:$16 sps:$4 sm:$0xff]  }
 0x303   :  { %4857 = vmatpush1.bf16.msra.mxu0 %v13616_v23  ;;  %5072 = vmatpush1.bf16.msra.mxu1 %v13619_v24  ;;  %v13661_v23 = vld [vmem:[#allocation6 + $0x708] ss:$16 sps:$4 sm:$0xff]   ;;  %v13666_v24 = vld [vmem:[#allocation6 + $0x724] ss:$16 sps:$4 sm:$0xff]  }
 0x304   :  { %4858 = vmatprep.subr.bf16.mxu0 %v13624_v25  ;;  %5073 = vmatprep.subr.bf16.mxu1 %v13627_v26  ;;  %v13669_v25 = vld [vmem:[#allocation6 + $0x72c] ss:$16 sps:$4 sm:$0xff]   ;;  %v13664_v26 = vld [vmem:[#allocation6 + $0x720] ss:$16 sps:$4 sm:$0xff]  }
 0x307   :  { %4859 = vmatpush1.bf16.msra.mxu0 %v13622_v28  ;;  %5074 = vmatpush1.bf16.msra.mxu1 %v13625_v29  ;;  %v13672_v29 = vld [vmem:[#allocation6 + $0x744] ss:$16 sps:$4 sm:$0xff]  }
 0x308   :  { %4860 = vmatprep.subr.bf16.mxu0 %v13630_v30  ;;  %5075 = vmatprep.subr.bf16.mxu1 %v13633_v31  ;;  %v13675_v30 = vld [vmem:[#allocation6 + $0x74c] ss:$16 sps:$4 sm:$0xff]  }
 0x30b   :  { %4861 = vmatpush1.bf16.msra.mxu0 %v13628_v33  ;;  %5076 = vmatpush1.bf16.msra.mxu1 %v13631_v34 }
 0x30c   :  { %4862 = vmatprep.subr.bf16.mxu0 %v13636_v35  ;;  %5077 = vmatprep.subr.bf16.mxu1 %v13639_v36 }
 0x30f   :  { %4863 = vmatpush1.bf16.msra.mxu0 %v13634_v37  ;;  %5078 = vmatpush1.bf16.msra.mxu1 %v13637_v38  ;;  %v13670_v37 = vld [vmem:[#allocation6 + $0x740] ss:$16 sps:$4 sm:$0xff]   ;;  %v13673_v38 = vld [vmem:[#allocation6 + $0x748] ss:$16 sps:$4 sm:$0xff]  }
 0x310   :  { %4864 = vmatprep.subr.bf16.mxu0 %v13642_v44  ;;  %5079 = vmatprep.subr.bf16.mxu1 %v13645_v45  ;;  %v13678_v45 = vld [vmem:[#allocation6 + $0x764] ss:$16 sps:$4 sm:$0xff]  }
 0x311   :  { %v2443_v54 = vpop.f32.mrb[0].mxu0  ;;  %v2658_v55 = vpop.f32.mrb[0].mxu1 }
 0x312   :  { %v15738_v58 = vadd.f32 %v2443_v54, %v570_v46  ;;  %v15740_v59 = vadd.f32 %v2658_v55, %v578_v47  ;;  %v2445_v60 = vpop.f32.mrb[1].mxu0  ;;  %v2660_v61 = vpop.f32.mrb[1].mxu1  ;;  %v13679_v54 = vld [vmem:[#allocation6 + $0x768] ss:$16 sps:$4 sm:$0xff]  }
 0x313   :  { %v15742_v62 = vadd.f32 %v2445_v60, %v574_v48  ;;  %v15744_v63 = vadd.f32 %v2660_v61, %v582_v49  ;;  %v2447_v0 = vpop.f32.mrb[2].mxu0  ;;  %v2662_v1 = vpop.f32.mrb[2].mxu1  ;;  %4865 = vmatpush1.bf16.msra.mxu0 %v13640_v50  ;;  %5080 = vmatpush1.bf16.msra.mxu1 %v13643_v51  ;;  %v13682_v60 = vld [vmem:[#allocation6 + $0x780] ss:$16 sps:$4 sm:$0xff]   ;;  %v13685_v61 = vld [vmem:[#allocation6 + $0x788] ss:$16 sps:$4 sm:$0xff]  }
 0x314   :  { %v11445_v4 = vmul.f32 -1.442695, %v15738_v58  ;;  %v11447_v5 = vmul.f32 -1.442695, %v15740_v59  ;;  %v15748_v6 = vadd.f32 %v2447_v0, %v570_v46  ;;  %v15750_v7 = vadd.f32 %v2662_v1, %v578_v47  ;;  %v2449_v8 = vpop.f32.mrb[3].mxu0  ;;  %v2664_v9 = vpop.f32.mrb[3].mxu1  ;;  %4866 = vmatprep.subr.bf16.mxu0 %v13648_v52  ;;  %5081 = vmatprep.subr.bf16.mxu1 %v13651_v53 }
 0x315   :  { %v11446_v10 = vmul.f32 -1.442695, %v15742_v62  ;;  %v11448_v11 = vmul.f32 -1.442695, %v15744_v63  ;;  %v15754_v12 = vadd.f32 %v2449_v8, %v574_v48  ;;  %v15756_v13 = vadd.f32 %v2664_v9, %v582_v49  ;;  %v13681_v46 = vld [vmem:[#allocation6 + $0x76c] ss:$16 sps:$4 sm:$0xff]  }
 0x316   :  { %14919 = vpow2.f32 %v11445_v4  ;;  %v11449_v14 = vmul.f32 -1.442695, %v15748_v6  ;;  %v11451_v15 = vmul.f32 -1.442695, %v15750_v7  ;;  %v13676_v53 = vld [vmem:[#allocation6 + $0x760] ss:$16 sps:$4 sm:$0xff]  }
 0x317   :  { %14921 = vpow2.f32 %v11447_v5  ;;  %4867 = vmatpush1.bf16.msra.mxu0 %v13646_v56  ;;  %5082 = vmatpush1.bf16.msra.mxu1 %v13649_v57  ;;  %v11450_v18 = vmul.f32 -1.442695, %v15754_v12  ;;  %v11452_v21 = vmul.f32 -1.442695, %v15756_v13  ;;  %v13684_v56 = vld [vmem:[#allocation6 + $0x784] ss:$16 sps:$4 sm:$0xff]  }
 0x318   :  { %14923 = vpow2.f32 %v11446_v10  ;;  %4868 = vmatprep.subr.bf16.mxu0 %v13654_v2  ;;  %5083 = vmatprep.subr.bf16.mxu1 %v13657_v3  ;;  %v13687_v57 = vld [vmem:[#allocation6 + $0x78c] ss:$16 sps:$4 sm:$0xff]   ;;  %v13690_v0 = vld [vmem:[#allocation6 + $0x7a4] ss:$16 sps:$4 sm:$0xff]   ;;  %v13688_v5 = vld [vmem:[#allocation6 + $0x7a0] ss:$16 sps:$4 sm:$0xff]  }
 0x319   :  { %14925 = vpow2.f32 %v11448_v11  ;;  %v13693_v1 = vld [vmem:[#allocation6 + $0x7ac] ss:$16 sps:$4 sm:$0xff]   ;;  %v13691_v8 = vld [vmem:[#allocation6 + $0x7a8] ss:$16 sps:$4 sm:$0xff]   ;;  %v13696_v10 = vld [vmem:[#allocation6 + $0x7c4] ss:$16 sps:$4 sm:$0xff]  }
 0x31a   :  { %14927 = vpow2.f32 %v11449_v14  ;;  %v13699_v11 = vld [vmem:[#allocation6 + $0x7cc] ss:$16 sps:$4 sm:$0xff]  }
 0x31b   :  { %14929 = vpow2.f32 %v11451_v15  ;;  %4869 = vmatpush1.bf16.msra.mxu0 %v13652_v16  ;;  %5084 = vmatpush1.bf16.msra.mxu1 %v13655_v17 }
 0x31c   :  { %14931 = vpow2.f32 %v11450_v18  ;;  %4870 = vmatprep.subr.bf16.mxu0 %v13660_v19  ;;  %5085 = vmatprep.subr.bf16.mxu1 %v13663_v20 }
 0x31d   :  { %14933 = vpow2.f32 %v11452_v21  ;;  %v13694_v21 = vld [vmem:[#allocation6 + $0x7c0] ss:$16 sps:$4 sm:$0xff]  }
 0x31f   :  { %4871 = vmatpush1.bf16.msra.mxu0 %v13658_v22  ;;  %5086 = vmatpush1.bf16.msra.mxu1 %v13661_v23  ;;  %v13697_v22 = vld [vmem:[#allocation6 + $0x7c8] ss:$16 sps:$4 sm:$0xff]  }
 0x320   :  { %v14920_v28 = vpop.eup %14919  ;;  %4872 = vmatprep.subr.bf16.mxu0 %v13666_v24  ;;  %5087 = vmatprep.subr.bf16.mxu1 %v13669_v25 }
 0x321   :  { %v14922_v31 = vpop.eup %14921  ;;  %v2691_v32 = vadd.f32 1.0, %v14920_v28 }
 0x322   :  { %v14924_v33 = vpop.eup %14923  ;;  %v2693_v34 = vadd.f32 1.0, %v14922_v31  ;;  %v13711_v31 = vld [vmem:[#allocation6 + $0x804] ss:$16 sps:$4 sm:$0xff]  }
 0x323   :  { %v14926_v35 = vpop.eup %14925  ;;  %14935 = vrcp.f32 %v2691_v32  ;;  %v2692_v36 = vadd.f32 1.0, %v14924_v33  ;;  %4873 = vmatpush1.bf16.msra.mxu0 %v13664_v26  ;;  %5088 = vmatpush1.bf16.msra.mxu1 %v13667_v27  ;;  %v13709_v32 = vld [vmem:[#allocation6 + $0x800] ss:$16 sps:$4 sm:$0xff]   ;;  %v13717_v33 = vld [vmem:[#allocation6 + $0x824] ss:$16 sps:$4 sm:$0xff]  }
 0x324   :  { %v14928_v41 = vpop.eup %14927  ;;  %14937 = vrcp.f32 %v2693_v34  ;;  %v2694_v44 = vadd.f32 1.0, %v14926_v35  ;;  %4874 = vmatprep.subr.bf16.mxu0 %v13672_v29  ;;  %5089 = vmatprep.subr.bf16.mxu1 %v13675_v30  ;;  %v13700_v29 = vld [vmem:[#allocation6 + $0x7e0] ss:$16 sps:$4 sm:$0xff]   ;;  %v13720_v34 = vld [vmem:[#allocation6 + $0x82c] ss:$16 sps:$4 sm:$0xff]  }
 0x325   :  { %v14930_v47 = vpop.eup %14929  ;;  %14939 = vrcp.f32 %v2692_v36  ;;  %v2695_v48 = vadd.f32 1.0, %v14928_v41  ;;  %v13807_v35 = vld [vmem:[%s15962_s8 + $0x24] ss:$40 sps:$4 sm:$0xff]   ;;  %v13726_v41 = vld [vmem:[#allocation6 + $0x84c] ss:$16 sps:$4 sm:$0xff]  }
 0x326   :  { %v14932_v49 = vpop.eup %14931  ;;  %14941 = vrcp.f32 %v2694_v44  ;;  %v2697_v50 = vadd.f32 1.0, %v14930_v47  ;;  %v13715_v36 = vld [vmem:[#allocation6 + $0x820] ss:$16 sps:$4 sm:$0xff]   ;;  %v13732_v47 = vld [vmem:[#allocation6 + $0x86c] ss:$16 sps:$4 sm:$0xff]  }
 0x327   :  { %v14934_v51 = vpop.eup %14933  ;;  %14943 = vrcp.f32 %v2695_v48  ;;  %v2696_v52 = vadd.f32 1.0, %v14932_v49  ;;  %4875 = vmatpush1.bf16.msra.mxu0 %v13670_v37  ;;  %5090 = vmatpush1.bf16.msra.mxu1 %v13673_v38  ;;  %v13718_v37 = vld [vmem:[#allocation6 + $0x828] ss:$16 sps:$4 sm:$0xff]   ;;  %v13723_v38 = vld [vmem:[#allocation6 + $0x844] ss:$16 sps:$4 sm:$0xff]  }
 0x328   :  { %14945 = vrcp.f32 %v2697_v50  ;;  %v2698_v55 = vadd.f32 1.0, %v14934_v51  ;;  %4876 = vmatprep.subr.bf16.mxu0 %v13678_v45  ;;  %5091 = vmatprep.subr.bf16.mxu1 %v13681_v46  ;;  %v13721_v44 = vld [vmem:[#allocation6 + $0x840] ss:$16 sps:$4 sm:$0xff]   ;;  %v13724_v45 = vld [vmem:[#allocation6 + $0x848] ss:$16 sps:$4 sm:$0xff]  }
 0x329   :  { %14947 = vrcp.f32 %v2696_v52  ;;  %v13729_v46 = vld [vmem:[#allocation6 + $0x864] ss:$16 sps:$4 sm:$0xff]   ;;  %v13727_v48 = vld [vmem:[#allocation6 + $0x860] ss:$16 sps:$4 sm:$0xff]   ;;  %v13730_v49 = vld [vmem:[#allocation6 + $0x868] ss:$16 sps:$4 sm:$0xff]  }
 0x32a   :  { %14949 = vrcp.f32 %v2698_v55  ;;  %v13735_v50 = vld [vmem:[#allocation6 + $0x884] ss:$16 sps:$4 sm:$0xff]   ;;  %v13738_v51 = vld [vmem:[#allocation6 + $0x88c] ss:$16 sps:$4 sm:$0xff]   ;;  %v13733_v52 = vld [vmem:[#allocation6 + $0x880] ss:$16 sps:$4 sm:$0xff]  }
 0x32b   :  { %4877 = vmatpush1.bf16.msra.mxu0 %v13676_v53  ;;  %5092 = vmatpush1.bf16.msra.mxu1 %v13679_v54  ;;  %v13736_v53 = vld [vmem:[#allocation6 + $0x888] ss:$16 sps:$4 sm:$0xff]   ;;  %v13741_v54 = vld [vmem:[#allocation6 + $0x8a4] ss:$16 sps:$4 sm:$0xff]   ;;  %v13744_v55 = vld [vmem:[#allocation6 + $0x8ac] ss:$16 sps:$4 sm:$0xff]  }
 0x32c   :  { %4878 = vmatprep.subr.bf16.mxu0 %v13684_v56  ;;  %5093 = vmatprep.subr.bf16.mxu1 %v13687_v57  ;;  %v13739_v56 = vld [vmem:[#allocation6 + $0x8a0] ss:$16 sps:$4 sm:$0xff]   ;;  %v13742_v57 = vld [vmem:[#allocation6 + $0x8a8] ss:$16 sps:$4 sm:$0xff]  }
 0x32d   :  { %v14936_v2 = vpop.eup %14935 }
 0x32e   :  { %v14938_v3 = vpop.eup %14937  ;;  %v2715_v16 = vmul.f32 %v14936_v2, %v15738_v58  ;;  %v13702_v58 = vld [vmem:[#allocation6 + $0x7e4] ss:$16 sps:$4 sm:$0xff]  }
 0x32f   :  { %v14940_v4 = vpop.eup %14939  ;;  %4879 = vmatpush1.bf16.msra.mxu0 %v13682_v60  ;;  %5094 = vmatpush1.bf16.msra.mxu1 %v13685_v61  ;;  %v2717_v19 = vmul.f32 %v14938_v3, %v15740_v59  ;;  %v13747_v60 = vld [vmem:[#allocation6 + $0x8c4] ss:$16 sps:$4 sm:$0xff]   ;;  %v13750_v61 = vld [vmem:[#allocation6 + $0x8cc] ss:$16 sps:$4 sm:$0xff]  }
 0x330   :  { %v14942_v9 = vpop.eup %14941  ;;  %4880 = vmatprep.subr.bf16.mxu0 %v13690_v0  ;;  %5095 = vmatprep.subr.bf16.mxu1 %v13693_v1  ;;  %v2716_v24 = vmul.f32 %v14940_v4, %v15742_v62  ;;  %v13703_v62 = vld [vmem:[#allocation6 + $0x7e8] ss:$16 sps:$4 sm:$0xff]   ;;  %v13745_v0 = vld [vmem:[#allocation6 + $0x8c0] ss:$16 sps:$4 sm:$0xff]   ;;  %v13753_v2 = vld [vmem:[#allocation6 + $0x8e4] ss:$16 sps:$4 sm:$0xff]  }
 0x331   :  { %v14944_v14 = vpop.eup %14943  ;;  %v2718_v27 = vmul.f32 %v14942_v9, %v15744_v63  ;;  %v13714_v63 = vld [vmem:[#allocation6 + $0x80c] ss:$16 sps:$4 sm:$0xff]   ;;  %v13748_v1 = vld [vmem:[#allocation6 + $0x8c8] ss:$16 sps:$4 sm:$0xff]   ;;  %v13751_v4 = vld [vmem:[#allocation6 + $0x8e0] ss:$16 sps:$4 sm:$0xff]  }
 0x332   :  { %v14946_v15 = vpop.eup %14945  ;;  %v2719_v17 = vmul.f32 %v14944_v14, %v15748_v6  ;;  %v13705_v6 = vld [vmem:[#allocation6 + $0x7ec] ss:$16 sps:$4 sm:$0xff]   ;;  %v13765_v14 = vld [vmem:[#allocation6 + $0x924] ss:$16 sps:$4 sm:$0xff]  }
 0x333   :  { %v14948_v18 = vpop.eup %14947  ;;  %v2721_v20 = vmul.f32 %v14946_v15, %v15750_v7  ;;  %4881 = vmatpush1.bf16.msra.mxu0 %v13688_v5  ;;  %5096 = vmatpush1.bf16.msra.mxu1 %v13691_v8  ;;  %v13756_v3 = vld [vmem:[#allocation6 + $0x8ec] ss:$16 sps:$4 sm:$0xff]   ;;  %v13754_v5 = vld [vmem:[#allocation6 + $0x8e8] ss:$16 sps:$4 sm:$0xff]   ;;  %v13759_v8 = vld [vmem:[#allocation6 + $0x904] ss:$16 sps:$4 sm:$0xff]  }
 0x334   :  { %v14950_v23 = vpop.eup %14949  ;;  %v15767_v25 = vpack.c.bf16 %v2719_v17, %v2715_v16  ;;  %v2720_v26 = vmul.f32 %v14948_v18, %v15754_v12  ;;  %4882 = vmatprep.subr.bf16.mxu0 %v13696_v10  ;;  %5097 = vmatprep.subr.bf16.mxu1 %v13699_v11  ;;  %v13706_v12 = vld [vmem:[%s15962_s8 + $0x18] ss:$40 sps:$4 sm:$0xff]   ;;  %v13757_v10 = vld [vmem:[#allocation6 + $0x900] ss:$16 sps:$4 sm:$0xff]   ;;  %v13760_v11 = vld [vmem:[#allocation6 + $0x908] ss:$16 sps:$4 sm:$0xff]  }
 0x335   :  { %v15771_v59 = vpack.c.bf16 %v2721_v20, %v2717_v19  ;;  %v2722_v7 = vmul.f32 %v14950_v23, %v15756_v13  ;;  %v13712_v13 = vld [vmem:[#allocation6 + $0x808] ss:$16 sps:$4 sm:$0xff]   ;;  %v13762_v9 = vld [vmem:[#allocation6 + $0x90c] ss:$16 sps:$4 sm:$0xff]   ;;  %v13763_v16 = vld [vmem:[#allocation6 + $0x920] ss:$16 sps:$4 sm:$0xff]  }
 0x336   :  { %v15774_v28 = vpack.c.bf16 %v2720_v26, %v2716_v24  ;;  %v13768_v15 = vld [vmem:[#allocation6 + $0x92c] ss:$16 sps:$4 sm:$0xff]   ;;  %v13766_v17 = vld [vmem:[#allocation6 + $0x928] ss:$16 sps:$4 sm:$0xff]   ;;  %v13771_v18 = vld [vmem:[#allocation6 + $0x944] ss:$16 sps:$4 sm:$0xff]  }
 0x337   :  { %4883 = vmatpush1.bf16.msra.mxu0 %v13694_v21  ;;  %5098 = vmatpush1.bf16.msra.mxu1 %v13697_v22  ;;  %v15776_v30 = vpack.c.bf16 %v2722_v7, %v2718_v27  ;;  %v13774_v19 = vld [vmem:[#allocation6 + $0x94c] ss:$16 sps:$4 sm:$0xff]   ;;  %v13769_v20 = vld [vmem:[#allocation6 + $0x940] ss:$16 sps:$4 sm:$0xff]   ;;  %v13772_v21 = vld [vmem:[#allocation6 + $0x948] ss:$16 sps:$4 sm:$0xff]  }
 0x338   :  { %4884 = vmatprep.subr.bf16.mxu0 %v13702_v58  ;;  %5099 = vmatprep.subr.bf16.mxu1 %v13705_v6  ;;  %v13777_v22 = vld [vmem:[#allocation6 + $0x964] ss:$16 sps:$4 sm:$0xff]   ;;  %v13780_v23 = vld [vmem:[#allocation6 + $0x96c] ss:$16 sps:$4 sm:$0xff]   ;;  %v13775_v24 = vld [vmem:[#allocation6 + $0x960] ss:$16 sps:$4 sm:$0xff]  }
 0x339   :  { %v13778_v26 = vld [vmem:[#allocation6 + $0x968] ss:$16 sps:$4 sm:$0xff]   ;;  %v13783_v58 = vld [vmem:[#allocation6 + $0x984] ss:$16 sps:$4 sm:$0xff]   ;;  %v13786_v6 = vld [vmem:[#allocation6 + $0x98c] ss:$16 sps:$4 sm:$0xff]  }
 0x33a   :  { %v13781_v27 = vld [vmem:[#allocation6 + $0x980] ss:$16 sps:$4 sm:$0xff]   ;;  %v13784_v7 = vld [vmem:[#allocation6 + $0x988] ss:$16 sps:$4 sm:$0xff]  }
 0x33b   :  { %4885 = vmatpush1.bf16.msra.mxu0 %v13700_v29  ;;  %5100 = vmatpush1.bf16.msra.mxu1 %v13703_v62  ;;  %v13789_v29 = vld [vmem:[#allocation6 + $0x9a4] ss:$16 sps:$4 sm:$0xff]   ;;  %v13792_v62 = vld [vmem:[#allocation6 + $0x9ac] ss:$16 sps:$4 sm:$0xff]  }
 0x33c   :  { %4897 = vmatprep.subr.bf16.mxu0 %v13711_v31  ;;  %5112 = vmatprep.subr.bf16.mxu1 %v13714_v63  ;;  %v13790_v31 = vld [vmem:[#allocation6 + $0x9a8] ss:$16 sps:$4 sm:$0xff]   ;;  %v13795_v63 = vld [vmem:[#allocation6 + $0x9c4] ss:$16 sps:$4 sm:$0xff]  }
 0x33e   :  { %4887 = vmatmul.mubr.bf16.vlgmr.msra.gmra.mrb[4].mxu0 %v13706_v12  ;;  %5102 = vmatmul.mubr.bf16.vlgmr.msra.gmra.mrb[4].mxu1 %v13706_v12  ;;  %v13787_v12 = vld [vmem:[#allocation6 + $0x9a0] ss:$16 sps:$4 sm:$0xff]  }
 0x33f   :  { %4898 = vmatpush1.bf16.msra.mxu0 %v13709_v32  ;;  %5113 = vmatpush1.bf16.msra.mxu1 %v13712_v13  ;;  %v13798_v32 = vld [vmem:[#allocation6 + $0x9cc] ss:$16 sps:$4 sm:$0xff]   ;;  %v13793_v13 = vld [vmem:[#allocation6 + $0x9c0] ss:$16 sps:$4 sm:$0xff]  }
 0x340   :  { %4899 = vmatprep.subr.bf16.mxu0 %v13717_v33  ;;  %5114 = vmatprep.subr.bf16.mxu1 %v13720_v34  ;;  %v13796_v33 = vld [vmem:[#allocation6 + $0x9c8] ss:$16 sps:$4 sm:$0xff]   ;;  %v13801_v34 = vld [vmem:[#allocation6 + $0x9e4] ss:$16 sps:$4 sm:$0xff]  }
 0x341   :  { %4929 = vmatprep.mubr.bf16.mxu0 %v13807_v35  ;;  %5144 = vmatprep.mubr.bf16.mxu1 %v13807_v35  ;;  %v13804_v35 = vld [vmem:[#allocation6 + $0x9ec] ss:$16 sps:$4 sm:$0xff]  }
 0x343   :  { %4900 = vmatpush1.bf16.msra.mxu0 %v13715_v36  ;;  %5115 = vmatpush1.bf16.msra.mxu1 %v13718_v37  ;;  %v13799_v36 = vld [vmem:[#allocation6 + $0x9e0] ss:$16 sps:$4 sm:$0xff]   ;;  %v13802_v37 = vld [vmem:[#allocation6 + $0x9e8] ss:$16 sps:$4 sm:$0xff]  }
 0x344   :  { %4901 = vmatprep.subr.bf16.mxu0 %v13723_v38  ;;  %5116 = vmatprep.subr.bf16.mxu1 %v13726_v41  ;;  %v13805_v38 = vld [vmem:[%s15962_s8 + $0x20] ss:$40 sps:$4 sm:$0xff]   ;;  %v13810_v41 = vld [vmem:[#allocation9 + $0x4] ss:$16 sps:$4 sm:$0xff]  }
 0x347   :  { %4902 = vmatpush1.bf16.msra.mxu0 %v13721_v44  ;;  %5117 = vmatpush1.bf16.msra.mxu1 %v13724_v45  ;;  %v13813_v44 = vld [vmem:[#allocation9 + $0xc] ss:$16 sps:$4 sm:$0xff]   ;;  %v13808_v45 = vld [vmem:[#allocation9] ss:$16 sps:$4 sm:$0xff]  }
 0x348   :  { %4903 = vmatprep.subr.bf16.mxu0 %v13729_v46  ;;  %5118 = vmatprep.subr.bf16.mxu1 %v13732_v47  ;;  %v13811_v46 = vld [vmem:[#allocation9 + $0x8] ss:$16 sps:$4 sm:$0xff]   ;;  %v13816_v47 = vld [vmem:[#allocation9 + $0x24] ss:$16 sps:$4 sm:$0xff]  }
 0x34b   :  { %4904 = vmatpush1.bf16.msra.mxu0 %v13727_v48  ;;  %5119 = vmatpush1.bf16.msra.mxu1 %v13730_v49  ;;  %v13819_v48 = vld [vmem:[#allocation9 + $0x2c] ss:$16 sps:$4 sm:$0xff]  }
 0x34c   :  { %4905 = vmatprep.subr.bf16.mxu0 %v13735_v50  ;;  %5120 = vmatprep.subr.bf16.mxu1 %v13738_v51  ;;  %v13906_v49 = vld [vmem:[%s15941_s2 + $0x4] ss:$40 sps:$4 sm:$0xff]   ;;  %v13814_v50 = vld [vmem:[#allocation9 + $0x20] ss:$16 sps:$4 sm:$0xff]   ;;  %v13817_v51 = vld [vmem:[#allocation9 + $0x28] ss:$16 sps:$4 sm:$0xff]  }
 0x34f   :  { %4906 = vmatpush1.bf16.msra.mxu0 %v13733_v52  ;;  %5121 = vmatpush1.bf16.msra.mxu1 %v13736_v53  ;;  %v13822_v52 = vld [vmem:[#allocation9 + $0x44] ss:$16 sps:$4 sm:$0xff]   ;;  %v13825_v53 = vld [vmem:[#allocation9 + $0x4c] ss:$16 sps:$4 sm:$0xff]  }
 0x350   :  { %4907 = vmatprep.subr.bf16.mxu0 %v13741_v54  ;;  %5122 = vmatprep.subr.bf16.mxu1 %v13744_v55  ;;  %v13820_v54 = vld [vmem:[#allocation9 + $0x40] ss:$16 sps:$4 sm:$0xff]   ;;  %v13823_v55 = vld [vmem:[#allocation9 + $0x48] ss:$16 sps:$4 sm:$0xff]  }
 0x353   :  { %4908 = vmatpush1.bf16.msra.mxu0 %v13739_v56  ;;  %5123 = vmatpush1.bf16.msra.mxu1 %v13742_v57  ;;  %v13828_v56 = vld [vmem:[#allocation9 + $0x64] ss:$16 sps:$4 sm:$0xff]   ;;  %v13831_v57 = vld [vmem:[#allocation9 + $0x6c] ss:$16 sps:$4 sm:$0xff]  }
 0x354   :  { %4909 = vmatprep.subr.bf16.mxu0 %v13747_v60  ;;  %5124 = vmatprep.subr.bf16.mxu1 %v13750_v61  ;;  %v13826_v60 = vld [vmem:[#allocation9 + $0x60] ss:$16 sps:$4 sm:$0xff]   ;;  %v13829_v61 = vld [vmem:[#allocation9 + $0x68] ss:$16 sps:$4 sm:$0xff]  }
 0x357   :  { %4910 = vmatpush1.bf16.msra.mxu0 %v13745_v0  ;;  %5125 = vmatpush1.bf16.msra.mxu1 %v13748_v1  ;;  %v13834_v0 = vld [vmem:[#allocation9 + $0x84] ss:$16 sps:$4 sm:$0xff]   ;;  %v13837_v1 = vld [vmem:[#allocation9 + $0x8c] ss:$16 sps:$4 sm:$0xff]  }
 0x358   :  { %4911 = vmatprep.subr.bf16.mxu0 %v13753_v2  ;;  %5126 = vmatprep.subr.bf16.mxu1 %v13756_v3  ;;  %v13832_v2 = vld [vmem:[#allocation9 + $0x80] ss:$16 sps:$4 sm:$0xff]   ;;  %v13835_v3 = vld [vmem:[#allocation9 + $0x88] ss:$16 sps:$4 sm:$0xff]  }
 0x35b   :  { %4912 = vmatpush1.bf16.msra.mxu0 %v13751_v4  ;;  %5127 = vmatpush1.bf16.msra.mxu1 %v13754_v5  ;;  %v13840_v4 = vld [vmem:[#allocation9 + $0xa4] ss:$16 sps:$4 sm:$0xff]   ;;  %v13843_v5 = vld [vmem:[#allocation9 + $0xac] ss:$16 sps:$4 sm:$0xff]  }
 0x35c   :  { %4913 = vmatprep.subr.bf16.mxu0 %v13759_v8  ;;  %5128 = vmatprep.subr.bf16.mxu1 %v13762_v9  ;;  %v13838_v8 = vld [vmem:[#allocation9 + $0xa0] ss:$16 sps:$4 sm:$0xff]   ;;  %v13841_v9 = vld [vmem:[#allocation9 + $0xa8] ss:$16 sps:$4 sm:$0xff]  }
 0x35f   :  { %4914 = vmatpush1.bf16.msra.mxu0 %v13757_v10  ;;  %5129 = vmatpush1.bf16.msra.mxu1 %v13760_v11  ;;  %v13846_v10 = vld [vmem:[#allocation9 + $0xc4] ss:$16 sps:$4 sm:$0xff]   ;;  %v13849_v11 = vld [vmem:[#allocation9 + $0xcc] ss:$16 sps:$4 sm:$0xff]  }
 0x360   :  { %4915 = vmatprep.subr.bf16.mxu0 %v13765_v14  ;;  %5130 = vmatprep.subr.bf16.mxu1 %v13768_v15  ;;  %v13844_v14 = vld [vmem:[#allocation9 + $0xc0] ss:$16 sps:$4 sm:$0xff]   ;;  %v13847_v15 = vld [vmem:[#allocation9 + $0xc8] ss:$16 sps:$4 sm:$0xff]  }
 0x363   :  { %4916 = vmatpush1.bf16.msra.mxu0 %v13763_v16  ;;  %5131 = vmatpush1.bf16.msra.mxu1 %v13766_v17  ;;  %v13852_v16 = vld [vmem:[#allocation9 + $0xe4] ss:$16 sps:$4 sm:$0xff]   ;;  %v13855_v17 = vld [vmem:[#allocation9 + $0xec] ss:$16 sps:$4 sm:$0xff]  }
 0x364   :  { %4917 = vmatprep.subr.bf16.mxu0 %v13771_v18  ;;  %5132 = vmatprep.subr.bf16.mxu1 %v13774_v19  ;;  %v13850_v18 = vld [vmem:[#allocation9 + $0xe0] ss:$16 sps:$4 sm:$0xff]   ;;  %v13853_v19 = vld [vmem:[#allocation9 + $0xe8] ss:$16 sps:$4 sm:$0xff]  }
 0x367   :  { %4918 = vmatpush1.bf16.msra.mxu0 %v13769_v20  ;;  %5133 = vmatpush1.bf16.msra.mxu1 %v13772_v21  ;;  %v13858_v20 = vld [vmem:[#allocation9 + $0x104] ss:$16 sps:$4 sm:$0xff]   ;;  %v13861_v21 = vld [vmem:[#allocation9 + $0x10c] ss:$16 sps:$4 sm:$0xff]  }
 0x368   :  { %4919 = vmatprep.subr.bf16.mxu0 %v13777_v22  ;;  %5134 = vmatprep.subr.bf16.mxu1 %v13780_v23  ;;  %v13856_v22 = vld [vmem:[#allocation9 + $0x100] ss:$16 sps:$4 sm:$0xff]   ;;  %v13859_v23 = vld [vmem:[#allocation9 + $0x108] ss:$16 sps:$4 sm:$0xff]  }
 0x36b   :  { %4920 = vmatpush1.bf16.msra.mxu0 %v13775_v24  ;;  %5135 = vmatpush1.bf16.msra.mxu1 %v13778_v26  ;;  %v13864_v24 = vld [vmem:[#allocation9 + $0x124] ss:$16 sps:$4 sm:$0xff]   ;;  %v13867_v26 = vld [vmem:[#allocation9 + $0x12c] ss:$16 sps:$4 sm:$0xff]  }
 0x36c   :  { %4921 = vmatprep.subr.bf16.mxu0 %v13783_v58  ;;  %5136 = vmatprep.subr.bf16.mxu1 %v13786_v6  ;;  %v13862_v58 = vld [vmem:[#allocation9 + $0x120] ss:$16 sps:$4 sm:$0xff]   ;;  %v13865_v6 = vld [vmem:[#allocation9 + $0x128] ss:$16 sps:$4 sm:$0xff]  }
 0x36f   :  { %4922 = vmatpush1.bf16.msra.mxu0 %v13781_v27  ;;  %5137 = vmatpush1.bf16.msra.mxu1 %v13784_v7  ;;  %v13870_v27 = vld [vmem:[#allocation9 + $0x144] ss:$16 sps:$4 sm:$0xff]   ;;  %v13873_v7 = vld [vmem:[#allocation9 + $0x14c] ss:$16 sps:$4 sm:$0xff]  }
 0x370   :  { %4923 = vmatprep.subr.bf16.mxu0 %v13789_v29  ;;  %5138 = vmatprep.subr.bf16.mxu1 %v13792_v62  ;;  %v13868_v29 = vld [vmem:[#allocation9 + $0x140] ss:$16 sps:$4 sm:$0xff]   ;;  %v13871_v62 = vld [vmem:[#allocation9 + $0x148] ss:$16 sps:$4 sm:$0xff]  }
 0x373   :  { %4924 = vmatpush1.bf16.msra.mxu0 %v13787_v12  ;;  %5139 = vmatpush1.bf16.msra.mxu1 %v13790_v31  ;;  %v13876_v12 = vld [vmem:[#allocation9 + $0x164] ss:$16 sps:$4 sm:$0xff]   ;;  %v13879_v31 = vld [vmem:[#allocation9 + $0x16c] ss:$16 sps:$4 sm:$0xff]  }
 0x374   :  { %4925 = vmatprep.subr.bf16.mxu0 %v13795_v63  ;;  %5140 = vmatprep.subr.bf16.mxu1 %v13798_v32  ;;  %v13874_v63 = vld [vmem:[#allocation9 + $0x160] ss:$16 sps:$4 sm:$0xff]   ;;  %v13877_v32 = vld [vmem:[#allocation9 + $0x168] ss:$16 sps:$4 sm:$0xff]  }
 0x377   :  { %4926 = vmatpush1.bf16.msra.mxu0 %v13793_v13  ;;  %5141 = vmatpush1.bf16.msra.mxu1 %v13796_v33  ;;  %v13882_v13 = vld [vmem:[#allocation9 + $0x184] ss:$16 sps:$4 sm:$0xff]   ;;  %v13885_v33 = vld [vmem:[#allocation9 + $0x18c] ss:$16 sps:$4 sm:$0xff]  }
 0x378   :  { %4927 = vmatprep.subr.bf16.mxu0 %v13801_v34  ;;  %5142 = vmatprep.subr.bf16.mxu1 %v13804_v35  ;;  %v13880_v34 = vld [vmem:[#allocation9 + $0x180] ss:$16 sps:$4 sm:$0xff]   ;;  %v13883_v35 = vld [vmem:[#allocation9 + $0x188] ss:$16 sps:$4 sm:$0xff]  }
 0x37b   :  { %4928 = vmatpush1.bf16.msra.mxu0 %v13799_v36  ;;  %5143 = vmatpush1.bf16.msra.mxu1 %v13802_v37  ;;  %v13888_v36 = vld [vmem:[#allocation9 + $0x1a4] ss:$16 sps:$4 sm:$0xff]   ;;  %v13891_v37 = vld [vmem:[#allocation9 + $0x1ac] ss:$16 sps:$4 sm:$0xff]  }
 0x37c   :  { %7213 = vmatprep.subr.bf16.mxu0 %v13810_v41  ;;  %7428 = vmatprep.subr.bf16.mxu1 %v13813_v44  ;;  %v13889_v41 = vld [vmem:[#allocation9 + $0x1a8] ss:$16 sps:$4 sm:$0xff]   ;;  %v13894_v44 = vld [vmem:[#allocation9 + $0x1c4] ss:$16 sps:$4 sm:$0xff]  }
 0x37e   :  { %4930 = vmatmul.mubr.bf16.vlgmr.msra.gmra.mrb[4].mxu0 %v13805_v38  ;;  %5145 = vmatmul.mubr.bf16.vlgmr.msra.gmra.mrb[4].mxu1 %v13805_v38  ;;  %v13886_v38 = vld [vmem:[#allocation9 + $0x1a0] ss:$16 sps:$4 sm:$0xff]  }
 0x37f   :  { %7214 = vmatpush1.bf16.msra.mxu0 %v13808_v45  ;;  %7429 = vmatpush1.bf16.msra.mxu1 %v13811_v46  ;;  %v13897_v45 = vld [vmem:[#allocation9 + $0x1cc] ss:$16 sps:$4 sm:$0xff]   ;;  %v13892_v46 = vld [vmem:[#allocation9 + $0x1c0] ss:$16 sps:$4 sm:$0xff]  }
 0x380   :  { %7215 = vmatprep.subr.bf16.mxu0 %v13816_v47  ;;  %7430 = vmatprep.subr.bf16.mxu1 %v13819_v48  ;;  %v13895_v47 = vld [vmem:[#allocation9 + $0x1c8] ss:$16 sps:$4 sm:$0xff]   ;;  %v13900_v48 = vld [vmem:[#allocation9 + $0x1e4] ss:$16 sps:$4 sm:$0xff]  }
 0x381   :  { %7245 = vmatprep.mubr.bf16.mxu0 %v13906_v49  ;;  %7460 = vmatprep.mubr.bf16.mxu1 %v13906_v49  ;;  %v13903_v49 = vld [vmem:[#allocation9 + $0x1ec] ss:$16 sps:$4 sm:$0xff]  }
 0x383   :  { %7216 = vmatpush1.bf16.msra.mxu0 %v13814_v50  ;;  %7431 = vmatpush1.bf16.msra.mxu1 %v13817_v51  ;;  %v13898_v50 = vld [vmem:[#allocation9 + $0x1e0] ss:$16 sps:$4 sm:$0xff]   ;;  %v13901_v51 = vld [vmem:[#allocation9 + $0x1e8] ss:$16 sps:$4 sm:$0xff]  }
 0x384   :  { %7217 = vmatprep.subr.bf16.mxu0 %v13822_v52  ;;  %7432 = vmatprep.subr.bf16.mxu1 %v13825_v53  ;;  %v13904_v52 = vld [vmem:[%s15941_s2] ss:$40 sps:$4 sm:$0xff]   ;;  %v13909_v53 = vld [vmem:[#allocation9 + $0x204] ss:$16 sps:$4 sm:$0xff]  }
 0x387   :  { %7218 = vmatpush1.bf16.msra.mxu0 %v13820_v54  ;;  %7433 = vmatpush1.bf16.msra.mxu1 %v13823_v55  ;;  %v13912_v54 = vld [vmem:[#allocation9 + $0x20c] ss:$16 sps:$4 sm:$0xff]   ;;  %v13907_v55 = vld [vmem:[#allocation9 + $0x200] ss:$16 sps:$4 sm:$0xff]  }
 0x388   :  { %7219 = vmatprep.subr.bf16.mxu0 %v13828_v56  ;;  %7434 = vmatprep.subr.bf16.mxu1 %v13831_v57  ;;  %v13910_v56 = vld [vmem:[#allocation9 + $0x208] ss:$16 sps:$4 sm:$0xff]   ;;  %v13915_v57 = vld [vmem:[#allocation9 + $0x224] ss:$16 sps:$4 sm:$0xff]  }
 0x38b   :  { %7220 = vmatpush1.bf16.msra.mxu0 %v13826_v60  ;;  %7435 = vmatpush1.bf16.msra.mxu1 %v13829_v61  ;;  %v13918_v60 = vld [vmem:[#allocation9 + $0x22c] ss:$16 sps:$4 sm:$0xff]  }
 0x38c   :  { %7221 = vmatprep.subr.bf16.mxu0 %v13834_v0  ;;  %7436 = vmatprep.subr.bf16.mxu1 %v13837_v1  ;;  %v14005_v61 = vld [vmem:[%s15941_s2 + $0xc] ss:$40 sps:$4 sm:$0xff]   ;;  %v13913_v0 = vld [vmem:[#allocation9 + $0x220] ss:$16 sps:$4 sm:$0xff]   ;;  %v13916_v1 = vld [vmem:[#allocation9 + $0x228] ss:$16 sps:$4 sm:$0xff]  }
 0x38f   :  { %7222 = vmatpush1.bf16.msra.mxu0 %v13832_v2  ;;  %7437 = vmatpush1.bf16.msra.mxu1 %v13835_v3  ;;  %v13921_v2 = vld [vmem:[#allocation9 + $0x244] ss:$16 sps:$4 sm:$0xff]   ;;  %v13924_v3 = vld [vmem:[#allocation9 + $0x24c] ss:$16 sps:$4 sm:$0xff]  }
 0x390   :  { %7223 = vmatprep.subr.bf16.mxu0 %v13840_v4  ;;  %7438 = vmatprep.subr.bf16.mxu1 %v13843_v5  ;;  %v13919_v4 = vld [vmem:[#allocation9 + $0x240] ss:$16 sps:$4 sm:$0xff]   ;;  %v13922_v5 = vld [vmem:[#allocation9 + $0x248] ss:$16 sps:$4 sm:$0xff]  }
 0x393   :  { %7224 = vmatpush1.bf16.msra.mxu0 %v13838_v8  ;;  %7439 = vmatpush1.bf16.msra.mxu1 %v13841_v9  ;;  %v13927_v8 = vld [vmem:[#allocation9 + $0x264] ss:$16 sps:$4 sm:$0xff]   ;;  %v13930_v9 = vld [vmem:[#allocation9 + $0x26c] ss:$16 sps:$4 sm:$0xff]  }
 0x394   :  { %7225 = vmatprep.subr.bf16.mxu0 %v13846_v10  ;;  %7440 = vmatprep.subr.bf16.mxu1 %v13849_v11  ;;  %v13925_v10 = vld [vmem:[#allocation9 + $0x260] ss:$16 sps:$4 sm:$0xff]   ;;  %v13928_v11 = vld [vmem:[#allocation9 + $0x268] ss:$16 sps:$4 sm:$0xff]  }
 0x397   :  { %7226 = vmatpush1.bf16.msra.mxu0 %v13844_v14  ;;  %7441 = vmatpush1.bf16.msra.mxu1 %v13847_v15  ;;  %v13933_v14 = vld [vmem:[#allocation9 + $0x284] ss:$16 sps:$4 sm:$0xff]   ;;  %v13936_v15 = vld [vmem:[#allocation9 + $0x28c] ss:$16 sps:$4 sm:$0xff]  }
 0x398   :  { %7227 = vmatprep.subr.bf16.mxu0 %v13852_v16  ;;  %7442 = vmatprep.subr.bf16.mxu1 %v13855_v17  ;;  %v13931_v16 = vld [vmem:[#allocation9 + $0x280] ss:$16 sps:$4 sm:$0xff]   ;;  %v13934_v17 = vld [vmem:[#allocation9 + $0x288] ss:$16 sps:$4 sm:$0xff]  }
 0x39b   :  { %7228 = vmatpush1.bf16.msra.mxu0 %v13850_v18  ;;  %7443 = vmatpush1.bf16.msra.mxu1 %v13853_v19  ;;  %v13939_v18 = vld [vmem:[#allocation9 + $0x2a4] ss:$16 sps:$4 sm:$0xff]   ;;  %v13942_v19 = vld [vmem:[#allocation9 + $0x2ac] ss:$16 sps:$4 sm:$0xff]  }
 0x39c   :  { %7229 = vmatprep.subr.bf16.mxu0 %v13858_v20  ;;  %7444 = vmatprep.subr.bf16.mxu1 %v13861_v21  ;;  %v13937_v20 = vld [vmem:[#allocation9 + $0x2a0] ss:$16 sps:$4 sm:$0xff]   ;;  %v13940_v21 = vld [vmem:[#allocation9 + $0x2a8] ss:$16 sps:$4 sm:$0xff]  }
 0x39f   :  { %7230 = vmatpush1.bf16.msra.mxu0 %v13856_v22  ;;  %7445 = vmatpush1.bf16.msra.mxu1 %v13859_v23  ;;  %v13945_v22 = vld [vmem:[#allocation9 + $0x2c4] ss:$16 sps:$4 sm:$0xff]   ;;  %v13948_v23 = vld [vmem:[#allocation9 + $0x2cc] ss:$16 sps:$4 sm:$0xff]  }
 0x3a0   :  { %7231 = vmatprep.subr.bf16.mxu0 %v13864_v24  ;;  %7446 = vmatprep.subr.bf16.mxu1 %v13867_v26  ;;  %v13943_v24 = vld [vmem:[#allocation9 + $0x2c0] ss:$16 sps:$4 sm:$0xff]   ;;  %v13946_v26 = vld [vmem:[#allocation9 + $0x2c8] ss:$16 sps:$4 sm:$0xff]  }
 0x3a3   :  { %7232 = vmatpush1.bf16.msra.mxu0 %v13862_v58  ;;  %7447 = vmatpush1.bf16.msra.mxu1 %v13865_v6  ;;  %v13951_v58 = vld [vmem:[#allocation9 + $0x2e4] ss:$16 sps:$4 sm:$0xff]   ;;  %v13954_v6 = vld [vmem:[#allocation9 + $0x2ec] ss:$16 sps:$4 sm:$0xff]  }
 0x3a4   :  { %7233 = vmatprep.subr.bf16.mxu0 %v13870_v27  ;;  %7448 = vmatprep.subr.bf16.mxu1 %v13873_v7  ;;  %v13949_v27 = vld [vmem:[#allocation9 + $0x2e0] ss:$16 sps:$4 sm:$0xff]   ;;  %v13952_v7 = vld [vmem:[#allocation9 + $0x2e8] ss:$16 sps:$4 sm:$0xff]  }
 0x3a7   :  { %7234 = vmatpush1.bf16.msra.mxu0 %v13868_v29  ;;  %7449 = vmatpush1.bf16.msra.mxu1 %v13871_v62  ;;  %v13957_v29 = vld [vmem:[#allocation9 + $0x304] ss:$16 sps:$4 sm:$0xff]   ;;  %v13960_v62 = vld [vmem:[#allocation9 + $0x30c] ss:$16 sps:$4 sm:$0xff]  }
 0x3a8   :  { %7235 = vmatprep.subr.bf16.mxu0 %v13876_v12  ;;  %7450 = vmatprep.subr.bf16.mxu1 %v13879_v31  ;;  %v13955_v12 = vld [vmem:[#allocation9 + $0x300] ss:$16 sps:$4 sm:$0xff]   ;;  %v13958_v31 = vld [vmem:[#allocation9 + $0x308] ss:$16 sps:$4 sm:$0xff]  }
 0x3ab   :  { %7236 = vmatpush1.bf16.msra.mxu0 %v13874_v63  ;;  %7451 = vmatpush1.bf16.msra.mxu1 %v13877_v32  ;;  %v13963_v63 = vld [vmem:[#allocation9 + $0x324] ss:$16 sps:$4 sm:$0xff]   ;;  %v13966_v32 = vld [vmem:[#allocation9 + $0x32c] ss:$16 sps:$4 sm:$0xff]  }
 0x3ac   :  { %7237 = vmatprep.subr.bf16.mxu0 %v13882_v13  ;;  %7452 = vmatprep.subr.bf16.mxu1 %v13885_v33  ;;  %v13961_v13 = vld [vmem:[#allocation9 + $0x320] ss:$16 sps:$4 sm:$0xff]   ;;  %v13964_v33 = vld [vmem:[#allocation9 + $0x328] ss:$16 sps:$4 sm:$0xff]  }
 0x3af   :  { %7238 = vmatpush1.bf16.msra.mxu0 %v13880_v34  ;;  %7453 = vmatpush1.bf16.msra.mxu1 %v13883_v35  ;;  %v13969_v34 = vld [vmem:[#allocation9 + $0x344] ss:$16 sps:$4 sm:$0xff]   ;;  %v13972_v35 = vld [vmem:[#allocation9 + $0x34c] ss:$16 sps:$4 sm:$0xff]  }
 0x3b0   :  { %7239 = vmatprep.subr.bf16.mxu0 %v13888_v36  ;;  %7454 = vmatprep.subr.bf16.mxu1 %v13891_v37  ;;  %v13967_v36 = vld [vmem:[#allocation9 + $0x340] ss:$16 sps:$4 sm:$0xff]   ;;  %v13970_v37 = vld [vmem:[#allocation9 + $0x348] ss:$16 sps:$4 sm:$0xff]  }
 0x3b3   :  { %7240 = vmatpush1.bf16.msra.mxu0 %v13886_v38  ;;  %7455 = vmatpush1.bf16.msra.mxu1 %v13889_v41  ;;  %v13975_v38 = vld [vmem:[#allocation9 + $0x364] ss:$16 sps:$4 sm:$0xff]   ;;  %v13978_v41 = vld [vmem:[#allocation9 + $0x36c] ss:$16 sps:$4 sm:$0xff]  }
 0x3b4   :  { %7241 = vmatprep.subr.bf16.mxu0 %v13894_v44  ;;  %7456 = vmatprep.subr.bf16.mxu1 %v13897_v45  ;;  %v13973_v44 = vld [vmem:[#allocation9 + $0x360] ss:$16 sps:$4 sm:$0xff]   ;;  %v13976_v45 = vld [vmem:[#allocation9 + $0x368] ss:$16 sps:$4 sm:$0xff]  }
 0x3b7   :  { %7242 = vmatpush1.bf16.msra.mxu0 %v13892_v46  ;;  %7457 = vmatpush1.bf16.msra.mxu1 %v13895_v47  ;;  %v13981_v46 = vld [vmem:[#allocation9 + $0x384] ss:$16 sps:$4 sm:$0xff]   ;;  %v13984_v47 = vld [vmem:[#allocation9 + $0x38c] ss:$16 sps:$4 sm:$0xff]  }
 0x3b8   :  { %7243 = vmatprep.subr.bf16.mxu0 %v13900_v48  ;;  %7458 = vmatprep.subr.bf16.mxu1 %v13903_v49  ;;  %v13979_v48 = vld [vmem:[#allocation9 + $0x380] ss:$16 sps:$4 sm:$0xff]   ;;  %v13982_v49 = vld [vmem:[#allocation9 + $0x388] ss:$16 sps:$4 sm:$0xff]  }
 0x3bb   :  { %7244 = vmatpush1.bf16.msra.mxu0 %v13898_v50  ;;  %7459 = vmatpush1.bf16.msra.mxu1 %v13901_v51  ;;  %v13987_v50 = vld [vmem:[#allocation9 + $0x3a4] ss:$16 sps:$4 sm:$0xff]   ;;  %v13990_v51 = vld [vmem:[#allocation9 + $0x3ac] ss:$16 sps:$4 sm:$0xff]  }
 0x3bc   :  { %7256 = vmatprep.subr.bf16.mxu0 %v13909_v53  ;;  %7471 = vmatprep.subr.bf16.mxu1 %v13912_v54  ;;  %v13988_v53 = vld [vmem:[#allocation9 + $0x3a8] ss:$16 sps:$4 sm:$0xff]   ;;  %v13993_v54 = vld [vmem:[#allocation9 + $0x3c4] ss:$16 sps:$4 sm:$0xff]  }
 0x3be   :  { %7246 = vmatmul.mubr.bf16.vlgmr.msra.gmra.mrb[8].mxu0 %v13904_v52  ;;  %7461 = vmatmul.mubr.bf16.vlgmr.msra.gmra.mrb[8].mxu1 %v13904_v52  ;;  %v13985_v52 = vld [vmem:[#allocation9 + $0x3a0] ss:$16 sps:$4 sm:$0xff]  }
 0x3bf   :  { %7257 = vmatpush1.bf16.msra.mxu0 %v13907_v55  ;;  %7472 = vmatpush1.bf16.msra.mxu1 %v13910_v56  ;;  %v13996_v55 = vld [vmem:[#allocation9 + $0x3cc] ss:$16 sps:$4 sm:$0xff]   ;;  %v13991_v56 = vld [vmem:[#allocation9 + $0x3c0] ss:$16 sps:$4 sm:$0xff]  }
 0x3c0   :  { %7258 = vmatprep.subr.bf16.mxu0 %v13915_v57  ;;  %7473 = vmatprep.subr.bf16.mxu1 %v13918_v60  ;;  %v13994_v57 = vld [vmem:[#allocation9 + $0x3c8] ss:$16 sps:$4 sm:$0xff]   ;;  %v13999_v60 = vld [vmem:[#allocation9 + $0x3e4] ss:$16 sps:$4 sm:$0xff]  }
 0x3c1   :  { %7288 = vmatprep.mubr.bf16.mxu0 %v14005_v61  ;;  %7503 = vmatprep.mubr.bf16.mxu1 %v14005_v61  ;;  %v14002_v61 = vld [vmem:[#allocation9 + $0x3ec] ss:$16 sps:$4 sm:$0xff]  }
 0x3c3   :  { %7259 = vmatpush1.bf16.msra.mxu0 %v13913_v0  ;;  %7474 = vmatpush1.bf16.msra.mxu1 %v13916_v1  ;;  %v13997_v0 = vld [vmem:[#allocation9 + $0x3e0] ss:$16 sps:$4 sm:$0xff]   ;;  %v14000_v1 = vld [vmem:[#allocation9 + $0x3e8] ss:$16 sps:$4 sm:$0xff]  }
 0x3c4   :  { %7260 = vmatprep.subr.bf16.mxu0 %v13921_v2  ;;  %7475 = vmatprep.subr.bf16.mxu1 %v13924_v3  ;;  %v14003_v2 = vld [vmem:[%s15941_s2 + $0x8] ss:$40 sps:$4 sm:$0xff]   ;;  %v14008_v3 = vld [vmem:[#allocation9 + $0x404] ss:$16 sps:$4 sm:$0xff]  }
 0x3c7   :  { %7261 = vmatpush1.bf16.msra.mxu0 %v13919_v4  ;;  %7476 = vmatpush1.bf16.msra.mxu1 %v13922_v5  ;;  %v14011_v4 = vld [vmem:[#allocation9 + $0x40c] ss:$16 sps:$4 sm:$0xff]   ;;  %v14006_v5 = vld [vmem:[#allocation9 + $0x400] ss:$16 sps:$4 sm:$0xff]  }
 0x3c8   :  { %7262 = vmatprep.subr.bf16.mxu0 %v13927_v8  ;;  %7477 = vmatprep.subr.bf16.mxu1 %v13930_v9  ;;  %v14009_v8 = vld [vmem:[#allocation9 + $0x408] ss:$16 sps:$4 sm:$0xff]   ;;  %v14014_v9 = vld [vmem:[#allocation9 + $0x424] ss:$16 sps:$4 sm:$0xff]  }
 0x3cb   :  { %7263 = vmatpush1.bf16.msra.mxu0 %v13925_v10  ;;  %7478 = vmatpush1.bf16.msra.mxu1 %v13928_v11  ;;  %v14017_v10 = vld [vmem:[#allocation9 + $0x42c] ss:$16 sps:$4 sm:$0xff]  }
 0x3cc   :  { %7264 = vmatprep.subr.bf16.mxu0 %v13933_v14  ;;  %7479 = vmatprep.subr.bf16.mxu1 %v13936_v15  ;;  %v14104_v11 = vld [vmem:[%s15941_s2 + $0x14] ss:$40 sps:$4 sm:$0xff]   ;;  %v14012_v14 = vld [vmem:[#allocation9 + $0x420] ss:$16 sps:$4 sm:$0xff]   ;;  %v14015_v15 = vld [vmem:[#allocation9 + $0x428] ss:$16 sps:$4 sm:$0xff]  }
 0x3cf   :  { %7265 = vmatpush1.bf16.msra.mxu0 %v13931_v16  ;;  %7480 = vmatpush1.bf16.msra.mxu1 %v13934_v17  ;;  %v14020_v16 = vld [vmem:[#allocation9 + $0x444] ss:$16 sps:$4 sm:$0xff]   ;;  %v14023_v17 = vld [vmem:[#allocation9 + $0x44c] ss:$16 sps:$4 sm:$0xff]  }
 0x3d0   :  { %7266 = vmatprep.subr.bf16.mxu0 %v13939_v18  ;;  %7481 = vmatprep.subr.bf16.mxu1 %v13942_v19  ;;  %v14018_v18 = vld [vmem:[#allocation9 + $0x440] ss:$16 sps:$4 sm:$0xff]   ;;  %v14021_v19 = vld [vmem:[#allocation9 + $0x448] ss:$16 sps:$4 sm:$0xff]  }
 0x3d3   :  { %7267 = vmatpush1.bf16.msra.mxu0 %v13937_v20  ;;  %7482 = vmatpush1.bf16.msra.mxu1 %v13940_v21  ;;  %v14026_v20 = vld [vmem:[#allocation9 + $0x464] ss:$16 sps:$4 sm:$0xff]   ;;  %v14029_v21 = vld [vmem:[#allocation9 + $0x46c] ss:$16 sps:$4 sm:$0xff]  }
 0x3d4   :  { %7268 = vmatprep.subr.bf16.mxu0 %v13945_v22  ;;  %7483 = vmatprep.subr.bf16.mxu1 %v13948_v23  ;;  %v14024_v22 = vld [vmem:[#allocation9 + $0x460] ss:$16 sps:$4 sm:$0xff]   ;;  %v14027_v23 = vld [vmem:[#allocation9 + $0x468] ss:$16 sps:$4 sm:$0xff]  }
 0x3d7   :  { %7269 = vmatpush1.bf16.msra.mxu0 %v13943_v24  ;;  %7484 = vmatpush1.bf16.msra.mxu1 %v13946_v26  ;;  %v14032_v24 = vld [vmem:[#allocation9 + $0x484] ss:$16 sps:$4 sm:$0xff]   ;;  %v14035_v26 = vld [vmem:[#allocation9 + $0x48c] ss:$16 sps:$4 sm:$0xff]  }
 0x3d8   :  { %7270 = vmatprep.subr.bf16.mxu0 %v13951_v58  ;;  %7485 = vmatprep.subr.bf16.mxu1 %v13954_v6  ;;  %v14030_v58 = vld [vmem:[#allocation9 + $0x480] ss:$16 sps:$4 sm:$0xff]   ;;  %v14033_v6 = vld [vmem:[#allocation9 + $0x488] ss:$16 sps:$4 sm:$0xff]  }
 0x3db   :  { %7271 = vmatpush1.bf16.msra.mxu0 %v13949_v27  ;;  %7486 = vmatpush1.bf16.msra.mxu1 %v13952_v7  ;;  %v14038_v27 = vld [vmem:[#allocation9 + $0x4a4] ss:$16 sps:$4 sm:$0xff]   ;;  %v14041_v7 = vld [vmem:[#allocation9 + $0x4ac] ss:$16 sps:$4 sm:$0xff]  }
 0x3dc   :  { %7272 = vmatprep.subr.bf16.mxu0 %v13957_v29  ;;  %7487 = vmatprep.subr.bf16.mxu1 %v13960_v62  ;;  %v14036_v29 = vld [vmem:[#allocation9 + $0x4a0] ss:$16 sps:$4 sm:$0xff]   ;;  %v14039_v62 = vld [vmem:[#allocation9 + $0x4a8] ss:$16 sps:$4 sm:$0xff]  }
 0x3df   :  { %7273 = vmatpush1.bf16.msra.mxu0 %v13955_v12  ;;  %7488 = vmatpush1.bf16.msra.mxu1 %v13958_v31  ;;  %v14044_v12 = vld [vmem:[#allocation9 + $0x4c4] ss:$16 sps:$4 sm:$0xff]   ;;  %v14047_v31 = vld [vmem:[#allocation9 + $0x4cc] ss:$16 sps:$4 sm:$0xff]  }
 0x3e0   :  { %7274 = vmatprep.subr.bf16.mxu0 %v13963_v63  ;;  %7489 = vmatprep.subr.bf16.mxu1 %v13966_v32  ;;  %v14042_v63 = vld [vmem:[#allocation9 + $0x4c0] ss:$16 sps:$4 sm:$0xff]   ;;  %v14045_v32 = vld [vmem:[#allocation9 + $0x4c8] ss:$16 sps:$4 sm:$0xff]  }
 0x3e3   :  { %7275 = vmatpush1.bf16.msra.mxu0 %v13961_v13  ;;  %7490 = vmatpush1.bf16.msra.mxu1 %v13964_v33  ;;  %v14050_v13 = vld [vmem:[#allocation9 + $0x4e4] ss:$16 sps:$4 sm:$0xff]   ;;  %v14053_v33 = vld [vmem:[#allocation9 + $0x4ec] ss:$16 sps:$4 sm:$0xff]  }
 0x3e4   :  { %7276 = vmatprep.subr.bf16.mxu0 %v13969_v34  ;;  %7491 = vmatprep.subr.bf16.mxu1 %v13972_v35  ;;  %v14048_v34 = vld [vmem:[#allocation9 + $0x4e0] ss:$16 sps:$4 sm:$0xff]   ;;  %v14051_v35 = vld [vmem:[#allocation9 + $0x4e8] ss:$16 sps:$4 sm:$0xff]  }
 0x3e7   :  { %7277 = vmatpush1.bf16.msra.mxu0 %v13967_v36  ;;  %7492 = vmatpush1.bf16.msra.mxu1 %v13970_v37  ;;  %v14056_v36 = vld [vmem:[#allocation9 + $0x504] ss:$16 sps:$4 sm:$0xff]   ;;  %v14059_v37 = vld [vmem:[#allocation9 + $0x50c] ss:$16 sps:$4 sm:$0xff]  }
 0x3e8   :  { %7278 = vmatprep.subr.bf16.mxu0 %v13975_v38  ;;  %7493 = vmatprep.subr.bf16.mxu1 %v13978_v41  ;;  %v14054_v38 = vld [vmem:[#allocation9 + $0x500] ss:$16 sps:$4 sm:$0xff]   ;;  %v14057_v41 = vld [vmem:[#allocation9 + $0x508] ss:$16 sps:$4 sm:$0xff]  }
 0x3eb   :  { %7279 = vmatpush1.bf16.msra.mxu0 %v13973_v44  ;;  %7494 = vmatpush1.bf16.msra.mxu1 %v13976_v45  ;;  %v14062_v44 = vld [vmem:[#allocation9 + $0x524] ss:$16 sps:$4 sm:$0xff]   ;;  %v14065_v45 = vld [vmem:[#allocation9 + $0x52c] ss:$16 sps:$4 sm:$0xff]  }
 0x3ec   :  { %7280 = vmatprep.subr.bf16.mxu0 %v13981_v46  ;;  %7495 = vmatprep.subr.bf16.mxu1 %v13984_v47  ;;  %v14060_v46 = vld [vmem:[#allocation9 + $0x520] ss:$16 sps:$4 sm:$0xff]   ;;  %v14063_v47 = vld [vmem:[#allocation9 + $0x528] ss:$16 sps:$4 sm:$0xff]  }
 0x3ef   :  { %7281 = vmatpush1.bf16.msra.mxu0 %v13979_v48  ;;  %7496 = vmatpush1.bf16.msra.mxu1 %v13982_v49  ;;  %v14068_v48 = vld [vmem:[#allocation9 + $0x544] ss:$16 sps:$4 sm:$0xff]   ;;  %v14071_v49 = vld [vmem:[#allocation9 + $0x54c] ss:$16 sps:$4 sm:$0xff]  }
 0x3f0   :  { %7282 = vmatprep.subr.bf16.mxu0 %v13987_v50  ;;  %7497 = vmatprep.subr.bf16.mxu1 %v13990_v51  ;;  %v14066_v50 = vld [vmem:[#allocation9 + $0x540] ss:$16 sps:$4 sm:$0xff]   ;;  %v14069_v51 = vld [vmem:[#allocation9 + $0x548] ss:$16 sps:$4 sm:$0xff]  }
 0x3f3   :  { %7283 = vmatpush1.bf16.msra.mxu0 %v13985_v52  ;;  %7498 = vmatpush1.bf16.msra.mxu1 %v13988_v53  ;;  %v14074_v52 = vld [vmem:[#allocation9 + $0x564] ss:$16 sps:$4 sm:$0xff]   ;;  %v14077_v53 = vld [vmem:[#allocation9 + $0x56c] ss:$16 sps:$4 sm:$0xff]  }
 0x3f4   :  { %7284 = vmatprep.subr.bf16.mxu0 %v13993_v54  ;;  %7499 = vmatprep.subr.bf16.mxu1 %v13996_v55  ;;  %v14072_v54 = vld [vmem:[#allocation9 + $0x560] ss:$16 sps:$4 sm:$0xff]   ;;  %v14075_v55 = vld [vmem:[#allocation9 + $0x568] ss:$16 sps:$4 sm:$0xff]  }
 0x3f7   :  { %7285 = vmatpush1.bf16.msra.mxu0 %v13991_v56  ;;  %7500 = vmatpush1.bf16.msra.mxu1 %v13994_v57  ;;  %v14080_v56 = vld [vmem:[#allocation9 + $0x584] ss:$16 sps:$4 sm:$0xff]   ;;  %v14083_v57 = vld [vmem:[#allocation9 + $0x58c] ss:$16 sps:$4 sm:$0xff]  }
 0x3f8   :  { %7286 = vmatprep.subr.bf16.mxu0 %v13999_v60  ;;  %7501 = vmatprep.subr.bf16.mxu1 %v14002_v61  ;;  %v14078_v60 = vld [vmem:[#allocation9 + $0x580] ss:$16 sps:$4 sm:$0xff]   ;;  %v14081_v61 = vld [vmem:[#allocation9 + $0x588] ss:$16 sps:$4 sm:$0xff]  }
 0x3fb   :  { %7287 = vmatpush1.bf16.msra.mxu0 %v13997_v0  ;;  %7502 = vmatpush1.bf16.msra.mxu1 %v14000_v1  ;;  %v14086_v0 = vld [vmem:[#allocation9 + $0x5a4] ss:$16 sps:$4 sm:$0xff]   ;;  %v14089_v1 = vld [vmem:[#allocation9 + $0x5ac] ss:$16 sps:$4 sm:$0xff]  }
 0x3fc   :  { %7299 = vmatprep.subr.bf16.mxu0 %v14008_v3  ;;  %7514 = vmatprep.subr.bf16.mxu1 %v14011_v4  ;;  %v14087_v3 = vld [vmem:[#allocation9 + $0x5a8] ss:$16 sps:$4 sm:$0xff]   ;;  %v14092_v4 = vld [vmem:[#allocation9 + $0x5c4] ss:$16 sps:$4 sm:$0xff]  }
 0x3fe   :  { %7289 = vmatmul.mubr.bf16.vlgmr.msra.gmra.mrb[8].mxu0 %v14003_v2  ;;  %7504 = vmatmul.mubr.bf16.vlgmr.msra.gmra.mrb[8].mxu1 %v14003_v2  ;;  %v14084_v2 = vld [vmem:[#allocation9 + $0x5a0] ss:$16 sps:$4 sm:$0xff]  }
 0x3ff   :  { %7300 = vmatpush1.bf16.msra.mxu0 %v14006_v5  ;;  %7515 = vmatpush1.bf16.msra.mxu1 %v14009_v8  ;;  %v14095_v5 = vld [vmem:[#allocation9 + $0x5cc] ss:$16 sps:$4 sm:$0xff]   ;;  %v14090_v8 = vld [vmem:[#allocation9 + $0x5c0] ss:$16 sps:$4 sm:$0xff]  }
 0x400   :  { %7301 = vmatprep.subr.bf16.mxu0 %v14014_v9  ;;  %7516 = vmatprep.subr.bf16.mxu1 %v14017_v10  ;;  %v14093_v9 = vld [vmem:[#allocation9 + $0x5c8] ss:$16 sps:$4 sm:$0xff]   ;;  %v14098_v10 = vld [vmem:[#allocation9 + $0x5e4] ss:$16 sps:$4 sm:$0xff]  }
 0x401   :  { %7331 = vmatprep.mubr.bf16.mxu0 %v14104_v11  ;;  %7546 = vmatprep.mubr.bf16.mxu1 %v14104_v11  ;;  %v14101_v11 = vld [vmem:[#allocation9 + $0x5ec] ss:$16 sps:$4 sm:$0xff]  }
 0x403   :  { %7302 = vmatpush1.bf16.msra.mxu0 %v14012_v14  ;;  %7517 = vmatpush1.bf16.msra.mxu1 %v14015_v15  ;;  %v14096_v14 = vld [vmem:[#allocation9 + $0x5e0] ss:$16 sps:$4 sm:$0xff]   ;;  %v14099_v15 = vld [vmem:[#allocation9 + $0x5e8] ss:$16 sps:$4 sm:$0xff]  }
 0x404   :  { %7303 = vmatprep.subr.bf16.mxu0 %v14020_v16  ;;  %7518 = vmatprep.subr.bf16.mxu1 %v14023_v17  ;;  %v14107_v16 = vld [vmem:[#allocation9 + $0x604] ss:$16 sps:$4 sm:$0xff]   ;;  %v14110_v17 = vld [vmem:[#allocation9 + $0x60c] ss:$16 sps:$4 sm:$0xff]  }
 0x407   :  { %7304 = vmatpush1.bf16.msra.mxu0 %v14018_v18  ;;  %7519 = vmatpush1.bf16.msra.mxu1 %v14021_v19  ;;  %v14102_v18 = vld [vmem:[%s15941_s2 + $0x10] ss:$40 sps:$4 sm:$0xff]  }
 0x408   :  { %7305 = vmatprep.subr.bf16.mxu0 %v14026_v20  ;;  %7520 = vmatprep.subr.bf16.mxu1 %v14029_v21  ;;  %v14105_v19 = vld [vmem:[#allocation9 + $0x600] ss:$16 sps:$4 sm:$0xff]   ;;  %v14108_v20 = vld [vmem:[#allocation9 + $0x608] ss:$16 sps:$4 sm:$0xff]   ;;  %v14113_v21 = vld [vmem:[#allocation9 + $0x624] ss:$16 sps:$4 sm:$0xff]  }
 0x40b   :  { %7306 = vmatpush1.bf16.msra.mxu0 %v14024_v22  ;;  %7521 = vmatpush1.bf16.msra.mxu1 %v14027_v23  ;;  %v14116_v22 = vld [vmem:[#allocation9 + $0x62c] ss:$16 sps:$4 sm:$0xff]  }
 0x40c   :  { %7307 = vmatprep.subr.bf16.mxu0 %v14032_v24  ;;  %7522 = vmatprep.subr.bf16.mxu1 %v14035_v26  ;;  %v14203_v23 = vld [vmem:[%s15941_s2 + $0x1c] ss:$40 sps:$4 sm:$0xff]   ;;  %v14111_v24 = vld [vmem:[#allocation9 + $0x620] ss:$16 sps:$4 sm:$0xff]   ;;  %v14114_v26 = vld [vmem:[#allocation9 + $0x628] ss:$16 sps:$4 sm:$0xff]  }
 0x40f   :  { %7308 = vmatpush1.bf16.msra.mxu0 %v14030_v58  ;;  %7523 = vmatpush1.bf16.msra.mxu1 %v14033_v6  ;;  %v14119_v58 = vld [vmem:[#allocation9 + $0x644] ss:$16 sps:$4 sm:$0xff]   ;;  %v14122_v6 = vld [vmem:[#allocation9 + $0x64c] ss:$16 sps:$4 sm:$0xff]  }
 0x410   :  { %7309 = vmatprep.subr.bf16.mxu0 %v14038_v27  ;;  %7524 = vmatprep.subr.bf16.mxu1 %v14041_v7  ;;  %v14117_v27 = vld [vmem:[#allocation9 + $0x640] ss:$16 sps:$4 sm:$0xff]   ;;  %v14120_v7 = vld [vmem:[#allocation9 + $0x648] ss:$16 sps:$4 sm:$0xff]  }
 0x413   :  { %7310 = vmatpush1.bf16.msra.mxu0 %v14036_v29  ;;  %7525 = vmatpush1.bf16.msra.mxu1 %v14039_v62  ;;  %v14125_v29 = vld [vmem:[#allocation9 + $0x664] ss:$16 sps:$4 sm:$0xff]   ;;  %v14128_v62 = vld [vmem:[#allocation9 + $0x66c] ss:$16 sps:$4 sm:$0xff]  }
 0x414   :  { %7311 = vmatprep.subr.bf16.mxu0 %v14044_v12  ;;  %7526 = vmatprep.subr.bf16.mxu1 %v14047_v31  ;;  %v14123_v12 = vld [vmem:[#allocation9 + $0x660] ss:$16 sps:$4 sm:$0xff]   ;;  %v14126_v31 = vld [vmem:[#allocation9 + $0x668] ss:$16 sps:$4 sm:$0xff]  }
 0x417   :  { %7312 = vmatpush1.bf16.msra.mxu0 %v14042_v63  ;;  %7527 = vmatpush1.bf16.msra.mxu1 %v14045_v32  ;;  %v14131_v63 = vld [vmem:[#allocation9 + $0x684] ss:$16 sps:$4 sm:$0xff]   ;;  %v14134_v32 = vld [vmem:[#allocation9 + $0x68c] ss:$16 sps:$4 sm:$0xff]  }
 0x418   :  { %7313 = vmatprep.subr.bf16.mxu0 %v14050_v13  ;;  %7528 = vmatprep.subr.bf16.mxu1 %v14053_v33  ;;  %v14129_v13 = vld [vmem:[#allocation9 + $0x680] ss:$16 sps:$4 sm:$0xff]   ;;  %v14132_v33 = vld [vmem:[#allocation9 + $0x688] ss:$16 sps:$4 sm:$0xff]  }
 0x41b   :  { %7314 = vmatpush1.bf16.msra.mxu0 %v14048_v34  ;;  %7529 = vmatpush1.bf16.msra.mxu1 %v14051_v35  ;;  %v3053_v34 = vld [vmem:[#allocation7] sm:$0xf]  ;;  %v14137_v35 = vld [vmem:[#allocation9 + $0x6a4] ss:$16 sps:$4 sm:$0xff]  }
 0x41c   :  { %7315 = vmatprep.subr.bf16.mxu0 %v14056_v36  ;;  %7530 = vmatprep.subr.bf16.mxu1 %v14059_v37  ;;  %v14140_v36 = vld [vmem:[#allocation9 + $0x6ac] ss:$16 sps:$4 sm:$0xff]   ;;  %v3058_v37 = vrot.slane %v3053_v34, %v15726_v39 }
 0x41f   :  { %7316 = vmatpush1.bf16.msra.mxu0 %v14054_v38  ;;  %7531 = vmatpush1.bf16.msra.mxu1 %v14057_v41  ;;  %v3066_v38 = vrot.slane %v3053_v34, %v15728_v40  ;;  %v3062_v41 = vrot.slane %v3053_v34, %v15730_v42 }
 0x420   :  { %7317 = vmatprep.subr.bf16.mxu0 %v14062_v44  ;;  %7532 = vmatprep.subr.bf16.mxu1 %v14065_v45  ;;  %v3070_v44 = vrot.slane %v3053_v34, %v15732_v43  ;;  %v14135_v45 = vld [vmem:[#allocation9 + $0x6a0] ss:$16 sps:$4 sm:$0xff]  }
 0x423   :  { %7318 = vmatpush1.bf16.msra.mxu0 %v14060_v46  ;;  %7533 = vmatpush1.bf16.msra.mxu1 %v14063_v47  ;;  %v14138_v46 = vld [vmem:[#allocation9 + $0x6a8] ss:$16 sps:$4 sm:$0xff]   ;;  %v14143_v47 = vld [vmem:[#allocation9 + $0x6c4] ss:$16 sps:$4 sm:$0xff]  }
 0x424   :  { %7319 = vmatprep.subr.bf16.mxu0 %v14068_v48  ;;  %7534 = vmatprep.subr.bf16.mxu1 %v14071_v49  ;;  %v14146_v48 = vld [vmem:[#allocation9 + $0x6cc] ss:$16 sps:$4 sm:$0xff]  }
 0x427   :  { %7320 = vmatpush1.bf16.msra.mxu0 %v14066_v50  ;;  %7535 = vmatpush1.bf16.msra.mxu1 %v14069_v51 }
 0x428   :  { %7321 = vmatprep.subr.bf16.mxu0 %v14074_v52  ;;  %7536 = vmatprep.subr.bf16.mxu1 %v14077_v53 }
 0x42b   :  { %7322 = vmatpush1.bf16.msra.mxu0 %v14072_v54  ;;  %7537 = vmatpush1.bf16.msra.mxu1 %v14075_v55  ;;  %v14141_v55 = vld [vmem:[#allocation9 + $0x6c0] ss:$16 sps:$4 sm:$0xff]  }
 0x42c   :  { %7323 = vmatprep.subr.bf16.mxu0 %v14080_v56  ;;  %7538 = vmatprep.subr.bf16.mxu1 %v14083_v57  ;;  %v14144_v56 = vld [vmem:[#allocation9 + $0x6c8] ss:$16 sps:$4 sm:$0xff]  }
 0x42f   :  { %7324 = vmatpush1.bf16.msra.mxu0 %v14078_v60  ;;  %7539 = vmatpush1.bf16.msra.mxu1 %v14081_v61 }
 0x430   :  { %7325 = vmatprep.subr.bf16.mxu0 %v14086_v0  ;;  %7540 = vmatprep.subr.bf16.mxu1 %v14089_v1  ;;  %v14149_v1 = vld [vmem:[#allocation9 + $0x6e4] ss:$16 sps:$4 sm:$0xff]  }
 0x433   :  { %7326 = vmatpush1.bf16.msra.mxu0 %v14084_v2  ;;  %7541 = vmatpush1.bf16.msra.mxu1 %v14087_v3  ;;  %v14152_v2 = vld [vmem:[#allocation9 + $0x6ec] ss:$16 sps:$4 sm:$0xff]  }
 0x434   :  { %7327 = vmatprep.subr.bf16.mxu0 %v14092_v4  ;;  %7542 = vmatprep.subr.bf16.mxu1 %v14095_v5 }
 0x437   :  { %7328 = vmatpush1.bf16.msra.mxu0 %v14090_v8  ;;  %7543 = vmatpush1.bf16.msra.mxu1 %v14093_v9 }
 0x438   :  { %7329 = vmatprep.subr.bf16.mxu0 %v14098_v10  ;;  %7544 = vmatprep.subr.bf16.mxu1 %v14101_v11 }
 0x43b   :  { %7330 = vmatpush1.bf16.msra.mxu0 %v14096_v14  ;;  %7545 = vmatpush1.bf16.msra.mxu1 %v14099_v15 }
 0x43c   :  { %7342 = vmatprep.subr.bf16.mxu0 %v14107_v16  ;;  %7557 = vmatprep.subr.bf16.mxu1 %v14110_v17 }
 0x43e   :  { %7332 = vmatmul.mubr.bf16.vlgmr.msra.gmra.mrb[8].mxu0 %v14102_v18  ;;  %7547 = vmatmul.mubr.bf16.vlgmr.msra.gmra.mrb[8].mxu1 %v14102_v18 }
 0x43f   :  { %7343 = vmatpush1.bf16.msra.mxu0 %v14105_v19  ;;  %7558 = vmatpush1.bf16.msra.mxu1 %v14108_v20  ;;  %v14147_v19 = vld [vmem:[#allocation9 + $0x6e0] ss:$16 sps:$4 sm:$0xff]   ;;  %v14150_v20 = vld [vmem:[#allocation9 + $0x6e8] ss:$16 sps:$4 sm:$0xff]  }
 0x440   :  { %7344 = vmatprep.subr.bf16.mxu0 %v14113_v21  ;;  %7559 = vmatprep.subr.bf16.mxu1 %v14116_v22  ;;  %v14155_v22 = vld [vmem:[#allocation9 + $0x704] ss:$16 sps:$4 sm:$0xff]  }
 0x441   :  { %7374 = vmatprep.mubr.bf16.mxu0 %v14203_v23  ;;  %7589 = vmatprep.mubr.bf16.mxu1 %v14203_v23  ;;  %v14158_v23 = vld [vmem:[#allocation9 + $0x70c] ss:$16 sps:$4 sm:$0xff]  }
 0x443   :  { %7345 = vmatpush1.bf16.msra.mxu0 %v14111_v24  ;;  %7560 = vmatpush1.bf16.msra.mxu1 %v14114_v26  ;;  %v14153_v26 = vld [vmem:[#allocation9 + $0x700] ss:$16 sps:$4 sm:$0xff]  }
 0x444   :  { %7346 = vmatprep.subr.bf16.mxu0 %v14119_v58  ;;  %7561 = vmatprep.subr.bf16.mxu1 %v14122_v6  ;;  %v14156_v58 = vld [vmem:[#allocation9 + $0x708] ss:$16 sps:$4 sm:$0xff]   ;;  %v14161_v6 = vld [vmem:[#allocation9 + $0x724] ss:$16 sps:$4 sm:$0xff]  }
 0x447   :  { %7347 = vmatpush1.bf16.msra.mxu0 %v14117_v27  ;;  %7562 = vmatpush1.bf16.msra.mxu1 %v14120_v7  ;;  %v14164_v27 = vld [vmem:[#allocation9 + $0x72c] ss:$16 sps:$4 sm:$0xff]   ;;  %v14159_v7 = vld [vmem:[#allocation9 + $0x720] ss:$16 sps:$4 sm:$0xff]  }
 0x448   :  { %7348 = vmatprep.subr.bf16.mxu0 %v14125_v29  ;;  %7563 = vmatprep.subr.bf16.mxu1 %v14128_v62  ;;  %v14162_v29 = vld [vmem:[#allocation9 + $0x728] ss:$16 sps:$4 sm:$0xff]  }
 0x44b   :  { %7349 = vmatpush1.bf16.msra.mxu0 %v14123_v12  ;;  %7564 = vmatpush1.bf16.msra.mxu1 %v14126_v31  ;;  %v14167_v12 = vld [vmem:[#allocation9 + $0x744] ss:$16 sps:$4 sm:$0xff]   ;;  %v14170_v31 = vld [vmem:[#allocation9 + $0x74c] ss:$16 sps:$4 sm:$0xff]  }
 0x44c   :  { %7350 = vmatprep.subr.bf16.mxu0 %v14131_v63  ;;  %7565 = vmatprep.subr.bf16.mxu1 %v14134_v32 }
 0x44f   :  { %7351 = vmatpush1.bf16.msra.mxu0 %v14129_v13  ;;  %7566 = vmatpush1.bf16.msra.mxu1 %v14132_v33 }
 0x450   :  { %7352 = vmatprep.subr.bf16.mxu0 %v14137_v35  ;;  %7567 = vmatprep.subr.bf16.mxu1 %v14140_v36  ;;  %v14165_v36 = vld [vmem:[#allocation9 + $0x740] ss:$16 sps:$4 sm:$0xff]  }
 0x451   :  { %v4931_v49 = vpop.f32.mrb[4].mxu0  ;;  %v5146_v50 = vpop.f32.mrb[4].mxu1 }
 0x452   :  { %v15812_v51 = vadd.f32 %v4931_v49, %v3058_v37  ;;  %v15814_v52 = vadd.f32 %v5146_v50, %v3066_v38  ;;  %v4933_v53 = vpop.f32.mrb[5].mxu0  ;;  %v5148_v54 = vpop.f32.mrb[5].mxu1 }
 0x453   :  { %v15816_v57 = vadd.f32 %v4933_v53, %v3062_v41  ;;  %v15818_v60 = vadd.f32 %v5148_v54, %v3070_v44  ;;  %v4935_v61 = vpop.f32.mrb[6].mxu0  ;;  %v5150_v0 = vpop.f32.mrb[6].mxu1  ;;  %7353 = vmatpush1.bf16.msra.mxu0 %v14135_v45  ;;  %7568 = vmatpush1.bf16.msra.mxu1 %v14138_v46  ;;  %v14176_v45 = vld [vmem:[#allocation9 + $0x76c] ss:$16 sps:$4 sm:$0xff]   ;;  %v14171_v54 = vld [vmem:[#allocation9 + $0x760] ss:$16 sps:$4 sm:$0xff]  }
 0x454   :  { %v11783_v3 = vmul.f32 -1.442695, %v15812_v51  ;;  %v11785_v4 = vmul.f32 -1.442695, %v15814_v52  ;;  %v15822_v5 = vadd.f32 %v4935_v61, %v3058_v37  ;;  %v15824_v8 = vadd.f32 %v5150_v0, %v3066_v38  ;;  %v4937_v9 = vpop.f32.mrb[7].mxu0  ;;  %v5152_v10 = vpop.f32.mrb[7].mxu1  ;;  %7354 = vmatprep.subr.bf16.mxu0 %v14143_v47  ;;  %7569 = vmatprep.subr.bf16.mxu1 %v14146_v48 }
 0x455   :  { %v11784_v11 = vmul.f32 -1.442695, %v15816_v57  ;;  %v11786_v14 = vmul.f32 -1.442695, %v15818_v60  ;;  %v15828_v15 = vadd.f32 %v4937_v9, %v3062_v41  ;;  %v15830_v16 = vadd.f32 %v5152_v10, %v3070_v44  ;;  %v14168_v37 = vld [vmem:[#allocation9 + $0x748] ss:$16 sps:$4 sm:$0xff]  }
 0x456   :  { %14951 = vpow2.f32 %v11783_v3  ;;  %v11787_v17 = vmul.f32 -1.442695, %v15822_v5  ;;  %v11789_v18 = vmul.f32 -1.442695, %v15824_v8  ;;  %v14173_v44 = vld [vmem:[#allocation9 + $0x764] ss:$16 sps:$4 sm:$0xff]  }
 0x457   :  { %14953 = vpow2.f32 %v11785_v4  ;;  %7355 = vmatpush1.bf16.msra.mxu0 %v14141_v55  ;;  %7570 = vmatpush1.bf16.msra.mxu1 %v14144_v56  ;;  %v11788_v21 = vmul.f32 -1.442695, %v15828_v15  ;;  %v11790_v24 = vmul.f32 -1.442695, %v15830_v16  ;;  %v14174_v55 = vld [vmem:[#allocation9 + $0x768] ss:$16 sps:$4 sm:$0xff]  }
 0x458   :  { %14955 = vpow2.f32 %v11784_v11  ;;  %7356 = vmatprep.subr.bf16.mxu0 %v14149_v1  ;;  %7571 = vmatprep.subr.bf16.mxu1 %v14152_v2  ;;  %v14179_v61 = vld [vmem:[#allocation9 + $0x784] ss:$16 sps:$4 sm:$0xff]   ;;  %v14182_v0 = vld [vmem:[#allocation9 + $0x78c] ss:$16 sps:$4 sm:$0xff]   ;;  %v14177_v1 = vld [vmem:[#allocation9 + $0x780] ss:$16 sps:$4 sm:$0xff]  }
 0x459   :  { %14957 = vpow2.f32 %v11786_v14  ;;  %v14180_v2 = vld [vmem:[#allocation9 + $0x788] ss:$16 sps:$4 sm:$0xff]   ;;  %v14185_v3 = vld [vmem:[#allocation9 + $0x7a4] ss:$16 sps:$4 sm:$0xff]   ;;  %v14188_v4 = vld [vmem:[#allocation9 + $0x7ac] ss:$16 sps:$4 sm:$0xff]  }
 0x45a   :  { %14959 = vpow2.f32 %v11787_v17  ;;  %v14183_v14 = vld [vmem:[#allocation9 + $0x7a0] ss:$16 sps:$4 sm:$0xff]   ;;  %v14186_v17 = vld [vmem:[#allocation9 + $0x7a8] ss:$16 sps:$4 sm:$0xff]  }
 0x45b   :  { %14961 = vpow2.f32 %v11789_v18  ;;  %7357 = vmatpush1.bf16.msra.mxu0 %v14147_v19  ;;  %7572 = vmatpush1.bf16.msra.mxu1 %v14150_v20  ;;  %v14191_v19 = vld [vmem:[#allocation9 + $0x7c4] ss:$16 sps:$4 sm:$0xff]   ;;  %v14194_v20 = vld [vmem:[#allocation9 + $0x7cc] ss:$16 sps:$4 sm:$0xff]  }
 0x45c   :  { %14963 = vpow2.f32 %v11788_v21  ;;  %7358 = vmatprep.subr.bf16.mxu0 %v14155_v22  ;;  %7573 = vmatprep.subr.bf16.mxu1 %v14158_v23 }
 0x45d   :  { %14965 = vpow2.f32 %v11790_v24 }
 0x45f   :  { %7359 = vmatpush1.bf16.msra.mxu0 %v14153_v26  ;;  %7574 = vmatpush1.bf16.msra.mxu1 %v14156_v58 }
 0x460   :  { %v14952_v62 = vpop.eup %14951  ;;  %7360 = vmatprep.subr.bf16.mxu0 %v14161_v6  ;;  %7575 = vmatprep.subr.bf16.mxu1 %v14164_v27  ;;  %v14189_v27 = vld [vmem:[#allocation9 + $0x7c0] ss:$16 sps:$4 sm:$0xff]  }
 0x461   :  { %v14954_v63 = vpop.eup %14953  ;;  %v5179_v32 = vadd.f32 1.0, %v14952_v62 }
 0x462   :  { %v14956_v13 = vpop.eup %14955  ;;  %v5181_v33 = vadd.f32 1.0, %v14954_v63 }
 0x463   :  { %v14958_v34 = vpop.eup %14957  ;;  %14967 = vrcp.f32 %v5179_v32  ;;  %v5180_v35 = vadd.f32 1.0, %v14956_v13  ;;  %7361 = vmatpush1.bf16.msra.mxu0 %v14159_v7  ;;  %7576 = vmatpush1.bf16.msra.mxu1 %v14162_v29  ;;  %v14192_v7 = vld [vmem:[#allocation9 + $0x7c8] ss:$16 sps:$4 sm:$0xff]   ;;  %v14195_v13 = vld [vmem:[#allocation9 + $0x7e0] ss:$16 sps:$4 sm:$0xff]  }
 0x464   :  { %v14960_v38 = vpop.eup %14959  ;;  %14969 = vrcp.f32 %v5181_v33  ;;  %v5182_v41 = vadd.f32 1.0, %v14958_v34  ;;  %7362 = vmatprep.subr.bf16.mxu0 %v14167_v12  ;;  %7577 = vmatprep.subr.bf16.mxu1 %v14170_v31  ;;  %v14209_v34 = vld [vmem:[#allocation9 + $0x80c] ss:$16 sps:$4 sm:$0xff]  }
 0x465   :  { %v14962_v46 = vpop.eup %14961  ;;  %14971 = vrcp.f32 %v5180_v35  ;;  %v5183_v47 = vadd.f32 1.0, %v14960_v38  ;;  %v14204_v35 = vld [vmem:[#allocation9 + $0x800] ss:$16 sps:$4 sm:$0xff]   ;;  %v14302_v38 = vld [vmem:[%s15941_s2 + $0x24] ss:$40 sps:$4 sm:$0xff]  }
 0x466   :  { %v14964_v48 = vpop.eup %14963  ;;  %14973 = vrcp.f32 %v5182_v41  ;;  %v5185_v49 = vadd.f32 1.0, %v14962_v46  ;;  %v14210_v41 = vld [vmem:[#allocation9 + $0x820] ss:$16 sps:$4 sm:$0xff]   ;;  %v14221_v46 = vld [vmem:[#allocation9 + $0x84c] ss:$16 sps:$4 sm:$0xff]  }
 0x467   :  { %v14966_v50 = vpop.eup %14965  ;;  %14975 = vrcp.f32 %v5183_v47  ;;  %v5184_v53 = vadd.f32 1.0, %v14964_v48  ;;  %7363 = vmatpush1.bf16.msra.mxu0 %v14165_v36  ;;  %7578 = vmatpush1.bf16.msra.mxu1 %v14168_v37  ;;  %v14212_v36 = vld [vmem:[#allocation9 + $0x824] ss:$16 sps:$4 sm:$0xff]   ;;  %v14215_v37 = vld [vmem:[#allocation9 + $0x82c] ss:$16 sps:$4 sm:$0xff]  }
 0x468   :  { %14977 = vrcp.f32 %v5185_v49  ;;  %v5186_v56 = vadd.f32 1.0, %v14966_v50  ;;  %7364 = vmatprep.subr.bf16.mxu0 %v14173_v44  ;;  %7579 = vmatprep.subr.bf16.mxu1 %v14176_v45  ;;  %v14213_v44 = vld [vmem:[#allocation9 + $0x828] ss:$16 sps:$4 sm:$0xff]   ;;  %v14218_v45 = vld [vmem:[#allocation9 + $0x844] ss:$16 sps:$4 sm:$0xff]  }
 0x469   :  { %14979 = vrcp.f32 %v5184_v53  ;;  %v14216_v47 = vld [vmem:[#allocation9 + $0x840] ss:$16 sps:$4 sm:$0xff]   ;;  %v14219_v48 = vld [vmem:[#allocation9 + $0x848] ss:$16 sps:$4 sm:$0xff]   ;;  %v14224_v49 = vld [vmem:[#allocation9 + $0x864] ss:$16 sps:$4 sm:$0xff]  }
 0x46a   :  { %14981 = vrcp.f32 %v5186_v56  ;;  %v14227_v50 = vld [vmem:[#allocation9 + $0x86c] ss:$16 sps:$4 sm:$0xff]   ;;  %v14222_v53 = vld [vmem:[#allocation9 + $0x860] ss:$16 sps:$4 sm:$0xff]  }
 0x46b   :  { %7365 = vmatpush1.bf16.msra.mxu0 %v14171_v54  ;;  %7580 = vmatpush1.bf16.msra.mxu1 %v14174_v55  ;;  %v14225_v54 = vld [vmem:[#allocation9 + $0x868] ss:$16 sps:$4 sm:$0xff]   ;;  %v14230_v55 = vld [vmem:[#allocation9 + $0x884] ss:$16 sps:$4 sm:$0xff]   ;;  %v14233_v56 = vld [vmem:[#allocation9 + $0x88c] ss:$16 sps:$4 sm:$0xff]  }
 0x46c   :  { %7366 = vmatprep.subr.bf16.mxu0 %v14179_v61  ;;  %7581 = vmatprep.subr.bf16.mxu1 %v14182_v0  ;;  %v14228_v61 = vld [vmem:[#allocation9 + $0x880] ss:$16 sps:$4 sm:$0xff]   ;;  %v14231_v0 = vld [vmem:[#allocation9 + $0x888] ss:$16 sps:$4 sm:$0xff]  }
 0x46d   :  { %v14968_v9 = vpop.eup %14967 }
 0x46e   :  { %v14970_v10 = vpop.eup %14969  ;;  %v5203_v23 = vmul.f32 %v14968_v9, %v15812_v51  ;;  %v14197_v51 = vld [vmem:[#allocation9 + $0x7e4] ss:$16 sps:$4 sm:$0xff]  }
 0x46f   :  { %v14972_v11 = vpop.eup %14971  ;;  %7367 = vmatpush1.bf16.msra.mxu0 %v14177_v1  ;;  %7582 = vmatpush1.bf16.msra.mxu1 %v14180_v2  ;;  %v5205_v58 = vmul.f32 %v14970_v10, %v15814_v52  ;;  %v14236_v1 = vld [vmem:[#allocation9 + $0x8a4] ss:$16 sps:$4 sm:$0xff]   ;;  %v14239_v2 = vld [vmem:[#allocation9 + $0x8ac] ss:$16 sps:$4 sm:$0xff]  }
 0x470   :  { %v14974_v18 = vpop.eup %14973  ;;  %7368 = vmatprep.subr.bf16.mxu0 %v14185_v3  ;;  %7583 = vmatprep.subr.bf16.mxu1 %v14188_v4  ;;  %v5204_v62 = vmul.f32 %v14972_v11, %v15816_v57  ;;  %v14198_v57 = vld [vmem:[#allocation9 + $0x7e8] ss:$16 sps:$4 sm:$0xff]   ;;  %v14234_v3 = vld [vmem:[#allocation9 + $0x8a0] ss:$16 sps:$4 sm:$0xff]   ;;  %v14242_v9 = vld [vmem:[#allocation9 + $0x8c4] ss:$16 sps:$4 sm:$0xff]  }
 0x471   :  { %v14976_v21 = vpop.eup %14975  ;;  %v5206_v63 = vmul.f32 %v14974_v18, %v15818_v60  ;;  %v14201_v60 = vld [vmem:[%s15941_s2 + $0x18] ss:$40 sps:$4 sm:$0xff]   ;;  %v14245_v10 = vld [vmem:[#allocation9 + $0x8cc] ss:$16 sps:$4 sm:$0xff]  }
 0x472   :  { %v14978_v22 = vpop.eup %14977  ;;  %v5207_v24 = vmul.f32 %v14976_v21, %v15822_v5  ;;  %v14200_v5 = vld [vmem:[#allocation9 + $0x7ec] ss:$16 sps:$4 sm:$0xff]   ;;  %v14237_v4 = vld [vmem:[#allocation9 + $0x8a8] ss:$16 sps:$4 sm:$0xff]   ;;  %v14240_v11 = vld [vmem:[#allocation9 + $0x8c0] ss:$16 sps:$4 sm:$0xff]  }
 0x473   :  { %v14980_v26 = vpop.eup %14979  ;;  %v5209_v6 = vmul.f32 %v14978_v22, %v15824_v8  ;;  %7369 = vmatpush1.bf16.msra.mxu0 %v14183_v14  ;;  %7584 = vmatpush1.bf16.msra.mxu1 %v14186_v17  ;;  %v14243_v14 = vld [vmem:[#allocation9 + $0x8c8] ss:$16 sps:$4 sm:$0xff]   ;;  %v14248_v17 = vld [vmem:[#allocation9 + $0x8e4] ss:$16 sps:$4 sm:$0xff]   ;;  %v14251_v18 = vld [vmem:[#allocation9 + $0x8ec] ss:$16 sps:$4 sm:$0xff]  }
 0x474   :  { %v14982_v29 = vpop.eup %14981  ;;  %v15841_v12 = vpack.c.bf16 %v5207_v24, %v5203_v23  ;;  %v5208_v31 = vmul.f32 %v14980_v26, %v15828_v15  ;;  %7370 = vmatprep.subr.bf16.mxu0 %v14191_v19  ;;  %7585 = vmatprep.subr.bf16.mxu1 %v14194_v20  ;;  %v14206_v15 = vld [vmem:[#allocation9 + $0x804] ss:$16 sps:$4 sm:$0xff]   ;;  %v14246_v19 = vld [vmem:[#allocation9 + $0x8e0] ss:$16 sps:$4 sm:$0xff]   ;;  %v14249_v20 = vld [vmem:[#allocation9 + $0x8e8] ss:$16 sps:$4 sm:$0xff]  }
 0x475   :  { %v15845_v52 = vpack.c.bf16 %v5209_v6, %v5205_v58  ;;  %v5210_v8 = vmul.f32 %v14982_v29, %v15830_v16  ;;  %v14207_v16 = vld [vmem:[#allocation9 + $0x808] ss:$16 sps:$4 sm:$0xff]   ;;  %v14254_v21 = vld [vmem:[#allocation9 + $0x904] ss:$16 sps:$4 sm:$0xff]   ;;  %v14257_v22 = vld [vmem:[#allocation9 + $0x90c] ss:$16 sps:$4 sm:$0xff]  }
 0x476   :  { %v15848_v32 = vpack.c.bf16 %v5208_v31, %v5204_v62  ;;  %v14252_v23 = vld [vmem:[#allocation9 + $0x900] ss:$16 sps:$4 sm:$0xff]   ;;  %v14255_v24 = vld [vmem:[#allocation9 + $0x908] ss:$16 sps:$4 sm:$0xff]   ;;  %v14260_v26 = vld [vmem:[#allocation9 + $0x924] ss:$16 sps:$4 sm:$0xff]  }
 0x477   :  { %7371 = vmatpush1.bf16.msra.mxu0 %v14189_v27  ;;  %7586 = vmatpush1.bf16.msra.mxu1 %v14192_v7  ;;  %v15850_v33 = vpack.c.bf16 %v5210_v8, %v5206_v63  ;;  %v14263_v58 = vld [vmem:[#allocation9 + $0x92c] ss:$16 sps:$4 sm:$0xff]   ;;  %v14258_v6 = vld [vmem:[#allocation9 + $0x920] ss:$16 sps:$4 sm:$0xff]   ;;  %v14261_v27 = vld [vmem:[#allocation9 + $0x928] ss:$16 sps:$4 sm:$0xff]  }
 0x478   :  { %7372 = vmatprep.subr.bf16.mxu0 %v14197_v51  ;;  %7587 = vmatprep.subr.bf16.mxu1 %v14200_v5  ;;  %v14266_v7 = vld [vmem:[#allocation9 + $0x944] ss:$16 sps:$4 sm:$0xff]   ;;  %v14269_v29 = vld [vmem:[#allocation9 + $0x94c] ss:$16 sps:$4 sm:$0xff]   ;;  %v14264_v62 = vld [vmem:[#allocation9 + $0x940] ss:$16 sps:$4 sm:$0xff]  }
 0x479   :  { %v14267_v31 = vld [vmem:[#allocation9 + $0x948] ss:$16 sps:$4 sm:$0xff]   ;;  %v14272_v51 = vld [vmem:[#allocation9 + $0x964] ss:$16 sps:$4 sm:$0xff]   ;;  %v14275_v5 = vld [vmem:[#allocation9 + $0x96c] ss:$16 sps:$4 sm:$0xff]  }
 0x47a   :  { %v14270_v63 = vld [vmem:[#allocation9 + $0x960] ss:$16 sps:$4 sm:$0xff]   ;;  %v14273_v8 = vld [vmem:[#allocation9 + $0x968] ss:$16 sps:$4 sm:$0xff]  }
 0x47b   :  { %7373 = vmatpush1.bf16.msra.mxu0 %v14195_v13  ;;  %7588 = vmatpush1.bf16.msra.mxu1 %v14198_v57  ;;  %v14278_v13 = vld [vmem:[#allocation9 + $0x984] ss:$16 sps:$4 sm:$0xff]   ;;  %v14281_v57 = vld [vmem:[#allocation9 + $0x98c] ss:$16 sps:$4 sm:$0xff]  }
 0x47c   :  { %7385 = vmatprep.subr.bf16.mxu0 %v14206_v15  ;;  %7600 = vmatprep.subr.bf16.mxu1 %v14209_v34  ;;  %v14276_v15 = vld [vmem:[#allocation9 + $0x980] ss:$16 sps:$4 sm:$0xff]   ;;  %v14279_v34 = vld [vmem:[#allocation9 + $0x988] ss:$16 sps:$4 sm:$0xff]  }
 0x47e   :  { %7375 = vmatmul.mubr.bf16.vlgmr.msra.gmra.mrb[8].mxu0 %v14201_v60  ;;  %7590 = vmatmul.mubr.bf16.vlgmr.msra.gmra.mrb[8].mxu1 %v14201_v60  ;;  %v14284_v60 = vld [vmem:[#allocation9 + $0x9a4] ss:$16 sps:$4 sm:$0xff]  }
 0x47f   :  { %7386 = vmatpush1.bf16.msra.mxu0 %v14204_v35  ;;  %7601 = vmatpush1.bf16.msra.mxu1 %v14207_v16  ;;  %v14287_v35 = vld [vmem:[#allocation9 + $0x9ac] ss:$16 sps:$4 sm:$0xff]   ;;  %v14282_v16 = vld [vmem:[#allocation9 + $0x9a0] ss:$16 sps:$4 sm:$0xff]  }
 0x480   :  { %7387 = vmatprep.subr.bf16.mxu0 %v14212_v36  ;;  %7602 = vmatprep.subr.bf16.mxu1 %v14215_v37  ;;  %v14285_v36 = vld [vmem:[#allocation9 + $0x9a8] ss:$16 sps:$4 sm:$0xff]   ;;  %v14290_v37 = vld [vmem:[#allocation9 + $0x9c4] ss:$16 sps:$4 sm:$0xff]  }
 0x481   :  { %7417 = vmatprep.mubr.bf16.mxu0 %v14302_v38  ;;  %7632 = vmatprep.mubr.bf16.mxu1 %v14302_v38  ;;  %v14293_v38 = vld [vmem:[#allocation9 + $0x9cc] ss:$16 sps:$4 sm:$0xff]  }
 0x483   :  { %7388 = vmatpush1.bf16.msra.mxu0 %v14210_v41  ;;  %7603 = vmatpush1.bf16.msra.mxu1 %v14213_v44  ;;  %v14288_v41 = vld [vmem:[#allocation9 + $0x9c0] ss:$16 sps:$4 sm:$0xff]   ;;  %v14291_v44 = vld [vmem:[#allocation9 + $0x9c8] ss:$16 sps:$4 sm:$0xff]  }
 0x484   :  { %7389 = vmatprep.subr.bf16.mxu0 %v14218_v45  ;;  %7604 = vmatprep.subr.bf16.mxu1 %v14221_v46  ;;  %v14296_v45 = vld [vmem:[#allocation9 + $0x9e4] ss:$16 sps:$4 sm:$0xff]   ;;  %v14299_v46 = vld [vmem:[#allocation9 + $0x9ec] ss:$16 sps:$4 sm:$0xff]  }
 0x487   :  { %7390 = vmatpush1.bf16.msra.mxu0 %v14216_v47  ;;  %7605 = vmatpush1.bf16.msra.mxu1 %v14219_v48  ;;  %v14294_v47 = vld [vmem:[#allocation9 + $0x9e0] ss:$16 sps:$4 sm:$0xff]   ;;  %v14297_v48 = vld [vmem:[#allocation9 + $0x9e8] ss:$16 sps:$4 sm:$0xff]  }
 0x488   :  { %7391 = vmatprep.subr.bf16.mxu0 %v14224_v49  ;;  %7606 = vmatprep.subr.bf16.mxu1 %v14227_v50  ;;  %v14305_v49 = vld [vmem:[#allocation13 + $0x4] ss:$16 sps:$4 sm:$0xff]   ;;  %v14308_v50 = vld [vmem:[#allocation13 + $0xc] ss:$16 sps:$4 sm:$0xff]  }
 0x48b   :  { %7392 = vmatpush1.bf16.msra.mxu0 %v14222_v53  ;;  %7607 = vmatpush1.bf16.msra.mxu1 %v14225_v54  ;;  %v14300_v53 = vld [vmem:[%s15941_s2 + $0x20] ss:$40 sps:$4 sm:$0xff]   ;;  %v14303_v54 = vld [vmem:[#allocation13] ss:$16 sps:$4 sm:$0xff]  }
 0x48c   :  { %7393 = vmatprep.subr.bf16.mxu0 %v14230_v55  ;;  %7608 = vmatprep.subr.bf16.mxu1 %v14233_v56  ;;  %v14306_v55 = vld [vmem:[#allocation13 + $0x8] ss:$16 sps:$4 sm:$0xff]   ;;  %v14311_v56 = vld [vmem:[#allocation13 + $0x24] ss:$16 sps:$4 sm:$0xff]  }
 0x48f   :  { %7394 = vmatpush1.bf16.msra.mxu0 %v14228_v61  ;;  %7609 = vmatpush1.bf16.msra.mxu1 %v14231_v0  ;;  %v14314_v61 = vld [vmem:[#allocation13 + $0x2c] ss:$16 sps:$4 sm:$0xff]   ;;  %v14309_v0 = vld [vmem:[#allocation13 + $0x20] ss:$16 sps:$4 sm:$0xff]  }
 0x490   :  { %7395 = vmatprep.subr.bf16.mxu0 %v14236_v1  ;;  %7610 = vmatprep.subr.bf16.mxu1 %v14239_v2  ;;  %v14312_v1 = vld [vmem:[#allocation13 + $0x28] ss:$16 sps:$4 sm:$0xff]   ;;  %v14317_v2 = vld [vmem:[#allocation13 + $0x44] ss:$16 sps:$4 sm:$0xff]  }
 0x493   :  { %7396 = vmatpush1.bf16.msra.mxu0 %v14234_v3  ;;  %7611 = vmatpush1.bf16.msra.mxu1 %v14237_v4  ;;  %v14320_v3 = vld [vmem:[#allocation13 + $0x4c] ss:$16 sps:$4 sm:$0xff]   ;;  %v14315_v4 = vld [vmem:[#allocation13 + $0x40] ss:$16 sps:$4 sm:$0xff]  }
 0x494   :  { %7397 = vmatprep.subr.bf16.mxu0 %v14242_v9  ;;  %7612 = vmatprep.subr.bf16.mxu1 %v14245_v10  ;;  %v14318_v9 = vld [vmem:[#allocation13 + $0x48] ss:$16 sps:$4 sm:$0xff]   ;;  %v14323_v10 = vld [vmem:[#allocation13 + $0x64] ss:$16 sps:$4 sm:$0xff]  }
 0x497   :  { %7398 = vmatpush1.bf16.msra.mxu0 %v14240_v11  ;;  %7613 = vmatpush1.bf16.msra.mxu1 %v14243_v14  ;;  %v14326_v11 = vld [vmem:[#allocation13 + $0x6c] ss:$16 sps:$4 sm:$0xff]   ;;  %v14321_v14 = vld [vmem:[#allocation13 + $0x60] ss:$16 sps:$4 sm:$0xff]  }
 0x498   :  { %7399 = vmatprep.subr.bf16.mxu0 %v14248_v17  ;;  %7614 = vmatprep.subr.bf16.mxu1 %v14251_v18  ;;  %v14324_v17 = vld [vmem:[#allocation13 + $0x68] ss:$16 sps:$4 sm:$0xff]   ;;  %v14329_v18 = vld [vmem:[#allocation13 + $0x84] ss:$16 sps:$4 sm:$0xff]  }
 0x49b   :  { %7400 = vmatpush1.bf16.msra.mxu0 %v14246_v19  ;;  %7615 = vmatpush1.bf16.msra.mxu1 %v14249_v20  ;;  %v14327_v19 = vld [vmem:[#allocation13 + $0x80] ss:$16 sps:$4 sm:$0xff]   ;;  %v14330_v20 = vld [vmem:[#allocation13 + $0x88] ss:$16 sps:$4 sm:$0xff]  }
 0x49c   :  { %7401 = vmatprep.subr.bf16.mxu0 %v14254_v21  ;;  %7616 = vmatprep.subr.bf16.mxu1 %v14257_v22  ;;  %v14335_v21 = vld [vmem:[#allocation13 + $0xa4] ss:$16 sps:$4 sm:$0xff]   ;;  %v14338_v22 = vld [vmem:[#allocation13 + $0xac] ss:$16 sps:$4 sm:$0xff]  }
 0x49f   :  { %7402 = vmatpush1.bf16.msra.mxu0 %v14252_v23  ;;  %7617 = vmatpush1.bf16.msra.mxu1 %v14255_v24  ;;  %v14333_v23 = vld [vmem:[#allocation13 + $0xa0] ss:$16 sps:$4 sm:$0xff]   ;;  %v14336_v24 = vld [vmem:[#allocation13 + $0xa8] ss:$16 sps:$4 sm:$0xff]  }
 0x4a0   :  { %7403 = vmatprep.subr.bf16.mxu0 %v14260_v26  ;;  %7618 = vmatprep.subr.bf16.mxu1 %v14263_v58  ;;  %v14341_v26 = vld [vmem:[#allocation13 + $0xc4] ss:$16 sps:$4 sm:$0xff]   ;;  %v14344_v58 = vld [vmem:[#allocation13 + $0xcc] ss:$16 sps:$4 sm:$0xff]  }
 0x4a3   :  { %7404 = vmatpush1.bf16.msra.mxu0 %v14258_v6  ;;  %7619 = vmatpush1.bf16.msra.mxu1 %v14261_v27  ;;  %v14339_v6 = vld [vmem:[#allocation13 + $0xc0] ss:$16 sps:$4 sm:$0xff]   ;;  %v14342_v27 = vld [vmem:[#allocation13 + $0xc8] ss:$16 sps:$4 sm:$0xff]  }
 0x4a4   :  { %7405 = vmatprep.subr.bf16.mxu0 %v14266_v7  ;;  %7620 = vmatprep.subr.bf16.mxu1 %v14269_v29  ;;  %v14347_v7 = vld [vmem:[#allocation13 + $0xe4] ss:$16 sps:$4 sm:$0xff]   ;;  %v14350_v29 = vld [vmem:[#allocation13 + $0xec] ss:$16 sps:$4 sm:$0xff]  }
 0x4a7   :  { %7406 = vmatpush1.bf16.msra.mxu0 %v14264_v62  ;;  %7621 = vmatpush1.bf16.msra.mxu1 %v14267_v31  ;;  %v14345_v62 = vld [vmem:[#allocation13 + $0xe0] ss:$16 sps:$4 sm:$0xff]   ;;  %v14348_v31 = vld [vmem:[#allocation13 + $0xe8] ss:$16 sps:$4 sm:$0xff]  }
 0x4a8   :  { %7407 = vmatprep.subr.bf16.mxu0 %v14272_v51  ;;  %7622 = vmatprep.subr.bf16.mxu1 %v14275_v5  ;;  %v14353_v51 = vld [vmem:[#allocation13 + $0x104] ss:$16 sps:$4 sm:$0xff]   ;;  %v14356_v5 = vld [vmem:[#allocation13 + $0x10c] ss:$16 sps:$4 sm:$0xff]  }
 0x4ab   :  { %7408 = vmatpush1.bf16.msra.mxu0 %v14270_v63  ;;  %7623 = vmatpush1.bf16.msra.mxu1 %v14273_v8  ;;  %v14351_v63 = vld [vmem:[#allocation13 + $0x100] ss:$16 sps:$4 sm:$0xff]   ;;  %v14354_v8 = vld [vmem:[#allocation13 + $0x108] ss:$16 sps:$4 sm:$0xff]  }
 0x4ac   :  { %7409 = vmatprep.subr.bf16.mxu0 %v14278_v13  ;;  %7624 = vmatprep.subr.bf16.mxu1 %v14281_v57  ;;  %v14359_v13 = vld [vmem:[#allocation13 + $0x124] ss:$16 sps:$4 sm:$0xff]   ;;  %v14362_v57 = vld [vmem:[#allocation13 + $0x12c] ss:$16 sps:$4 sm:$0xff]  }
 0x4af   :  { %7410 = vmatpush1.bf16.msra.mxu0 %v14276_v15  ;;  %7625 = vmatpush1.bf16.msra.mxu1 %v14279_v34  ;;  %v14357_v15 = vld [vmem:[#allocation13 + $0x120] ss:$16 sps:$4 sm:$0xff]   ;;  %v14360_v34 = vld [vmem:[#allocation13 + $0x128] ss:$16 sps:$4 sm:$0xff]  }
 0x4b0   :  { %7411 = vmatprep.subr.bf16.mxu0 %v14284_v60  ;;  %7626 = vmatprep.subr.bf16.mxu1 %v14287_v35  ;;  %v14365_v60 = vld [vmem:[#allocation13 + $0x144] ss:$16 sps:$4 sm:$0xff]   ;;  %v14368_v35 = vld [vmem:[#allocation13 + $0x14c] ss:$16 sps:$4 sm:$0xff]  }
 0x4b3   :  { %7412 = vmatpush1.bf16.msra.mxu0 %v14282_v16  ;;  %7627 = vmatpush1.bf16.msra.mxu1 %v14285_v36  ;;  %v14363_v16 = vld [vmem:[#allocation13 + $0x140] ss:$16 sps:$4 sm:$0xff]   ;;  %v14366_v36 = vld [vmem:[#allocation13 + $0x148] ss:$16 sps:$4 sm:$0xff]  }
 0x4b4   :  { %7413 = vmatprep.subr.bf16.mxu0 %v14290_v37  ;;  %7628 = vmatprep.subr.bf16.mxu1 %v14293_v38  ;;  %v14371_v37 = vld [vmem:[#allocation13 + $0x164] ss:$16 sps:$4 sm:$0xff]   ;;  %v14374_v38 = vld [vmem:[#allocation13 + $0x16c] ss:$16 sps:$4 sm:$0xff]  }
 0x4b7   :  { %7414 = vmatpush1.bf16.msra.mxu0 %v14288_v41  ;;  %7629 = vmatpush1.bf16.msra.mxu1 %v14291_v44  ;;  %v14369_v41 = vld [vmem:[#allocation13 + $0x160] ss:$16 sps:$4 sm:$0xff]   ;;  %v14372_v44 = vld [vmem:[#allocation13 + $0x168] ss:$16 sps:$4 sm:$0xff]  }
 0x4b8   :  { %7415 = vmatprep.subr.bf16.mxu0 %v14296_v45  ;;  %7630 = vmatprep.subr.bf16.mxu1 %v14299_v46  ;;  %v14377_v45 = vld [vmem:[#allocation13 + $0x184] ss:$16 sps:$4 sm:$0xff]   ;;  %v14380_v46 = vld [vmem:[#allocation13 + $0x18c] ss:$16 sps:$4 sm:$0xff]  }
 0x4bb   :  { %7416 = vmatpush1.bf16.msra.mxu0 %v14294_v47  ;;  %7631 = vmatpush1.bf16.msra.mxu1 %v14297_v48  ;;  %v14375_v47 = vld [vmem:[#allocation13 + $0x180] ss:$16 sps:$4 sm:$0xff]   ;;  %v14378_v48 = vld [vmem:[#allocation13 + $0x188] ss:$16 sps:$4 sm:$0xff]  }
 0x4bc   :  { %8603 = vmatprep.subr.bf16.mxu0 %v14305_v49  ;;  %8689 = vmatprep.subr.bf16.mxu1 %v14308_v50  ;;  %v14383_v49 = vld [vmem:[#allocation13 + $0x1a4] ss:$16 sps:$4 sm:$0xff]   ;;  %v14386_v50 = vld [vmem:[#allocation13 + $0x1ac] ss:$16 sps:$4 sm:$0xff]  }
 0x4be   :  { %7418 = vmatmul.mubr.bf16.vlgmr.msra.gmra.mrb[8].mxu0 %v14300_v53  ;;  %7633 = vmatmul.mubr.bf16.vlgmr.msra.gmra.mrb[8].mxu1 %v14300_v53  ;;  %v14381_v53 = vld [vmem:[#allocation13 + $0x1a0] ss:$16 sps:$4 sm:$0xff]  }
 0x4bf   :  { %8604 = vmatpush1.bf16.msra.mxu0 %v14303_v54  ;;  %8635 = vmatprep.mubr.bf16.mxu0 %v15848_v32  ;;  %v14384_v54 = vld [vmem:[#allocation13 + $0x1a8] ss:$16 sps:$4 sm:$0xff]  }
 0x4c0   :  { %8690 = vmatpush1.bf16.msra.mxu1 %v14306_v55  ;;  %8721 = vmatprep.mubr.bf16.mxu1 %v15848_v32  ;;  %v14332_v32 = vld [vmem:[#allocation13 + $0x8c] ss:$16 sps:$4 sm:$0xff]   ;;  %v14389_v55 = vld [vmem:[#allocation13 + $0x1c4] ss:$16 sps:$4 sm:$0xff]  }
 0x4c1   :  { %8605 = vmatprep.subr.bf16.mxu0 %v14311_v56  ;;  %8691 = vmatprep.subr.bf16.mxu1 %v14314_v61  ;;  %v14392_v56 = vld [vmem:[#allocation13 + $0x1cc] ss:$16 sps:$4 sm:$0xff]   ;;  %v14387_v61 = vld [vmem:[#allocation13 + $0x1c0] ss:$16 sps:$4 sm:$0xff]  }
 0x4c3   :  { %8606 = vmatpush1.bf16.msra.mxu0 %v14309_v0  ;;  %v14390_v0 = vld [vmem:[#allocation13 + $0x1c8] ss:$16 sps:$4 sm:$0xff]  }
 0x4c4   :  { %8692 = vmatpush1.bf16.msra.mxu1 %v14312_v1  ;;  %8607 = vmatprep.subr.bf16.mxu0 %v14317_v2  ;;  %v14395_v1 = vld [vmem:[#allocation13 + $0x1e4] ss:$16 sps:$4 sm:$0xff]   ;;  %v14398_v2 = vld [vmem:[#allocation13 + $0x1ec] ss:$16 sps:$4 sm:$0xff]  }
 0x4c5   :  { %8693 = vmatprep.subr.bf16.mxu1 %v14320_v3  ;;  %v14393_v3 = vld [vmem:[#allocation13 + $0x1e0] ss:$16 sps:$4 sm:$0xff]  }
 0x4c7   :  { %8608 = vmatpush1.bf16.msra.mxu0 %v14315_v4  ;;  %v14396_v4 = vld [vmem:[#allocation13 + $0x1e8] ss:$16 sps:$4 sm:$0xff]  }
 0x4c8   :  { %8694 = vmatpush1.bf16.msra.mxu1 %v14318_v9  ;;  %8609 = vmatprep.subr.bf16.mxu0 %v14323_v10  ;;  %v14401_v9 = vld [vmem:[#allocation13 + $0x204] ss:$16 sps:$4 sm:$0xff]   ;;  %v14404_v10 = vld [vmem:[#allocation13 + $0x20c] ss:$16 sps:$4 sm:$0xff]  }
 0x4c9   :  { %8695 = vmatprep.subr.bf16.mxu1 %v14326_v11  ;;  %v14399_v11 = vld [vmem:[#allocation13 + $0x200] ss:$16 sps:$4 sm:$0xff]  }
 0x4cb   :  { %8610 = vmatpush1.bf16.msra.mxu0 %v14321_v14  ;;  %v14402_v14 = vld [vmem:[#allocation13 + $0x208] ss:$16 sps:$4 sm:$0xff]  }
 0x4cc   :  { %8696 = vmatpush1.bf16.msra.mxu1 %v14324_v17  ;;  %8611 = vmatprep.subr.bf16.mxu0 %v14329_v18  ;;  %v14407_v17 = vld [vmem:[#allocation13 + $0x224] ss:$16 sps:$4 sm:$0xff]   ;;  %v14410_v18 = vld [vmem:[#allocation13 + $0x22c] ss:$16 sps:$4 sm:$0xff]  }
 0x4cd   :  { %8697 = vmatprep.subr.bf16.mxu1 %v14332_v32  ;;  %v14405_v32 = vld [vmem:[#allocation13 + $0x220] ss:$16 sps:$4 sm:$0xff]  }
 0x4cf   :  { %8612 = vmatpush1.bf16.msra.mxu0 %v14327_v19  ;;  %v14408_v19 = vld [vmem:[#allocation13 + $0x228] ss:$16 sps:$4 sm:$0xff]  }
 0x4d0   :  { %8698 = vmatpush1.bf16.msra.mxu1 %v14330_v20  ;;  %8613 = vmatprep.subr.bf16.mxu0 %v14335_v21  ;;  %v14413_v20 = vld [vmem:[#allocation13 + $0x244] ss:$16 sps:$4 sm:$0xff]   ;;  %v14416_v21 = vld [vmem:[#allocation13 + $0x24c] ss:$16 sps:$4 sm:$0xff]  }
 0x4d1   :  { %8699 = vmatprep.subr.bf16.mxu1 %v14338_v22  ;;  %v14411_v22 = vld [vmem:[#allocation13 + $0x240] ss:$16 sps:$4 sm:$0xff]  }
 0x4d3   :  { %8614 = vmatpush1.bf16.msra.mxu0 %v14333_v23  ;;  %v14414_v23 = vld [vmem:[#allocation13 + $0x248] ss:$16 sps:$4 sm:$0xff]  }
 0x4d4   :  { %8700 = vmatpush1.bf16.msra.mxu1 %v14336_v24  ;;  %8615 = vmatprep.subr.bf16.mxu0 %v14341_v26  ;;  %v14419_v24 = vld [vmem:[#allocation13 + $0x264] ss:$16 sps:$4 sm:$0xff]   ;;  %v14417_v26 = vld [vmem:[#allocation13 + $0x260] ss:$16 sps:$4 sm:$0xff]  }
 0x4d5   :  { %8701 = vmatprep.subr.bf16.mxu1 %v14344_v58  ;;  %v14420_v58 = vld [vmem:[#allocation13 + $0x268] ss:$16 sps:$4 sm:$0xff]  }
 0x4d7   :  { %8616 = vmatpush1.bf16.msra.mxu0 %v14339_v6  ;;  %v14425_v6 = vld [vmem:[#allocation13 + $0x284] ss:$16 sps:$4 sm:$0xff]  }
 0x4d8   :  { %8702 = vmatpush1.bf16.msra.mxu1 %v14342_v27  ;;  %8617 = vmatprep.subr.bf16.mxu0 %v14347_v7  ;;  %v14428_v27 = vld [vmem:[#allocation13 + $0x28c] ss:$16 sps:$4 sm:$0xff]   ;;  %v14426_v7 = vld [vmem:[#allocation13 + $0x288] ss:$16 sps:$4 sm:$0xff]  }
 0x4d9   :  { %8703 = vmatprep.subr.bf16.mxu1 %v14350_v29  ;;  %v14431_v29 = vld [vmem:[#allocation13 + $0x2a4] ss:$16 sps:$4 sm:$0xff]  }
 0x4db   :  { %8618 = vmatpush1.bf16.msra.mxu0 %v14345_v62  ;;  %v14434_v62 = vld [vmem:[#allocation13 + $0x2ac] ss:$16 sps:$4 sm:$0xff]  }
 0x4dc   :  { %8704 = vmatpush1.bf16.msra.mxu1 %v14348_v31  ;;  %8619 = vmatprep.subr.bf16.mxu0 %v14353_v51  ;;  %v14429_v31 = vld [vmem:[#allocation13 + $0x2a0] ss:$16 sps:$4 sm:$0xff]   ;;  %v14432_v51 = vld [vmem:[#allocation13 + $0x2a8] ss:$16 sps:$4 sm:$0xff]  }
 0x4dd   :  { %8705 = vmatprep.subr.bf16.mxu1 %v14356_v5  ;;  %v14437_v5 = vld [vmem:[#allocation13 + $0x2c4] ss:$16 sps:$4 sm:$0xff]  }
 0x4df   :  { %8620 = vmatpush1.bf16.msra.mxu0 %v14351_v63  ;;  %v14440_v63 = vld [vmem:[#allocation13 + $0x2cc] ss:$16 sps:$4 sm:$0xff]  }
 0x4e0   :  { %8706 = vmatpush1.bf16.msra.mxu1 %v14354_v8  ;;  %8621 = vmatprep.subr.bf16.mxu0 %v14359_v13  ;;  %v14435_v8 = vld [vmem:[#allocation13 + $0x2c0] ss:$16 sps:$4 sm:$0xff]   ;;  %v14438_v13 = vld [vmem:[#allocation13 + $0x2c8] ss:$16 sps:$4 sm:$0xff]  }
 0x4e1   :  { %8707 = vmatprep.subr.bf16.mxu1 %v14362_v57  ;;  %v14443_v57 = vld [vmem:[#allocation13 + $0x2e4] ss:$16 sps:$4 sm:$0xff]  }
 0x4e3   :  { %8622 = vmatpush1.bf16.msra.mxu0 %v14357_v15  ;;  %v14446_v15 = vld [vmem:[#allocation13 + $0x2ec] ss:$16 sps:$4 sm:$0xff]  }
 0x4e4   :  { %8708 = vmatpush1.bf16.msra.mxu1 %v14360_v34  ;;  %8623 = vmatprep.subr.bf16.mxu0 %v14365_v60  ;;  %v14441_v34 = vld [vmem:[#allocation13 + $0x2e0] ss:$16 sps:$4 sm:$0xff]   ;;  %v14444_v60 = vld [vmem:[#allocation13 + $0x2e8] ss:$16 sps:$4 sm:$0xff]  }
 0x4e5   :  { %8709 = vmatprep.subr.bf16.mxu1 %v14368_v35  ;;  %v14449_v35 = vld [vmem:[#allocation13 + $0x304] ss:$16 sps:$4 sm:$0xff]  }
 0x4e7   :  { %8624 = vmatpush1.bf16.msra.mxu0 %v14363_v16  ;;  %v14452_v16 = vld [vmem:[#allocation13 + $0x30c] ss:$16 sps:$4 sm:$0xff]  }
 0x4e8   :  { %8710 = vmatpush1.bf16.msra.mxu1 %v14366_v36  ;;  %8625 = vmatprep.subr.bf16.mxu0 %v14371_v37  ;;  %v14447_v36 = vld [vmem:[#allocation13 + $0x300] ss:$16 sps:$4 sm:$0xff]   ;;  %v14450_v37 = vld [vmem:[#allocation13 + $0x308] ss:$16 sps:$4 sm:$0xff]  }
 0x4e9   :  { %8711 = vmatprep.subr.bf16.mxu1 %v14374_v38  ;;  %v14455_v38 = vld [vmem:[#allocation13 + $0x324] ss:$16 sps:$4 sm:$0xff]  }
 0x4eb   :  { %8626 = vmatpush1.bf16.msra.mxu0 %v14369_v41  ;;  %v14458_v41 = vld [vmem:[#allocation13 + $0x32c] ss:$16 sps:$4 sm:$0xff]  }
 0x4ec   :  { %8712 = vmatpush1.bf16.msra.mxu1 %v14372_v44  ;;  %8627 = vmatprep.subr.bf16.mxu0 %v14377_v45  ;;  %v14453_v44 = vld [vmem:[#allocation13 + $0x320] ss:$16 sps:$4 sm:$0xff]   ;;  %v14456_v45 = vld [vmem:[#allocation13 + $0x328] ss:$16 sps:$4 sm:$0xff]  }
 0x4ed   :  { %8713 = vmatprep.subr.bf16.mxu1 %v14380_v46  ;;  %v14461_v46 = vld [vmem:[#allocation13 + $0x344] ss:$16 sps:$4 sm:$0xff]  }
 0x4ef   :  { %8628 = vmatpush1.bf16.msra.mxu0 %v14375_v47  ;;  %v14464_v47 = vld [vmem:[#allocation13 + $0x34c] ss:$16 sps:$4 sm:$0xff]  }
 0x4f0   :  { %8714 = vmatpush1.bf16.msra.mxu1 %v14378_v48  ;;  %8629 = vmatprep.subr.bf16.mxu0 %v14383_v49  ;;  %v14459_v48 = vld [vmem:[#allocation13 + $0x340] ss:$16 sps:$4 sm:$0xff]   ;;  %v14462_v49 = vld [vmem:[#allocation13 + $0x348] ss:$16 sps:$4 sm:$0xff]  }
 0x4f1   :  { %8715 = vmatprep.subr.bf16.mxu1 %v14386_v50  ;;  %v14467_v50 = vld [vmem:[#allocation13 + $0x364] ss:$16 sps:$4 sm:$0xff]  }
 0x4f3   :  { %8630 = vmatpush1.bf16.msra.mxu0 %v14381_v53  ;;  %v14470_v53 = vld [vmem:[#allocation13 + $0x36c] ss:$16 sps:$4 sm:$0xff]  }
 0x4f4   :  { %8716 = vmatpush1.bf16.msra.mxu1 %v14384_v54  ;;  %8631 = vmatprep.subr.bf16.mxu0 %v14389_v55  ;;  %v14465_v54 = vld [vmem:[#allocation13 + $0x360] ss:$16 sps:$4 sm:$0xff]   ;;  %v14468_v55 = vld [vmem:[#allocation13 + $0x368] ss:$16 sps:$4 sm:$0xff]  }
 0x4f5   :  { %8717 = vmatprep.subr.bf16.mxu1 %v14392_v56  ;;  %v14473_v56 = vld [vmem:[#allocation13 + $0x384] ss:$16 sps:$4 sm:$0xff]  }
 0x4f7   :  { %8632 = vmatpush1.bf16.msra.mxu0 %v14387_v61  ;;  %v14476_v61 = vld [vmem:[#allocation13 + $0x38c] ss:$16 sps:$4 sm:$0xff]  }
 0x4f8   :  { %8718 = vmatpush1.bf16.msra.mxu1 %v14390_v0  ;;  %8633 = vmatprep.subr.bf16.mxu0 %v14395_v1  ;;  %v14471_v0 = vld [vmem:[#allocation13 + $0x380] ss:$16 sps:$4 sm:$0xff]   ;;  %v14474_v1 = vld [vmem:[#allocation13 + $0x388] ss:$16 sps:$4 sm:$0xff]  }
 0x4f9   :  { %8719 = vmatprep.subr.bf16.mxu1 %v14398_v2  ;;  %v14479_v2 = vld [vmem:[#allocation13 + $0x3a4] ss:$16 sps:$4 sm:$0xff]  }
 0x4fb   :  { %8634 = vmatpush1.bf16.msra.mxu0 %v14393_v3  ;;  %v14482_v3 = vld [vmem:[#allocation13 + $0x3ac] ss:$16 sps:$4 sm:$0xff]  }
 0x4fc   :  { %8720 = vmatpush1.bf16.msra.mxu1 %v14396_v4  ;;  %8646 = vmatprep.subr.bf16.mxu0 %v14401_v9  ;;  %v14477_v4 = vld [vmem:[#allocation13 + $0x3a0] ss:$16 sps:$4 sm:$0xff]   ;;  %v14480_v9 = vld [vmem:[#allocation13 + $0x3a8] ss:$16 sps:$4 sm:$0xff]  }
 0x4fd   :  { %8732 = vmatprep.subr.bf16.mxu1 %v14404_v10  ;;  %v14485_v10 = vld [vmem:[#allocation13 + $0x3c4] ss:$16 sps:$4 sm:$0xff]  }
 0x4fe   :  { %8636 = vmatmul.mubr.bf16.vlgmr.msra.gmra.mrb[12].mxu0 %v15841_v12 }
 0x4ff   :  { %8722 = vmatmul.mubr.bf16.vlgmr.msra.gmra.mrb[12].mxu1 %v15841_v12  ;;  %8647 = vmatpush1.bf16.msra.mxu0 %v14399_v11  ;;  %v14422_v12 = vld [vmem:[#allocation13 + $0x26c] ss:$16 sps:$4 sm:$0xff]  }
 0x500   :  { %8678 = vmatprep.mubr.bf16.mxu0 %v15850_v33  ;;  %8733 = vmatpush1.bf16.msra.mxu1 %v14402_v14  ;;  %v14488_v11 = vld [vmem:[#allocation13 + $0x3cc] ss:$16 sps:$4 sm:$0xff]   ;;  %v14483_v14 = vld [vmem:[#allocation13 + $0x3c0] ss:$16 sps:$4 sm:$0xff]  }
 0x501   :  { %8764 = vmatprep.mubr.bf16.mxu1 %v15850_v33  ;;  %8648 = vmatprep.subr.bf16.mxu0 %v14407_v17  ;;  %v14423_v33 = vld [vmem:[#allocation13 + $0x280] ss:$16 sps:$4 sm:$0xff]   ;;  %v14486_v17 = vld [vmem:[#allocation13 + $0x3c8] ss:$16 sps:$4 sm:$0xff]  }
 0x502   :  { %8734 = vmatprep.subr.bf16.mxu1 %v14410_v18  ;;  %v14491_v18 = vld [vmem:[#allocation13 + $0x3e4] ss:$16 sps:$4 sm:$0xff]  }
 0x503   :  { %8649 = vmatpush1.bf16.msra.mxu0 %v14405_v32  ;;  %v14494_v32 = vld [vmem:[#allocation13 + $0x3ec] ss:$16 sps:$4 sm:$0xff]  }
 0x504   :  { %8735 = vmatpush1.bf16.msra.mxu1 %v14408_v19  ;;  %8650 = vmatprep.subr.bf16.mxu0 %v14413_v20  ;;  %v14489_v19 = vld [vmem:[#allocation13 + $0x3e0] ss:$16 sps:$4 sm:$0xff]   ;;  %v14492_v20 = vld [vmem:[#allocation13 + $0x3e8] ss:$16 sps:$4 sm:$0xff]  }
 0x505   :  { %8736 = vmatprep.subr.bf16.mxu1 %v14416_v21  ;;  %v14497_v21 = vld [vmem:[#allocation12 + $0x4] ss:$16 sps:$4 sm:$0xff]  }
 0x507   :  { %8651 = vmatpush1.bf16.msra.mxu0 %v14411_v22  ;;  %v14500_v22 = vld [vmem:[#allocation12 + $0xc] ss:$16 sps:$4 sm:$0xff]  }
 0x508   :  { %8737 = vmatpush1.bf16.msra.mxu1 %v14414_v23  ;;  %8652 = vmatprep.subr.bf16.mxu0 %v14419_v24  ;;  %v14495_v23 = vld [vmem:[#allocation12] ss:$16 sps:$4 sm:$0xff]   ;;  %v14498_v24 = vld [vmem:[#allocation12 + $0x8] ss:$16 sps:$4 sm:$0xff]  }
 0x509   :  { %8738 = vmatprep.subr.bf16.mxu1 %v14422_v12  ;;  %v14503_v12 = vld [vmem:[#allocation12 + $0x24] ss:$16 sps:$4 sm:$0xff]  }
 0x50b   :  { %8653 = vmatpush1.bf16.msra.mxu0 %v14417_v26  ;;  %v14506_v26 = vld [vmem:[#allocation12 + $0x2c] ss:$16 sps:$4 sm:$0xff]  }
 0x50c   :  { %8739 = vmatpush1.bf16.msra.mxu1 %v14420_v58  ;;  %8654 = vmatprep.subr.bf16.mxu0 %v14425_v6  ;;  %v14501_v58 = vld [vmem:[#allocation12 + $0x20] ss:$16 sps:$4 sm:$0xff]   ;;  %v14504_v6 = vld [vmem:[#allocation12 + $0x28] ss:$16 sps:$4 sm:$0xff]  }
 0x50d   :  { %8740 = vmatprep.subr.bf16.mxu1 %v14428_v27  ;;  %v14509_v27 = vld [vmem:[#allocation12 + $0x44] ss:$16 sps:$4 sm:$0xff]  }
 0x50f   :  { %8655 = vmatpush1.bf16.msra.mxu0 %v14423_v33  ;;  %v14512_v33 = vld [vmem:[#allocation12 + $0x4c] ss:$16 sps:$4 sm:$0xff]  }
 0x510   :  { %8741 = vmatpush1.bf16.msra.mxu1 %v14426_v7  ;;  %8656 = vmatprep.subr.bf16.mxu0 %v14431_v29  ;;  %v14507_v7 = vld [vmem:[#allocation12 + $0x40] ss:$16 sps:$4 sm:$0xff]   ;;  %v14510_v29 = vld [vmem:[#allocation12 + $0x48] ss:$16 sps:$4 sm:$0xff]  }
 0x511   :  { %8742 = vmatprep.subr.bf16.mxu1 %v14434_v62  ;;  %v14515_v62 = vld [vmem:[#allocation12 + $0x64] ss:$16 sps:$4 sm:$0xff]  }
 0x513   :  { %8657 = vmatpush1.bf16.msra.mxu0 %v14429_v31  ;;  %v14513_v31 = vld [vmem:[#allocation12 + $0x60] ss:$16 sps:$4 sm:$0xff]  }
 0x514   :  { %8743 = vmatpush1.bf16.msra.mxu1 %v14432_v51  ;;  %8658 = vmatprep.subr.bf16.mxu0 %v14437_v5  ;;  %v14516_v51 = vld [vmem:[#allocation12 + $0x68] ss:$16 sps:$4 sm:$0xff]   ;;  %v14521_v5 = vld [vmem:[#allocation12 + $0x84] ss:$16 sps:$4 sm:$0xff]  }
 0x515   :  { %8744 = vmatprep.subr.bf16.mxu1 %v14440_v63  ;;  %v14524_v63 = vld [vmem:[#allocation12 + $0x8c] ss:$16 sps:$4 sm:$0xff]  }
 0x517   :  { %8659 = vmatpush1.bf16.msra.mxu0 %v14435_v8  ;;  %v14522_v8 = vld [vmem:[#allocation12 + $0x88] ss:$16 sps:$4 sm:$0xff]  }
 0x518   :  { %8745 = vmatpush1.bf16.msra.mxu1 %v14438_v13  ;;  %8660 = vmatprep.subr.bf16.mxu0 %v14443_v57  ;;  %v14527_v13 = vld [vmem:[#allocation12 + $0xa4] ss:$16 sps:$4 sm:$0xff]   ;;  %v14530_v57 = vld [vmem:[#allocation12 + $0xac] ss:$16 sps:$4 sm:$0xff]  }
 0x519   :  { %8746 = vmatprep.subr.bf16.mxu1 %v14446_v15  ;;  %v14525_v15 = vld [vmem:[#allocation12 + $0xa0] ss:$16 sps:$4 sm:$0xff]  }
 0x51b   :  { %8661 = vmatpush1.bf16.msra.mxu0 %v14441_v34  ;;  %v14528_v34 = vld [vmem:[#allocation12 + $0xa8] ss:$16 sps:$4 sm:$0xff]  }
 0x51c   :  { %8747 = vmatpush1.bf16.msra.mxu1 %v14444_v60  ;;  %8662 = vmatprep.subr.bf16.mxu0 %v14449_v35  ;;  %v14533_v60 = vld [vmem:[#allocation12 + $0xc4] ss:$16 sps:$4 sm:$0xff]   ;;  %v14536_v35 = vld [vmem:[#allocation12 + $0xcc] ss:$16 sps:$4 sm:$0xff]  }
 0x51d   :  { %8748 = vmatprep.subr.bf16.mxu1 %v14452_v16  ;;  %v14531_v16 = vld [vmem:[#allocation12 + $0xc0] ss:$16 sps:$4 sm:$0xff]  }
 0x51f   :  { %8663 = vmatpush1.bf16.msra.mxu0 %v14447_v36  ;;  %v14534_v36 = vld [vmem:[#allocation12 + $0xc8] ss:$16 sps:$4 sm:$0xff]  }
 0x520   :  { %8749 = vmatpush1.bf16.msra.mxu1 %v14450_v37  ;;  %8664 = vmatprep.subr.bf16.mxu0 %v14455_v38  ;;  %v14539_v37 = vld [vmem:[#allocation12 + $0xe4] ss:$16 sps:$4 sm:$0xff]   ;;  %v14542_v38 = vld [vmem:[#allocation12 + $0xec] ss:$16 sps:$4 sm:$0xff]  }
 0x521   :  { %8750 = vmatprep.subr.bf16.mxu1 %v14458_v41  ;;  %v14537_v41 = vld [vmem:[#allocation12 + $0xe0] ss:$16 sps:$4 sm:$0xff]  }
 0x523   :  { %8665 = vmatpush1.bf16.msra.mxu0 %v14453_v44  ;;  %v14540_v44 = vld [vmem:[#allocation12 + $0xe8] ss:$16 sps:$4 sm:$0xff]  }
 0x524   :  { %8751 = vmatpush1.bf16.msra.mxu1 %v14456_v45  ;;  %8666 = vmatprep.subr.bf16.mxu0 %v14461_v46  ;;  %v14545_v45 = vld [vmem:[#allocation12 + $0x104] ss:$16 sps:$4 sm:$0xff]   ;;  %v14548_v46 = vld [vmem:[#allocation12 + $0x10c] ss:$16 sps:$4 sm:$0xff]  }
 0x525   :  { %8752 = vmatprep.subr.bf16.mxu1 %v14464_v47  ;;  %v14543_v47 = vld [vmem:[#allocation12 + $0x100] ss:$16 sps:$4 sm:$0xff]  }
 0x527   :  { %8667 = vmatpush1.bf16.msra.mxu0 %v14459_v48  ;;  %v14546_v48 = vld [vmem:[#allocation12 + $0x108] ss:$16 sps:$4 sm:$0xff]  }
 0x528   :  { %8753 = vmatpush1.bf16.msra.mxu1 %v14462_v49  ;;  %8668 = vmatprep.subr.bf16.mxu0 %v14467_v50  ;;  %v14551_v49 = vld [vmem:[#allocation12 + $0x124] ss:$16 sps:$4 sm:$0xff]   ;;  %v14554_v50 = vld [vmem:[#allocation12 + $0x12c] ss:$16 sps:$4 sm:$0xff]  }
 0x529   :  { %8754 = vmatprep.subr.bf16.mxu1 %v14470_v53  ;;  %v14549_v53 = vld [vmem:[#allocation12 + $0x120] ss:$16 sps:$4 sm:$0xff]  }
 0x52b   :  { %8669 = vmatpush1.bf16.msra.mxu0 %v14465_v54  ;;  %v14552_v54 = vld [vmem:[#allocation12 + $0x128] ss:$16 sps:$4 sm:$0xff]  }
 0x52c   :  { %8755 = vmatpush1.bf16.msra.mxu1 %v14468_v55  ;;  %8670 = vmatprep.subr.bf16.mxu0 %v14473_v56  ;;  %v14557_v55 = vld [vmem:[#allocation12 + $0x144] ss:$16 sps:$4 sm:$0xff]   ;;  %v14560_v56 = vld [vmem:[#allocation12 + $0x14c] ss:$16 sps:$4 sm:$0xff]  }
 0x52d   :  { %8756 = vmatprep.subr.bf16.mxu1 %v14476_v61  ;;  %v14555_v61 = vld [vmem:[#allocation12 + $0x140] ss:$16 sps:$4 sm:$0xff]  }
 0x52f   :  { %8671 = vmatpush1.bf16.msra.mxu0 %v14471_v0  ;;  %v14558_v0 = vld [vmem:[#allocation12 + $0x148] ss:$16 sps:$4 sm:$0xff]  }
 0x530   :  { %8757 = vmatpush1.bf16.msra.mxu1 %v14474_v1  ;;  %8672 = vmatprep.subr.bf16.mxu0 %v14479_v2  ;;  %v14563_v1 = vld [vmem:[#allocation12 + $0x164] ss:$16 sps:$4 sm:$0xff]   ;;  %v14566_v2 = vld [vmem:[#allocation12 + $0x16c] ss:$16 sps:$4 sm:$0xff]  }
 0x531   :  { %8758 = vmatprep.subr.bf16.mxu1 %v14482_v3  ;;  %v14561_v3 = vld [vmem:[#allocation12 + $0x160] ss:$16 sps:$4 sm:$0xff]  }
 0x533   :  { %8673 = vmatpush1.bf16.msra.mxu0 %v14477_v4  ;;  %v14564_v4 = vld [vmem:[#allocation12 + $0x168] ss:$16 sps:$4 sm:$0xff]  }
 0x534   :  { %8759 = vmatpush1.bf16.msra.mxu1 %v14480_v9  ;;  %8674 = vmatprep.subr.bf16.mxu0 %v14485_v10  ;;  %v14569_v9 = vld [vmem:[#allocation12 + $0x184] ss:$16 sps:$4 sm:$0xff]   ;;  %v14572_v10 = vld [vmem:[#allocation12 + $0x18c] ss:$16 sps:$4 sm:$0xff]  }
 0x535   :  { %8760 = vmatprep.subr.bf16.mxu1 %v14488_v11  ;;  %v14567_v11 = vld [vmem:[#allocation12 + $0x180] ss:$16 sps:$4 sm:$0xff]  }
 0x537   :  { %8675 = vmatpush1.bf16.msra.mxu0 %v14483_v14  ;;  %v14570_v14 = vld [vmem:[#allocation12 + $0x188] ss:$16 sps:$4 sm:$0xff]  }
 0x538   :  { %8761 = vmatpush1.bf16.msra.mxu1 %v14486_v17  ;;  %8676 = vmatprep.subr.bf16.mxu0 %v14491_v18  ;;  %v14575_v17 = vld [vmem:[#allocation12 + $0x1a4] ss:$16 sps:$4 sm:$0xff]   ;;  %v14578_v18 = vld [vmem:[#allocation12 + $0x1ac] ss:$16 sps:$4 sm:$0xff]  }
 0x539   :  { %8762 = vmatprep.subr.bf16.mxu1 %v14494_v32  ;;  %v14573_v32 = vld [vmem:[#allocation12 + $0x1a0] ss:$16 sps:$4 sm:$0xff]  }
 0x53b   :  { %8677 = vmatpush1.bf16.msra.mxu0 %v14489_v19  ;;  %v14576_v19 = vld [vmem:[#allocation12 + $0x1a8] ss:$16 sps:$4 sm:$0xff]  }
 0x53c   :  { %8763 = vmatpush1.bf16.msra.mxu1 %v14492_v20  ;;  %9415 = vmatprep.subr.bf16.mxu0 %v14497_v21  ;;  %v14581_v20 = vld [vmem:[#allocation12 + $0x1c4] ss:$16 sps:$4 sm:$0xff]   ;;  %v14584_v21 = vld [vmem:[#allocation12 + $0x1cc] ss:$16 sps:$4 sm:$0xff]  }
 0x53d   :  { %9501 = vmatprep.subr.bf16.mxu1 %v14500_v22  ;;  %v14579_v22 = vld [vmem:[#allocation12 + $0x1c0] ss:$16 sps:$4 sm:$0xff]  }
 0x53e   :  { %8679 = vmatmul.mubr.bf16.vlgmr.msra.gmra.mrb[12].mxu0 %v15845_v52 }
 0x53f   :  { %8765 = vmatmul.mubr.bf16.vlgmr.msra.gmra.mrb[12].mxu1 %v15845_v52  ;;  %9416 = vmatpush1.bf16.msra.mxu0 %v14495_v23  ;;  %v14518_v52 = vld [vmem:[#allocation12 + $0x6c] ss:$16 sps:$4 sm:$0xff]   ;;  %v14582_v23 = vld [vmem:[#allocation12 + $0x1c8] ss:$16 sps:$4 sm:$0xff]  }
 0x540   :  { %9447 = vmatprep.mubr.bf16.mxu0 %v15774_v28  ;;  %9502 = vmatpush1.bf16.msra.mxu1 %v14498_v24  ;;  %v14587_v24 = vld [vmem:[#allocation12 + $0x1e4] ss:$16 sps:$4 sm:$0xff]  }
 0x541   :  { %9533 = vmatprep.mubr.bf16.mxu1 %v15774_v28  ;;  %9417 = vmatprep.subr.bf16.mxu0 %v14503_v12  ;;  %v14519_v28 = vld [vmem:[#allocation12 + $0x80] ss:$16 sps:$4 sm:$0xff]   ;;  %v14590_v12 = vld [vmem:[#allocation12 + $0x1ec] ss:$16 sps:$4 sm:$0xff]  }
 0x542   :  { %9503 = vmatprep.subr.bf16.mxu1 %v14506_v26  ;;  %v14585_v26 = vld [vmem:[#allocation12 + $0x1e0] ss:$16 sps:$4 sm:$0xff]  }
 0x543   :  { %9418 = vmatpush1.bf16.msra.mxu0 %v14501_v58  ;;  %v14588_v58 = vld [vmem:[#allocation12 + $0x1e8] ss:$16 sps:$4 sm:$0xff]  }
 0x544   :  { %9504 = vmatpush1.bf16.msra.mxu1 %v14504_v6  ;;  %9419 = vmatprep.subr.bf16.mxu0 %v14509_v27  ;;  %v14593_v6 = vld [vmem:[#allocation12 + $0x204] ss:$16 sps:$4 sm:$0xff]   ;;  %v14596_v27 = vld [vmem:[#allocation12 + $0x20c] ss:$16 sps:$4 sm:$0xff]  }
 0x545   :  { %9505 = vmatprep.subr.bf16.mxu1 %v14512_v33  ;;  %v14591_v33 = vld [vmem:[#allocation12 + $0x200] ss:$16 sps:$4 sm:$0xff]  }
 0x547   :  { %9420 = vmatpush1.bf16.msra.mxu0 %v14507_v7  ;;  %v14594_v7 = vld [vmem:[#allocation12 + $0x208] ss:$16 sps:$4 sm:$0xff]  }
 0x548   :  { %9506 = vmatpush1.bf16.msra.mxu1 %v14510_v29  ;;  %9421 = vmatprep.subr.bf16.mxu0 %v14515_v62  ;;  %v14599_v29 = vld [vmem:[#allocation12 + $0x224] ss:$16 sps:$4 sm:$0xff]   ;;  %v14602_v62 = vld [vmem:[#allocation12 + $0x22c] ss:$16 sps:$4 sm:$0xff]  }
 0x549   :  { %9507 = vmatprep.subr.bf16.mxu1 %v14518_v52  ;;  %v14597_v52 = vld [vmem:[#allocation12 + $0x220] ss:$16 sps:$4 sm:$0xff]  }
 0x54b   :  { %9422 = vmatpush1.bf16.msra.mxu0 %v14513_v31  ;;  %v14600_v31 = vld [vmem:[#allocation12 + $0x228] ss:$16 sps:$4 sm:$0xff]  }
 0x54c   :  { %9508 = vmatpush1.bf16.msra.mxu1 %v14516_v51  ;;  %9423 = vmatprep.subr.bf16.mxu0 %v14521_v5  ;;  %v14605_v51 = vld [vmem:[#allocation12 + $0x244] ss:$16 sps:$4 sm:$0xff]   ;;  %v14608_v5 = vld [vmem:[#allocation12 + $0x24c] ss:$16 sps:$4 sm:$0xff]  }
 0x54d   :  { %9509 = vmatprep.subr.bf16.mxu1 %v14524_v63  ;;  %v14603_v63 = vld [vmem:[#allocation12 + $0x240] ss:$16 sps:$4 sm:$0xff]  }
 0x54f   :  { %9424 = vmatpush1.bf16.msra.mxu0 %v14519_v28  ;;  %v14606_v28 = vld [vmem:[#allocation12 + $0x248] ss:$16 sps:$4 sm:$0xff]  }
 0x550   :  { %9510 = vmatpush1.bf16.msra.mxu1 %v14522_v8  ;;  %9425 = vmatprep.subr.bf16.mxu0 %v14527_v13  ;;  %v14611_v8 = vld [vmem:[#allocation12 + $0x264] ss:$16 sps:$4 sm:$0xff]   ;;  %v14609_v13 = vld [vmem:[#allocation12 + $0x260] ss:$16 sps:$4 sm:$0xff]  }
 0x551   :  { %9511 = vmatprep.subr.bf16.mxu1 %v14530_v57  ;;  %v14612_v57 = vld [vmem:[#allocation12 + $0x268] ss:$16 sps:$4 sm:$0xff]  }
 0x553   :  { %9426 = vmatpush1.bf16.msra.mxu0 %v14525_v15  ;;  %v14617_v15 = vld [vmem:[#allocation12 + $0x284] ss:$16 sps:$4 sm:$0xff]  }
 0x554   :  { %9512 = vmatpush1.bf16.msra.mxu1 %v14528_v34  ;;  %9427 = vmatprep.subr.bf16.mxu0 %v14533_v60  ;;  %v14620_v34 = vld [vmem:[#allocation12 + $0x28c] ss:$16 sps:$4 sm:$0xff]  }
 0x555   :  { %9513 = vmatprep.subr.bf16.mxu1 %v14536_v35  ;;  %v5541_v60 = vld [vmem:[#allocation10] sm:$0xf]  ;;  %v14618_v35 = vld [vmem:[#allocation12 + $0x288] ss:$16 sps:$4 sm:$0xff]  }
 0x557   :  { %9428 = vmatpush1.bf16.msra.mxu0 %v14531_v16  ;;  %v14623_v16 = vld [vmem:[#allocation12 + $0x2a4] ss:$16 sps:$4 sm:$0xff]  }
 0x558   :  { %9514 = vmatpush1.bf16.msra.mxu1 %v14534_v36  ;;  %9429 = vmatprep.subr.bf16.mxu0 %v14539_v37  ;;  %v14626_v36 = vld [vmem:[#allocation12 + $0x2ac] ss:$16 sps:$4 sm:$0xff]   ;;  %v5546_v37 = vrot.slane %v5541_v60, %v15726_v39 }
 0x559   :  { %9515 = vmatprep.subr.bf16.mxu1 %v14542_v38  ;;  %v5554_v38 = vrot.slane %v5541_v60, %v15728_v40 }
 0x55b   :  { %9430 = vmatpush1.bf16.msra.mxu0 %v14537_v41  ;;  %v5550_v41 = vrot.slane %v5541_v60, %v15730_v42 }
 0x55c   :  { %9516 = vmatpush1.bf16.msra.mxu1 %v14540_v44  ;;  %9431 = vmatprep.subr.bf16.mxu0 %v14545_v45  ;;  %v5558_v44 = vrot.slane %v5541_v60, %v15732_v43  ;;  %v14621_v45 = vld [vmem:[#allocation12 + $0x2a0] ss:$16 sps:$4 sm:$0xff]  }
 0x55d   :  { %9517 = vmatprep.subr.bf16.mxu1 %v14548_v46  ;;  %v14624_v46 = vld [vmem:[#allocation12 + $0x2a8] ss:$16 sps:$4 sm:$0xff]   ;;  %v14651_v60 = vld [vmem:[#allocation12 + $0x340] ss:$16 sps:$4 sm:$0xff]  }
 0x55f   :  { %9432 = vmatpush1.bf16.msra.mxu0 %v14543_v47  ;;  %v14629_v47 = vld [vmem:[#allocation12 + $0x2c4] ss:$16 sps:$4 sm:$0xff]  }
 0x560   :  { %9518 = vmatpush1.bf16.msra.mxu1 %v14546_v48  ;;  %9433 = vmatprep.subr.bf16.mxu0 %v14551_v49 }
 0x561   :  { %9519 = vmatprep.subr.bf16.mxu1 %v14554_v50  ;;  %v14632_v50 = vld [vmem:[#allocation12 + $0x2cc] ss:$16 sps:$4 sm:$0xff]  }
 0x563   :  { %9434 = vmatpush1.bf16.msra.mxu0 %v14549_v53 }
 0x564   :  { %9520 = vmatpush1.bf16.msra.mxu1 %v14552_v54  ;;  %9435 = vmatprep.subr.bf16.mxu0 %v14557_v55 }
 0x565   :  { %9521 = vmatprep.subr.bf16.mxu1 %v14560_v56 }
 0x567   :  { %9436 = vmatpush1.bf16.msra.mxu0 %v14555_v61  ;;  %v14627_v61 = vld [vmem:[#allocation12 + $0x2c0] ss:$16 sps:$4 sm:$0xff]  }
 0x568   :  { %9522 = vmatpush1.bf16.msra.mxu1 %v14558_v0  ;;  %9437 = vmatprep.subr.bf16.mxu0 %v14563_v1 }
 0x569   :  { %9523 = vmatprep.subr.bf16.mxu1 %v14566_v2 }
 0x56b   :  { %9438 = vmatpush1.bf16.msra.mxu0 %v14561_v3 }
 0x56c   :  { %9524 = vmatpush1.bf16.msra.mxu1 %v14564_v4  ;;  %9439 = vmatprep.subr.bf16.mxu0 %v14569_v9  ;;  %v14630_v4 = vld [vmem:[#allocation12 + $0x2c8] ss:$16 sps:$4 sm:$0xff]   ;;  %v14635_v9 = vld [vmem:[#allocation12 + $0x2e4] ss:$16 sps:$4 sm:$0xff]  }
 0x56d   :  { %9525 = vmatprep.subr.bf16.mxu1 %v14572_v10 }
 0x56f   :  { %9440 = vmatpush1.bf16.msra.mxu0 %v14567_v11 }
 0x570   :  { %9526 = vmatpush1.bf16.msra.mxu1 %v14570_v14  ;;  %9441 = vmatprep.subr.bf16.mxu0 %v14575_v17 }
 0x571   :  { %9527 = vmatprep.subr.bf16.mxu1 %v14578_v18 }
 0x573   :  { %9442 = vmatpush1.bf16.msra.mxu0 %v14573_v32 }
 0x574   :  { %9528 = vmatpush1.bf16.msra.mxu1 %v14576_v19  ;;  %9443 = vmatprep.subr.bf16.mxu0 %v14581_v20 }
 0x575   :  { %9529 = vmatprep.subr.bf16.mxu1 %v14584_v21 }
 0x577   :  { %9444 = vmatpush1.bf16.msra.mxu0 %v14579_v22 }
 0x578   :  { %9530 = vmatpush1.bf16.msra.mxu1 %v14582_v23  ;;  %9445 = vmatprep.subr.bf16.mxu0 %v14587_v24  ;;  %v14638_v23 = vld [vmem:[#allocation12 + $0x2ec] ss:$16 sps:$4 sm:$0xff]  }
 0x579   :  { %9531 = vmatprep.subr.bf16.mxu1 %v14590_v12 }
 0x57b   :  { %9446 = vmatpush1.bf16.msra.mxu0 %v14585_v26  ;;  %v14633_v26 = vld [vmem:[#allocation12 + $0x2e0] ss:$16 sps:$4 sm:$0xff]  }
 0x57c   :  { %9532 = vmatpush1.bf16.msra.mxu1 %v14588_v58  ;;  %9458 = vmatprep.subr.bf16.mxu0 %v14593_v6  ;;  %v14636_v6 = vld [vmem:[#allocation12 + $0x2e8] ss:$16 sps:$4 sm:$0xff]  }
 0x57d   :  { %9544 = vmatprep.subr.bf16.mxu1 %v14596_v27  ;;  %v14641_v27 = vld [vmem:[#allocation12 + $0x304] ss:$16 sps:$4 sm:$0xff]  }
 0x57e   :  { %9448 = vmatmul.mubr.bf16.vlgmr.msra.gmra.mrb[12].mxu0 %v15767_v25 }
 0x57f   :  { %9534 = vmatmul.mubr.bf16.vlgmr.msra.gmra.mrb[12].mxu1 %v15767_v25  ;;  %9459 = vmatpush1.bf16.msra.mxu0 %v14591_v33  ;;  %v14614_v25 = vld [vmem:[#allocation12 + $0x26c] ss:$16 sps:$4 sm:$0xff]  }
 0x580   :  { %9490 = vmatprep.mubr.bf16.mxu0 %v15776_v30  ;;  %9545 = vmatpush1.bf16.msra.mxu1 %v14594_v7  ;;  %v14644_v7 = vld [vmem:[#allocation12 + $0x30c] ss:$16 sps:$4 sm:$0xff]  }
 0x581   :  { %9576 = vmatprep.mubr.bf16.mxu1 %v15776_v30  ;;  %9460 = vmatprep.subr.bf16.mxu0 %v14599_v29  ;;  %v14615_v30 = vld [vmem:[#allocation12 + $0x280] ss:$16 sps:$4 sm:$0xff]  }
 0x582   :  { %9546 = vmatprep.subr.bf16.mxu1 %v14602_v62  ;;  %v14639_v29 = vld [vmem:[#allocation12 + $0x300] ss:$16 sps:$4 sm:$0xff]   ;;  %v14642_v62 = vld [vmem:[#allocation12 + $0x308] ss:$16 sps:$4 sm:$0xff]  }
 0x583   :  { %9461 = vmatpush1.bf16.msra.mxu0 %v14597_v52  ;;  %v14647_v52 = vld [vmem:[#allocation12 + $0x324] ss:$16 sps:$4 sm:$0xff]  }
 0x584   :  { %9547 = vmatpush1.bf16.msra.mxu1 %v14600_v31  ;;  %9462 = vmatprep.subr.bf16.mxu0 %v14605_v51  ;;  %v14650_v31 = vld [vmem:[#allocation12 + $0x32c] ss:$16 sps:$4 sm:$0xff]   ;;  %v14645_v51 = vld [vmem:[#allocation12 + $0x320] ss:$16 sps:$4 sm:$0xff]  }
 0x585   :  { %9548 = vmatprep.subr.bf16.mxu1 %v14608_v5 }
 0x587   :  { %9463 = vmatpush1.bf16.msra.mxu0 %v14603_v63  ;;  %v14648_v63 = vld [vmem:[#allocation12 + $0x328] ss:$16 sps:$4 sm:$0xff]  }
 0x588   :  { %9549 = vmatpush1.bf16.msra.mxu1 %v14606_v28  ;;  %9464 = vmatprep.subr.bf16.mxu0 %v14611_v8  ;;  %v14653_v28 = vld [vmem:[#allocation12 + $0x344] ss:$16 sps:$4 sm:$0xff]  }
 0x589   :  { %9550 = vmatprep.subr.bf16.mxu1 %v14614_v25 }
 0x58b   :  { %9465 = vmatpush1.bf16.msra.mxu0 %v14609_v13  ;;  %v14656_v13 = vld [vmem:[#allocation12 + $0x34c] ss:$16 sps:$4 sm:$0xff]  }
 0x58c   :  { %9551 = vmatpush1.bf16.msra.mxu1 %v14612_v57  ;;  %9466 = vmatprep.subr.bf16.mxu0 %v14617_v15 }
 0x58d   :  { %9552 = vmatprep.subr.bf16.mxu1 %v14620_v34 }
 0x58f   :  { %9467 = vmatpush1.bf16.msra.mxu0 %v14615_v30 }
 0x590   :  { %9553 = vmatpush1.bf16.msra.mxu1 %v14618_v35  ;;  %9468 = vmatprep.subr.bf16.mxu0 %v14623_v16 }
 0x591   :  { %v7419_v48 = vpop.f32.mrb[8].mxu0  ;;  %v7634_v49 = vpop.f32.mrb[8].mxu1  ;;  %9554 = vmatprep.subr.bf16.mxu1 %v14626_v36  ;;  %v14654_v36 = vld [vmem:[#allocation12 + $0x348] ss:$16 sps:$4 sm:$0xff]  }
 0x592   :  { %v15879_v53 = vadd.f32 %v7419_v48, %v5546_v37  ;;  %v15881_v54 = vadd.f32 %v7634_v49, %v5554_v38  ;;  %v7421_v55 = vpop.f32.mrb[9].mxu0  ;;  %v7636_v56 = vpop.f32.mrb[9].mxu1  ;;  %v14657_v49 = vld [vmem:[#allocation12 + $0x360] ss:$16 sps:$4 sm:$0xff]  }
 0x593   :  { %v15883_v0 = vadd.f32 %v7421_v55, %v5550_v41  ;;  %v15885_v1 = vadd.f32 %v7636_v56, %v5558_v44  ;;  %v7423_v2 = vpop.f32.mrb[10].mxu0  ;;  %v7638_v3 = vpop.f32.mrb[10].mxu1  ;;  %9469 = vmatpush1.bf16.msra.mxu0 %v14621_v45  ;;  %v14660_v55 = vld [vmem:[#allocation12 + $0x368] ss:$16 sps:$4 sm:$0xff]   ;;  %v14665_v56 = vld [vmem:[#allocation12 + $0x384] ss:$16 sps:$4 sm:$0xff]  }
 0x594   :  { %v12121_v10 = vmul.f32 -1.442695, %v15879_v53  ;;  %v12123_v11 = vmul.f32 -1.442695, %v15881_v54  ;;  %v15889_v14 = vadd.f32 %v7423_v2, %v5546_v37  ;;  %v15891_v17 = vadd.f32 %v7638_v3, %v5554_v38  ;;  %9555 = vmatpush1.bf16.msra.mxu1 %v14624_v46  ;;  %v7425_v18 = vpop.f32.mrb[11].mxu0  ;;  %v7640_v32 = vpop.f32.mrb[11].mxu1  ;;  %9470 = vmatprep.subr.bf16.mxu0 %v14629_v47 }
 0x595   :  { %v12122_v19 = vmul.f32 -1.442695, %v15883_v0  ;;  %v12124_v20 = vmul.f32 -1.442695, %v15885_v1  ;;  %v15895_v21 = vadd.f32 %v7425_v18, %v5550_v41  ;;  %v15897_v22 = vadd.f32 %v7640_v32, %v5558_v44  ;;  %9556 = vmatprep.subr.bf16.mxu1 %v14632_v50  ;;  %v14659_v37 = vld [vmem:[#allocation12 + $0x364] ss:$16 sps:$4 sm:$0xff]  }
 0x596   :  { %14983 = vpow2.f32 %v12121_v10  ;;  %v12125_v24 = vmul.f32 -1.442695, %v15889_v14  ;;  %v12127_v12 = vmul.f32 -1.442695, %v15891_v17  ;;  %v14662_v44 = vld [vmem:[#allocation12 + $0x36c] ss:$16 sps:$4 sm:$0xff]  }
 0x597   :  { %14985 = vpow2.f32 %v12123_v11  ;;  %9471 = vmatpush1.bf16.msra.mxu0 %v14627_v61  ;;  %v12126_v58 = vmul.f32 -1.442695, %v15895_v21  ;;  %v12128_v33 = vmul.f32 -1.442695, %v15897_v22  ;;  %v14668_v61 = vld [vmem:[#allocation12 + $0x38c] ss:$16 sps:$4 sm:$0xff]  }
 0x598   :  { %14987 = vpow2.f32 %v12122_v19  ;;  %9557 = vmatpush1.bf16.msra.mxu1 %v14630_v4  ;;  %9472 = vmatprep.subr.bf16.mxu0 %v14635_v9  ;;  %v14663_v2 = vld [vmem:[#allocation12 + $0x380] ss:$16 sps:$4 sm:$0xff]   ;;  %v14666_v3 = vld [vmem:[#allocation12 + $0x388] ss:$16 sps:$4 sm:$0xff]   ;;  %v14671_v4 = vld [vmem:[#allocation12 + $0x3a4] ss:$16 sps:$4 sm:$0xff]  }
 0x599   :  { %14989 = vpow2.f32 %v12124_v20  ;;  %9558 = vmatprep.subr.bf16.mxu1 %v14638_v23  ;;  %v14674_v10 = vld [vmem:[#allocation12 + $0x3ac] ss:$16 sps:$4 sm:$0xff]   ;;  %v14669_v32 = vld [vmem:[#allocation12 + $0x3a0] ss:$16 sps:$4 sm:$0xff]   ;;  %v14672_v20 = vld [vmem:[#allocation12 + $0x3a8] ss:$16 sps:$4 sm:$0xff]  }
 0x59a   :  { %14991 = vpow2.f32 %v12125_v24  ;;  %v14677_v23 = vld [vmem:[#allocation12 + $0x3c4] ss:$16 sps:$4 sm:$0xff]  }
 0x59b   :  { %14993 = vpow2.f32 %v12127_v12  ;;  %9473 = vmatpush1.bf16.msra.mxu0 %v14633_v26  ;;  %v14680_v12 = vld [vmem:[#allocation12 + $0x3cc] ss:$16 sps:$4 sm:$0xff]  }
 0x59c   :  { %14995 = vpow2.f32 %v12126_v58  ;;  %9559 = vmatpush1.bf16.msra.mxu1 %v14636_v6  ;;  %9474 = vmatprep.subr.bf16.mxu0 %v14641_v27 }
 0x59d   :  { %14997 = vpow2.f32 %v12128_v33  ;;  %9560 = vmatprep.subr.bf16.mxu1 %v14644_v7 }
 0x59f   :  { %9475 = vmatpush1.bf16.msra.mxu0 %v14639_v29  ;;  %v14675_v29 = vld [vmem:[#allocation12 + $0x3c0] ss:$16 sps:$4 sm:$0xff]  }
 0x5a0   :  { %v14984_v5 = vpop.eup %14983  ;;  %9561 = vmatpush1.bf16.msra.mxu1 %v14642_v62  ;;  %9476 = vmatprep.subr.bf16.mxu0 %v14647_v52 }
 0x5a1   :  { %v14986_v8 = vpop.eup %14985  ;;  %v7667_v25 = vadd.f32 1.0, %v14984_v5  ;;  %9562 = vmatprep.subr.bf16.mxu1 %v14650_v31  ;;  %v14678_v5 = vld [vmem:[#allocation12 + $0x3c8] ss:$16 sps:$4 sm:$0xff]  }
 0x5a2   :  { %v14988_v57 = vpop.eup %14987  ;;  %v7669_v15 = vadd.f32 1.0, %v14986_v8  ;;  %v14681_v8 = vld [vmem:[#allocation12 + $0x3e0] ss:$16 sps:$4 sm:$0xff]  }
 0x5a3   :  { %v14990_v34 = vpop.eup %14989  ;;  %14999 = vrcp.f32 %v7667_v25  ;;  %v7668_v30 = vadd.f32 1.0, %v14988_v57  ;;  %9477 = vmatpush1.bf16.msra.mxu0 %v14645_v51  ;;  %v14689_v25 = vld [vmem:[#allocation15 + $0x4] ss:$16 sps:$4 sm:$0xff]   ;;  %v14687_v57 = vld [vmem:[#allocation15] ss:$16 sps:$4 sm:$0xff]  }
 0x5a4   :  { %v14992_v35 = vpop.eup %14991  ;;  %15001 = vrcp.f32 %v7669_v15  ;;  %v7670_v16 = vadd.f32 1.0, %v14990_v34  ;;  %9563 = vmatpush1.bf16.msra.mxu1 %v14648_v63  ;;  %9478 = vmatprep.subr.bf16.mxu0 %v14653_v28  ;;  %v14698_v15 = vld [vmem:[#allocation15 + $0x2c] ss:$16 sps:$4 sm:$0xff]   ;;  %v14693_v34 = vld [vmem:[#allocation15 + $0x20] ss:$16 sps:$4 sm:$0xff]  }
 0x5a5   :  { %v14994_v38 = vpop.eup %14993  ;;  %15003 = vrcp.f32 %v7668_v30  ;;  %v7671_v41 = vadd.f32 1.0, %v14992_v35  ;;  %9564 = vmatprep.subr.bf16.mxu1 %v14656_v13  ;;  %v14692_v13 = vld [vmem:[#allocation15 + $0xc] ss:$16 sps:$4 sm:$0xff]   ;;  %v14696_v30 = vld [vmem:[#allocation15 + $0x28] ss:$16 sps:$4 sm:$0xff]  }
 0x5a6   :  { %v14996_v45 = vpop.eup %14995  ;;  %15005 = vrcp.f32 %v7670_v16  ;;  %v7673_v46 = vadd.f32 1.0, %v14994_v38  ;;  %v14704_v35 = vld [vmem:[#allocation15 + $0x4c] ss:$16 sps:$4 sm:$0xff]   ;;  %v14699_v16 = vld [vmem:[#allocation15 + $0x40] ss:$16 sps:$4 sm:$0xff]  }
 0x5a7   :  { %v14998_v47 = vpop.eup %14997  ;;  %15007 = vrcp.f32 %v7671_v41  ;;  %v7672_v48 = vadd.f32 1.0, %v14996_v45  ;;  %9479 = vmatpush1.bf16.msra.mxu0 %v14651_v60  ;;  %v14701_v60 = vld [vmem:[#allocation15 + $0x44] ss:$16 sps:$4 sm:$0xff]   ;;  %v14710_v38 = vld [vmem:[#allocation15 + $0x6c] ss:$16 sps:$4 sm:$0xff]  }
 0x5a8   :  { %15009 = vrcp.f32 %v7673_v46  ;;  %v7674_v50 = vadd.f32 1.0, %v14998_v47  ;;  %9565 = vmatpush1.bf16.msra.mxu1 %v14654_v36  ;;  %9480 = vmatprep.subr.bf16.mxu0 %v14659_v37  ;;  %v14702_v36 = vld [vmem:[#allocation15 + $0x48] ss:$16 sps:$4 sm:$0xff]   ;;  %v14707_v37 = vld [vmem:[#allocation15 + $0x64] ss:$16 sps:$4 sm:$0xff]  }
 0x5a9   :  { %15011 = vrcp.f32 %v7672_v48  ;;  %9566 = vmatprep.subr.bf16.mxu1 %v14662_v44  ;;  %v14708_v41 = vld [vmem:[#allocation15 + $0x68] ss:$16 sps:$4 sm:$0xff]   ;;  %v14713_v44 = vld [vmem:[#allocation15 + $0x84] ss:$16 sps:$4 sm:$0xff]   ;;  %v14716_v45 = vld [vmem:[#allocation15 + $0x8c] ss:$16 sps:$4 sm:$0xff]  }
 0x5aa   :  { %15013 = vrcp.f32 %v7674_v50  ;;  %v14711_v46 = vld [vmem:[#allocation15 + $0x80] ss:$16 sps:$4 sm:$0xff]   ;;  %v14714_v47 = vld [vmem:[#allocation15 + $0x88] ss:$16 sps:$4 sm:$0xff]   ;;  %v14719_v48 = vld [vmem:[#allocation15 + $0xa4] ss:$16 sps:$4 sm:$0xff]  }
 0x5ab   :  { %9481 = vmatpush1.bf16.msra.mxu0 %v14657_v49  ;;  %v14722_v49 = vld [vmem:[#allocation15 + $0xac] ss:$16 sps:$4 sm:$0xff]   ;;  %v14717_v50 = vld [vmem:[#allocation15 + $0xa0] ss:$16 sps:$4 sm:$0xff]  }
 0x5ac   :  { %9567 = vmatpush1.bf16.msra.mxu1 %v14660_v55  ;;  %9482 = vmatprep.subr.bf16.mxu0 %v14665_v56  ;;  %v14720_v55 = vld [vmem:[#allocation15 + $0xa8] ss:$16 sps:$4 sm:$0xff]   ;;  %v14725_v56 = vld [vmem:[#allocation15 + $0xc4] ss:$16 sps:$4 sm:$0xff]  }
 0x5ad   :  { %v15000_v9 = vpop.eup %14999  ;;  %9568 = vmatprep.subr.bf16.mxu1 %v14668_v61  ;;  %v14728_v61 = vld [vmem:[#allocation15 + $0xcc] ss:$16 sps:$4 sm:$0xff]  }
 0x5ae   :  { %v15002_v11 = vpop.eup %15001  ;;  %v7691_v58 = vmul.f32 %v15000_v9, %v15879_v53  ;;  %v14683_v53 = vld [vmem:[#allocation12 + $0x3e4] ss:$16 sps:$4 sm:$0xff]   ;;  %v14734_v9 = vld [vmem:[#allocation15 + $0xec] ss:$16 sps:$4 sm:$0xff]  }
 0x5af   :  { %v15004_v18 = vpop.eup %15003  ;;  %9483 = vmatpush1.bf16.msra.mxu0 %v14663_v2  ;;  %v7693_v33 = vmul.f32 %v15002_v11, %v15881_v54  ;;  %v14723_v2 = vld [vmem:[#allocation15 + $0xc0] ss:$16 sps:$4 sm:$0xff]   ;;  %v14732_v11 = vld [vmem:[#allocation15 + $0xe8] ss:$16 sps:$4 sm:$0xff]  }
 0x5b0   :  { %v15006_v19 = vpop.eup %15005  ;;  %9569 = vmatpush1.bf16.msra.mxu1 %v14666_v3  ;;  %9484 = vmatprep.subr.bf16.mxu0 %v14671_v4  ;;  %v7692_v52 = vmul.f32 %v15004_v18, %v15883_v0  ;;  %v14726_v3 = vld [vmem:[#allocation15 + $0xc8] ss:$16 sps:$4 sm:$0xff]   ;;  %v14731_v4 = vld [vmem:[#allocation15 + $0xe4] ss:$16 sps:$4 sm:$0xff]  }
 0x5b1   :  { %v15008_v24 = vpop.eup %15007  ;;  %9570 = vmatprep.subr.bf16.mxu1 %v14674_v10  ;;  %v14729_v10 = vld [vmem:[#allocation15 + $0xe0] ss:$16 sps:$4 sm:$0xff]   ;;  %v14737_v18 = vld [vmem:[#allocation15 + $0x104] ss:$16 sps:$4 sm:$0xff]  }
 0x5b2   :  { %v15010_v26 = vpop.eup %15009  ;;  %v7695_v6 = vmul.f32 %v15008_v24, %v15889_v14  ;;  %v7694_v14 = vmul.f32 %v15006_v19, %v15885_v1  ;;  %v14690_v1 = vld [vmem:[#allocation15 + $0x8] ss:$16 sps:$4 sm:$0xff]   ;;  %v14735_v19 = vld [vmem:[#allocation15 + $0x100] ss:$16 sps:$4 sm:$0xff]   ;;  %v14746_v24 = vld [vmem:[#allocation15 + $0x12c] ss:$16 sps:$4 sm:$0xff]  }
 0x5b3   :  { %v15012_v27 = vpop.eup %15011  ;;  %v7697_v7 = vmul.f32 %v15010_v26, %v15891_v17  ;;  %9485 = vmatpush1.bf16.msra.mxu0 %v14669_v32  ;;  %v14686_v17 = vld [vmem:[#allocation12 + $0x3ec] ss:$16 sps:$4 sm:$0xff]   ;;  %v14744_v26 = vld [vmem:[#allocation15 + $0x128] ss:$16 sps:$4 sm:$0xff]  }
 0x5b4   :  { %v15014_v62 = vpop.eup %15013  ;;  %v15908_v31 = vpack.c.bf16 %v7695_v6, %v7691_v58  ;;  %v7696_v51 = vmul.f32 %v15012_v27, %v15895_v21  ;;  %9571 = vmatpush1.bf16.msra.mxu1 %v14672_v20  ;;  %9486 = vmatprep.subr.bf16.mxu0 %v14677_v23  ;;  %v14684_v21 = vld [vmem:[#allocation12 + $0x3e8] ss:$16 sps:$4 sm:$0xff]   ;;  %v14740_v32 = vld [vmem:[#allocation15 + $0x10c] ss:$16 sps:$4 sm:$0xff]   ;;  %v14743_v23 = vld [vmem:[#allocation15 + $0x124] ss:$16 sps:$4 sm:$0xff]  }
 0x5b5   :  { %v15912_v63 = vpack.c.bf16 %v7697_v7, %v7693_v33  ;;  %v7698_v54 = vmul.f32 %v15014_v62, %v15897_v22  ;;  %9572 = vmatprep.subr.bf16.mxu1 %v14680_v12  ;;  %v14695_v22 = vld [vmem:[#allocation15 + $0x24] ss:$16 sps:$4 sm:$0xff]   ;;  %v14738_v20 = vld [vmem:[#allocation15 + $0x108] ss:$16 sps:$4 sm:$0xff]   ;;  %v14741_v12 = vld [vmem:[#allocation15 + $0x120] ss:$16 sps:$4 sm:$0xff]  }
 0x5b6   :  { %v9588_v28 = vpack.c.bf16 %v7696_v51, %v7692_v52  ;;  %v14749_v58 = vld [vmem:[#allocation15 + $0x144] ss:$16 sps:$4 sm:$0xff]   ;;  %v14752_v6 = vld [vmem:[#allocation15 + $0x14c] ss:$16 sps:$4 sm:$0xff]   ;;  %v14747_v27 = vld [vmem:[#allocation15 + $0x140] ss:$16 sps:$4 sm:$0xff]  }
 0x5b7   :  { %9487 = vmatpush1.bf16.msra.mxu0 %v14675_v29  ;;  %v15915_v0 = vpack.c.bf16 %v7698_v54, %v7694_v14  ;;  %v14750_v33 = vld [vmem:[#allocation15 + $0x148] ss:$16 sps:$4 sm:$0xff]   ;;  %v14755_v7 = vld [vmem:[#allocation15 + $0x164] ss:$16 sps:$4 sm:$0xff]   ;;  %v14758_v29 = vld [vmem:[#allocation15 + $0x16c] ss:$16 sps:$4 sm:$0xff]  }
 0x5b8   :  { %9573 = vmatpush1.bf16.msra.mxu1 %v14678_v5  ;;  %9488 = vmatprep.subr.bf16.mxu0 %v14683_v53  ;;  %v14753_v62 = vld [vmem:[#allocation15 + $0x160] ss:$16 sps:$4 sm:$0xff]   ;;  %v14756_v52 = vld [vmem:[#allocation15 + $0x168] ss:$16 sps:$4 sm:$0xff]   ;;  %v14761_v51 = vld [vmem:[#allocation15 + $0x184] ss:$16 sps:$4 sm:$0xff]  }
 0x5b9   :  { %9574 = vmatprep.subr.bf16.mxu1 %v14686_v17  ;;  %v14764_v5 = vld [vmem:[#allocation15 + $0x18c] ss:$16 sps:$4 sm:$0xff]   ;;  %v14759_v53 = vld [vmem:[#allocation15 + $0x180] ss:$16 sps:$4 sm:$0xff]   ;;  %v14762_v14 = vld [vmem:[#allocation15 + $0x188] ss:$16 sps:$4 sm:$0xff]  }
 0x5ba   :  { %v14767_v54 = vld [vmem:[#allocation15 + $0x1a4] ss:$16 sps:$4 sm:$0xff]   ;;  %v14770_v17 = vld [vmem:[#allocation15 + $0x1ac] ss:$16 sps:$4 sm:$0xff]  }
 0x5bb   :  { %9489 = vmatpush1.bf16.msra.mxu0 %v14681_v8  ;;  %v14768_v8 = vld [vmem:[#allocation15 + $0x1a8] ss:$16 sps:$4 sm:$0xff]  }
 0x5bc   :  { %9575 = vmatpush1.bf16.msra.mxu1 %v14684_v21  ;;  %10359 = vmatprep.subr.bf16.mxu0 %v14689_v25  ;;  %v14773_v21 = vld [vmem:[#allocation15 + $0x1c4] ss:$16 sps:$4 sm:$0xff]   ;;  %v14776_v25 = vld [vmem:[#allocation15 + $0x1cc] ss:$16 sps:$4 sm:$0xff]  }
 0x5bd   :  { %10445 = vmatprep.subr.bf16.mxu1 %v14692_v13  ;;  %v14771_v13 = vld [vmem:[#allocation15 + $0x1c0] ss:$16 sps:$4 sm:$0xff]  }
 0x5be   :  { %9491 = vmatmul.mubr.bf16.vlgmr.msra.gmra.mrb[12].mxu0 %v15771_v59 }
 0x5bf   :  { %9577 = vmatmul.mubr.bf16.vlgmr.msra.gmra.mrb[12].mxu1 %v15771_v59  ;;  %10360 = vmatpush1.bf16.msra.mxu0 %v14687_v57  ;;  %v14705_v59 = vld [vmem:[#allocation15 + $0x60] ss:$16 sps:$4 sm:$0xff]   ;;  %v14774_v57 = vld [vmem:[#allocation15 + $0x1c8] ss:$16 sps:$4 sm:$0xff]  }
 0x5c0   :  { %10391 = vmatprep.mubr.bf16.mxu0 %v9588_v28  ;;  %10446 = vmatpush1.bf16.msra.mxu1 %v14690_v1  ;;  %v14779_v1 = vld [vmem:[#allocation15 + $0x1e4] ss:$16 sps:$4 sm:$0xff]  }
 0x5c1   :  { %10477 = vmatprep.mubr.bf16.mxu1 %v9588_v28  ;;  %10361 = vmatprep.subr.bf16.mxu0 %v14695_v22  ;;  %v14765_v28 = vld [vmem:[#allocation15 + $0x1a0] ss:$16 sps:$4 sm:$0xff]   ;;  %v14782_v22 = vld [vmem:[#allocation15 + $0x1ec] ss:$16 sps:$4 sm:$0xff]  }
 0x5c2   :  { %10447 = vmatprep.subr.bf16.mxu1 %v14698_v15  ;;  %v14777_v15 = vld [vmem:[#allocation15 + $0x1e0] ss:$16 sps:$4 sm:$0xff]  }
 0x5c3   :  { %10362 = vmatpush1.bf16.msra.mxu0 %v14693_v34  ;;  %v14780_v34 = vld [vmem:[#allocation15 + $0x1e8] ss:$16 sps:$4 sm:$0xff]  }
 0x5c4   :  { %10448 = vmatpush1.bf16.msra.mxu1 %v14696_v30  ;;  %10363 = vmatprep.subr.bf16.mxu0 %v14701_v60  ;;  %v14785_v30 = vld [vmem:[#allocation15 + $0x204] ss:$16 sps:$4 sm:$0xff]   ;;  %v14788_v60 = vld [vmem:[#allocation15 + $0x20c] ss:$16 sps:$4 sm:$0xff]  }
 0x5c5   :  { %10449 = vmatprep.subr.bf16.mxu1 %v14704_v35  ;;  %v14783_v35 = vld [vmem:[#allocation15 + $0x200] ss:$16 sps:$4 sm:$0xff]  }
 0x5c7   :  { %10364 = vmatpush1.bf16.msra.mxu0 %v14699_v16  ;;  %v14786_v16 = vld [vmem:[#allocation15 + $0x208] ss:$16 sps:$4 sm:$0xff]  }
 0x5c8   :  { %10450 = vmatpush1.bf16.msra.mxu1 %v14702_v36  ;;  %10365 = vmatprep.subr.bf16.mxu0 %v14707_v37  ;;  %v14791_v36 = vld [vmem:[#allocation15 + $0x224] ss:$16 sps:$4 sm:$0xff]   ;;  %v14794_v37 = vld [vmem:[#allocation15 + $0x22c] ss:$16 sps:$4 sm:$0xff]  }
 0x5c9   :  { %10451 = vmatprep.subr.bf16.mxu1 %v14710_v38  ;;  %v14789_v38 = vld [vmem:[#allocation15 + $0x220] ss:$16 sps:$4 sm:$0xff]  }
 0x5cb   :  { %10366 = vmatpush1.bf16.msra.mxu0 %v14705_v59  ;;  %v14792_v59 = vld [vmem:[#allocation15 + $0x228] ss:$16 sps:$4 sm:$0xff]  }
 0x5cc   :  { %10452 = vmatpush1.bf16.msra.mxu1 %v14708_v41  ;;  %10367 = vmatprep.subr.bf16.mxu0 %v14713_v44  ;;  %v14797_v41 = vld [vmem:[#allocation15 + $0x244] ss:$16 sps:$4 sm:$0xff]   ;;  %v14800_v44 = vld [vmem:[#allocation15 + $0x24c] ss:$16 sps:$4 sm:$0xff]  }
 0x5cd   :  { %10453 = vmatprep.subr.bf16.mxu1 %v14716_v45  ;;  %v14795_v45 = vld [vmem:[#allocation15 + $0x240] ss:$16 sps:$4 sm:$0xff]  }
 0x5cf   :  { %10368 = vmatpush1.bf16.msra.mxu0 %v14711_v46  ;;  %v14798_v46 = vld [vmem:[#allocation15 + $0x248] ss:$16 sps:$4 sm:$0xff]  }
 0x5d0   :  { %10454 = vmatpush1.bf16.msra.mxu1 %v14714_v47  ;;  %10369 = vmatprep.subr.bf16.mxu0 %v14719_v48  ;;  %v14803_v47 = vld [vmem:[#allocation15 + $0x264] ss:$16 sps:$4 sm:$0xff]   ;;  %v14801_v48 = vld [vmem:[#allocation15 + $0x260] ss:$16 sps:$4 sm:$0xff]  }
 0x5d1   :  { %10455 = vmatprep.subr.bf16.mxu1 %v14722_v49  ;;  %v14804_v49 = vld [vmem:[#allocation15 + $0x268] ss:$16 sps:$4 sm:$0xff]  }
 0x5d3   :  { %10370 = vmatpush1.bf16.msra.mxu0 %v14717_v50  ;;  %v14809_v50 = vld [vmem:[#allocation15 + $0x284] ss:$16 sps:$4 sm:$0xff]  }
 0x5d4   :  { %10456 = vmatpush1.bf16.msra.mxu1 %v14720_v55  ;;  %10371 = vmatprep.subr.bf16.mxu0 %v14725_v56  ;;  %v14812_v55 = vld [vmem:[#allocation15 + $0x28c] ss:$16 sps:$4 sm:$0xff]   ;;  %v14810_v56 = vld [vmem:[#allocation15 + $0x288] ss:$16 sps:$4 sm:$0xff]  }
 0x5d5   :  { %10457 = vmatprep.subr.bf16.mxu1 %v14728_v61  ;;  %v14815_v61 = vld [vmem:[#allocation15 + $0x2a4] ss:$16 sps:$4 sm:$0xff]  }
 0x5d7   :  { %10372 = vmatpush1.bf16.msra.mxu0 %v14723_v2  ;;  %v14818_v2 = vld [vmem:[#allocation15 + $0x2ac] ss:$16 sps:$4 sm:$0xff]  }
 0x5d8   :  { %10458 = vmatpush1.bf16.msra.mxu1 %v14726_v3  ;;  %10373 = vmatprep.subr.bf16.mxu0 %v14731_v4  ;;  %v14813_v3 = vld [vmem:[#allocation15 + $0x2a0] ss:$16 sps:$4 sm:$0xff]   ;;  %v14816_v4 = vld [vmem:[#allocation15 + $0x2a8] ss:$16 sps:$4 sm:$0xff]  }
 0x5d9   :  { %10459 = vmatprep.subr.bf16.mxu1 %v14734_v9  ;;  %v14821_v9 = vld [vmem:[#allocation15 + $0x2c4] ss:$16 sps:$4 sm:$0xff]  }
 0x5db   :  { %10374 = vmatpush1.bf16.msra.mxu0 %v14729_v10  ;;  %v14824_v10 = vld [vmem:[#allocation15 + $0x2cc] ss:$16 sps:$4 sm:$0xff]  }
 0x5dc   :  { %10460 = vmatpush1.bf16.msra.mxu1 %v14732_v11  ;;  %10375 = vmatprep.subr.bf16.mxu0 %v14737_v18  ;;  %v14819_v11 = vld [vmem:[#allocation15 + $0x2c0] ss:$16 sps:$4 sm:$0xff]   ;;  %v14822_v18 = vld [vmem:[#allocation15 + $0x2c8] ss:$16 sps:$4 sm:$0xff]  }
 0x5dd   :  { %10461 = vmatprep.subr.bf16.mxu1 %v14740_v32  ;;  %v14827_v32 = vld [vmem:[#allocation15 + $0x2e4] ss:$16 sps:$4 sm:$0xff]  }
 0x5df   :  { %10376 = vmatpush1.bf16.msra.mxu0 %v14735_v19  ;;  %v14830_v19 = vld [vmem:[#allocation15 + $0x2ec] ss:$16 sps:$4 sm:$0xff]  }
 0x5e0   :  { %10462 = vmatpush1.bf16.msra.mxu1 %v14738_v20  ;;  %10377 = vmatprep.subr.bf16.mxu0 %v14743_v23  ;;  %v14825_v20 = vld [vmem:[#allocation15 + $0x2e0] ss:$16 sps:$4 sm:$0xff]   ;;  %v14828_v23 = vld [vmem:[#allocation15 + $0x2e8] ss:$16 sps:$4 sm:$0xff]  }
 0x5e1   :  { %10463 = vmatprep.subr.bf16.mxu1 %v14746_v24  ;;  %v14833_v24 = vld [vmem:[#allocation15 + $0x304] ss:$16 sps:$4 sm:$0xff]  }
 0x5e3   :  { %10378 = vmatpush1.bf16.msra.mxu0 %v14741_v12  ;;  %v14836_v12 = vld [vmem:[#allocation15 + $0x30c] ss:$16 sps:$4 sm:$0xff]  }
 0x5e4   :  { %10464 = vmatpush1.bf16.msra.mxu1 %v14744_v26  ;;  %10379 = vmatprep.subr.bf16.mxu0 %v14749_v58  ;;  %v14831_v26 = vld [vmem:[#allocation15 + $0x300] ss:$16 sps:$4 sm:$0xff]   ;;  %v14834_v58 = vld [vmem:[#allocation15 + $0x308] ss:$16 sps:$4 sm:$0xff]  }
 0x5e5   :  { %10465 = vmatprep.subr.bf16.mxu1 %v14752_v6  ;;  %v14839_v6 = vld [vmem:[#allocation15 + $0x324] ss:$16 sps:$4 sm:$0xff]  }
 0x5e7   :  { %10380 = vmatpush1.bf16.msra.mxu0 %v14747_v27  ;;  %v14842_v27 = vld [vmem:[#allocation15 + $0x32c] ss:$16 sps:$4 sm:$0xff]  }
 0x5e8   :  { %10466 = vmatpush1.bf16.msra.mxu1 %v14750_v33  ;;  %10381 = vmatprep.subr.bf16.mxu0 %v14755_v7  ;;  %v14837_v33 = vld [vmem:[#allocation15 + $0x320] ss:$16 sps:$4 sm:$0xff]   ;;  %v14840_v7 = vld [vmem:[#allocation15 + $0x328] ss:$16 sps:$4 sm:$0xff]  }
 0x5e9   :  { %10467 = vmatprep.subr.bf16.mxu1 %v14758_v29  ;;  %v14845_v29 = vld [vmem:[#allocation15 + $0x344] ss:$16 sps:$4 sm:$0xff]  }
 0x5eb   :  { %10382 = vmatpush1.bf16.msra.mxu0 %v14753_v62  ;;  %v14848_v62 = vld [vmem:[#allocation15 + $0x34c] ss:$16 sps:$4 sm:$0xff]  }
 0x5ec   :  { %10468 = vmatpush1.bf16.msra.mxu1 %v14756_v52  ;;  %10383 = vmatprep.subr.bf16.mxu0 %v14761_v51  ;;  %v14843_v52 = vld [vmem:[#allocation15 + $0x340] ss:$16 sps:$4 sm:$0xff]   ;;  %v14846_v51 = vld [vmem:[#allocation15 + $0x348] ss:$16 sps:$4 sm:$0xff]  }
 0x5ed   :  { %10469 = vmatprep.subr.bf16.mxu1 %v14764_v5  ;;  %v14851_v5 = vld [vmem:[#allocation15 + $0x364] ss:$16 sps:$4 sm:$0xff]  }
 0x5ef   :  { %10384 = vmatpush1.bf16.msra.mxu0 %v14759_v53  ;;  %v14854_v53 = vld [vmem:[#allocation15 + $0x36c] ss:$16 sps:$4 sm:$0xff]  }
 0x5f0   :  { %10470 = vmatpush1.bf16.msra.mxu1 %v14762_v14  ;;  %10385 = vmatprep.subr.bf16.mxu0 %v14767_v54  ;;  %v14849_v14 = vld [vmem:[#allocation15 + $0x360] ss:$16 sps:$4 sm:$0xff]   ;;  %v14852_v54 = vld [vmem:[#allocation15 + $0x368] ss:$16 sps:$4 sm:$0xff]  }
 0x5f1   :  { %10471 = vmatprep.subr.bf16.mxu1 %v14770_v17  ;;  %v14857_v17 = vld [vmem:[#allocation15 + $0x384] ss:$16 sps:$4 sm:$0xff]  }
 0x5f3   :  { %10386 = vmatpush1.bf16.msra.mxu0 %v14765_v28  ;;  %v14860_v28 = vld [vmem:[#allocation15 + $0x38c] ss:$16 sps:$4 sm:$0xff]  }
 0x5f4   :  { %10472 = vmatpush1.bf16.msra.mxu1 %v14768_v8  ;;  %10387 = vmatprep.subr.bf16.mxu0 %v14773_v21  ;;  %v14855_v8 = vld [vmem:[#allocation15 + $0x380] ss:$16 sps:$4 sm:$0xff]   ;;  %v14858_v21 = vld [vmem:[#allocation15 + $0x388] ss:$16 sps:$4 sm:$0xff]  }
 0x5f5   :  { %10473 = vmatprep.subr.bf16.mxu1 %v14776_v25  ;;  %v14863_v25 = vld [vmem:[#allocation15 + $0x3a4] ss:$16 sps:$4 sm:$0xff]  }
 0x5f7   :  { %10388 = vmatpush1.bf16.msra.mxu0 %v14771_v13  ;;  %v14866_v13 = vld [vmem:[#allocation15 + $0x3ac] ss:$16 sps:$4 sm:$0xff]  }
 0x5f8   :  { %10474 = vmatpush1.bf16.msra.mxu1 %v14774_v57  ;;  %10389 = vmatprep.subr.bf16.mxu0 %v14779_v1  ;;  %v14861_v57 = vld [vmem:[#allocation15 + $0x3a0] ss:$16 sps:$4 sm:$0xff]   ;;  %v14864_v1 = vld [vmem:[#allocation15 + $0x3a8] ss:$16 sps:$4 sm:$0xff]  }
 0x5f9   :  { %10475 = vmatprep.subr.bf16.mxu1 %v14782_v22  ;;  %v14869_v22 = vld [vmem:[#allocation15 + $0x3c4] ss:$16 sps:$4 sm:$0xff]  }
 0x5fb   :  { %10390 = vmatpush1.bf16.msra.mxu0 %v14777_v15  ;;  %v14872_v15 = vld [vmem:[#allocation15 + $0x3cc] ss:$16 sps:$4 sm:$0xff]  }
 0x5fc   :  { %10476 = vmatpush1.bf16.msra.mxu1 %v14780_v34  ;;  %10402 = vmatprep.subr.bf16.mxu0 %v14785_v30  ;;  %v14867_v34 = vld [vmem:[#allocation15 + $0x3c0] ss:$16 sps:$4 sm:$0xff]   ;;  %v14870_v30 = vld [vmem:[#allocation15 + $0x3c8] ss:$16 sps:$4 sm:$0xff]  }
 0x5fd   :  { %10488 = vmatprep.subr.bf16.mxu1 %v14788_v60  ;;  %v14875_v60 = vld [vmem:[#allocation15 + $0x3e4] ss:$16 sps:$4 sm:$0xff]  }
 0x5fe   :  { %10392 = vmatmul.mubr.bf16.vlgmr.msra.gmra.mrb[12].mxu0 %v15908_v31 }
 0x5ff   :  { %10478 = vmatmul.mubr.bf16.vlgmr.msra.gmra.mrb[12].mxu1 %v15908_v31  ;;  %10403 = vmatpush1.bf16.msra.mxu0 %v14783_v35  ;;  %v14806_v31 = vld [vmem:[#allocation15 + $0x26c] ss:$16 sps:$4 sm:$0xff]  }
 0x600   :  { %10434 = vmatprep.mubr.bf16.mxu0 %v15915_v0  ;;  %10489 = vmatpush1.bf16.msra.mxu1 %v14786_v16  ;;  %v14878_v35 = vld [vmem:[#allocation15 + $0x3ec] ss:$16 sps:$4 sm:$0xff]   ;;  %v14873_v16 = vld [vmem:[#allocation15 + $0x3e0] ss:$16 sps:$4 sm:$0xff]  }
 0x601   :  { %10520 = vmatprep.mubr.bf16.mxu1 %v15915_v0  ;;  %10404 = vmatprep.subr.bf16.mxu0 %v14791_v36  ;;  %v14807_v0 = vld [vmem:[#allocation15 + $0x280] ss:$16 sps:$4 sm:$0xff]   ;;  %v14876_v36 = vld [vmem:[#allocation15 + $0x3e8] ss:$16 sps:$4 sm:$0xff]  }
 0x602   :  { %10490 = vmatprep.subr.bf16.mxu1 %v14794_v37  ;;  %v14879_v37 = vld [vmem:[#allocation18 + $0x40] sm:$0xff]  }
 0x603   :  { %10405 = vmatpush1.bf16.msra.mxu0 %v14789_v38  ;;  %v14880_v38 = vld [vmem:[#allocation18 + $0xc0] sm:$0xff]  }
 0x604   :  { %10491 = vmatpush1.bf16.msra.mxu1 %v14792_v59  ;;  %10406 = vmatprep.subr.bf16.mxu0 %v14797_v41  ;;  %v14881_v59 = vld [vmem:[#allocation18] sm:$0xff]  }
 0x605   :  { %10492 = vmatprep.subr.bf16.mxu1 %v14800_v44  ;;  %v14882_v41 = vld [vmem:[#allocation18 + $0x80] sm:$0xff]   ;;  %v14883_v44 = vld [vmem:[#allocation18 + $0x48] sm:$0xff]  }
 0x607   :  { %10407 = vmatpush1.bf16.msra.mxu0 %v14795_v45  ;;  %v14884_v45 = vld [vmem:[#allocation18 + $0xc8] sm:$0xff]  }
 0x608   :  { %10493 = vmatpush1.bf16.msra.mxu1 %v14798_v46  ;;  %10408 = vmatprep.subr.bf16.mxu0 %v14803_v47  ;;  %v14885_v46 = vld [vmem:[#allocation18 + $0x8] sm:$0xff]  }
 0x609   :  { %10494 = vmatprep.subr.bf16.mxu1 %v14806_v31  ;;  %v14886_v47 = vld [vmem:[#allocation18 + $0x88] sm:$0xff]   ;;  %v14887_v31 = vld [vmem:[#allocation18 + $0x50] sm:$0xff]  }
 0x60b   :  { %10409 = vmatpush1.bf16.msra.mxu0 %v14801_v48  ;;  %v14888_v48 = vld [vmem:[#allocation18 + $0xd0] sm:$0xff]  }
 0x60c   :  { %10495 = vmatpush1.bf16.msra.mxu1 %v14804_v49  ;;  %10410 = vmatprep.subr.bf16.mxu0 %v14809_v50  ;;  %v14889_v49 = vld [vmem:[#allocation18 + $0x10] sm:$0xff]   ;;  %v14891_v50 = vld [vmem:[#allocation18 + $0x58] sm:$0xff]  }
 0x60d   :  { %10496 = vmatprep.subr.bf16.mxu1 %v14812_v55  ;;  %v14892_v55 = vld [vmem:[#allocation18 + $0xd8] sm:$0xff]  }
 0x60f   :  { %10411 = vmatpush1.bf16.msra.mxu0 %v14807_v0  ;;  %v14893_v0 = vld [vmem:[#allocation18 + $0x18] sm:$0xff]  }
 0x610   :  { %10497 = vmatpush1.bf16.msra.mxu1 %v14810_v56  ;;  %10412 = vmatprep.subr.bf16.mxu0 %v14815_v61  ;;  %v14894_v56 = vld [vmem:[#allocation18 + $0x98] sm:$0xff]   ;;  %v14895_v61 = vld [vmem:[#allocation18 + $0x60] sm:$0xff]  }
 0x611   :  { %10498 = vmatprep.subr.bf16.mxu1 %v14818_v2  ;;  %v14896_v2 = vld [vmem:[#allocation18 + $0xe0] sm:$0xff]  }
 0x613   :  { %10413 = vmatpush1.bf16.msra.mxu0 %v14813_v3  ;;  %v14897_v3 = vld [vmem:[#allocation18 + $0x20] sm:$0xff]  }
 0x614   :  { %10499 = vmatpush1.bf16.msra.mxu1 %v14816_v4  ;;  %10414 = vmatprep.subr.bf16.mxu0 %v14821_v9  ;;  %v14898_v4 = vld [vmem:[#allocation18 + $0xa0] sm:$0xff]   ;;  %v14899_v9 = vld [vmem:[#allocation18 + $0x68] sm:$0xff]  }
 0x615   :  { %10500 = vmatprep.subr.bf16.mxu1 %v14824_v10  ;;  %v14900_v10 = vld [vmem:[#allocation18 + $0xe8] sm:$0xff]  }
 0x617   :  { %10415 = vmatpush1.bf16.msra.mxu0 %v14819_v11  ;;  %v14901_v11 = vld [vmem:[#allocation18 + $0x28] sm:$0xff]  }
 0x618   :  { %10501 = vmatpush1.bf16.msra.mxu1 %v14822_v18  ;;  %10416 = vmatprep.subr.bf16.mxu0 %v14827_v32  ;;  %v14902_v18 = vld [vmem:[#allocation18 + $0xa8] sm:$0xff]   ;;  %v14903_v32 = vld [vmem:[#allocation18 + $0x70] sm:$0xff]  }
 0x619   :  { %10502 = vmatprep.subr.bf16.mxu1 %v14830_v19  ;;  %v14904_v19 = vld [vmem:[#allocation18 + $0xf0] sm:$0xff]  }
 0x61b   :  { %10417 = vmatpush1.bf16.msra.mxu0 %v14825_v20  ;;  %v14905_v20 = vld [vmem:[#allocation18 + $0x30] sm:$0xff]  }
 0x61c   :  { %10503 = vmatpush1.bf16.msra.mxu1 %v14828_v23  ;;  %10418 = vmatprep.subr.bf16.mxu0 %v14833_v24  ;;  %v14906_v23 = vld [vmem:[#allocation18 + $0xb0] sm:$0xff]   ;;  %v14907_v24 = vld [vmem:[#allocation18 + $0x78] sm:$0xff]  }
 0x61d   :  { %10504 = vmatprep.subr.bf16.mxu1 %v14836_v12  ;;  %v14908_v12 = vld [vmem:[#allocation18 + $0xf8] sm:$0xff]  }
 0x61f   :  { %10419 = vmatpush1.bf16.msra.mxu0 %v14831_v26  ;;  %v14909_v26 = vld [vmem:[#allocation18 + $0x38] sm:$0xff]  }
 0x620   :  { %10505 = vmatpush1.bf16.msra.mxu1 %v14834_v58  ;;  %10420 = vmatprep.subr.bf16.mxu0 %v14839_v6  ;;  %v14910_v58 = vld [vmem:[#allocation18 + $0xb8] sm:$0xff]  }
 0x621   :  { %10506 = vmatprep.subr.bf16.mxu1 %v14842_v27  ;;  %v10539_v6 = vld [vmem:[#allocation16] sm:$0xf] }
 0x622   :  { %v10544_v27 = vrot.slane %v10539_v6, %v15726_v39 }
 0x623   :  { %10421 = vmatpush1.bf16.msra.mxu0 %v14837_v33  ;;  %v10552_v33 = vrot.slane %v10539_v6, %v15728_v40 }
 0x624   :  { %10507 = vmatpush1.bf16.msra.mxu1 %v14840_v7  ;;  %10422 = vmatprep.subr.bf16.mxu0 %v14845_v29  ;;  %v10548_v7 = vrot.slane %v10539_v6, %v15730_v42  ;;  %v10556_v29 = vrot.slane %v10539_v6, %v15732_v43 }
 0x625   :  { %10508 = vmatprep.subr.bf16.mxu1 %v14848_v62 }
 0x627   :  { %10423 = vmatpush1.bf16.msra.mxu0 %v14843_v52 }
 0x628   :  { %10509 = vmatpush1.bf16.msra.mxu1 %v14846_v51  ;;  %10424 = vmatprep.subr.bf16.mxu0 %v14851_v5 }
 0x629   :  { %10510 = vmatprep.subr.bf16.mxu1 %v14854_v53 }
 0x62b   :  { %10425 = vmatpush1.bf16.msra.mxu0 %v14849_v14 }
 0x62c   :  { %10511 = vmatpush1.bf16.msra.mxu1 %v14852_v54  ;;  %10426 = vmatprep.subr.bf16.mxu0 %v14857_v17 }
 0x62d   :  { %10512 = vmatprep.subr.bf16.mxu1 %v14860_v28 }
 0x62f   :  { %10427 = vmatpush1.bf16.msra.mxu0 %v14855_v8 }
 0x630   :  { %10513 = vmatpush1.bf16.msra.mxu1 %v14858_v21  ;;  %10428 = vmatprep.subr.bf16.mxu0 %v14863_v25 }
 0x631   :  { %10514 = vmatprep.subr.bf16.mxu1 %v14866_v13 }
 0x633   :  { %10429 = vmatpush1.bf16.msra.mxu0 %v14861_v57 }
 0x634   :  { %10515 = vmatpush1.bf16.msra.mxu1 %v14864_v1  ;;  %10430 = vmatprep.subr.bf16.mxu0 %v14869_v22 }
 0x635   :  { %10516 = vmatprep.subr.bf16.mxu1 %v14872_v15 }
 0x637   :  { %10431 = vmatpush1.bf16.msra.mxu0 %v14867_v34 }
 0x638   :  { %10517 = vmatpush1.bf16.msra.mxu1 %v14870_v30  ;;  %10432 = vmatprep.subr.bf16.mxu0 %v14875_v60 }
 0x639   :  { %10518 = vmatprep.subr.bf16.mxu1 %v14878_v35 }
 0x63b   :  { %10433 = vmatpush1.bf16.msra.mxu0 %v14873_v16 }
 0x63c   :  { %10519 = vmatpush1.bf16.msra.mxu1 %v14876_v36  ;;  %12565 = vmatprep.subr.bf16.mxu0 %v14879_v37 }
 0x63d   :  { %12587 = vmatprep.subr.bf16.mxu1 %v14880_v38 }
 0x63e   :  { %10435 = vmatmul.mubr.bf16.vlgmr.msra.gmra.mrb[12].mxu0 %v15912_v63 }
 0x63f   :  { %10521 = vmatmul.mubr.bf16.vlgmr.msra.gmra.mrb[12].mxu1 %v15912_v63  ;;  %12566 = vmatpush3.bf16.msra.mxu0 %v14881_v59  ;;  %v14890_v63 = vld [vmem:[#allocation18 + $0x90] sm:$0xff]  }
 0x640   :  { %12588 = vmatpush3.bf16.msra.mxu1 %v14882_v41  ;;  %12567 = vmatprep.subr.bf16.mxu0 %v14883_v44 }
 0x641   :  { %12589 = vmatprep.subr.bf16.mxu1 %v14884_v45 }
 0x643   :  { %12568 = vmatpush3.bf16.msra.mxu0 %v14885_v46 }
 0x644   :  { %12590 = vmatpush3.bf16.msra.mxu1 %v14886_v47  ;;  %12569 = vmatprep.subr.bf16.mxu0 %v14887_v31 }
 0x645   :  { %12591 = vmatprep.subr.bf16.mxu1 %v14888_v48 }
 0x647   :  { %12570 = vmatpush3.bf16.msra.mxu0 %v14889_v49 }
 0x648   :  { %12592 = vmatpush3.bf16.msra.mxu1 %v14890_v63  ;;  %12571 = vmatprep.subr.bf16.mxu0 %v14891_v50 }
 0x649   :  { %12593 = vmatprep.subr.bf16.mxu1 %v14892_v55 }
 0x64b   :  { %12572 = vmatpush3.bf16.msra.mxu0 %v14893_v0 }
 0x64c   :  { %12594 = vmatpush3.bf16.msra.mxu1 %v14894_v56  ;;  %12573 = vmatprep.subr.bf16.mxu0 %v14895_v61 }
 0x64d   :  { %12595 = vmatprep.subr.bf16.mxu1 %v14896_v2 }
 0x64f   :  { %12574 = vmatpush3.bf16.msra.mxu0 %v14897_v3 }
 0x650   :  { %12596 = vmatpush3.bf16.msra.mxu1 %v14898_v4  ;;  %12575 = vmatprep.subr.bf16.mxu0 %v14899_v9 }
 0x651   :  { %12597 = vmatprep.subr.bf16.mxu1 %v14900_v10 }
 0x653   :  { %12576 = vmatpush3.bf16.msra.mxu0 %v14901_v11 }
 0x654   :  { %12598 = vmatpush3.bf16.msra.mxu1 %v14902_v18  ;;  %12577 = vmatprep.subr.bf16.mxu0 %v14903_v32 }
 0x655   :  { %12599 = vmatprep.subr.bf16.mxu1 %v14904_v19 }
 0x657   :  { %12578 = vmatpush3.bf16.msra.mxu0 %v14905_v20 }
 0x658   :  { %12600 = vmatpush3.bf16.msra.mxu1 %v14906_v23  ;;  %12579 = vmatprep.subr.bf16.mxu0 %v14907_v24 }
 0x659   :  { %12601 = vmatprep.subr.bf16.mxu1 %v14908_v12 }
 0x65b   :  { %12580 = vmatpush3.bf16.msra.mxu0 %v14909_v26 }
 0x65c   :  { %12602 = vmatpush3.bf16.msra.mxu1 %v14910_v58 }
 0x711   :  { %v10436_v62 = vpop.f32.mrb[12].mxu0 }
 0x712   :  { %v10561_v52 = vadd.f32 %v10544_v27, %v10436_v62  ;;  %v10522_v51 = vpop.f32.mrb[12].mxu1  ;;  %v10438_v5 = vpop.f32.mrb[13].mxu0  ;;  %v14914_v62 = vld [vmem:[#allocation21 + $0x18] sm:$0xff]  }
 0x713   :  { %v10563_v53 = vadd.f32 %v10552_v33, %v10522_v51  ;;  %v15929_v14 = vadd.f32 %v10548_v7, %v10438_v5  ;;  %v10524_v54 = vpop.f32.mrb[13].mxu1  ;;  %v10440_v17 = vpop.f32.mrb[14].mxu0  ;;  %v14916_v51 = vld [vmem:[#allocation21 + $0x28] sm:$0xff]   ;;  %v14917_v5 = vld [vmem:[#allocation21 + $0x30] sm:$0xff]  }
 0x714   :  { %v12513_v28 = vmul.f32 -1.442695, %v10561_v52  ;;  %v10564_v8 = vadd.f32 %v10556_v29, %v10524_v54  ;;  %v10565_v21 = vadd.f32 %v10544_v27, %v10440_v17  ;;  %v10526_v25 = vpop.f32.mrb[14].mxu1  ;;  %v10442_v39 = vpop.f32.mrb[15].mxu0  ;;  %v14911_v27 = vld [vmem:[#allocation21] sm:$0xff]  }
 0x715   :  { %v12515_v13 = vmul.f32 -1.442695, %v10563_v53  ;;  %v12514_v40 = vmul.f32 -1.442695, %v15929_v14  ;;  %v10567_v42 = vadd.f32 %v10552_v33, %v10526_v25  ;;  %v10566_v57 = vadd.f32 %v10548_v7, %v10442_v39  ;;  %v10528_v43 = vpop.f32.mrb[15].mxu1  ;;  %v14912_v7 = vld [vmem:[#allocation21 + $0x8] sm:$0xff]  }
 0x716   :  { %15015 = vpow2.f32 %v12513_v28  ;;  %v12516_v1 = vmul.f32 -1.442695, %v10564_v8  ;;  %v12517_v22 = vmul.f32 -1.442695, %v10565_v21  ;;  %v10568_v15 = vadd.f32 %v10556_v29, %v10528_v43  ;;  %v14913_v29 = vld [vmem:[#allocation21 + $0x10] sm:$0xff]  }
 0x717   :  { %15017 = vpow2.f32 %v12515_v13  ;;  %v12519_v34 = vmul.f32 -1.442695, %v10567_v42  ;;  %v12518_v30 = vmul.f32 -1.442695, %v10566_v57  ;;  %v15397_v33 = vmov 0.0  }
 0x718   :  { %15019 = vpow2.f32 %v12514_v40  ;;  %v12520_v60 = vmul.f32 -1.442695, %v10568_v15  ;;  %12618 = vmatprep.subr.bf16.mxu0 %v15397_v33  ;;  %v12521_v17 = vld [vmem:[#allocation19] ss:$0 sm:$0xff] }
 0x719   :  { %15021 = vpow2.f32 %v12516_v1 }
 0x71a   :  { %15023 = vpow2.f32 %v12517_v22 }
 0x71b   :  { %15025 = vpow2.f32 %v12519_v34 }
 0x71c   :  { %15027 = vpow2.f32 %v12518_v30 }
 0x71d   :  { %15029 = vpow2.f32 %v12520_v60 }
 0x720   :  { %v15016_v35 = vpop.eup %15015 }
 0x721   :  { %v15018_v16 = vpop.eup %15017  ;;  %v10593_v36 = vadd.f32 1.0, %v15016_v35 }
 0x722   :  { %v15020_v37 = vpop.eup %15019  ;;  %v10595_v38 = vadd.f32 1.0, %v15018_v16 }
 0x723   :  { %v15022_v59 = vpop.eup %15021  ;;  %15031 = vrcp.f32 %v10593_v36  ;;  %v10594_v41 = vadd.f32 1.0, %v15020_v37 }
 0x724   :  { %v15024_v44 = vpop.eup %15023  ;;  %15033 = vrcp.f32 %v10595_v38  ;;  %v10596_v45 = vadd.f32 1.0, %v15022_v59 }
 0x725   :  { %v15026_v46 = vpop.eup %15025  ;;  %15035 = vrcp.f32 %v10594_v41  ;;  %v10597_v47 = vadd.f32 1.0, %v15024_v44 }
 0x726   :  { %v15028_v31 = vpop.eup %15027  ;;  %15037 = vrcp.f32 %v10596_v45  ;;  %v10599_v48 = vadd.f32 1.0, %v15026_v46  ;;  %v12556_v46 = vld [vmem:[#allocation22] ss:$0 sm:$0xff] }
 0x727   :  { %v15030_v49 = vpop.eup %15029  ;;  %15039 = vrcp.f32 %v10597_v47  ;;  %v10598_v63 = vadd.f32 1.0, %v15028_v31 }
 0x728   :  { %15041 = vrcp.f32 %v10599_v48  ;;  %v10600_v50 = vadd.f32 1.0, %v15030_v49 }
 0x729   :  { %15043 = vrcp.f32 %v10598_v63 }
 0x72a   :  { %15045 = vrcp.f32 %v10600_v50 }
 0x72d   :  { %v15032_v55 = vpop.eup %15031 }
 0x72e   :  { %v15034_v0 = vpop.eup %15033  ;;  %v10617_v4 = vmul.f32 %v15032_v55, %v10561_v52  ;;  %v14915_v52 = vld [vmem:[#allocation21 + $0x20] sm:$0xff]  }
 0x72f   :  { %v15036_v56 = vpop.eup %15035  ;;  %v10619_v11 = vmul.f32 %v15034_v0, %v10563_v53  ;;  %v14918_v53 = vld [vmem:[#allocation21 + $0x38] sm:$0xff]  }
 0x730   :  { %v15038_v61 = vpop.eup %15037  ;;  %v10618_v19 = vmul.f32 %v15036_v56, %v15929_v14 }
 0x731   :  { %v15040_v2 = vpop.eup %15039  ;;  %v10620_v24 = vmul.f32 %v15038_v61, %v10564_v8 }
 0x732   :  { %v15042_v3 = vpop.eup %15041  ;;  %v10621_v9 = vmul.f32 %v15040_v2, %v10565_v21 }
 0x733   :  { %v15044_v10 = vpop.eup %15043  ;;  %v10623_v18 = vmul.f32 %v15042_v3, %v10567_v42 }
 0x734   :  { %v15046_v32 = vpop.eup %15045  ;;  %v10625_v20 = vpack.c.bf16 %v10621_v9, %v10617_v4  ;;  %v10622_v23 = vmul.f32 %v15044_v10, %v10566_v57 }
 0x735   :  { %v10627_v12 = vpack.c.bf16 %v10623_v18, %v10619_v11  ;;  %v10624_v26 = vmul.f32 %v15046_v32, %v10568_v15 }
 0x736   :  { %v10626_v58 = vpack.c.bf16 %v10622_v23, %v10618_v19 }
 0x737   :  { %v10628_v6 = vpack.c.bf16 %v10624_v26, %v10620_v24 }
 0x738   :  { %10924 = vmatprep.mubr.bf16.mxu0 %v10626_v58 }
 0x739   :  { %10965 = vmatprep.mubr.bf16.mxu1 %v10628_v6  ;;  %10925 = vmatmul.mubr.bf16.vlgmr.msra.gmra.mrb[16].mxu0 %v10625_v20 }
 0x73a   :  { %10966 = vmatmul.mubr.bf16.vlgmr.msra.gmra.mrb[16].mxu1 %v10627_v12  ;;  %12619 = vmatpush3.bf16.msra.mxu0 %v14911_v27 }
 0x73b   :  { %12620 = vmatprep.subr.bf16.mxu0 %v15397_v33  ;;  %12634 = vmatprep.mubr.msk.bf16.mxu0 %vm15398_vm0, %v15397_v33 }
 0x73e   :  { %12621 = vmatpush3.bf16.msra.mxu0 %v14912_v7 }
 0x73f   :  { %12622 = vmatprep.subr.bf16.mxu0 %v15397_v33 }
 0x742   :  { %12623 = vmatpush3.bf16.msra.mxu0 %v14913_v29 }
 0x743   :  { %12624 = vmatprep.subr.bf16.mxu0 %v15397_v33 }
 0x746   :  { %12625 = vmatpush3.bf16.msra.mxu0 %v14914_v62 }
 0x747   :  { %12626 = vmatprep.subr.bf16.mxu0 %v15397_v33 }
 0x74a   :  { %12627 = vmatpush3.bf16.msra.mxu0 %v14915_v52 }
 0x74b   :  { %12628 = vmatprep.subr.bf16.mxu0 %v15397_v33 }
 0x74e   :  { %12629 = vmatpush3.bf16.msra.mxu0 %v14916_v51 }
 0x74f   :  { %12630 = vmatprep.subr.bf16.mxu0 %v15397_v33 }
 0x752   :  { %12631 = vmatpush3.bf16.msra.mxu0 %v14917_v5 }
 0x753   :  { %12632 = vmatprep.subr.bf16.mxu0 %v15397_v33 }
 0x756   :  { %12633 = vmatpush3.bf16.msra.mxu0 %v14918_v53 }
 0x80c   :  { %v12581_v14 = vpop.f32.mrb[16].mxu0 }
 0x80d   :  { %v12603_v54 = vpop.f32.mrb[16].mxu1  ;;  %v12582_v28 = vpop.f32.mrb[17].mxu0 }
 0x80e   :  { %v12583_v8 = vadd.f32 %v12582_v28, %v12581_v14  ;;  %v12604_v21 = vpop.f32.mrb[17].mxu1  ;;  %v12584_v25 = vpop.f32.mrb[18].mxu0 }
 0x80f   :  { %v12605_v39 = vadd.f32 %v12604_v21, %v12603_v54  ;;  %v12606_v13 = vpop.f32.mrb[18].mxu1  ;;  %v12585_v40 = vpop.f32.mrb[19].mxu0 }
 0x810   :  { %v10927_v42 = vadd.f32 %v12583_v8, %v12521_v17  ;;  %v12586_v57 = vadd.f32 %v12585_v40, %v12584_v25  ;;  %v12607_v43 = vpop.f32.mrb[19].mxu1 }
 0x811   :  { %v12608_v1 = vadd.f32 %v12607_v43, %v12606_v13 }
 0x812   :  { %v10968_v22 = vadd.f32 %v12605_v39, %v10927_v42  ;;  %v10930_v15 = vadd.f32 %v12586_v57, %v12521_v17 }
 0x814   :  { %v12554_v34 = vmul.f32 -1.442695, %v10968_v22  ;;  %v10971_v30 = vadd.f32 %v12608_v1, %v10930_v15 }
 0x816   :  { %15047 = vpow2.f32 %v12554_v34  ;;  %v12555_v60 = vmul.f32 -1.442695, %v10971_v30 }
 0x818   :  { %15049 = vpow2.f32 %v12555_v60 }
 0x820   :  { %v15048_v35 = vpop.eup %15047 }
 0x821   :  { %v10980_v16 = vadd.f32 1.0, %v15048_v35 }
 0x822   :  { %v15050_v36 = vpop.eup %15049 }
 0x823   :  { %15051 = vrcp.f32 %v10980_v16  ;;  %v10981_v37 = vadd.f32 1.0, %v15050_v36 }
 0x825   :  { %15053 = vrcp.f32 %v10981_v37 }
 0x82d   :  { %v15052_v38 = vpop.eup %15051 }
 0x82e   :  { %v10986_v41 = vmul.f32 %v15052_v38, %v10968_v22 }
 0x82f   :  { %v15054_v59 = vpop.eup %15053 }
 0x830   :  { %v10987_v44 = vmul.f32 %v15054_v59, %v10971_v30 }
 0x832   :  { %v10988_v45 = vpack.c.bf16 %v10987_v44, %v10986_v41 }
 0x834   :  { %12635 = vmatmul.mubr.bf16.vlgmr.msra.gmra.mrb[20].mxu0 %v10988_v45 }
 0x907   :  { %v11094_v47 = vpop.f32.mrb[20].mxu0 }
 0x908   :  { %v11095_v31 = vadd.f32 %v12556_v46, %v11094_v47  ;;  %v12636_v48 = vpop.f32.mrb[21].mxu0 }
 0x909   :  { %v11097_v49 = vpop.f32.mrb[22].mxu0 }
 0x90a   :  { %11101 = vst [vmem:[%s15956_s17] sm:$0xff] %v11095_v31  ;;  %v11098_v63 = vadd.f32 %v12556_v46, %v11097_v49  ;;  %v12637_v50 = vpop.f32.mrb[23].mxu0 }
 0x90c   :  { %11102 = vst [vmem:[%s15956_s17 + $0x8] sm:$0xff] %v11098_v63 }
 0x90d   :  { %11107 = vsyncpa [#allocation3], 1 }
 0x90e   :  { %11108 = vsyncpa [#allocation5], 1 }
 0x90f   :  { %11109 = vsyncpa [#allocation8], 1 }
 0x910   :  { %11110 = vsyncpa [#allocation11], 1 }
 0x911   :  { %11111 = vsyncpa [#allocation14], 1 }
 0x912   :  { %11112 = vsyncpa [#allocation17], 1 }
 0x913   :  { %11113 = vsyncpa [#allocation20], 1 }
 0x914   :  { %11114 = vsyncpa [#allocation23], 1 }

</bundles_post_ra>
